<compile_context>
chip_gen: v6e
topology: v6e:2x2x1
jax: 0.10.0
libtpu: 0.0.40
codegen_flags: <defaults>
</compile_context>

<pallas_src>
import functools

import jax
import jax.numpy as jnp
from jax.experimental import pallas as pl
from jax.experimental.pallas import tpu as pltpu

LANE = 128
VMEM_LIMIT = 48 * 1024 * 1024


def _round_up(n, m=LANE):
    return ((n + m - 1) // m) * m


# ---------------------------------------------------------------------------
# Pallas kernels
# ---------------------------------------------------------------------------
def _matmul_bias_act_kernel(x_ref, w_ref, b_ref, o_ref, *, relu):
    # x_ref: [tm, K] bf16   w_ref: [K, N] bf16   b_ref: [1, N] f32
    acc = jnp.dot(x_ref[...], w_ref[...], preferred_element_type=jnp.float32)
    y = acc + b_ref[...]
    if relu:
        y = jnp.maximum(y, 0.0)
    o_ref[...] = y.astype(o_ref.dtype)


def matmul_bias_act(x, w, bias, *, relu, out_dtype):
    """out[m, n] = act(sum_k x[m,k] * w[k,n] + bias[n]); BN scale pre-folded."""
    M, K = x.shape
    N = w.shape[1]
    # Per-layer M block: tile only when M is large and divisible; otherwise a
    # single full-extent block (legal since block == full dim), no M padding.
    tm = 256 if (M > 256 and M % 256 == 0) else M
    return pl.pallas_call(
        functools.partial(_matmul_bias_act_kernel, relu=relu),
        out_shape=jax.ShapeDtypeStruct((M, N), out_dtype),
        grid_spec=pltpu.PrefetchScalarGridSpec(
            num_scalar_prefetch=0,
            grid=(M // tm,),
            in_specs=[
                pl.BlockSpec((tm, K), lambda i: (i, 0)),
                pl.BlockSpec((K, N), lambda i: (0, 0)),
                pl.BlockSpec((1, N), lambda i: (0, 0)),
            ],
            out_specs=pl.BlockSpec((tm, N), lambda i: (i, 0)),
        ),
        compiler_params=pltpu.CompilerParams(
            dimension_semantics=("parallel",),
            vmem_limit_bytes=VMEM_LIMIT,
        ),
    )(x, w, bias)


def _head_kernel(x_ref, w1_ref, b1_ref, w2_ref, b2_ref, w3_ref, b3_ref,
                 w4_ref, b4_ref, o_ref):
    # Fused fully-convolutional head: the 32-row activation never leaves VMEM.
    h = jnp.dot(x_ref[...], w1_ref[...], preferred_element_type=jnp.float32)
    h = jnp.maximum(h + b1_ref[...], 0.0)                      # f1 + ReLU
    h = jnp.dot(h.astype(jnp.bfloat16), w2_ref[...],
                preferred_element_type=jnp.float32)
    h = jnp.maximum(h + b2_ref[...], 0.0)                      # f2 + ReLU
    h = jnp.dot(h.astype(jnp.bfloat16), w3_ref[...],
                preferred_element_type=jnp.float32)
    h = jnp.maximum(h + b3_ref[...], 0.0)                      # f3 + ReLU
    h = jnp.dot(h.astype(jnp.bfloat16), w4_ref[...],
                preferred_element_type=jnp.float32)
    o_ref[...] = (h + b4_ref[...]).astype(o_ref.dtype)         # f4: no ReLU


def fused_head(patches, params):
    w1, b1 = params["f1"]
    w2, b2 = params["f2"]
    w3, b3 = params["f3"]
    w4, b4 = params["f4"]
    M = patches.shape[0]
    return pl.pallas_call(
        _head_kernel,
        out_shape=jax.ShapeDtypeStruct((M, w4.shape[1]), jnp.float32),
        compiler_params=pltpu.CompilerParams(vmem_limit_bytes=VMEM_LIMIT),
    )(patches, w1, b1, w2, b2, w3, b3, w4, b4)


# ---------------------------------------------------------------------------
# Glue: im2col + layer application (XLA side)
# ---------------------------------------------------------------------------
def im2col(x, ksz, stride, pad):
    """x: [N,H,W,C] -> patches [N*OH*OW, ksz*ksz*C] (ordering (kh, kw, c))."""
    if pad:
        x = jnp.pad(x, ((0, 0), (pad, pad), (pad, pad), (0, 0)))
    n, h, w, c = x.shape
    oh = (h - ksz) // stride + 1
    ow = (w - ksz) // stride + 1
    cols = []
    for i in range(ksz):
        for j in range(ksz):
            cols.append(x[:, i:i + (oh - 1) * stride + 1:stride,
                          j:j + (ow - 1) * stride + 1:stride, :])
    patches = jnp.stack(cols, axis=3)          # [N, OH, OW, ksz*ksz, C]
    return patches.reshape(n * oh * ow, ksz * ksz * c), (n, oh, ow)


def conv_layer(x, layer, ksz, stride, pad, relu=True):
    w_mat, bias = layer
    patches, (n, oh, ow) = im2col(x, ksz, stride, pad)
    patches = patches.astype(jnp.bfloat16)
    out = matmul_bias_act(patches, w_mat, bias, relu=relu,
                          out_dtype=jnp.bfloat16)
    return out.reshape(n, oh, ow, -1)


def maxpool2x2(x):
    """MaxPool2d(kernel=2, stride=2) over NHWC input (H, W even) — XLA fused."""
    n, h, w, c = x.shape
    assert h % 2 == 0 and w % 2 == 0, (h, w)
    return x.reshape(n, h // 2, 2, w // 2, 2, c).max(axis=(2, 4))


# ---------------------------------------------------------------------------
# Deterministic parameter construction (synthetic weights, pre-padded)
# ---------------------------------------------------------------------------
def _conv_weight(key, oc, ic, ksz):
    k1, k2 = jax.random.split(key)
    fan_in = ic * ksz * ksz
    w = jax.random.normal(k1, (oc, ic, ksz, ksz), jnp.float32) / jnp.sqrt(fan_in)
    b = 0.01 * jax.random.normal(k2, (oc,), jnp.float32)
    return w, b


def _bn_fold(key, oc, conv_bias, eps=1e-5):
    k1, k2, k3, k4 = jax.random.split(key, 4)
    gamma = 1.0 + 0.1 * jax.random.normal(k1, (oc,), jnp.float32)
    beta = 0.1 * jax.random.normal(k2, (oc,), jnp.float32)
    mean = 0.1 * jax.random.normal(k3, (oc,), jnp.float32)
    var = 1.0 + 0.1 * jax.random.uniform(k4, (oc,), jnp.float32)
    scale = gamma / jnp.sqrt(var + eps)
    bias = beta + scale * (conv_bias - mean)
    return scale, bias


def _pack_layer(w, bias, scale, ic_pad, oc_pad):
    """Fold scale into w, zero-pad channels, reorder to [(kh,kw,ic_pad), oc_pad]."""
    oc, ic, kh, kw = w.shape
    w = w * scale[:, None, None, None]                       # fold BN scale
    w = jnp.pad(w, ((0, oc_pad - oc), (0, ic_pad - ic), (0, 0), (0, 0)))
    b = jnp.pad(bias, (0, oc_pad - oc))
    w_mat = jnp.transpose(w, (2, 3, 1, 0)).reshape(kh * kw * ic_pad, oc_pad)
    return w_mat.astype(jnp.bfloat16), b.reshape(1, oc_pad).astype(jnp.float32)


def init_params(key, conv_size=(20, 40, 80, 110), fc_size=(300, 300, 200)):
    keys = jax.random.split(key, 16)
    params = {}

    pads = ([_round_up(c) for c in conv_size]
            + [_round_up(c) for c in fc_size]
            + [_round_up(1)])          # [128,128,128,128,384,384,256,128]

    def conv_bn(kw_key, kbn_key, oc, ic, ksz, ic_pad, oc_pad):
        w, b = _conv_weight(kw_key, oc, ic, ksz)
        scale, bias = _bn_fold(kbn_key, oc, b)
        return _pack_layer(w, bias, scale, ic_pad, oc_pad)

    def plain_conv(kw_key, oc, ic, ksz, ic_pad, oc_pad):
        w, b = _conv_weight(kw_key, oc, ic, ksz)
        return _pack_layer(w, b, jnp.ones((oc,), jnp.float32), ic_pad, oc_pad)

    params["c1"] = conv_bn(keys[0], keys[1], conv_size[0], 3, 7, 3, pads[0])
    params["c2"] = conv_bn(keys[2], keys[3], conv_size[1], conv_size[0], 5,
                           pads[0], pads[1])
    params["c3"] = conv_bn(keys[4], keys[5], conv_size[2], conv_size[1], 3,
                           pads[1], pads[2])
    params["c4"] = conv_bn(keys[6], keys[7], conv_size[3], conv_size[2], 3,
                           pads[2], pads[3])
    params["f1"] = plain_conv(keys[8], fc_size[0], conv_size[3], 5,
                              pads[3], pads[4])
    params["f2"] = plain_conv(keys[9], fc_size[1], fc_size[0], 1,
                              pads[4], pads[5])
    params["f3"] = plain_conv(keys[10], fc_size[2], fc_size[1], 1,
                              pads[5], pads[6])
    params["f4"] = plain_conv(keys[11], 1, fc_size[2], 1,
                              pads[6], pads[7])
    return params


# ---------------------------------------------------------------------------
# CandidateDetector forward
# ---------------------------------------------------------------------------
def candidate_detector_forward(x_nchw, params):
    x = jnp.transpose(x_nchw, (0, 2, 3, 1)).astype(jnp.bfloat16)  # NCHW -> NHWC
    # self.convolutions (channels carried zero-padded to 128)
    x = conv_layer(x, params["c1"], ksz=7, stride=2, pad=3)   # (N,32,32,128)
    x = maxpool2x2(x)                                         # (N,16,16,128)
    x = conv_layer(x, params["c2"], ksz=5, stride=1, pad=0)   # (N,12,12,128)
    x = conv_layer(x, params["c3"], ksz=3, stride=1, pad=0)   # (N,10,10,128)
    x = conv_layer(x, params["c4"], ksz=3, stride=1, pad=0)   # (N, 8, 8,128)
    # fully-convolutional head, fused into one Pallas call
    # (Dropout2d is identity in eval mode)
    patches, (n, oh, ow) = im2col(x, 5, 1, 0)                 # (N*4*4, 3200)
    out = fused_head(patches.astype(jnp.bfloat16), params)    # (N*16, 128) f32
    out = out.reshape(n, oh, ow, -1)[..., :1]                 # real channel 0
    return jnp.transpose(out, (0, 3, 1, 2))                   # NHWC -> NCHW


if __name__ == "__main__":
    key = jax.random.PRNGKey(0)
    kx, kp = jax.random.split(key)
    # 64x64 is the smallest power-of-two spatial size that survives the
    # valid-conv stack (64 -> 32 -> 16 -> 12 -> 10 -> 8 -> 4).
    x = jax.random.normal(kx, (2, 3, 64, 64), jnp.float32)
    params = init_params(kp)

    fwd = jax.jit(candidate_detector_forward)
    y = fwd(x, params)
    y = jax.block_until_ready(y)

    assert y.shape == (2, 1, 4, 4), y.shape
    assert y.dtype == jnp.float32
    assert bool(jnp.all(jnp.isfinite(y)))
    print("KERNEL_OK")
</pallas_src>

<mosaic_0001>
module attributes {stable_mosaic.version = 11 : i64} {
  func.func @_matmul_bias_act_kernel(%arg0: i32, %arg1: memref<256x147xbf16, #tpu.memory_space<vmem>>, %arg2: memref<147x128xbf16, #tpu.memory_space<vmem>>, %arg3: memref<1x128xf32, #tpu.memory_space<vmem>>, %arg4: memref<256x128xbf16, #tpu.memory_space<vmem>>) attributes {dimension_semantics = [#tpu.dimension_semantics<parallel>], iteration_bounds = array<i64: 8>, scalar_prefetch = 0 : i64, scratch_operands = 0 : i64, tpu.core_type = #tpu.core_type<tc>, window_params = [{transform_indices = @transform_0, window_bounds = array<i64: 256, 147>}, {pipeline_mode = #tpu.pipeline_mode<synchronous>, transform_indices = @transform_1, window_bounds = array<i64: 147, 128>}, {pipeline_mode = #tpu.pipeline_mode<synchronous>, transform_indices = @transform_2, window_bounds = array<i64: 1, 128>}, {transform_indices = @transform_3, window_bounds = array<i64: 256, 128>}]} {
    %c0 = arith.constant 0 : index
    %c0_0 = arith.constant 0 : index
    %0 = vector.load %arg1[%c0, %c0_0] : memref<256x147xbf16, #tpu.memory_space<vmem>>, vector<256x147xbf16>
    %c0_1 = arith.constant 0 : index
    %c0_2 = arith.constant 0 : index
    %1 = vector.load %arg2[%c0_1, %c0_2] : memref<147x128xbf16, #tpu.memory_space<vmem>>, vector<147x128xbf16>
    %cst = arith.constant dense<0.000000e+00> : vector<256x128xf32>
    %2 = tpu.matmul %0, %1, %cst {dimension_numbers = #tpu.dot_dimension_numbers<[1], [0], [0], [1], [0, 0, 1, 1], [], []>} : vector<256x147xbf16>, vector<147x128xbf16>, vector<256x128xf32> -> vector<256x128xf32>
    %c0_3 = arith.constant 0 : index
    %c0_4 = arith.constant 0 : index
    %3 = vector.load %arg3[%c0_3, %c0_4] : memref<1x128xf32, #tpu.memory_space<vmem>>, vector<1x128xf32>
    %4 = vector.broadcast %3 : vector<1x128xf32> to vector<256x128xf32>
    %5 = arith.addf %2, %4 : vector<256x128xf32>
    %cst_5 = arith.constant 0.000000e+00 : f32
    %6 = vector.broadcast %cst_5 : f32 to vector<256x128xf32>
    %7 = arith.maximumf %5, %6 : vector<256x128xf32>
    %8 = arith.truncf %7 : vector<256x128xf32> to vector<256x128xbf16>
    %c0_6 = arith.constant 0 : index
    %c0_7 = arith.constant 0 : index
    %9 = vector.load %arg4[%c0_6, %c0_7] : memref<256x128xbf16, #tpu.memory_space<vmem>>, vector<256x128xbf16>
    tpu.vector_store %arg4[%c0_6, %c0_7], %8 {strides = array<i32>} : memref<256x128xbf16, #tpu.memory_space<vmem>>, vector<256x128xbf16>,
    return
  }
  func.func @transform_0(%arg0: i32) -> (i32, i32) {
    %c0_i32 = arith.constant 0 : i32
    %c0_i32_0 = arith.constant 0 : i32
    return %arg0, %c0_i32 : i32, i32
  }
  func.func @transform_1(%arg0: i32) -> (i32, i32) {
    %c0_i32 = arith.constant 0 : i32
    %c0_i32_0 = arith.constant 0 : i32
    %c0_i32_1 = arith.constant 0 : i32
    return %c0_i32, %c0_i32_0 : i32, i32
  }
  func.func @transform_2(%arg0: i32) -> (i32, i32) {
    %c0_i32 = arith.constant 0 : i32
    %c0_i32_0 = arith.constant 0 : i32
    %c0_i32_1 = arith.constant 0 : i32
    return %c0_i32, %c0_i32_0 : i32, i32
  }
  func.func @transform_3(%arg0: i32) -> (i32, i32) {
    %c0_i32 = arith.constant 0 : i32
    %c0_i32_0 = arith.constant 0 : i32
    return %arg0, %c0_i32 : i32, i32
  }
}

module attributes {stable_mosaic.version = 11 : i64} {
  func.func @_matmul_bias_act_kernel(%arg0: i32, %arg1: memref<288x3200xbf16, #tpu.memory_space<vmem>>, %arg2: memref<3200x128xbf16, #tpu.memory_space<vmem>>, %arg3: memref<1x128xf32, #tpu.memory_space<vmem>>, %arg4: memref<288x128xbf16, #tpu.memory_space<vmem>>) attributes {dimension_semantics = [#tpu.dimension_semantics<parallel>], iteration_bounds = array<i64: 1>, scalar_prefetch = 0 : i64, scratch_operands = 0 : i64, tpu.core_type = #tpu.core_type<tc>, window_params = [{transform_indices = @transform_0, window_bounds = array<i64: 288, 3200>}, {pipeline_mode = #tpu.pipeline_mode<synchronous>, transform_indices = @transform_1, window_bounds = array<i64: 3200, 128>}, {pipeline_mode = #tpu.pipeline_mode<synchronous>, transform_indices = @transform_2, window_bounds = array<i64: 1, 128>}, {transform_indices = @transform_3, window_bounds = array<i64: 288, 128>}]} {
    %c0 = arith.constant 0 : index
    %c0_0 = arith.constant 0 : index
    %0 = vector.load %arg1[%c0, %c0_0] : memref<288x3200xbf16, #tpu.memory_space<vmem>>, vector<288x3200xbf16>
    %c0_1 = arith.constant 0 : index
    %c0_2 = arith.constant 0 : index
    %1 = vector.load %arg2[%c0_1, %c0_2] : memref<3200x128xbf16, #tpu.memory_space<vmem>>, vector<3200x128xbf16>
    %cst = arith.constant dense<0.000000e+00> : vector<288x128xf32>
    %2 = tpu.matmul %0, %1, %cst {dimension_numbers = #tpu.dot_dimension_numbers<[1], [0], [0], [1], [0, 0, 1, 1], [], []>} : vector<288x3200xbf16>, vector<3200x128xbf16>, vector<288x128xf32> -> vector<288x128xf32>
    %c0_3 = arith.constant 0 : index
    %c0_4 = arith.constant 0 : index
    %3 = vector.load %arg3[%c0_3, %c0_4] : memref<1x128xf32, #tpu.memory_space<vmem>>, vector<1x128xf32>
    %4 = vector.broadcast %3 : vector<1x128xf32> to vector<288x128xf32>
    %5 = arith.addf %2, %4 : vector<288x128xf32>
    %cst_5 = arith.constant 0.000000e+00 : f32
    %6 = vector.broadcast %cst_5 : f32 to vector<288x128xf32>
    %7 = arith.maximumf %5, %6 : vector<288x128xf32>
    %8 = arith.truncf %7 : vector<288x128xf32> to vector<288x128xbf16>
    %c0_6 = arith.constant 0 : index
    %c0_7 = arith.constant 0 : index
    %9 = vector.load %arg4[%c0_6, %c0_7] : memref<288x128xbf16, #tpu.memory_space<vmem>>, vector<288x128xbf16>
    tpu.vector_store %arg4[%c0_6, %c0_7], %8 {strides = array<i32>} : memref<288x128xbf16, #tpu.memory_space<vmem>>, vector<288x128xbf16>,
    return
  }
  func.func @transform_0(%arg0: i32) -> (i32, i32) {
    %c0_i32 = arith.constant 0 : i32
    %c0_i32_0 = arith.constant 0 : i32
    return %arg0, %c0_i32 : i32, i32
  }
  func.func @transform_1(%arg0: i32) -> (i32, i32) {
    %c0_i32 = arith.constant 0 : i32
    %c0_i32_0 = arith.constant 0 : i32
    %c0_i32_1 = arith.constant 0 : i32
    return %c0_i32, %c0_i32_0 : i32, i32
  }
  func.func @transform_2(%arg0: i32) -> (i32, i32) {
    %c0_i32 = arith.constant 0 : i32
    %c0_i32_0 = arith.constant 0 : i32
    %c0_i32_1 = arith.constant 0 : i32
    return %c0_i32, %c0_i32_0 : i32, i32
  }
  func.func @transform_3(%arg0: i32) -> (i32, i32) {
    %c0_i32 = arith.constant 0 : i32
    %c0_i32_0 = arith.constant 0 : i32
    return %arg0, %c0_i32 : i32, i32
  }
}

module attributes {stable_mosaic.version = 11 : i64} {
  func.func @_matmul_bias_act_kernel(%arg0: i32, %arg1: memref<200x1152xbf16, #tpu.memory_space<vmem>>, %arg2: memref<1152x128xbf16, #tpu.memory_space<vmem>>, %arg3: memref<1x128xf32, #tpu.memory_space<vmem>>, %arg4: memref<200x128xbf16, #tpu.memory_space<vmem>>) attributes {dimension_semantics = [#tpu.dimension_semantics<parallel>], iteration_bounds = array<i64: 1>, scalar_prefetch = 0 : i64, scratch_operands = 0 : i64, tpu.core_type = #tpu.core_type<tc>, window_params = [{transform_indices = @transform_0, window_bounds = array<i64: 200, 1152>}, {pipeline_mode = #tpu.pipeline_mode<synchronous>, transform_indices = @transform_1, window_bounds = array<i64: 1152, 128>}, {pipeline_mode = #tpu.pipeline_mode<synchronous>, transform_indices = @transform_2, window_bounds = array<i64: 1, 128>}, {transform_indices = @transform_3, window_bounds = array<i64: 200, 128>}]} {
    %c0 = arith.constant 0 : index
    %c0_0 = arith.constant 0 : index
    %0 = vector.load %arg1[%c0, %c0_0] : memref<200x1152xbf16, #tpu.memory_space<vmem>>, vector<200x1152xbf16>
    %c0_1 = arith.constant 0 : index
    %c0_2 = arith.constant 0 : index
    %1 = vector.load %arg2[%c0_1, %c0_2] : memref<1152x128xbf16, #tpu.memory_space<vmem>>, vector<1152x128xbf16>
    %cst = arith.constant dense<0.000000e+00> : vector<200x128xf32>
    %2 = tpu.matmul %0, %1, %cst {dimension_numbers = #tpu.dot_dimension_numbers<[1], [0], [0], [1], [0, 0, 1, 1], [], []>} : vector<200x1152xbf16>, vector<1152x128xbf16>, vector<200x128xf32> -> vector<200x128xf32>
    %c0_3 = arith.constant 0 : index
    %c0_4 = arith.constant 0 : index
    %3 = vector.load %arg3[%c0_3, %c0_4] : memref<1x128xf32, #tpu.memory_space<vmem>>, vector<1x128xf32>
    %4 = vector.broadcast %3 : vector<1x128xf32> to vector<200x128xf32>
    %5 = arith.addf %2, %4 : vector<200x128xf32>
    %cst_5 = arith.constant 0.000000e+00 : f32
    %6 = vector.broadcast %cst_5 : f32 to vector<200x128xf32>
    %7 = arith.maximumf %5, %6 : vector<200x128xf32>
    %8 = arith.truncf %7 : vector<200x128xf32> to vector<200x128xbf16>
    %c0_6 = arith.constant 0 : index
    %c0_7 = arith.constant 0 : index
    %9 = vector.load %arg4[%c0_6, %c0_7] : memref<200x128xbf16, #tpu.memory_space<vmem>>, vector<200x128xbf16>
    tpu.vector_store %arg4[%c0_6, %c0_7], %8 {strides = array<i32>} : memref<200x128xbf16, #tpu.memory_space<vmem>>, vector<200x128xbf16>,
    return
  }
  func.func @transform_0(%arg0: i32) -> (i32, i32) {
    %c0_i32 = arith.constant 0 : i32
    %c0_i32_0 = arith.constant 0 : i32
    return %arg0, %c0_i32 : i32, i32
  }
  func.func @transform_1(%arg0: i32) -> (i32, i32) {
    %c0_i32 = arith.constant 0 : i32
    %c0_i32_0 = arith.constant 0 : i32
    %c0_i32_1 = arith.constant 0 : i32
    return %c0_i32, %c0_i32_0 : i32, i32
  }
  func.func @transform_2(%arg0: i32) -> (i32, i32) {
    %c0_i32 = arith.constant 0 : i32
    %c0_i32_0 = arith.constant 0 : i32
    %c0_i32_1 = arith.constant 0 : i32
    return %c0_i32, %c0_i32_0 : i32, i32
  }
  func.func @transform_3(%arg0: i32) -> (i32, i32) {
    %c0_i32 = arith.constant 0 : i32
    %c0_i32_0 = arith.constant 0 : i32
    return %arg0, %c0_i32 : i32, i32
  }
}

module attributes {stable_mosaic.version = 11 : i64} {
  func.func @_matmul_bias_act_kernel(%arg0: i32, %arg1: memref<128x1152xbf16, #tpu.memory_space<vmem>>, %arg2: memref<1152x128xbf16, #tpu.memory_space<vmem>>, %arg3: memref<1x128xf32, #tpu.memory_space<vmem>>, %arg4: memref<128x128xbf16, #tpu.memory_space<vmem>>) attributes {dimension_semantics = [#tpu.dimension_semantics<parallel>], iteration_bounds = array<i64: 1>, scalar_prefetch = 0 : i64, scratch_operands = 0 : i64, tpu.core_type = #tpu.core_type<tc>, window_params = [{transform_indices = @transform_0, window_bounds = array<i64: 128, 1152>}, {pipeline_mode = #tpu.pipeline_mode<synchronous>, transform_indices = @transform_1, window_bounds = array<i64: 1152, 128>}, {pipeline_mode = #tpu.pipeline_mode<synchronous>, transform_indices = @transform_2, window_bounds = array<i64: 1, 128>}, {transform_indices = @transform_3, window_bounds = array<i64: 128, 128>}]} {
    %c0 = arith.constant 0 : index
    %c0_0 = arith.constant 0 : index
    %0 = vector.load %arg1[%c0, %c0_0] : memref<128x1152xbf16, #tpu.memory_space<vmem>>, vector<128x1152xbf16>
    %c0_1 = arith.constant 0 : index
    %c0_2 = arith.constant 0 : index
    %1 = vector.load %arg2[%c0_1, %c0_2] : memref<1152x128xbf16, #tpu.memory_space<vmem>>, vector<1152x128xbf16>
    %cst = arith.constant dense<0.000000e+00> : vector<128x128xf32>
    %2 = tpu.matmul %0, %1, %cst {dimension_numbers = #tpu.dot_dimension_numbers<[1], [0], [0], [1], [0, 0, 1, 1], [], []>} : vector<128x1152xbf16>, vector<1152x128xbf16>, vector<128x128xf32> -> vector<128x128xf32>
    %c0_3 = arith.constant 0 : index
    %c0_4 = arith.constant 0 : index
    %3 = vector.load %arg3[%c0_3, %c0_4] : memref<1x128xf32, #tpu.memory_space<vmem>>, vector<1x128xf32>
    %4 = vector.broadcast %3 : vector<1x128xf32> to vector<128x128xf32>
    %5 = arith.addf %2, %4 : vector<128x128xf32>
    %cst_5 = arith.constant 0.000000e+00 : f32
    %6 = vector.broadcast %cst_5 : f32 to vector<128x128xf32>
    %7 = arith.maximumf %5, %6 : vector<128x128xf32>
    %8 = arith.truncf %7 : vector<128x128xf32> to vector<128x128xbf16>
    %c0_6 = arith.constant 0 : index
    %c0_7 = arith.constant 0 : index
    %9 = vector.load %arg4[%c0_6, %c0_7] : memref<128x128xbf16, #tpu.memory_space<vmem>>, vector<128x128xbf16>
    tpu.vector_store %arg4[%c0_6, %c0_7], %8 {strides = array<i32>} : memref<128x128xbf16, #tpu.memory_space<vmem>>, vector<128x128xbf16>,
    return
  }
  func.func @transform_0(%arg0: i32) -> (i32, i32) {
    %c0_i32 = arith.constant 0 : i32
    %c0_i32_0 = arith.constant 0 : i32
    return %arg0, %c0_i32 : i32, i32
  }
  func.func @transform_1(%arg0: i32) -> (i32, i32) {
    %c0_i32 = arith.constant 0 : i32
    %c0_i32_0 = arith.constant 0 : i32
    %c0_i32_1 = arith.constant 0 : i32
    return %c0_i32, %c0_i32_0 : i32, i32
  }
  func.func @transform_2(%arg0: i32) -> (i32, i32) {
    %c0_i32 = arith.constant 0 : i32
    %c0_i32_0 = arith.constant 0 : i32
    %c0_i32_1 = arith.constant 0 : i32
    return %c0_i32, %c0_i32_0 : i32, i32
  }
  func.func @transform_3(%arg0: i32) -> (i32, i32) {
    %c0_i32 = arith.constant 0 : i32
    %c0_i32_0 = arith.constant 0 : i32
    return %arg0, %c0_i32 : i32, i32
  }
}

module attributes {stable_mosaic.version = 11 : i64} {
  func.func @_head_kernel(%arg0: memref<32x3200xbf16, #tpu.memory_space<vmem>>, %arg1: memref<3200x384xbf16, #tpu.memory_space<vmem>>, %arg2: memref<1x384xf32, #tpu.memory_space<vmem>>, %arg3: memref<384x384xbf16, #tpu.memory_space<vmem>>, %arg4: memref<1x384xf32, #tpu.memory_space<vmem>>, %arg5: memref<384x256xbf16, #tpu.memory_space<vmem>>, %arg6: memref<1x256xf32, #tpu.memory_space<vmem>>, %arg7: memref<256x128xbf16, #tpu.memory_space<vmem>>, %arg8: memref<1x128xf32, #tpu.memory_space<vmem>>, %arg9: memref<32x128xf32, #tpu.memory_space<vmem>>) attributes {dimension_semantics = [], scalar_prefetch = 0 : i64, scratch_operands = 0 : i64, tpu.core_type = #tpu.core_type<tc>} {
    %c0 = arith.constant 0 : index
    %c0_0 = arith.constant 0 : index
    %0 = vector.load %arg0[%c0, %c0_0] : memref<32x3200xbf16, #tpu.memory_space<vmem>>, vector<32x3200xbf16>
    %c0_1 = arith.constant 0 : index
    %c0_2 = arith.constant 0 : index
    %1 = vector.load %arg1[%c0_1, %c0_2] : memref<3200x384xbf16, #tpu.memory_space<vmem>>, vector<3200x384xbf16>
    %cst = arith.constant dense<0.000000e+00> : vector<32x384xf32>
    %2 = tpu.matmul %0, %1, %cst {dimension_numbers = #tpu.dot_dimension_numbers<[1], [0], [0], [1], [0, 0, 1, 1], [], []>} : vector<32x3200xbf16>, vector<3200x384xbf16>, vector<32x384xf32> -> vector<32x384xf32>
    %c0_3 = arith.constant 0 : index
    %c0_4 = arith.constant 0 : index
    %3 = vector.load %arg2[%c0_3, %c0_4] : memref<1x384xf32, #tpu.memory_space<vmem>>, vector<1x384xf32>
    %4 = vector.broadcast %3 : vector<1x384xf32> to vector<32x384xf32>
    %5 = arith.addf %2, %4 : vector<32x384xf32>
    %cst_5 = arith.constant 0.000000e+00 : f32
    %6 = vector.broadcast %cst_5 : f32 to vector<32x384xf32>
    %7 = arith.maximumf %5, %6 : vector<32x384xf32>
    %8 = arith.truncf %7 : vector<32x384xf32> to vector<32x384xbf16>
    %c0_6 = arith.constant 0 : index
    %c0_7 = arith.constant 0 : index
    %9 = vector.load %arg3[%c0_6, %c0_7] : memref<384x384xbf16, #tpu.memory_space<vmem>>, vector<384x384xbf16>
    %cst_8 = arith.constant dense<0.000000e+00> : vector<32x384xf32>
    %10 = tpu.matmul %8, %9, %cst_8 {dimension_numbers = #tpu.dot_dimension_numbers<[1], [0], [0], [1], [0, 0, 1, 1], [], []>} : vector<32x384xbf16>, vector<384x384xbf16>, vector<32x384xf32> -> vector<32x384xf32>
    %c0_9 = arith.constant 0 : index
    %c0_10 = arith.constant 0 : index
    %11 = vector.load %arg4[%c0_9, %c0_10] : memref<1x384xf32, #tpu.memory_space<vmem>>, vector<1x384xf32>
    %12 = vector.broadcast %11 : vector<1x384xf32> to vector<32x384xf32>
    %13 = arith.addf %10, %12 : vector<32x384xf32>
    %cst_11 = arith.constant 0.000000e+00 : f32
    %14 = vector.broadcast %cst_11 : f32 to vector<32x384xf32>
    %15 = arith.maximumf %13, %14 : vector<32x384xf32>
    %16 = arith.truncf %15 : vector<32x384xf32> to vector<32x384xbf16>
    %c0_12 = arith.constant 0 : index
    %c0_13 = arith.constant 0 : index
    %17 = vector.load %arg5[%c0_12, %c0_13] : memref<384x256xbf16, #tpu.memory_space<vmem>>, vector<384x256xbf16>
    %cst_14 = arith.constant dense<0.000000e+00> : vector<32x256xf32>
    %18 = tpu.matmul %16, %17, %cst_14 {dimension_numbers = #tpu.dot_dimension_numbers<[1], [0], [0], [1], [0, 0, 1, 1], [], []>} : vector<32x384xbf16>, vector<384x256xbf16>, vector<32x256xf32> -> vector<32x256xf32>
    %c0_15 = arith.constant 0 : index
    %c0_16 = arith.constant 0 : index
    %19 = vector.load %arg6[%c0_15, %c0_16] : memref<1x256xf32, #tpu.memory_space<vmem>>, vector<1x256xf32>
    %20 = vector.broadcast %19 : vector<1x256xf32> to vector<32x256xf32>
    %21 = arith.addf %18, %20 : vector<32x256xf32>
    %cst_17 = arith.constant 0.000000e+00 : f32
    %22 = vector.broadcast %cst_17 : f32 to vector<32x256xf32>
    %23 = arith.maximumf %21, %22 : vector<32x256xf32>
    %24 = arith.truncf %23 : vector<32x256xf32> to vector<32x256xbf16>
    %c0_18 = arith.constant 0 : index
    %c0_19 = arith.constant 0 : index
    %25 = vector.load %arg7[%c0_18, %c0_19] : memref<256x128xbf16, #tpu.memory_space<vmem>>, vector<256x128xbf16>
    %cst_20 = arith.constant dense<0.000000e+00> : vector<32x128xf32>
    %26 = tpu.matmul %24, %25, %cst_20 {dimension_numbers = #tpu.dot_dimension_numbers<[1], [0], [0], [1], [0, 0, 1, 1], [], []>} : vector<32x256xbf16>, vector<256x128xbf16>, vector<32x128xf32> -> vector<32x128xf32>
    %c0_21 = arith.constant 0 : index
    %c0_22 = arith.constant 0 : index
    %27 = vector.load %arg8[%c0_21, %c0_22] : memref<1x128xf32, #tpu.memory_space<vmem>>, vector<1x128xf32>
    %28 = vector.broadcast %27 : vector<1x128xf32> to vector<32x128xf32>
    %29 = arith.addf %26, %28 : vector<32x128xf32>
    %c0_23 = arith.constant 0 : index
    %c0_24 = arith.constant 0 : index
    %30 = vector.load %arg9[%c0_23, %c0_24] : memref<32x128xf32, #tpu.memory_space<vmem>>, vector<32x128xf32>
    tpu.vector_store %arg9[%c0_23, %c0_24], %29 {strides = array<i32>} : memref<32x128xf32, #tpu.memory_space<vmem>>, vector<32x128xf32>,
    return
  }
}

</mosaic_0001>

<bundles_post_ra>
// kernel: candidate_detector_forward.5
= control target key start
LH: loop header
LB: loop body
LE: loop exit
PB: predicated region body
PF: predicated region fallthrough
CT: control target
= control target key end

     0   :  { %s1251_s12 = smov 0   ;;  %s1407_s0 = inlined_call_operand.vmem [shape: bf16[2048,147], index: 0, kind: input, shape index: {}]   ;;  %s1408_s1 = inlined_call_operand.vmem [shape: bf16[147,128], index: 1, kind: input, shape index: {}]   ;;  %s1409_s2 = inlined_call_operand.vmem [shape: f32[1,128], index: 2, kind: input, shape index: {}]   ;;  %s1410_s3 = inlined_call_operand.vmem [shape: bf16[2048,128], index: 3, kind: output, shape index: {}]  }
   0x1 LB: > { %s902_s13 = sadd.s32 4294967295, %s1227_s12   ;;  %p906_p0 = scmp.ge.s32.totalorder %s1227_s12, 1  ;;  %s1227_s12 = sphi %s1251_s12, %s13_s12  }
   0x2   : > { %p139_p1 = scmp.lt.s32.totalorder %s1227_s12, 9 }
   0x4   : > { %p140_p2 = pnand %p906_p0, %p139_p1 }
   0x5   : > { %s907_s20 = sshll.u32 (!%p140_p2), %s902_s13, 5 }
   0x6   : > { %143 = sbr.rel (%p140_p2) target bundleno = 312 (0x138), region = 32  ;;  %p165_p3 = scmp.lt.s32.totalorder (!%p140_p2), %s907_s20, 255 }
   0xb   : > { %v1163_v0 = vld [vmem:[%s1408_s1 + $0x38] sm:$0xff]   ;;  %v1229_v1 = vmov 0   ;;  %v1164_v2 = vld [vmem:[%s1408_s1 + $0x30] sm:$0xff]   ;;  %v1165_v3 = vld [vmem:[%s1408_s1 + $0x28] sm:$0xff]   ;;  %s1412_s20 = smov (!%p165_p3, %s907_s20), 255  ;;  %vm437_vm0 = vcmask 154624  }
   0xc   : > { %493 = vmatprep.subr.bf16.mxu0 %v1229_v1  ;;  %1133 = vmatprep.subr.bf16.mxu1 %v1229_v1  ;;  %v1166_v4 = vld [vmem:[%s1408_s1 + $0x20] sm:$0xff]   ;;  %s1005_s23 = sshll.u32 %s1412_s20, 3  ;;  %v1167_v5 = vld [vmem:[%s1408_s1 + $0x18] sm:$0xff]   ;;  %v1168_v8 = vld [vmem:[%s1408_s1 + $0x10] sm:$0xff]   ;;  %vm486_vm1 = vcmask 1040384   ;;  %vm487_vm2 = vcmask 1041408  }
   0xd   : > { %494 = vmatpush1.bf16.msra.mxu0 %v1163_v0  ;;  %1143 = vmatpush1.bf16.msra.mxu1 %v1163_v0  ;;  %s1277_s26 = scalar_lea.vmem %s1407_s0, %s1005_s23  ;;  %v1169_v9 = vld [vmem:[%s1408_s1 + $0x8] sm:$0xff]   ;;  %v1230_v10 = vmov 65535   ;;  %v1170_v12 = vld [vmem:[%s1408_s1] sm:$0xff]   ;;  %s911_s15 = sshll.u32 %s1412_s20, 2 }
   0xe   : > { %495 = vmatprep.subr.bf16.mxu0 %v1229_v1  ;;  %1134 = vmatprep.subr.bf16.mxu1 %v1229_v1  ;;  %v1175_v6 = vld [vmem:[%s1277_s26 + $0x4] ss:$8 sps:$4 sm:$0xff]   ;;  %v488_v11 = vsel %vm486_vm1, 4294967295, %v1230_v10  ;;  %v1171_v13 = vld [vmem:[%s1408_s1 + $0x48] ss:$0 sps:$4 sm:$0x33]   ;;  %s1358_s18 = scalar_lea.vmem %s1410_s3, %s911_s15 }
   0xf   : > { %v1178_v7 = vld [vmem:[%s1277_s26 + $0x84] ss:$8 sps:$4 sm:$0xff]   ;;  %955 = vmatprep.mubr.msk.bf16.mxu0 %vm437_vm0, %v1175_v6  ;;  %v489_v14 = vsel %vm487_vm2, %v488_v11, 0  ;;  %v1173_v17 = vld [vmem:[%s1277_s26] ss:$8 sps:$4 sm:$0xff]  }
  0x10   : > { %963 = vmatprep.mubr.msk.bf16.mxu1 %vm437_vm0, %v1178_v7  ;;  %v491_v15 = vand.u32 %v1171_v13, %v489_v14  ;;  %v1172_v16 = vld [vmem:[%s1408_s1 + $0x40] sm:$0xff]   ;;  %v1179_v19 = vld [vmem:[%s1277_s26 + $0x14] ss:$8 sps:$4 sm:$0xff]   ;;  %v1183_v21 = vld [vmem:[%s1277_s26 + $0x10] ss:$8 sps:$4 sm:$0xff]  }
  0x11   : > { %496 = vmatpush1.bf16.msra.mxu0 %v1164_v2  ;;  %1144 = vmatpush1.bf16.msra.mxu1 %v1164_v2  ;;  %v1176_v18 = vld [vmem:[%s1277_s26 + $0x80] ss:$8 sps:$4 sm:$0xff]   ;;  %v1181_v20 = vld [vmem:[%s1277_s26 + $0x94] ss:$8 sps:$4 sm:$0xff]   ;;  %v1184_v22 = vld [vmem:[%s1277_s26 + $0x90] ss:$8 sps:$4 sm:$0xff]  }
  0x12   : > { %497 = vmatprep.subr.bf16.mxu0 %v1229_v1  ;;  %1135 = vmatprep.subr.bf16.mxu1 %v1229_v1  ;;  %v1185_v23 = vld [vmem:[%s1277_s26 + $0x24] ss:$8 sps:$4 sm:$0xff]   ;;  %v1189_v25 = vld [vmem:[%s1277_s26 + $0x20] ss:$8 sps:$4 sm:$0xff]   ;;  %v1191_v27 = vld [vmem:[%s1277_s26 + $0x34] ss:$8 sps:$4 sm:$0xff]  }
  0x13   : > { %v1187_v24 = vld [vmem:[%s1277_s26 + $0xa4] ss:$8 sps:$4 sm:$0xff]   ;;  %v1190_v26 = vld [vmem:[%s1277_s26 + $0xa0] ss:$8 sps:$4 sm:$0xff]   ;;  %v1193_v28 = vld [vmem:[%s1277_s26 + $0xb4] ss:$8 sps:$4 sm:$0xff]  }
  0x14   : > { %v1195_v29 = vld [vmem:[%s1277_s26 + $0x30] ss:$8 sps:$4 sm:$0xff]   ;;  %v1197_v31 = vld [vmem:[%s1277_s26 + $0x44] ss:$8 sps:$4 sm:$0xff]   ;;  %v1201_v33 = vld [vmem:[%s1277_s26 + $0x40] ss:$8 sps:$4 sm:$0xff]  }
  0x15   : > { %498 = vmatpush1.bf16.msra.mxu0 %v1165_v3  ;;  %1145 = vmatpush1.bf16.msra.mxu1 %v1165_v3  ;;  %v1196_v30 = vld [vmem:[%s1277_s26 + $0xb0] ss:$8 sps:$4 sm:$0xff]   ;;  %v1199_v32 = vld [vmem:[%s1277_s26 + $0xc4] ss:$8 sps:$4 sm:$0xff]   ;;  %v1202_v34 = vld [vmem:[%s1277_s26 + $0xc0] ss:$8 sps:$4 sm:$0xff]  }
  0x16   : > { %499 = vmatprep.subr.bf16.mxu0 %v1229_v1  ;;  %1136 = vmatprep.subr.bf16.mxu1 %v1229_v1  ;;  %v1203_v35 = vld [vmem:[%s1277_s26 + $0x54] ss:$8 sps:$4 sm:$0xff]   ;;  %v1207_v37 = vld [vmem:[%s1277_s26 + $0x50] ss:$8 sps:$4 sm:$0xff]   ;;  %v1209_v39 = vld [vmem:[%s1277_s26 + $0x64] ss:$8 sps:$4 sm:$0xff]  }
  0x17   : > { %v1205_v36 = vld [vmem:[%s1277_s26 + $0xd4] ss:$8 sps:$4 sm:$0xff]   ;;  %v1208_v38 = vld [vmem:[%s1277_s26 + $0xd0] ss:$8 sps:$4 sm:$0xff]   ;;  %v1211_v40 = vld [vmem:[%s1277_s26 + $0xe4] ss:$8 sps:$4 sm:$0xff]  }
  0x18   : > { %v1213_v41 = vld [vmem:[%s1277_s26 + $0x60] ss:$8 sps:$4 sm:$0xff]   ;;  %v1215_v43 = vld [vmem:[%s1277_s26 + $0x74] ss:$8 sps:$4 sm:$0xff]   ;;  %v1219_v45 = vld [vmem:[%s1277_s26 + $0x70] ss:$8 sps:$4 sm:$0xff]  }
  0x19   : > { %500 = vmatpush1.bf16.msra.mxu0 %v1166_v4  ;;  %1146 = vmatpush1.bf16.msra.mxu1 %v1166_v4  ;;  %v1214_v42 = vld [vmem:[%s1277_s26 + $0xe0] ss:$8 sps:$4 sm:$0xff]   ;;  %v1217_v44 = vld [vmem:[%s1277_s26 + $0xf4] ss:$8 sps:$4 sm:$0xff]   ;;  %v1220_v46 = vld [vmem:[%s1277_s26 + $0xf0] ss:$8 sps:$4 sm:$0xff]  }
  0x1a   : > { %501 = vmatprep.subr.bf16.mxu0 %v1229_v1  ;;  %1137 = vmatprep.subr.bf16.mxu1 %v1229_v1  ;;  %v1348_v47 = vld [vmem:[%s1409_s2] ss:$0 sm:$0xff] }
  0x1d   : > { %502 = vmatpush1.bf16.msra.mxu0 %v1167_v5  ;;  %1147 = vmatpush1.bf16.msra.mxu1 %v1167_v5 }
  0x1e   : > { %503 = vmatprep.subr.bf16.mxu0 %v1229_v1  ;;  %1138 = vmatprep.subr.bf16.mxu1 %v1229_v1 }
  0x21   : > { %504 = vmatpush1.bf16.msra.mxu0 %v1168_v8  ;;  %1148 = vmatpush1.bf16.msra.mxu1 %v1168_v8 }
  0x22   : > { %505 = vmatprep.subr.bf16.mxu0 %v1229_v1  ;;  %1139 = vmatprep.subr.bf16.mxu1 %v1229_v1 }
  0x25   : > { %506 = vmatpush1.bf16.msra.mxu0 %v1169_v9  ;;  %1149 = vmatpush1.bf16.msra.mxu1 %v1169_v9 }
  0x26   : > { %507 = vmatprep.subr.bf16.mxu0 %v1229_v1  ;;  %1140 = vmatprep.subr.bf16.mxu1 %v1229_v1 }
  0x29   : > { %508 = vmatpush1.bf16.msra.mxu0 %v1170_v12  ;;  %1150 = vmatpush1.bf16.msra.mxu1 %v1170_v12 }
  0x2a   : > { %521 = vmatprep.subr.bf16.mxu0 %v1229_v1  ;;  %1141 = vmatprep.subr.bf16.mxu1 %v1229_v1 }
  0x2d   : > { %522 = vmatpush2.bf16.msra.mxu0 %v491_v15  ;;  %1151 = vmatpush2.bf16.msra.mxu1 %v491_v15 }
  0x2e   : > { %523 = vmatprep.subr.bf16.mxu0 %v1229_v1  ;;  %1142 = vmatprep.subr.bf16.mxu1 %v1229_v1 }
  0x31   : > { %524 = vmatpush2.bf16.msra.mxu0 %v1172_v16  ;;  %1152 = vmatpush2.bf16.msra.mxu1 %v1172_v16 }
  0x34   : > { %526 = vmatmul.mubr.bf16.vlgmr.msra.gmra.mxu0 %v1173_v17  ;;  %590 = vmatmul.mubr.bf16.vlgmr.msra.gmra.mxu1 %v1176_v18 }
  0x35   : > { %956 = vmatprep.mubr.msk.bf16.mxu0 %vm437_vm0, %v1179_v19  ;;  %964 = vmatprep.mubr.msk.bf16.mxu1 %vm437_vm0, %v1181_v20 }
  0x3c   : > { %534 = vmatmul.mubr.bf16.gmra.mxu0 %v1183_v21  ;;  %598 = vmatmul.mubr.bf16.gmra.mxu1 %v1184_v22 }
  0x3d   : > { %957 = vmatprep.mubr.msk.bf16.mxu0 %vm437_vm0, %v1185_v23  ;;  %965 = vmatprep.mubr.msk.bf16.mxu1 %vm437_vm0, %v1187_v24 }
  0x44   : > { %542 = vmatmul.mubr.bf16.gmra.mxu0 %v1189_v25  ;;  %606 = vmatmul.mubr.bf16.gmra.mxu1 %v1190_v26 }
  0x45   : > { %958 = vmatprep.mubr.msk.bf16.mxu0 %vm437_vm0, %v1191_v27  ;;  %966 = vmatprep.mubr.msk.bf16.mxu1 %vm437_vm0, %v1193_v28 }
  0x4c   : > { %550 = vmatmul.mubr.bf16.gmra.mxu0 %v1195_v29  ;;  %614 = vmatmul.mubr.bf16.gmra.mxu1 %v1196_v30 }
  0x4d   : > { %959 = vmatprep.mubr.msk.bf16.mxu0 %vm437_vm0, %v1197_v31  ;;  %967 = vmatprep.mubr.msk.bf16.mxu1 %vm437_vm0, %v1199_v32 }
  0x54   : > { %558 = vmatmul.mubr.bf16.gmra.mxu0 %v1201_v33  ;;  %622 = vmatmul.mubr.bf16.gmra.mxu1 %v1202_v34 }
  0x55   : > { %960 = vmatprep.mubr.msk.bf16.mxu0 %vm437_vm0, %v1203_v35  ;;  %968 = vmatprep.mubr.msk.bf16.mxu1 %vm437_vm0, %v1205_v36 }
  0x5c   : > { %566 = vmatmul.mubr.bf16.gmra.mxu0 %v1207_v37  ;;  %630 = vmatmul.mubr.bf16.gmra.mxu1 %v1208_v38 }
  0x5d   : > { %961 = vmatprep.mubr.msk.bf16.mxu0 %vm437_vm0, %v1209_v39  ;;  %969 = vmatprep.mubr.msk.bf16.mxu1 %vm437_vm0, %v1211_v40 }
  0x64   : > { %574 = vmatmul.mubr.bf16.gmra.mxu0 %v1213_v41  ;;  %638 = vmatmul.mubr.bf16.gmra.mxu1 %v1214_v42 }
  0x65   : > { %962 = vmatprep.mubr.msk.bf16.mxu0 %vm437_vm0, %v1215_v43  ;;  %970 = vmatprep.mubr.msk.bf16.mxu1 %vm437_vm0, %v1217_v44 }
  0x6c   : > { %582 = vmatmul.mubr.bf16.gmra.mxu0 %v1219_v45  ;;  %646 = vmatmul.mubr.bf16.gmra.mxu1 %v1220_v46 }
  0xf4   : > { %v527_v48 = vpop.f32.mrf.mxu0  ;;  %v591_v49 = vpop.f32.mrf.mxu1 }
  0xf5   : > { %v528_v52 = vadd.f32 %v1348_v47, %v527_v48  ;;  %v592_v53 = vadd.f32 %v1348_v47, %v591_v49 }
  0xf6   : > { %v529_v50 = vpop.f32.mrf.mxu0  ;;  %v593_v51 = vpop.f32.mrf.mxu1 }
  0xf7   : > { %v654_v60 = vmax.f32 %v528_v52, 0.0  ;;  %v670_v61 = vmax.f32 %v592_v53, 0.0 }
  0xf8   : > { %v530_v54 = vpop.f32.mrf.mxu0  ;;  %v594_v55 = vpop.f32.mrf.mxu1 }
  0xf9   : > { %v531_v56 = vadd.f32 %v1348_v47, %v530_v54  ;;  %v595_v57 = vadd.f32 %v1348_v47, %v594_v55 }
  0xfa   : > { %v532_v58 = vpop.f32.mrf.mxu0  ;;  %v596_v59 = vpop.f32.mrf.mxu1 }
  0xfb   : > { %v655_v62 = vmax.f32 %v531_v56, 0.0  ;;  %v671_v63 = vmax.f32 %v595_v57, 0.0 }
  0xfc   : > { %v535_v0 = vpop.f32.mrf.mxu0  ;;  %v599_v1 = vpop.f32.mrf.mxu1 }
  0xfd   : > { %v1041_v2 = vpack.c.bf16 %v655_v62, %v654_v60  ;;  %v1081_v3 = vpack.c.bf16 %v671_v63, %v670_v61  ;;  %v536_v6 = vadd.f32 %v1348_v47, %v535_v0  ;;  %v600_v7 = vadd.f32 %v1348_v47, %v599_v1 }
  0xfe   : > { %v537_v4 = vpop.f32.mrf.mxu0  ;;  %v601_v5 = vpop.f32.mrf.mxu1 }
  0xff   : > { %1042 = vst [vmem:[%s1358_s18] sm:$0xff] %v1041_v2   ;;  %1125 = vst [vmem:[%s1358_s18 + $0x40] sm:$0xff] %v1081_v3   ;;  %v656_v14 = vmax.f32 %v536_v6, 0.0  ;;  %v672_v15 = vmax.f32 %v600_v7, 0.0 }
 0x100   : > { %v538_v8 = vpop.f32.mrf.mxu0  ;;  %v602_v9 = vpop.f32.mrf.mxu1 }
 0x101   : > { %v539_v10 = vadd.f32 %v1348_v47, %v538_v8  ;;  %v603_v11 = vadd.f32 %v1348_v47, %v602_v9 }
 0x102   : > { %v540_v12 = vpop.f32.mrf.mxu0  ;;  %v604_v13 = vpop.f32.mrf.mxu1 }
 0x103   : > { %v657_v16 = vmax.f32 %v539_v10, 0.0  ;;  %v673_v17 = vmax.f32 %v603_v11, 0.0 }
 0x104   : > { %v543_v18 = vpop.f32.mrf.mxu0  ;;  %v607_v19 = vpop.f32.mrf.mxu1 }
 0x105   : > { %v1046_v20 = vpack.c.bf16 %v657_v16, %v656_v14  ;;  %v1086_v21 = vpack.c.bf16 %v673_v17, %v672_v15  ;;  %v544_v24 = vadd.f32 %v1348_v47, %v543_v18  ;;  %v608_v25 = vadd.f32 %v1348_v47, %v607_v19 }
 0x106   : > { %v545_v22 = vpop.f32.mrf.mxu0  ;;  %v609_v23 = vpop.f32.mrf.mxu1 }
 0x107   : > { %1118 = vst [vmem:[%s1358_s18 + $0x8] sm:$0xff] %v1046_v20   ;;  %1126 = vst [vmem:[%s1358_s18 + $0x48] sm:$0xff] %v1086_v21   ;;  %v658_v32 = vmax.f32 %v544_v24, 0.0  ;;  %v674_v33 = vmax.f32 %v608_v25, 0.0 }
 0x108   : > { %v546_v26 = vpop.f32.mrf.mxu0  ;;  %v610_v27 = vpop.f32.mrf.mxu1 }
 0x109   : > { %v547_v28 = vadd.f32 %v1348_v47, %v546_v26  ;;  %v611_v29 = vadd.f32 %v1348_v47, %v610_v27 }
 0x10a   : > { %v548_v30 = vpop.f32.mrf.mxu0  ;;  %v612_v31 = vpop.f32.mrf.mxu1 }
 0x10b   : > { %v659_v34 = vmax.f32 %v547_v28, 0.0  ;;  %v675_v35 = vmax.f32 %v611_v29, 0.0 }
 0x10c   : > { %v551_v36 = vpop.f32.mrf.mxu0  ;;  %v615_v37 = vpop.f32.mrf.mxu1 }
 0x10d   : > { %v1051_v38 = vpack.c.bf16 %v659_v34, %v658_v32  ;;  %v1091_v39 = vpack.c.bf16 %v675_v35, %v674_v33  ;;  %v552_v42 = vadd.f32 %v1348_v47, %v551_v36  ;;  %v616_v43 = vadd.f32 %v1348_v47, %v615_v37 }
 0x10e   : > { %v553_v40 = vpop.f32.mrf.mxu0  ;;  %v617_v41 = vpop.f32.mrf.mxu1 }
 0x10f   : > { %1119 = vst [vmem:[%s1358_s18 + $0x10] sm:$0xff] %v1051_v38   ;;  %1127 = vst [vmem:[%s1358_s18 + $0x50] sm:$0xff] %v1091_v39   ;;  %v660_v51 = vmax.f32 %v552_v42, 0.0  ;;  %v676_v52 = vmax.f32 %v616_v43, 0.0 }
 0x110   : > { %v554_v44 = vpop.f32.mrf.mxu0  ;;  %v618_v45 = vpop.f32.mrf.mxu1 }
 0x111   : > { %v555_v46 = vadd.f32 %v1348_v47, %v554_v44  ;;  %v619_v48 = vadd.f32 %v1348_v47, %v618_v45 }
 0x112   : > { %v556_v49 = vpop.f32.mrf.mxu0  ;;  %v620_v50 = vpop.f32.mrf.mxu1 }
 0x113   : > { %v661_v53 = vmax.f32 %v555_v46, 0.0  ;;  %v677_v54 = vmax.f32 %v619_v48, 0.0 }
 0x114   : > { %v559_v55 = vpop.f32.mrf.mxu0  ;;  %v623_v56 = vpop.f32.mrf.mxu1 }
 0x115   : > { %v1056_v57 = vpack.c.bf16 %v661_v53, %v660_v51  ;;  %v1096_v58 = vpack.c.bf16 %v677_v54, %v676_v52  ;;  %v560_v61 = vadd.f32 %v1348_v47, %v559_v55  ;;  %v624_v62 = vadd.f32 %v1348_v47, %v623_v56 }
 0x116   : > { %v561_v59 = vpop.f32.mrf.mxu0  ;;  %v625_v60 = vpop.f32.mrf.mxu1 }
 0x117   : > { %1120 = vst [vmem:[%s1358_s18 + $0x18] sm:$0xff] %v1056_v57   ;;  %1128 = vst [vmem:[%s1358_s18 + $0x58] sm:$0xff] %v1096_v58   ;;  %v662_v5 = vmax.f32 %v560_v61, 0.0  ;;  %v678_v6 = vmax.f32 %v624_v62, 0.0 }
 0x118   : > { %v562_v63 = vpop.f32.mrf.mxu0  ;;  %v626_v0 = vpop.f32.mrf.mxu1 }
 0x119   : > { %v563_v1 = vadd.f32 %v1348_v47, %v562_v63  ;;  %v627_v2 = vadd.f32 %v1348_v47, %v626_v0 }
 0x11a   : > { %v564_v3 = vpop.f32.mrf.mxu0  ;;  %v628_v4 = vpop.f32.mrf.mxu1 }
 0x11b   : > { %v663_v7 = vmax.f32 %v563_v1, 0.0  ;;  %v679_v8 = vmax.f32 %v627_v2, 0.0 }
 0x11c   : > { %v567_v9 = vpop.f32.mrf.mxu0  ;;  %v631_v10 = vpop.f32.mrf.mxu1 }
 0x11d   : > { %v1061_v11 = vpack.c.bf16 %v663_v7, %v662_v5  ;;  %v1101_v12 = vpack.c.bf16 %v679_v8, %v678_v6  ;;  %v568_v15 = vadd.f32 %v1348_v47, %v567_v9  ;;  %v632_v16 = vadd.f32 %v1348_v47, %v631_v10 }
 0x11e   : > { %v569_v13 = vpop.f32.mrf.mxu0  ;;  %v633_v14 = vpop.f32.mrf.mxu1 }
 0x11f   : > { %1121 = vst [vmem:[%s1358_s18 + $0x20] sm:$0xff] %v1061_v11   ;;  %1129 = vst [vmem:[%s1358_s18 + $0x60] sm:$0xff] %v1101_v12   ;;  %v664_v23 = vmax.f32 %v568_v15, 0.0  ;;  %v680_v24 = vmax.f32 %v632_v16, 0.0 }
 0x120   : > { %v570_v17 = vpop.f32.mrf.mxu0  ;;  %v634_v18 = vpop.f32.mrf.mxu1 }
 0x121   : > { %v571_v19 = vadd.f32 %v1348_v47, %v570_v17  ;;  %v635_v20 = vadd.f32 %v1348_v47, %v634_v18 }
 0x122   : > { %v572_v21 = vpop.f32.mrf.mxu0  ;;  %v636_v22 = vpop.f32.mrf.mxu1 }
 0x123   : > { %v665_v25 = vmax.f32 %v571_v19, 0.0  ;;  %v681_v26 = vmax.f32 %v635_v20, 0.0 }
 0x124   : > { %v575_v27 = vpop.f32.mrf.mxu0  ;;  %v639_v28 = vpop.f32.mrf.mxu1 }
 0x125   : > { %v1066_v29 = vpack.c.bf16 %v665_v25, %v664_v23  ;;  %v1106_v30 = vpack.c.bf16 %v681_v26, %v680_v24  ;;  %v576_v33 = vadd.f32 %v1348_v47, %v575_v27  ;;  %v640_v34 = vadd.f32 %v1348_v47, %v639_v28 }
 0x126   : > { %v577_v31 = vpop.f32.mrf.mxu0  ;;  %v641_v32 = vpop.f32.mrf.mxu1 }
 0x127   : > { %1122 = vst [vmem:[%s1358_s18 + $0x28] sm:$0xff] %v1066_v29   ;;  %1130 = vst [vmem:[%s1358_s18 + $0x68] sm:$0xff] %v1106_v30   ;;  %v666_v41 = vmax.f32 %v576_v33, 0.0  ;;  %v682_v42 = vmax.f32 %v640_v34, 0.0 }
 0x128   : > { %v578_v35 = vpop.f32.mrf.mxu0  ;;  %v642_v36 = vpop.f32.mrf.mxu1 }
 0x129   : > { %v579_v37 = vadd.f32 %v1348_v47, %v578_v35  ;;  %v643_v38 = vadd.f32 %v1348_v47, %v642_v36 }
 0x12a   : > { %v580_v39 = vpop.f32.mrf.mxu0  ;;  %v644_v40 = vpop.f32.mrf.mxu1 }
 0x12b   : > { %v667_v43 = vmax.f32 %v579_v37, 0.0  ;;  %v683_v44 = vmax.f32 %v643_v38, 0.0 }
 0x12c   : > { %v583_v45 = vpop.f32.mrf.mxu0  ;;  %v647_v46 = vpop.f32.mrf.mxu1 }
 0x12d   : > { %v1071_v48 = vpack.c.bf16 %v667_v43, %v666_v41  ;;  %v1111_v49 = vpack.c.bf16 %v683_v44, %v682_v42  ;;  %v584_v52 = vadd.f32 %v1348_v47, %v583_v45  ;;  %v648_v53 = vadd.f32 %v1348_v47, %v647_v46 }
 0x12e   : > { %v585_v50 = vpop.f32.mrf.mxu0  ;;  %v649_v51 = vpop.f32.mrf.mxu1 }
 0x12f   : > { %1123 = vst [vmem:[%s1358_s18 + $0x30] sm:$0xff] %v1071_v48   ;;  %1131 = vst [vmem:[%s1358_s18 + $0x70] sm:$0xff] %v1111_v49   ;;  %v668_v60 = vmax.f32 %v584_v52, 0.0  ;;  %v684_v61 = vmax.f32 %v648_v53, 0.0 }
 0x130   : > { %v586_v54 = vpop.f32.mrf.mxu0  ;;  %v650_v55 = vpop.f32.mrf.mxu1 }
 0x131   : > { %v587_v56 = vadd.f32 %v1348_v47, %v586_v54  ;;  %v651_v57 = vadd.f32 %v1348_v47, %v650_v55 }
 0x132   : > { %v588_v58 = vpop.f32.mrf.mxu0  ;;  %v652_v59 = vpop.f32.mrf.mxu1 }
 0x133   : > { %v669_v62 = vmax.f32 %v587_v56, 0.0  ;;  %v685_v63 = vmax.f32 %v651_v57, 0.0 }
 0x135   : > { %v1076_v0 = vpack.c.bf16 %v669_v62, %v668_v60  ;;  %v1116_v1 = vpack.c.bf16 %v685_v63, %v684_v61 }
 0x137   : > { %1124 = vst [vmem:[%s1358_s18 + $0x38] sm:$0xff] %v1076_v0   ;;  %1132 = vst [vmem:[%s1358_s18 + $0x78] sm:$0xff] %v1116_v1  }
 0x138 PF: > { %s13_s12 = sadd.s32 1, %s1227_s12  }
 0x139   : > { %p10_p4 = scmp.ge.s32.totalorder %s13_s12, 10  }
 0x13b   :  { %12 = sbr.rel (!%p10_p4) target bundleno = 1 (0x1), region = 62 }

// kernel: candidate_detector_forward.6
= control target key start
LH: loop header
LB: loop body
LE: loop exit
PB: predicated region body
PF: predicated region fallthrough
CT: control target
= control target key end

     0   :  { %v8671_v0 = vmov 0   ;;  %s11612_s1 = inlined_call_operand.vmem [shape: bf16[3200,128], index: 1, kind: input, shape index: {}]   ;;  %s11613_s0 = inlined_call_operand.vmem [shape: bf16[288,3200], index: 0, kind: input, shape index: {}]   ;;  %s11614_s2 = inlined_call_operand.vmem [shape: f32[1,128], index: 2, kind: input, shape index: {}]   ;;  %s11615_s3 = inlined_call_operand.vmem [shape: bf16[288,128], index: 3, kind: output, shape index: {}]  }
   0x1   :  { %4358 = vmatprep.subr.bf16.mxu0 %v8671_v0  ;;  %4535 = vmatprep.subr.bf16.mxu1 %v8671_v0  ;;  %v7804_v1 = vld [vmem:[%s11612_s1 + $0x38] sm:$0xff]   ;;  %v7806_v3 = vld [vmem:[%s11612_s1 + $0x30] sm:$0xff]   ;;  %v7808_v5 = vld [vmem:[%s11612_s1 + $0x28] sm:$0xff]  }
   0x2   :  { %v7805_v2 = vld [vmem:[%s11612_s1 + $0xb8] sm:$0xff]   ;;  %4359 = vmatpush1.bf16.msra.mxu0 %v7804_v1  ;;  %v7807_v4 = vld [vmem:[%s11612_s1 + $0xb0] sm:$0xff]   ;;  %v7809_v6 = vld [vmem:[%s11612_s1 + $0xa8] sm:$0xff]  }
   0x3   :  { %4536 = vmatpush1.bf16.msra.mxu1 %v7805_v2  ;;  %4360 = vmatprep.subr.bf16.mxu0 %v8671_v0  ;;  %v7810_v7 = vld [vmem:[%s11612_s1 + $0x20] sm:$0xff]   ;;  %v7812_v9 = vld [vmem:[%s11612_s1 + $0x18] sm:$0xff]   ;;  %v7814_v11 = vld [vmem:[%s11612_s1 + $0x10] sm:$0xff]  }
   0x4   :  { %4537 = vmatprep.subr.bf16.mxu1 %v8671_v0  ;;  %v7811_v8 = vld [vmem:[%s11612_s1 + $0xa0] sm:$0xff]   ;;  %v7813_v10 = vld [vmem:[%s11612_s1 + $0x98] sm:$0xff]   ;;  %v7815_v12 = vld [vmem:[%s11612_s1 + $0x90] sm:$0xff]  }
   0x5   :  { %v7816_v13 = vld [vmem:[%s11612_s1 + $0x8] sm:$0xff]   ;;  %v7818_v15 = vld [vmem:[%s11612_s1] sm:$0xff]   ;;  %v7820_v17 = vld [vmem:[%s11612_s1 + $0x78] sm:$0xff]  }
   0x6   :  { %4361 = vmatpush1.bf16.msra.mxu0 %v7806_v3  ;;  %v7817_v14 = vld [vmem:[%s11612_s1 + $0x88] sm:$0xff]   ;;  %v7819_v16 = vld [vmem:[%s11612_s1 + $0x80] sm:$0xff]   ;;  %v7821_v18 = vld [vmem:[%s11612_s1 + $0xf8] sm:$0xff]  }
   0x7   :  { %4538 = vmatpush1.bf16.msra.mxu1 %v7807_v4  ;;  %4362 = vmatprep.subr.bf16.mxu0 %v8671_v0  ;;  %v7838_v19 = vld [vmem:[%s11613_s0 + $0x4] ss:$100 sps:$4 sm:$0xff]   ;;  %v7822_v20 = vld [vmem:[%s11612_s1 + $0x70] sm:$0xff]   ;;  %v7828_v27 = vld [vmem:[%s11612_s1 + $0x58] sm:$0xff]  }
   0x8   :  { %4539 = vmatprep.subr.bf16.mxu1 %v8671_v0  ;;  %v7841_v21 = vld [vmem:[%s11613_s0 + $0xc] ss:$100 sps:$4 sm:$0xff]   ;;  %4390 = vmatprep.mubr.bf16.mxu0 %v7838_v19  ;;  %v7826_v25 = vld [vmem:[%s11612_s1 + $0x60] sm:$0xff]   ;;  %v7829_v28 = vld [vmem:[%s11612_s1 + $0xd8] sm:$0xff]  }
   0x9   :  { %v7823_v22 = vld [vmem:[%s11612_s1 + $0xf0] sm:$0xff]   ;;  %4567 = vmatprep.mubr.bf16.mxu1 %v7841_v21  ;;  %v7824_v23 = vld [vmem:[%s11612_s1 + $0x68] sm:$0xff]   ;;  %v7827_v26 = vld [vmem:[%s11612_s1 + $0xe0] sm:$0xff]  }
   0xa   :  { %4363 = vmatpush1.bf16.msra.mxu0 %v7808_v5  ;;  %v7825_v24 = vld [vmem:[%s11612_s1 + $0xe8] sm:$0xff]   ;;  %v7830_v29 = vld [vmem:[%s11612_s1 + $0x50] sm:$0xff]   ;;  %v7834_v33 = vld [vmem:[%s11612_s1 + $0x40] sm:$0xff]  }
   0xb   :  { %4540 = vmatpush1.bf16.msra.mxu1 %v7809_v6  ;;  %4364 = vmatprep.subr.bf16.mxu0 %v8671_v0  ;;  %v7831_v30 = vld [vmem:[%s11612_s1 + $0xd0] sm:$0xff]   ;;  %v7832_v31 = vld [vmem:[%s11612_s1 + $0x48] sm:$0xff]   ;;  %v7835_v34 = vld [vmem:[%s11612_s1 + $0xc0] sm:$0xff]  }
   0xc   :  { %4541 = vmatprep.subr.bf16.mxu1 %v8671_v0  ;;  %v7833_v32 = vld [vmem:[%s11612_s1 + $0xc8] sm:$0xff]   ;;  %v7836_v35 = vld [vmem:[%s11613_s0] ss:$100 sps:$4 sm:$0xff]   ;;  %v7842_v37 = vld [vmem:[%s11612_s1 + $0x138] sm:$0xff]  }
   0xd   :  { %v7839_v36 = vld [vmem:[%s11613_s0 + $0x8] ss:$100 sps:$4 sm:$0xff]   ;;  %v7845_v39 = vld [vmem:[%s11613_s0 + $0xd4] ss:$100 sps:$4 sm:$0xff]   ;;  %v7853_v46 = vld [vmem:[%s11613_s0 + $0x19c] ss:$100 sps:$4 sm:$0xff]  }
   0xe   :  { %4365 = vmatpush1.bf16.msra.mxu0 %v7810_v7  ;;  %v7843_v38 = vld [vmem:[%s11613_s0 + $0xcc] ss:$100 sps:$4 sm:$0xff]   ;;  %v7849_v40 = vld [vmem:[%s11612_s1 + $0x1b8] sm:$0xff]   ;;  %v7866_v50 = vld [vmem:[%s11612_s1 + $0x120] sm:$0xff]  }
   0xf   :  { %4542 = vmatpush1.bf16.msra.mxu1 %v7811_v8  ;;  %4366 = vmatprep.subr.bf16.mxu0 %v8671_v0  ;;  %v7850_v41 = vld [vmem:[%s11612_s1 + $0x130] sm:$0xff]   ;;  %v7847_v43 = vld [vmem:[%s11613_s0 + $0xc8] ss:$100 sps:$4 sm:$0xff]   ;;  %v7873_v51 = vld [vmem:[%s11612_s1 + $0x1a0] sm:$0xff]  }
  0x10   :  { %4543 = vmatprep.subr.bf16.mxu1 %v8671_v0  ;;  %v7857_v42 = vld [vmem:[%s11612_s1 + $0x1b0] sm:$0xff]   ;;  %v7858_v47 = vld [vmem:[%s11612_s1 + $0x128] sm:$0xff]   ;;  %v7856_v52 = vld [vmem:[%s11613_s0 + $0x198] ss:$100 sps:$4 sm:$0xff]  }
  0x11   :  { %v7848_v44 = vld [vmem:[%s11613_s0 + $0xd0] ss:$100 sps:$4 sm:$0xff]   ;;  %v7865_v48 = vld [vmem:[%s11612_s1 + $0x1a8] sm:$0xff]   ;;  %v7859_v53 = vld [vmem:[%s11613_s0 + $0x25c] ss:$100 sps:$4 sm:$0xff]  }
  0x12   :  { %4367 = vmatpush1.bf16.msra.mxu0 %v7812_v9  ;;  %v7851_v45 = vld [vmem:[%s11613_s0 + $0x194] ss:$100 sps:$4 sm:$0xff]   ;;  %v7861_v54 = vld [vmem:[%s11613_s0 + $0x264] ss:$100 sps:$4 sm:$0xff]   ;;  %v7869_v62 = vld [vmem:[%s11613_s0 + $0x32c] ss:$100 sps:$4 sm:$0xff]  }
  0x13   :  { %4544 = vmatpush1.bf16.msra.mxu1 %v7813_v10  ;;  %4368 = vmatprep.subr.bf16.mxu0 %v8671_v0  ;;  %v7855_v49 = vld [vmem:[%s11613_s0 + $0x190] ss:$100 sps:$4 sm:$0xff]   ;;  %v7874_v55 = vld [vmem:[%s11612_s1 + $0x118] sm:$0xff]   ;;  %v7864_v60 = vld [vmem:[%s11613_s0 + $0x260] ss:$100 sps:$4 sm:$0xff]  }
  0x14   :  { %4545 = vmatprep.subr.bf16.mxu1 %v8671_v0  ;;  %v7881_v56 = vld [vmem:[%s11612_s1 + $0x198] sm:$0xff]   ;;  %v7882_v58 = vld [vmem:[%s11612_s1 + $0x110] sm:$0xff]   ;;  %v7867_v61 = vld [vmem:[%s11613_s0 + $0x324] ss:$100 sps:$4 sm:$0xff]  }
  0x15   :  { %v7863_v57 = vld [vmem:[%s11613_s0 + $0x258] ss:$100 sps:$4 sm:$0xff]   ;;  %v7889_v59 = vld [vmem:[%s11612_s1 + $0x190] sm:$0xff]   ;;  %v7894_v63 = vld [vmem:[%s11612_s1 + $0x108] sm:$0xff]  }
  0x16   :  { %4369 = vmatpush1.bf16.msra.mxu0 %v7814_v11  ;;  %v7901_v1 = vld [vmem:[%s11612_s1 + $0x188] sm:$0xff]   ;;  %v7871_v2 = vld [vmem:[%s11613_s0 + $0x320] ss:$100 sps:$4 sm:$0xff]   ;;  %v7877_v7 = vld [vmem:[%s11613_s0 + $0x3f4] ss:$100 sps:$4 sm:$0xff]  }
  0x17   :  { %4546 = vmatpush1.bf16.msra.mxu1 %v7815_v12  ;;  %4370 = vmatprep.subr.bf16.mxu0 %v8671_v0  ;;  %v7904_v3 = vld [vmem:[%s11612_s1 + $0x100] sm:$0xff]   ;;  %v7872_v4 = vld [vmem:[%s11613_s0 + $0x328] ss:$100 sps:$4 sm:$0xff]   ;;  %v7912_v8 = vld [vmem:[%s11612_s1 + $0x178] sm:$0xff]  }
  0x18   :  { %4547 = vmatprep.subr.bf16.mxu1 %v8671_v0  ;;  %v7911_v5 = vld [vmem:[%s11612_s1 + $0x180] sm:$0xff]   ;;  %v7875_v6 = vld [vmem:[%s11613_s0 + $0x3ec] ss:$100 sps:$4 sm:$0xff]   ;;  %v7919_v9 = vld [vmem:[%s11612_s1 + $0x1f8] sm:$0xff]  }
  0x19   :  { %v7879_v10 = vld [vmem:[%s11613_s0 + $0x3e8] ss:$100 sps:$4 sm:$0xff]   ;;  %v7920_v11 = vld [vmem:[%s11612_s1 + $0x170] sm:$0xff]   ;;  %v7943_v19 = vld [vmem:[%s11612_s1 + $0x1e0] sm:$0xff]  }
  0x1a   :  { %4371 = vmatpush1.bf16.msra.mxu0 %v7816_v13  ;;  %v7927_v12 = vld [vmem:[%s11612_s1 + $0x1f0] sm:$0xff]   ;;  %v7888_v21 = vld [vmem:[%s11613_s0 + $0x4b8] ss:$100 sps:$4 sm:$0xff]  }
  0x1b   :  { %4548 = vmatpush1.bf16.msra.mxu1 %v7817_v14  ;;  %4372 = vmatprep.subr.bf16.mxu0 %v8671_v0  ;;  %v7880_v13 = vld [vmem:[%s11613_s0 + $0x3f0] ss:$100 sps:$4 sm:$0xff]  }
  0x1c   :  { %4549 = vmatprep.subr.bf16.mxu1 %v8671_v0  ;;  %v7883_v14 = vld [vmem:[%s11613_s0 + $0x4b4] ss:$100 sps:$4 sm:$0xff]  }
  0x1e   :  { %4373 = vmatpush1.bf16.msra.mxu0 %v7818_v15  ;;  %v7885_v15 = vld [vmem:[%s11613_s0 + $0x4bc] ss:$100 sps:$4 sm:$0xff]  }
  0x1f   :  { %4550 = vmatpush1.bf16.msra.mxu1 %v7819_v16  ;;  %4374 = vmatprep.subr.bf16.mxu0 %v8671_v0  ;;  %v7928_v16 = vld [vmem:[%s11612_s1 + $0x168] sm:$0xff]  }
  0x20   :  { %4551 = vmatprep.subr.bf16.mxu1 %v8671_v0 }
  0x22   :  { %4375 = vmatpush2.bf16.msra.mxu0 %v7820_v17  ;;  %v7935_v17 = vld [vmem:[%s11612_s1 + $0x1e8] sm:$0xff]  }
  0x23   :  { %4552 = vmatpush2.bf16.msra.mxu1 %v7821_v18  ;;  %4376 = vmatprep.subr.bf16.mxu0 %v8671_v0  ;;  %v7936_v18 = vld [vmem:[%s11612_s1 + $0x160] sm:$0xff]  }
  0x24   :  { %4553 = vmatprep.subr.bf16.mxu1 %v8671_v0 }
  0x26   :  { %4377 = vmatpush2.bf16.msra.mxu0 %v7822_v20  ;;  %v7887_v20 = vld [vmem:[%s11613_s0 + $0x4b0] ss:$100 sps:$4 sm:$0xff]  }
  0x27   :  { %4554 = vmatpush2.bf16.msra.mxu1 %v7823_v22  ;;  %4378 = vmatprep.subr.bf16.mxu0 %v8671_v0  ;;  %v7890_v22 = vld [vmem:[%s11613_s0 + $0x57c] ss:$100 sps:$4 sm:$0xff]  }
  0x28   :  { %4555 = vmatprep.subr.bf16.mxu1 %v8671_v0 }
  0x2a   :  { %4379 = vmatpush2.bf16.msra.mxu0 %v7824_v23  ;;  %v7892_v23 = vld [vmem:[%s11613_s0 + $0x584] ss:$100 sps:$4 sm:$0xff]  }
  0x2b   :  { %4556 = vmatpush2.bf16.msra.mxu1 %v7825_v24  ;;  %4380 = vmatprep.subr.bf16.mxu0 %v8671_v0  ;;  %v7944_v24 = vld [vmem:[%s11612_s1 + $0x158] sm:$0xff]  }
  0x2c   :  { %4557 = vmatprep.subr.bf16.mxu1 %v8671_v0 }
  0x2e   :  { %4381 = vmatpush2.bf16.msra.mxu0 %v7826_v25  ;;  %v7951_v25 = vld [vmem:[%s11612_s1 + $0x1d8] sm:$0xff]  }
  0x2f   :  { %4558 = vmatpush2.bf16.msra.mxu1 %v7827_v26  ;;  %4382 = vmatprep.subr.bf16.mxu0 %v8671_v0  ;;  %v7895_v26 = vld [vmem:[%s11613_s0 + $0x578] ss:$100 sps:$4 sm:$0xff]  }
  0x30   :  { %4559 = vmatprep.subr.bf16.mxu1 %v8671_v0 }
  0x32   :  { %4383 = vmatpush2.bf16.msra.mxu0 %v7828_v27  ;;  %v7952_v27 = vld [vmem:[%s11612_s1 + $0x150] sm:$0xff]  }
  0x33   :  { %4560 = vmatpush2.bf16.msra.mxu1 %v7829_v28  ;;  %4384 = vmatprep.subr.bf16.mxu0 %v8671_v0  ;;  %v7959_v28 = vld [vmem:[%s11612_s1 + $0x1d0] sm:$0xff]  }
  0x34   :  { %4561 = vmatprep.subr.bf16.mxu1 %v8671_v0 }
  0x36   :  { %4385 = vmatpush2.bf16.msra.mxu0 %v7830_v29  ;;  %v7896_v29 = vld [vmem:[%s11613_s0 + $0x580] ss:$100 sps:$4 sm:$0xff]  }
  0x37   :  { %4562 = vmatpush2.bf16.msra.mxu1 %v7831_v30  ;;  %4386 = vmatprep.subr.bf16.mxu0 %v8671_v0  ;;  %v7897_v30 = vld [vmem:[%s11613_s0 + $0x644] ss:$100 sps:$4 sm:$0xff]  }
  0x38   :  { %4563 = vmatprep.subr.bf16.mxu1 %v8671_v0 }
  0x3a   :  { %4387 = vmatpush2.bf16.msra.mxu0 %v7832_v31  ;;  %v7899_v31 = vld [vmem:[%s11613_s0 + $0x64c] ss:$100 sps:$4 sm:$0xff]  }
  0x3b   :  { %4564 = vmatpush2.bf16.msra.mxu1 %v7833_v32  ;;  %4388 = vmatprep.subr.bf16.mxu0 %v8671_v0  ;;  %v7964_v32 = vld [vmem:[%s11612_s1 + $0x148] sm:$0xff]  }
  0x3c   :  { %4565 = vmatprep.subr.bf16.mxu1 %v8671_v0 }
  0x3e   :  { %4389 = vmatpush2.bf16.msra.mxu0 %v7834_v33  ;;  %v7971_v33 = vld [vmem:[%s11612_s1 + $0x1c8] sm:$0xff]  }
  0x3f   :  { %4566 = vmatpush2.bf16.msra.mxu1 %v7835_v34  ;;  %4712 = vmatprep.subr.bf16.mxu0 %v8671_v0  ;;  %v7902_v34 = vld [vmem:[%s11613_s0 + $0x640] ss:$100 sps:$4 sm:$0xff]  }
  0x40   :  { %4889 = vmatprep.subr.bf16.mxu1 %v8671_v0 }
  0x41   :  { %4391 = vmatmul.mubr.bf16.vlgmr.msra.gmra.mxu0 %v7836_v35  ;;  %v7974_v35 = vld [vmem:[%s11612_s1 + $0x140] sm:$0xff]  }
  0x42   :  { %4568 = vmatmul.mubr.bf16.vlgmr.msra.gmra.mxu1 %v7839_v36  ;;  %4713 = vmatpush1.bf16.msra.mxu0 %v7842_v37  ;;  %v7975_v36 = vld [vmem:[%s11612_s1 + $0x1c0] sm:$0xff]   ;;  %v7903_v37 = vld [vmem:[%s11613_s0 + $0x648] ss:$100 sps:$4 sm:$0xff]  }
  0x43   :  { %4398 = vmatprep.mubr.bf16.mxu0 %v7843_v38  ;;  %4575 = vmatprep.mubr.bf16.mxu1 %v7845_v39  ;;  %v7905_v38 = vld [vmem:[%s11613_s0 + $0x70c] ss:$100 sps:$4 sm:$0xff]   ;;  %v7907_v39 = vld [vmem:[%s11613_s0 + $0x714] ss:$100 sps:$4 sm:$0xff]  }
  0x44   :  { %4714 = vmatprep.subr.bf16.mxu0 %v8671_v0  ;;  %4890 = vmatpush1.bf16.msra.mxu1 %v7849_v40  ;;  %v7909_v40 = vld [vmem:[%s11613_s0 + $0x708] ss:$100 sps:$4 sm:$0xff]  }
  0x45   :  { %4891 = vmatprep.subr.bf16.mxu1 %v8671_v0 }
  0x46   :  { %4715 = vmatpush1.bf16.msra.mxu0 %v7850_v41  ;;  %v7910_v41 = vld [vmem:[%s11613_s0 + $0x710] ss:$100 sps:$4 sm:$0xff]  }
  0x47   :  { %4716 = vmatprep.subr.bf16.mxu0 %v8671_v0 }
  0x48   :  { %4892 = vmatpush1.bf16.msra.mxu1 %v7857_v42  ;;  %v7913_v42 = vld [vmem:[%s11613_s0 + $0x7d4] ss:$100 sps:$4 sm:$0xff]  }
  0x49   :  { %4399 = vmatmul.mubr.bf16.gmra.mxu0 %v7847_v43  ;;  %4893 = vmatprep.subr.bf16.mxu1 %v8671_v0  ;;  %v7915_v43 = vld [vmem:[%s11613_s0 + $0x7dc] ss:$100 sps:$4 sm:$0xff]  }
  0x4a   :  { %4576 = vmatmul.mubr.bf16.gmra.mxu1 %v7848_v44  ;;  %4406 = vmatprep.mubr.bf16.mxu0 %v7851_v45  ;;  %v7917_v44 = vld [vmem:[%s11613_s0 + $0x7d0] ss:$100 sps:$4 sm:$0xff]   ;;  %v7918_v45 = vld [vmem:[%s11613_s0 + $0x7d8] ss:$100 sps:$4 sm:$0xff]  }
  0x4b   :  { %4583 = vmatprep.mubr.bf16.mxu1 %v7853_v46  ;;  %4717 = vmatpush1.bf16.msra.mxu0 %v7858_v47  ;;  %v7921_v46 = vld [vmem:[%s11613_s0 + $0x89c] ss:$100 sps:$4 sm:$0xff]   ;;  %v7923_v47 = vld [vmem:[%s11613_s0 + $0x8a4] ss:$100 sps:$4 sm:$0xff]  }
  0x4c   :  { %4718 = vmatprep.subr.bf16.mxu0 %v8671_v0  ;;  %4894 = vmatpush1.bf16.msra.mxu1 %v7865_v48  ;;  %v7925_v48 = vld [vmem:[%s11613_s0 + $0x898] ss:$100 sps:$4 sm:$0xff]  }
  0x4d   :  { %4895 = vmatprep.subr.bf16.mxu1 %v8671_v0 }
  0x4f   :  { %4719 = vmatpush1.bf16.msra.mxu0 %v7866_v50  ;;  %v7929_v50 = vld [vmem:[%s11613_s0 + $0x964] ss:$100 sps:$4 sm:$0xff]  }
  0x50   :  { %4720 = vmatprep.subr.bf16.mxu0 %v8671_v0  ;;  %4896 = vmatpush1.bf16.msra.mxu1 %v7873_v51  ;;  %v7931_v51 = vld [vmem:[%s11613_s0 + $0x96c] ss:$100 sps:$4 sm:$0xff]  }
  0x51   :  { %4407 = vmatmul.mubr.bf16.gmra.mxu0 %v7855_v49  ;;  %4897 = vmatprep.subr.bf16.mxu1 %v8671_v0  ;;  %v7926_v49 = vld [vmem:[%s11613_s0 + $0x8a0] ss:$100 sps:$4 sm:$0xff]  }
  0x52   :  { %4584 = vmatmul.mubr.bf16.gmra.mxu1 %v7856_v52  ;;  %4414 = vmatprep.mubr.bf16.mxu0 %v7859_v53  ;;  %v7933_v52 = vld [vmem:[%s11613_s0 + $0x960] ss:$100 sps:$4 sm:$0xff]   ;;  %v7934_v53 = vld [vmem:[%s11613_s0 + $0x968] ss:$100 sps:$4 sm:$0xff]  }
  0x53   :  { %4591 = vmatprep.mubr.bf16.mxu1 %v7861_v54  ;;  %4721 = vmatpush1.bf16.msra.mxu0 %v7874_v55  ;;  %v7937_v54 = vld [vmem:[%s11613_s0 + $0xa2c] ss:$100 sps:$4 sm:$0xff]   ;;  %v7939_v55 = vld [vmem:[%s11613_s0 + $0xa34] ss:$100 sps:$4 sm:$0xff]  }
  0x54   :  { %4722 = vmatprep.subr.bf16.mxu0 %v8671_v0  ;;  %4898 = vmatpush1.bf16.msra.mxu1 %v7881_v56  ;;  %v7941_v56 = vld [vmem:[%s11613_s0 + $0xa28] ss:$100 sps:$4 sm:$0xff]  }
  0x55   :  { %4899 = vmatprep.subr.bf16.mxu1 %v8671_v0 }
  0x57   :  { %4723 = vmatpush1.bf16.msra.mxu0 %v7882_v58  ;;  %v7945_v58 = vld [vmem:[%s11613_s0 + $0xaf4] ss:$100 sps:$4 sm:$0xff]  }
  0x58   :  { %4724 = vmatprep.subr.bf16.mxu0 %v8671_v0  ;;  %4900 = vmatpush1.bf16.msra.mxu1 %v7889_v59  ;;  %v7947_v59 = vld [vmem:[%s11613_s0 + $0xafc] ss:$100 sps:$4 sm:$0xff]  }
  0x59   :  { %4415 = vmatmul.mubr.bf16.gmra.mxu0 %v7863_v57  ;;  %4901 = vmatprep.subr.bf16.mxu1 %v8671_v0  ;;  %v7942_v57 = vld [vmem:[%s11613_s0 + $0xa30] ss:$100 sps:$4 sm:$0xff]  }
  0x5a   :  { %4592 = vmatmul.mubr.bf16.gmra.mxu1 %v7864_v60  ;;  %4422 = vmatprep.mubr.bf16.mxu0 %v7867_v61  ;;  %v7949_v60 = vld [vmem:[%s11613_s0 + $0xaf0] ss:$100 sps:$4 sm:$0xff]   ;;  %v7950_v61 = vld [vmem:[%s11613_s0 + $0xaf8] ss:$100 sps:$4 sm:$0xff]  }
  0x5b   :  { %4599 = vmatprep.mubr.bf16.mxu1 %v7869_v62  ;;  %4725 = vmatpush1.bf16.msra.mxu0 %v7894_v63  ;;  %v7953_v62 = vld [vmem:[%s11613_s0 + $0xbbc] ss:$100 sps:$4 sm:$0xff]   ;;  %v7955_v63 = vld [vmem:[%s11613_s0 + $0xbc4] ss:$100 sps:$4 sm:$0xff]  }
  0x5c   :  { %4726 = vmatprep.subr.bf16.mxu0 %v8671_v0  ;;  %4902 = vmatpush1.bf16.msra.mxu1 %v7901_v1  ;;  %v7957_v1 = vld [vmem:[%s11613_s0 + $0xbb8] ss:$100 sps:$4 sm:$0xff]  }
  0x5d   :  { %4903 = vmatprep.subr.bf16.mxu1 %v8671_v0 }
  0x5f   :  { %4727 = vmatpush1.bf16.msra.mxu0 %v7904_v3  ;;  %v7960_v3 = vld [vmem:[%s11613_s0 + $0xc84] ss:$100 sps:$4 sm:$0xff]  }
  0x60   :  { %4728 = vmatprep.subr.bf16.mxu0 %v8671_v0  ;;  %4904 = vmatpush1.bf16.msra.mxu1 %v7911_v5  ;;  %v7965_v5 = vld [vmem:[%s11613_s0 + $0xc80] ss:$100 sps:$4 sm:$0xff]  }
  0x61   :  { %4423 = vmatmul.mubr.bf16.gmra.mxu0 %v7871_v2  ;;  %4905 = vmatprep.subr.bf16.mxu1 %v8671_v0  ;;  %v7958_v2 = vld [vmem:[%s11613_s0 + $0xbc0] ss:$100 sps:$4 sm:$0xff]  }
  0x62   :  { %4600 = vmatmul.mubr.bf16.gmra.mxu1 %v7872_v4  ;;  %4430 = vmatprep.mubr.bf16.mxu0 %v7875_v6  ;;  %v7962_v4 = vld [vmem:[%s11613_s0 + $0xc8c] ss:$100 sps:$4 sm:$0xff]  }
  0x63   :  { %4607 = vmatprep.mubr.bf16.mxu1 %v7877_v7  ;;  %4729 = vmatpush2.bf16.msra.mxu0 %v7912_v8  ;;  %v7966_v6 = vld [vmem:[%s11613_s0 + $0xc88] ss:$100 sps:$4 sm:$0xff]   ;;  %v7969_v8 = vld [vmem:[%s11613_s0 + $0xd54] ss:$100 sps:$4 sm:$0xff]  }
  0x64   :  { %4730 = vmatprep.subr.bf16.mxu0 %v8671_v0  ;;  %4906 = vmatpush2.bf16.msra.mxu1 %v7919_v9  ;;  %v7967_v7 = vld [vmem:[%s11613_s0 + $0xd4c] ss:$100 sps:$4 sm:$0xff]  }
  0x65   :  { %4907 = vmatprep.subr.bf16.mxu1 %v8671_v0  ;;  %v7972_v9 = vld [vmem:[%s11613_s0 + $0xd48] ss:$100 sps:$4 sm:$0xff]  }
  0x67   :  { %4731 = vmatpush2.bf16.msra.mxu0 %v7920_v11  ;;  %v7978_v11 = vld [vmem:[%s11613_s0 + $0x14] ss:$100 sps:$4 sm:$0xff]  }
  0x68   :  { %4732 = vmatprep.subr.bf16.mxu0 %v8671_v0  ;;  %4908 = vmatpush2.bf16.msra.mxu1 %v7927_v12  ;;  %v7981_v12 = vld [vmem:[%s11613_s0 + $0x1c] ss:$100 sps:$4 sm:$0xff]  }
  0x69   :  { %4431 = vmatmul.mubr.bf16.gmra.mxu0 %v7879_v10  ;;  %4909 = vmatprep.subr.bf16.mxu1 %v8671_v0  ;;  %v7973_v10 = vld [vmem:[%s11613_s0 + $0xd50] ss:$100 sps:$4 sm:$0xff]  }
  0x6a   :  { %4608 = vmatmul.mubr.bf16.gmra.mxu1 %v7880_v13  ;;  %4438 = vmatprep.mubr.bf16.mxu0 %v7883_v14  ;;  %v7976_v13 = vld [vmem:[%s11613_s0 + $0x10] ss:$100 sps:$4 sm:$0xff]   ;;  %v7979_v14 = vld [vmem:[%s11613_s0 + $0x18] ss:$100 sps:$4 sm:$0xff]  }
  0x6b   :  { %4615 = vmatprep.mubr.bf16.mxu1 %v7885_v15  ;;  %4733 = vmatpush2.bf16.msra.mxu0 %v7928_v16  ;;  %v7982_v15 = vld [vmem:[%s11612_s1 + $0x238] sm:$0xff]  }
  0x6c   :  { %4734 = vmatprep.subr.bf16.mxu0 %v8671_v0  ;;  %4910 = vmatpush2.bf16.msra.mxu1 %v7935_v17  ;;  %v7983_v16 = vld [vmem:[%s11613_s0 + $0xdc] ss:$100 sps:$4 sm:$0xff]   ;;  %v7985_v17 = vld [vmem:[%s11613_s0 + $0xe4] ss:$100 sps:$4 sm:$0xff]  }
  0x6d   :  { %4911 = vmatprep.subr.bf16.mxu1 %v8671_v0 }
  0x6f   :  { %4735 = vmatpush2.bf16.msra.mxu0 %v7936_v18  ;;  %v7989_v18 = vld [vmem:[%s11612_s1 + $0x2b8] sm:$0xff]  }
  0x70   :  { %4736 = vmatprep.subr.bf16.mxu0 %v8671_v0  ;;  %4912 = vmatpush2.bf16.msra.mxu1 %v7943_v19  ;;  %v7990_v19 = vld [vmem:[%s11612_s1 + $0x230] sm:$0xff]  }
  0x71   :  { %4439 = vmatmul.mubr.bf16.gmra.mxu0 %v7887_v20  ;;  %4913 = vmatprep.subr.bf16.mxu1 %v8671_v0  ;;  %v7997_v20 = vld [vmem:[%s11612_s1 + $0x2b0] sm:$0xff]  }
  0x72   :  { %4616 = vmatmul.mubr.bf16.gmra.mxu1 %v7888_v21  ;;  %4446 = vmatprep.mubr.bf16.mxu0 %v7890_v22  ;;  %v7987_v21 = vld [vmem:[%s11613_s0 + $0xd8] ss:$100 sps:$4 sm:$0xff]   ;;  %v7988_v22 = vld [vmem:[%s11613_s0 + $0xe0] ss:$100 sps:$4 sm:$0xff]  }
  0x73   :  { %4623 = vmatprep.mubr.bf16.mxu1 %v7892_v23  ;;  %4737 = vmatpush2.bf16.msra.mxu0 %v7944_v24  ;;  %v7991_v23 = vld [vmem:[%s11613_s0 + $0x1a4] ss:$100 sps:$4 sm:$0xff]   ;;  %v7993_v24 = vld [vmem:[%s11613_s0 + $0x1ac] ss:$100 sps:$4 sm:$0xff]  }
  0x74   :  { %4738 = vmatprep.subr.bf16.mxu0 %v8671_v0  ;;  %4914 = vmatpush2.bf16.msra.mxu1 %v7951_v25  ;;  %v7998_v25 = vld [vmem:[%s11612_s1 + $0x228] sm:$0xff]  }
  0x75   :  { %4915 = vmatprep.subr.bf16.mxu1 %v8671_v0 }
  0x77   :  { %4739 = vmatpush2.bf16.msra.mxu0 %v7952_v27  ;;  %v8006_v27 = vld [vmem:[%s11612_s1 + $0x220] sm:$0xff]  }
  0x78   :  { %4740 = vmatprep.subr.bf16.mxu0 %v8671_v0  ;;  %4916 = vmatpush2.bf16.msra.mxu1 %v7959_v28  ;;  %v7995_v28 = vld [vmem:[%s11613_s0 + $0x1a0] ss:$100 sps:$4 sm:$0xff]  }
  0x79   :  { %4447 = vmatmul.mubr.bf16.gmra.mxu0 %v7895_v26  ;;  %4917 = vmatprep.subr.bf16.mxu1 %v8671_v0  ;;  %v8005_v26 = vld [vmem:[%s11612_s1 + $0x2a8] sm:$0xff]  }
  0x7a   :  { %4624 = vmatmul.mubr.bf16.gmra.mxu1 %v7896_v29  ;;  %4454 = vmatprep.mubr.bf16.mxu0 %v7897_v30  ;;  %v7996_v29 = vld [vmem:[%s11613_s0 + $0x1a8] ss:$100 sps:$4 sm:$0xff]   ;;  %v8013_v30 = vld [vmem:[%s11612_s1 + $0x2a0] sm:$0xff]  }
  0x7b   :  { %4631 = vmatprep.mubr.bf16.mxu1 %v7899_v31  ;;  %4741 = vmatpush2.bf16.msra.mxu0 %v7964_v32  ;;  %v7999_v31 = vld [vmem:[%s11613_s0 + $0x26c] ss:$100 sps:$4 sm:$0xff]   ;;  %v8001_v32 = vld [vmem:[%s11613_s0 + $0x274] ss:$100 sps:$4 sm:$0xff]  }
  0x7c   :  { %4742 = vmatprep.subr.bf16.mxu0 %v8671_v0  ;;  %4918 = vmatpush2.bf16.msra.mxu1 %v7971_v33  ;;  %v8014_v33 = vld [vmem:[%s11612_s1 + $0x218] sm:$0xff]  }
  0x7d   :  { %4919 = vmatprep.subr.bf16.mxu1 %v8671_v0 }
  0x7f   :  { %4743 = vmatpush2.bf16.msra.mxu0 %v7974_v35  ;;  %v8022_v35 = vld [vmem:[%s11612_s1 + $0x210] sm:$0xff]  }
  0x80   :  { %4920 = vmatpush2.bf16.msra.mxu1 %v7975_v36  ;;  %5066 = vmatprep.subr.bf16.mxu0 %v8671_v0  ;;  %v8003_v36 = vld [vmem:[%s11613_s0 + $0x268] ss:$100 sps:$4 sm:$0xff]  }
  0x81   :  { %4455 = vmatmul.mubr.bf16.gmra.mxu0 %v7902_v34  ;;  %5243 = vmatprep.subr.bf16.mxu1 %v8671_v0  ;;  %v8021_v34 = vld [vmem:[%s11612_s1 + $0x298] sm:$0xff]  }
  0x82   :  { %4632 = vmatmul.mubr.bf16.gmra.mxu1 %v7903_v37  ;;  %4462 = vmatprep.mubr.bf16.mxu0 %v7905_v38  ;;  %v8004_v37 = vld [vmem:[%s11613_s0 + $0x270] ss:$100 sps:$4 sm:$0xff]  }
  0x83   :  { %4639 = vmatprep.mubr.bf16.mxu1 %v7907_v39  ;;  %v8007_v38 = vld [vmem:[%s11613_s0 + $0x334] ss:$100 sps:$4 sm:$0xff]  }
  0x84   :  { %v8029_v39 = vld [vmem:[%s11612_s1 + $0x290] sm:$0xff]  }
  0x89   :  { %4463 = vmatmul.mubr.bf16.gmra.mxu0 %v7909_v40  ;;  %v8009_v40 = vld [vmem:[%s11613_s0 + $0x33c] ss:$100 sps:$4 sm:$0xff]  }
  0x8a   :  { %4640 = vmatmul.mubr.bf16.gmra.mxu1 %v7910_v41  ;;  %4470 = vmatprep.mubr.bf16.mxu0 %v7913_v42  ;;  %v8034_v41 = vld [vmem:[%s11612_s1 + $0x208] sm:$0xff]  }
  0x8b   :  { %4647 = vmatprep.mubr.bf16.mxu1 %v7915_v43  ;;  %v8041_v42 = vld [vmem:[%s11612_s1 + $0x288] sm:$0xff]   ;;  %v8044_v43 = vld [vmem:[%s11612_s1 + $0x200] sm:$0xff]  }
  0x91   :  { %4471 = vmatmul.mubr.bf16.gmra.mxu0 %v7917_v44  ;;  %v8011_v44 = vld [vmem:[%s11613_s0 + $0x330] ss:$100 sps:$4 sm:$0xff]  }
  0x92   :  { %4648 = vmatmul.mubr.bf16.gmra.mxu1 %v7918_v45  ;;  %4478 = vmatprep.mubr.bf16.mxu0 %v7921_v46  ;;  %v8012_v45 = vld [vmem:[%s11613_s0 + $0x338] ss:$100 sps:$4 sm:$0xff]  }
  0x93   :  { %4655 = vmatprep.mubr.bf16.mxu1 %v7923_v47  ;;  %v8015_v46 = vld [vmem:[%s11613_s0 + $0x3fc] ss:$100 sps:$4 sm:$0xff]  }
  0x94   :  { %v8051_v47 = vld [vmem:[%s11612_s1 + $0x280] sm:$0xff]  }
  0x99   :  { %4479 = vmatmul.mubr.bf16.gmra.mxu0 %v7925_v48  ;;  %v8017_v48 = vld [vmem:[%s11613_s0 + $0x404] ss:$100 sps:$4 sm:$0xff]  }
  0x9a   :  { %4656 = vmatmul.mubr.bf16.gmra.mxu1 %v7926_v49  ;;  %4486 = vmatprep.mubr.bf16.mxu0 %v7929_v50  ;;  %v8052_v49 = vld [vmem:[%s11612_s1 + $0x278] sm:$0xff]  }
  0x9b   :  { %4663 = vmatprep.mubr.bf16.mxu1 %v7931_v51  ;;  %v8059_v50 = vld [vmem:[%s11612_s1 + $0x2f8] sm:$0xff]   ;;  %v8060_v51 = vld [vmem:[%s11612_s1 + $0x270] sm:$0xff]  }
  0xa1   :  { %4487 = vmatmul.mubr.bf16.gmra.mxu0 %v7933_v52  ;;  %v8019_v52 = vld [vmem:[%s11613_s0 + $0x3f8] ss:$100 sps:$4 sm:$0xff]  }
  0xa2   :  { %4664 = vmatmul.mubr.bf16.gmra.mxu1 %v7934_v53  ;;  %4494 = vmatprep.mubr.bf16.mxu0 %v7937_v54  ;;  %v8020_v53 = vld [vmem:[%s11613_s0 + $0x400] ss:$100 sps:$4 sm:$0xff]  }
  0xa3   :  { %4671 = vmatprep.mubr.bf16.mxu1 %v7939_v55  ;;  %v8023_v54 = vld [vmem:[%s11613_s0 + $0x4c4] ss:$100 sps:$4 sm:$0xff]   ;;  %v8067_v55 = vld [vmem:[%s11612_s1 + $0x2f0] sm:$0xff]  }
  0xa9   :  { %4495 = vmatmul.mubr.bf16.gmra.mxu0 %v7941_v56  ;;  %v8025_v56 = vld [vmem:[%s11613_s0 + $0x4cc] ss:$100 sps:$4 sm:$0xff]  }
  0xaa   :  { %4672 = vmatmul.mubr.bf16.gmra.mxu1 %v7942_v57  ;;  %4502 = vmatprep.mubr.bf16.mxu0 %v7945_v58  ;;  %v8068_v57 = vld [vmem:[%s11612_s1 + $0x268] sm:$0xff]  }
  0xab   :  { %4679 = vmatprep.mubr.bf16.mxu1 %v7947_v59  ;;  %v8075_v58 = vld [vmem:[%s11612_s1 + $0x2e8] sm:$0xff]   ;;  %v8076_v59 = vld [vmem:[%s11612_s1 + $0x260] sm:$0xff]  }
  0xb1   :  { %4503 = vmatmul.mubr.bf16.gmra.mxu0 %v7949_v60  ;;  %v8027_v60 = vld [vmem:[%s11613_s0 + $0x4c0] ss:$100 sps:$4 sm:$0xff]  }
  0xb2   :  { %4680 = vmatmul.mubr.bf16.gmra.mxu1 %v7950_v61  ;;  %4510 = vmatprep.mubr.bf16.mxu0 %v7953_v62  ;;  %v8028_v61 = vld [vmem:[%s11613_s0 + $0x4c8] ss:$100 sps:$4 sm:$0xff]  }
  0xb3   :  { %4687 = vmatprep.mubr.bf16.mxu1 %v7955_v63  ;;  %v8030_v62 = vld [vmem:[%s11613_s0 + $0x58c] ss:$100 sps:$4 sm:$0xff]   ;;  %v8083_v63 = vld [vmem:[%s11612_s1 + $0x2e0] sm:$0xff]  }
  0xb9   :  { %4511 = vmatmul.mubr.bf16.gmra.mxu0 %v7957_v1  ;;  %v9349_v1 = vld [vmem:[%s11614_s2] ss:$0 sm:$0xff] }
  0xba   :  { %4688 = vmatmul.mubr.bf16.gmra.mxu1 %v7958_v2  ;;  %4518 = vmatprep.mubr.bf16.mxu0 %v7960_v3  ;;  %v8032_v2 = vld [vmem:[%s11613_s0 + $0x594] ss:$100 sps:$4 sm:$0xff]  }
  0xbb   :  { %4695 = vmatprep.mubr.bf16.mxu1 %v7962_v4  ;;  %v8084_v3 = vld [vmem:[%s11612_s1 + $0x258] sm:$0xff]  }
  0xbc   :  { %v8091_v4 = vld [vmem:[%s11612_s1 + $0x2d8] sm:$0xff]  }
  0xc1   :  { %4519 = vmatmul.mubr.bf16.gmra.mxu0 %v7965_v5 }
  0xc2   :  { %4696 = vmatmul.mubr.bf16.gmra.mxu1 %v7966_v6  ;;  %4526 = vmatprep.mubr.bf16.mxu0 %v7967_v7  ;;  %v8092_v6 = vld [vmem:[%s11612_s1 + $0x250] sm:$0xff]  }
  0xc3   :  { %4703 = vmatprep.mubr.bf16.mxu1 %v7969_v8 }
  0xc9   :  { %4527 = vmatmul.mubr.bf16.gmra.mxu0 %v7972_v9  ;;  %v8099_v9 = vld [vmem:[%s11612_s1 + $0x2d0] sm:$0xff]  }
  0xca   :  { %4704 = vmatmul.mubr.bf16.gmra.mxu1 %v7973_v10  ;;  %4744 = vmatprep.mubr.bf16.mxu0 %v7978_v11  ;;  %v8035_v11 = vld [vmem:[%s11613_s0 + $0x588] ss:$100 sps:$4 sm:$0xff]  }
  0xcb   :  { %4921 = vmatprep.mubr.bf16.mxu1 %v7981_v12 }
  0xd1   :  { %4745 = vmatmul.mubr.bf16.vlgmr.msra.gmra.mxu0 %v7976_v13 }
  0xd2   :  { %4922 = vmatmul.mubr.bf16.vlgmr.msra.gmra.mxu1 %v7979_v14  ;;  %5067 = vmatpush1.bf16.msra.mxu0 %v7982_v15  ;;  %v8036_v14 = vld [vmem:[%s11613_s0 + $0x590] ss:$100 sps:$4 sm:$0xff]  }
  0xd3   :  { %4752 = vmatprep.mubr.bf16.mxu0 %v7983_v16  ;;  %4929 = vmatprep.mubr.bf16.mxu1 %v7985_v17  ;;  %v8037_v15 = vld [vmem:[%s11613_s0 + $0x654] ss:$100 sps:$4 sm:$0xff]  }
  0xd4   :  { %5068 = vmatprep.subr.bf16.mxu0 %v8671_v0  ;;  %5244 = vmatpush1.bf16.msra.mxu1 %v7989_v18 }
  0xd5   :  { %5245 = vmatprep.subr.bf16.mxu1 %v8671_v0 }
  0xd6   :  { %5069 = vmatpush1.bf16.msra.mxu0 %v7990_v19 }
  0xd7   :  { %5070 = vmatprep.subr.bf16.mxu0 %v8671_v0 }
  0xd8   :  { %5246 = vmatpush1.bf16.msra.mxu1 %v7997_v20  ;;  %v8039_v20 = vld [vmem:[%s11613_s0 + $0x65c] ss:$100 sps:$4 sm:$0xff]  }
  0xd9   :  { %4753 = vmatmul.mubr.bf16.gmra.mxu0 %v7987_v21  ;;  %5247 = vmatprep.subr.bf16.mxu1 %v8671_v0  ;;  %v8106_v21 = vld [vmem:[%s11612_s1 + $0x248] sm:$0xff]  }
  0xda   :  { %4930 = vmatmul.mubr.bf16.gmra.mxu1 %v7988_v22  ;;  %4760 = vmatprep.mubr.bf16.mxu0 %v7991_v23 }
  0xdb   :  { %4937 = vmatprep.mubr.bf16.mxu1 %v7993_v24  ;;  %5071 = vmatpush1.bf16.msra.mxu0 %v7998_v25  ;;  %v8113_v24 = vld [vmem:[%s11612_s1 + $0x2c8] sm:$0xff]  }
  0xdc   :  { %5072 = vmatprep.subr.bf16.mxu0 %v8671_v0  ;;  %5248 = vmatpush1.bf16.msra.mxu1 %v8005_v26  ;;  %v8114_v26 = vld [vmem:[%s11612_s1 + $0x240] sm:$0xff]  }
  0xdd   :  { %5249 = vmatprep.subr.bf16.mxu1 %v8671_v0 }
  0xdf   :  { %5073 = vmatpush1.bf16.msra.mxu0 %v8006_v27 }
  0xe0   :  { %5074 = vmatprep.subr.bf16.mxu0 %v8671_v0  ;;  %5250 = vmatpush1.bf16.msra.mxu1 %v8013_v30 }
  0xe1   :  { %4761 = vmatmul.mubr.bf16.gmra.mxu0 %v7995_v28  ;;  %5251 = vmatprep.subr.bf16.mxu1 %v8671_v0 }
  0xe2   :  { %4938 = vmatmul.mubr.bf16.gmra.mxu1 %v7996_v29  ;;  %4768 = vmatprep.mubr.bf16.mxu0 %v7999_v31  ;;  %v8115_v29 = vld [vmem:[%s11612_s1 + $0x2c0] sm:$0xff]   ;;  %v8042_v31 = vld [vmem:[%s11613_s0 + $0x650] ss:$100 sps:$4 sm:$0xff]  }
  0xe3   :  { %4945 = vmatprep.mubr.bf16.mxu1 %v8001_v32  ;;  %5075 = vmatpush1.bf16.msra.mxu0 %v8014_v33 }
  0xe4   :  { %5076 = vmatprep.subr.bf16.mxu0 %v8671_v0  ;;  %5252 = vmatpush1.bf16.msra.mxu1 %v8021_v34  ;;  %v8043_v34 = vld [vmem:[%s11613_s0 + $0x658] ss:$100 sps:$4 sm:$0xff]  }
  0xe5   :  { %5253 = vmatprep.subr.bf16.mxu1 %v8671_v0 }
  0xe7   :  { %5077 = vmatpush1.bf16.msra.mxu0 %v8022_v35  ;;  %v8045_v35 = vld [vmem:[%s11613_s0 + $0x71c] ss:$100 sps:$4 sm:$0xff]  }
  0xe8   :  { %5078 = vmatprep.subr.bf16.mxu0 %v8671_v0  ;;  %5254 = vmatpush1.bf16.msra.mxu1 %v8029_v39 }
  0xe9   :  { %4769 = vmatmul.mubr.bf16.gmra.mxu0 %v8003_v36  ;;  %5255 = vmatprep.subr.bf16.mxu1 %v8671_v0 }
  0xea   :  { %4946 = vmatmul.mubr.bf16.gmra.mxu1 %v8004_v37  ;;  %4776 = vmatprep.mubr.bf16.mxu0 %v8007_v38 }
  0xeb   :  { %4953 = vmatprep.mubr.bf16.mxu1 %v8009_v40  ;;  %5079 = vmatpush1.bf16.msra.mxu0 %v8034_v41  ;;  %v8047_v40 = vld [vmem:[%s11613_s0 + $0x724] ss:$100 sps:$4 sm:$0xff]  }
  0xec   :  { %5080 = vmatprep.subr.bf16.mxu0 %v8671_v0  ;;  %5256 = vmatpush1.bf16.msra.mxu1 %v8041_v42 }
  0xed   :  { %5257 = vmatprep.subr.bf16.mxu1 %v8671_v0 }
  0xef   :  { %5081 = vmatpush1.bf16.msra.mxu0 %v8044_v43 }
  0xf0   :  { %5082 = vmatprep.subr.bf16.mxu0 %v8671_v0  ;;  %5258 = vmatpush1.bf16.msra.mxu1 %v8051_v47  ;;  %v8049_v47 = vld [vmem:[%s11613_s0 + $0x718] ss:$100 sps:$4 sm:$0xff]  }
  0xf1   :  { %4777 = vmatmul.mubr.bf16.gmra.mxu0 %v8011_v44  ;;  %5259 = vmatprep.subr.bf16.mxu1 %v8671_v0 }
  0xf2   :  { %4954 = vmatmul.mubr.bf16.gmra.mxu1 %v8012_v45  ;;  %4784 = vmatprep.mubr.bf16.mxu0 %v8015_v46 }
  0xf3   :  { %4961 = vmatprep.mubr.bf16.mxu1 %v8017_v48  ;;  %5083 = vmatpush2.bf16.msra.mxu0 %v8052_v49 }
  0xf4   :  { %5084 = vmatprep.subr.bf16.mxu0 %v8671_v0  ;;  %5260 = vmatpush2.bf16.msra.mxu1 %v8059_v50  ;;  %v8050_v50 = vld [vmem:[%s11613_s0 + $0x720] ss:$100 sps:$4 sm:$0xff]  }
  0xf5   :  { %5261 = vmatprep.subr.bf16.mxu1 %v8671_v0 }
  0xf7   :  { %5085 = vmatpush2.bf16.msra.mxu0 %v8060_v51  ;;  %v8055_v51 = vld [vmem:[%s11613_s0 + $0x7e4] ss:$100 sps:$4 sm:$0xff]  }
  0xf8   :  { %5086 = vmatprep.subr.bf16.mxu0 %v8671_v0  ;;  %5262 = vmatpush2.bf16.msra.mxu1 %v8067_v55 }
  0xf9   :  { %4785 = vmatmul.mubr.bf16.gmra.mxu0 %v8019_v52  ;;  %5263 = vmatprep.subr.bf16.mxu1 %v8671_v0 }
  0xfa   :  { %4962 = vmatmul.mubr.bf16.gmra.mxu1 %v8020_v53  ;;  %4792 = vmatprep.mubr.bf16.mxu0 %v8023_v54 }
  0xfb   :  { %4969 = vmatprep.mubr.bf16.mxu1 %v8025_v56  ;;  %5087 = vmatpush2.bf16.msra.mxu0 %v8068_v57  ;;  %v8058_v56 = vld [vmem:[%s11613_s0 + $0x7ec] ss:$100 sps:$4 sm:$0xff]  }
  0xfc   :  { %5088 = vmatprep.subr.bf16.mxu0 %v8671_v0  ;;  %5264 = vmatpush2.bf16.msra.mxu1 %v8075_v58 }
  0xfd   :  { %5265 = vmatprep.subr.bf16.mxu1 %v8671_v0 }
  0xff   :  { %5089 = vmatpush2.bf16.msra.mxu0 %v8076_v59 }
 0x100   :  { %5090 = vmatprep.subr.bf16.mxu0 %v8671_v0  ;;  %5266 = vmatpush2.bf16.msra.mxu1 %v8083_v63  ;;  %v8053_v63 = vld [vmem:[%s11613_s0 + $0x7e0] ss:$100 sps:$4 sm:$0xff]  }
 0x101   :  { %v4392_v5 = vpop.f32.mrf.mxu0  ;;  %4793 = vmatmul.mubr.bf16.gmra.mxu0 %v8027_v60  ;;  %5267 = vmatprep.subr.bf16.mxu1 %v8671_v0 }
 0x102   :  { %v4393_v7 = vadd.f32 %v9349_v1, %v4392_v5  ;;  %v4569_v8 = vpop.f32.mrf.mxu1  ;;  %4970 = vmatmul.mubr.bf16.gmra.mxu1 %v8028_v61  ;;  %4800 = vmatprep.mubr.bf16.mxu0 %v8030_v62  ;;  %v8063_v5 = vld [vmem:[%s11613_s0 + $0x8ac] ss:$100 sps:$4 sm:$0xff]  }
 0x103   :  { %v4394_v10 = vpop.f32.mrf.mxu0  ;;  %4977 = vmatprep.mubr.bf16.mxu1 %v8032_v2  ;;  %5091 = vmatpush2.bf16.msra.mxu0 %v8084_v3 }
 0x104   :  { %v9373_v12 = vadd.f32 %v4569_v8, %v4393_v7  ;;  %v4571_v13 = vpop.f32.mrf.mxu1  ;;  %5092 = vmatprep.subr.bf16.mxu0 %v8671_v0  ;;  %5268 = vmatpush2.bf16.msra.mxu1 %v8091_v4  ;;  %v8056_v4 = vld [vmem:[%s11613_s0 + $0x7e8] ss:$100 sps:$4 sm:$0xff]   ;;  %v8066_v10 = vld [vmem:[%s11613_s0 + $0x8b4] ss:$100 sps:$4 sm:$0xff]  }
 0x105   :  { %v4395_v16 = vpop.f32.mrf.mxu0  ;;  %5269 = vmatprep.subr.bf16.mxu1 %v8671_v0 }
 0x106   :  { %v4396_v17 = vadd.f32 %v9349_v1, %v4395_v16  ;;  %v4572_v18 = vpop.f32.mrf.mxu1 }
 0x107   :  { %v4397_v19 = vpop.f32.mrf.mxu0  ;;  %5093 = vmatpush2.bf16.msra.mxu0 %v8092_v6 }
 0x108   :  { %v9390_v22 = vadd.f32 %v4572_v18, %v4396_v17  ;;  %v4574_v23 = vpop.f32.mrf.mxu1  ;;  %5094 = vmatprep.subr.bf16.mxu0 %v8671_v0  ;;  %5270 = vmatpush2.bf16.msra.mxu1 %v8099_v9  ;;  %v8061_v18 = vld [vmem:[%s11613_s0 + $0x8a8] ss:$100 sps:$4 sm:$0xff]  }
 0x109   :  { %v4400_v25 = vpop.f32.mrf.mxu0  ;;  %4801 = vmatmul.mubr.bf16.gmra.mxu0 %v8035_v11  ;;  %5271 = vmatprep.subr.bf16.mxu1 %v8671_v0  ;;  %v8071_v23 = vld [vmem:[%s11613_s0 + $0x974] ss:$100 sps:$4 sm:$0xff]  }
 0x10a   :  { %v4401_v27 = vadd.f32 %v9349_v1, %v4400_v25  ;;  %v4577_v28 = vpop.f32.mrf.mxu1  ;;  %4978 = vmatmul.mubr.bf16.gmra.mxu1 %v8036_v14  ;;  %4808 = vmatprep.mubr.bf16.mxu0 %v8037_v15 }
 0x10b   :  { %v4402_v30 = vpop.f32.mrf.mxu0  ;;  %4985 = vmatprep.mubr.bf16.mxu1 %v8039_v20  ;;  %5095 = vmatpush2.bf16.msra.mxu0 %v8106_v21  ;;  %v8064_v21 = vld [vmem:[%s11613_s0 + $0x8b0] ss:$100 sps:$4 sm:$0xff]  }
 0x10c   :  { %v9407_v32 = vadd.f32 %v4577_v28, %v4401_v27  ;;  %v4579_v33 = vpop.f32.mrf.mxu1  ;;  %5096 = vmatprep.subr.bf16.mxu0 %v8671_v0  ;;  %5272 = vmatpush2.bf16.msra.mxu1 %v8113_v24  ;;  %v8074_v28 = vld [vmem:[%s11613_s0 + $0x97c] ss:$100 sps:$4 sm:$0xff]  }
 0x10d   :  { %v4403_v36 = vpop.f32.mrf.mxu0  ;;  %5273 = vmatprep.subr.bf16.mxu1 %v8671_v0 }
 0x10e   :  { %v4404_v37 = vadd.f32 %v9349_v1, %v4403_v36  ;;  %v4580_v38 = vpop.f32.mrf.mxu1  ;;  %v8069_v36 = vld [vmem:[%s11613_s0 + $0x970] ss:$100 sps:$4 sm:$0xff]  }
 0x10f   :  { %v4405_v39 = vpop.f32.mrf.mxu0  ;;  %5097 = vmatpush2.bf16.msra.mxu0 %v8114_v26 }
 0x110   :  { %v9421_v41 = vadd.f32 %v4580_v38, %v4404_v37  ;;  %v4582_v42 = vpop.f32.mrf.mxu1  ;;  %5274 = vmatpush2.bf16.msra.mxu1 %v8115_v29  ;;  %5420 = vmatprep.subr.bf16.mxu0 %v8671_v0  ;;  %v8072_v39 = vld [vmem:[%s11613_s0 + $0x978] ss:$100 sps:$4 sm:$0xff]  }
 0x111   :  { %v4408_v43 = vpop.f32.mrf.mxu0  ;;  %4809 = vmatmul.mubr.bf16.gmra.mxu0 %v8042_v31  ;;  %5597 = vmatprep.subr.bf16.mxu1 %v8671_v0 }
 0x112   :  { %v4409_v44 = vadd.f32 %v9349_v1, %v4408_v43  ;;  %v4585_v45 = vpop.f32.mrf.mxu1  ;;  %4986 = vmatmul.mubr.bf16.gmra.mxu1 %v8043_v34  ;;  %4816 = vmatprep.mubr.bf16.mxu0 %v8045_v35 }
 0x113   :  { %v4410_v46 = vpop.f32.mrf.mxu0  ;;  %4993 = vmatprep.mubr.bf16.mxu1 %v8047_v40  ;;  %v8079_v40 = vld [vmem:[%s11613_s0 + $0xa3c] ss:$100 sps:$4 sm:$0xff]  }
 0x114   :  { %v9429_v48 = vadd.f32 %v4585_v45, %v4409_v44  ;;  %v4587_v49 = vpop.f32.mrf.mxu1  ;;  %v8082_v46 = vld [vmem:[%s11613_s0 + $0xa44] ss:$100 sps:$4 sm:$0xff]  }
 0x115   :  { %v4411_v52 = vpop.f32.mrf.mxu0 }
 0x116   :  { %v4412_v53 = vadd.f32 %v9349_v1, %v4411_v52  ;;  %v4588_v54 = vpop.f32.mrf.mxu1 }
 0x117   :  { %v4413_v55 = vpop.f32.mrf.mxu0 }
 0x118   :  { %v9441_v57 = vadd.f32 %v4588_v54, %v4412_v53  ;;  %v4590_v58 = vpop.f32.mrf.mxu1  ;;  %v8077_v54 = vld [vmem:[%s11613_s0 + $0xa38] ss:$100 sps:$4 sm:$0xff]  }
 0x119   :  { %v4416_v59 = vpop.f32.mrf.mxu0  ;;  %4817 = vmatmul.mubr.bf16.gmra.mxu0 %v8049_v47  ;;  %v8080_v58 = vld [vmem:[%s11613_s0 + $0xa40] ss:$100 sps:$4 sm:$0xff]  }
 0x11a   :  { %v4417_v60 = vadd.f32 %v9349_v1, %v4416_v59  ;;  %v4593_v61 = vpop.f32.mrf.mxu1  ;;  %4994 = vmatmul.mubr.bf16.gmra.mxu1 %v8050_v50  ;;  %4824 = vmatprep.mubr.bf16.mxu0 %v8055_v51  ;;  %v8087_v59 = vld [vmem:[%s11613_s0 + $0xb04] ss:$100 sps:$4 sm:$0xff]  }
 0x11b   :  { %v4418_v62 = vpop.f32.mrf.mxu0  ;;  %5001 = vmatprep.mubr.bf16.mxu1 %v8058_v56 }
 0x11c   :  { %v9447_v2 = vadd.f32 %v4593_v61, %v4417_v60  ;;  %v4595_v3 = vpop.f32.mrf.mxu1 }
 0x11d   :  { %v4419_v6 = vpop.f32.mrf.mxu0  ;;  %v8090_v3 = vld [vmem:[%s11613_s0 + $0xb0c] ss:$100 sps:$4 sm:$0xff]  }
 0x11e   :  { %v4420_v7 = vadd.f32 %v9349_v1, %v4419_v6  ;;  %v4596_v8 = vpop.f32.mrf.mxu1 }
 0x11f   :  { %v4421_v9 = vpop.f32.mrf.mxu0 }
 0x120   :  { %v9459_v11 = vadd.f32 %v4596_v8, %v4420_v7  ;;  %v4598_v13 = vpop.f32.mrf.mxu1 }
 0x121   :  { %v4424_v14 = vpop.f32.mrf.mxu0  ;;  %4825 = vmatmul.mubr.bf16.gmra.mxu0 %v8053_v63 }
 0x122   :  { %v4425_v15 = vadd.f32 %v9349_v1, %v4424_v14  ;;  %v4601_v16 = vpop.f32.mrf.mxu1  ;;  %5002 = vmatmul.mubr.bf16.gmra.mxu1 %v8056_v4  ;;  %4832 = vmatprep.mubr.bf16.mxu0 %v8063_v5 }
 0x123   :  { %v4426_v17 = vpop.f32.mrf.mxu0  ;;  %5009 = vmatprep.mubr.bf16.mxu1 %v8066_v10  ;;  %v8085_v10 = vld [vmem:[%s11613_s0 + $0xb00] ss:$100 sps:$4 sm:$0xff]  }
 0x124   :  { %v9465_v19 = vadd.f32 %v4601_v16, %v4425_v15  ;;  %v4603_v20 = vpop.f32.mrf.mxu1  ;;  %v8088_v15 = vld [vmem:[%s11613_s0 + $0xb08] ss:$100 sps:$4 sm:$0xff]  }
 0x125   :  { %v4427_v24 = vpop.f32.mrf.mxu0  ;;  %v8095_v16 = vld [vmem:[%s11613_s0 + $0xbcc] ss:$100 sps:$4 sm:$0xff]  }
 0x126   :  { %v4428_v25 = vadd.f32 %v9349_v1, %v4427_v24  ;;  %v4604_v26 = vpop.f32.mrf.mxu1 }
 0x127   :  { %v4429_v27 = vpop.f32.mrf.mxu0 }
 0x128   :  { %v9477_v29 = vadd.f32 %v4604_v26, %v4428_v25  ;;  %v4606_v30 = vpop.f32.mrf.mxu1 }
 0x129   :  { %v4432_v31 = vpop.f32.mrf.mxu0  ;;  %4833 = vmatmul.mubr.bf16.gmra.mxu0 %v8061_v18 }
 0x12a   :  { %v4433_v33 = vadd.f32 %v9349_v1, %v4432_v31  ;;  %v4609_v34 = vpop.f32.mrf.mxu1  ;;  %5010 = vmatmul.mubr.bf16.gmra.mxu1 %v8064_v21  ;;  %4840 = vmatprep.mubr.bf16.mxu0 %v8071_v23  ;;  %v8098_v23 = vld [vmem:[%s11613_s0 + $0xbd4] ss:$100 sps:$4 sm:$0xff]   ;;  %v8093_v31 = vld [vmem:[%s11613_s0 + $0xbc8] ss:$100 sps:$4 sm:$0xff]  }
 0x12b   :  { %v4434_v35 = vpop.f32.mrf.mxu0  ;;  %5017 = vmatprep.mubr.bf16.mxu1 %v8074_v28 }
 0x12c   :  { %v9483_v37 = vadd.f32 %v4609_v34, %v4433_v33  ;;  %v4611_v38 = vpop.f32.mrf.mxu1  ;;  %v8096_v35 = vld [vmem:[%s11613_s0 + $0xbd0] ss:$100 sps:$4 sm:$0xff]  }
 0x12d   :  { %v4435_v42 = vpop.f32.mrf.mxu0 }
 0x12e   :  { %v4436_v43 = vadd.f32 %v9349_v1, %v4435_v42  ;;  %v4612_v44 = vpop.f32.mrf.mxu1 }
 0x12f   :  { %v4437_v45 = vpop.f32.mrf.mxu0 }
 0x130   :  { %v9495_v47 = vadd.f32 %v4612_v44, %v4436_v43  ;;  %v4614_v49 = vpop.f32.mrf.mxu1  ;;  %v8105_v43 = vld [vmem:[%s11613_s0 + $0xc9c] ss:$100 sps:$4 sm:$0xff]  }
 0x131   :  { %v4440_v50 = vpop.f32.mrf.mxu0  ;;  %4841 = vmatmul.mubr.bf16.gmra.mxu0 %v8069_v36  ;;  %v8102_v36 = vld [vmem:[%s11613_s0 + $0xc94] ss:$100 sps:$4 sm:$0xff]  }
 0x132   :  { %v4441_v51 = vadd.f32 %v9349_v1, %v4440_v50  ;;  %v4617_v52 = vpop.f32.mrf.mxu1  ;;  %5018 = vmatmul.mubr.bf16.gmra.mxu1 %v8072_v39  ;;  %4848 = vmatprep.mubr.bf16.mxu0 %v8079_v40 }
 0x133   :  { %v4442_v53 = vpop.f32.mrf.mxu0  ;;  %5025 = vmatprep.mubr.bf16.mxu1 %v8082_v46 }
 0x134   :  { %v9501_v55 = vadd.f32 %v4617_v52, %v4441_v51  ;;  %v4619_v56 = vpop.f32.mrf.mxu1  ;;  %v8100_v52 = vld [vmem:[%s11613_s0 + $0xc90] ss:$100 sps:$4 sm:$0xff]  }
 0x135   :  { %v4443_v60 = vpop.f32.mrf.mxu0  ;;  %v8103_v56 = vld [vmem:[%s11613_s0 + $0xc98] ss:$100 sps:$4 sm:$0xff]  }
 0x136   :  { %v4444_v61 = vadd.f32 %v9349_v1, %v4443_v60  ;;  %v4620_v62 = vpop.f32.mrf.mxu1 }
 0x137   :  { %v4445_v63 = vpop.f32.mrf.mxu0 }
 0x138   :  { %v9513_v4 = vadd.f32 %v4620_v62, %v4444_v61  ;;  %v4622_v5 = vpop.f32.mrf.mxu1  ;;  %v8112_v63 = vld [vmem:[%s11613_s0 + $0xd64] ss:$100 sps:$4 sm:$0xff]  }
 0x139   :  { %v4448_v6 = vpop.f32.mrf.mxu0  ;;  %4849 = vmatmul.mubr.bf16.gmra.mxu0 %v8077_v54 }
 0x13a   :  { %v4449_v7 = vadd.f32 %v9349_v1, %v4448_v6  ;;  %v4625_v8 = vpop.f32.mrf.mxu1  ;;  %5026 = vmatmul.mubr.bf16.gmra.mxu1 %v8080_v58  ;;  %4856 = vmatprep.mubr.bf16.mxu0 %v8087_v59  ;;  %v8109_v58 = vld [vmem:[%s11613_s0 + $0xd5c] ss:$100 sps:$4 sm:$0xff]  }
 0x13b   :  { %v4450_v9 = vpop.f32.mrf.mxu0  ;;  %5033 = vmatprep.mubr.bf16.mxu1 %v8090_v3 }
 0x13c   :  { %v9519_v13 = vadd.f32 %v4625_v8, %v4449_v7  ;;  %v4627_v14 = vpop.f32.mrf.mxu1 }
 0x13d   :  { %v4451_v17 = vpop.f32.mrf.mxu0 }
 0x13e   :  { %v4452_v18 = vadd.f32 %v9349_v1, %v4451_v17  ;;  %v4628_v20 = vpop.f32.mrf.mxu1  ;;  %v8118_v17 = vld [vmem:[%s11613_s0 + $0x24] ss:$100 sps:$4 sm:$0xff]  }
 0x13f   :  { %v4453_v21 = vpop.f32.mrf.mxu0 }
 0x140   :  { %v9531_v24 = vadd.f32 %v4628_v20, %v4452_v18  ;;  %v4630_v25 = vpop.f32.mrf.mxu1 }
 0x141   :  { %v4456_v26 = vpop.f32.mrf.mxu0  ;;  %4857 = vmatmul.mubr.bf16.gmra.mxu0 %v8085_v10  ;;  %v8107_v10 = vld [vmem:[%s11613_s0 + $0xd58] ss:$100 sps:$4 sm:$0xff]   ;;  %v8121_v25 = vld [vmem:[%s11613_s0 + $0x2c] ss:$100 sps:$4 sm:$0xff]  }
 0x142   :  { %v4457_v27 = vadd.f32 %v9349_v1, %v4456_v26  ;;  %v4633_v28 = vpop.f32.mrf.mxu1  ;;  %5034 = vmatmul.mubr.bf16.gmra.mxu1 %v8088_v15  ;;  %4864 = vmatprep.mubr.bf16.mxu0 %v8095_v16  ;;  %v8110_v16 = vld [vmem:[%s11613_s0 + $0xd60] ss:$100 sps:$4 sm:$0xff]  }
 0x143   :  { %v4458_v30 = vpop.f32.mrf.mxu0  ;;  %5041 = vmatprep.mubr.bf16.mxu1 %v8098_v23 }
 0x144   :  { %v9537_v33 = vadd.f32 %v4633_v28, %v4457_v27  ;;  %v4635_v34 = vpop.f32.mrf.mxu1 }
 0x145   :  { %v4459_v38 = vpop.f32.mrf.mxu0 }
 0x146   :  { %v4460_v39 = vadd.f32 %v9349_v1, %v4459_v38  ;;  %v4636_v40 = vpop.f32.mrf.mxu1 }
 0x147   :  { %v4461_v42 = vpop.f32.mrf.mxu0 }
 0x148   :  { %v9549_v44 = vadd.f32 %v4636_v40, %v4460_v39  ;;  %v4638_v45 = vpop.f32.mrf.mxu1  ;;  %v8119_v39 = vld [vmem:[%s11613_s0 + $0x28] ss:$100 sps:$4 sm:$0xff]   ;;  %v8122_v40 = vld [vmem:[%s11612_s1 + $0x338] sm:$0xff]  }
 0x149   :  { %v4464_v46 = vpop.f32.mrf.mxu0  ;;  %4865 = vmatmul.mubr.bf16.gmra.mxu0 %v8093_v31 }
 0x14a   :  { %v4465_v49 = vadd.f32 %v9349_v1, %v4464_v46  ;;  %v4641_v50 = vpop.f32.mrf.mxu1  ;;  %5042 = vmatmul.mubr.bf16.gmra.mxu1 %v8096_v35  ;;  %4872 = vmatprep.mubr.bf16.mxu0 %v8102_v36  ;;  %v8116_v35 = vld [vmem:[%s11613_s0 + $0x20] ss:$100 sps:$4 sm:$0xff]  }
 0x14b   :  { %v4466_v51 = vpop.f32.mrf.mxu0  ;;  %5049 = vmatprep.mubr.bf16.mxu1 %v8105_v43 }
 0x14c   :  { %v9555_v53 = vadd.f32 %v4641_v50, %v4465_v49  ;;  %v4643_v54 = vpop.f32.mrf.mxu1  ;;  %v8125_v49 = vld [vmem:[%s11613_s0 + $0xec] ss:$100 sps:$4 sm:$0xff]   ;;  %v8128_v50 = vld [vmem:[%s11613_s0 + $0xf4] ss:$100 sps:$4 sm:$0xff]  }
 0x14d   :  { %v4467_v59 = vpop.f32.mrf.mxu0  ;;  %v8129_v54 = vld [vmem:[%s11612_s1 + $0x3b8] sm:$0xff]  }
 0x14e   :  { %v4468_v60 = vadd.f32 %v9349_v1, %v4467_v59  ;;  %v4644_v61 = vpop.f32.mrf.mxu1 }
 0x14f   :  { %v4469_v62 = vpop.f32.mrf.mxu0 }
 0x150   :  { %v9567_v3 = vadd.f32 %v4644_v61, %v4468_v60  ;;  %v4646_v5 = vpop.f32.mrf.mxu1  ;;  %v8137_v61 = vld [vmem:[%s11612_s1 + $0x3b0] sm:$0xff]  }
 0x151   :  { %v4472_v6 = vpop.f32.mrf.mxu0  ;;  %4873 = vmatmul.mubr.bf16.gmra.mxu0 %v8100_v52 }
 0x152   :  { %v4473_v7 = vadd.f32 %v9349_v1, %v4472_v6  ;;  %v4649_v8 = vpop.f32.mrf.mxu1  ;;  %5050 = vmatmul.mubr.bf16.gmra.mxu1 %v8103_v56  ;;  %4880 = vmatprep.mubr.bf16.mxu0 %v8109_v58  ;;  %v8130_v58 = vld [vmem:[%s11612_s1 + $0x330] sm:$0xff]  }
 0x153   :  { %v4474_v9 = vpop.f32.mrf.mxu0  ;;  %5057 = vmatprep.mubr.bf16.mxu1 %v8112_v63  ;;  %v8123_v63 = vld [vmem:[%s11613_s0 + $0xe8] ss:$100 sps:$4 sm:$0xff]  }
 0x154   :  { %v9573_v14 = vadd.f32 %v4649_v8, %v4473_v7  ;;  %v4651_v15 = vpop.f32.mrf.mxu1  ;;  %v8133_v7 = vld [vmem:[%s11613_s0 + $0x1b4] ss:$100 sps:$4 sm:$0xff]   ;;  %v9634_v9 = vld [vmem:[%s11614_s2] ss:$0 sm:$0xff] }
 0x155   :  { %v4475_v18 = vpop.f32.mrf.mxu0 }
 0x156   :  { %v4476_v20 = vadd.f32 %v9349_v1, %v4475_v18  ;;  %v4652_v21 = vpop.f32.mrf.mxu1  ;;  %v8138_v18 = vld [vmem:[%s11612_s1 + $0x328] sm:$0xff]  }
 0x157   :  { %v4477_v23 = vpop.f32.mrf.mxu0 }
 0x158   :  { %v9585_v26 = vadd.f32 %v4652_v21, %v4476_v20  ;;  %v4654_v27 = vpop.f32.mrf.mxu1  ;;  %v8145_v23 = vld [vmem:[%s11612_s1 + $0x3a8] sm:$0xff]  }
 0x159   :  { %v4480_v28 = vpop.f32.mrf.mxu0  ;;  %4881 = vmatmul.mubr.bf16.gmra.mxu0 %v8107_v10  ;;  %v8146_v27 = vld [vmem:[%s11612_s1 + $0x320] sm:$0xff]  }
 0x15a   :  { %v4481_v30 = vadd.f32 %v9349_v1, %v4480_v28  ;;  %v4657_v31 = vpop.f32.mrf.mxu1  ;;  %5058 = vmatmul.mubr.bf16.gmra.mxu1 %v8110_v16  ;;  %5098 = vmatprep.mubr.bf16.mxu0 %v8118_v17  ;;  %v8136_v17 = vld [vmem:[%s11613_s0 + $0x1bc] ss:$100 sps:$4 sm:$0xff]  }
 0x15b   :  { %v4482_v34 = vpop.f32.mrf.mxu0  ;;  %5275 = vmatprep.mubr.bf16.mxu1 %v8121_v25 }
 0x15c   :  { %v9591_v36 = vadd.f32 %v4657_v31, %v4481_v30  ;;  %v4659_v38 = vpop.f32.mrf.mxu1  ;;  %v8131_v34 = vld [vmem:[%s11613_s0 + $0x1b0] ss:$100 sps:$4 sm:$0xff]  }
 0x15d   :  { %v4483_v42 = vpop.f32.mrf.mxu0 }
 0x15e   :  { %v4484_v43 = vadd.f32 %v9349_v1, %v4483_v42  ;;  %v4660_v45 = vpop.f32.mrf.mxu1 }
 0x15f   :  { %v4485_v46 = vpop.f32.mrf.mxu0 }
 0x160   :  { %v9606_v51 = vadd.f32 %v4660_v45, %v4484_v43  ;;  %v4662_v52 = vpop.f32.mrf.mxu1  ;;  %v8141_v43 = vld [vmem:[%s11613_s0 + $0x27c] ss:$100 sps:$4 sm:$0xff]  }
 0x161   :  { %v4488_v56 = vpop.f32.mrf.mxu0  ;;  %5099 = vmatmul.mubr.bf16.vlgmr.msra.gmra.mxu0 %v8116_v35  ;;  %v8154_v52 = vld [vmem:[%s11612_s1 + $0x318] sm:$0xff]  }
 0x162   :  { %v4489_v59 = vadd.f32 %v9349_v1, %v4488_v56  ;;  %v4665_v60 = vpop.f32.mrf.mxu1  ;;  %5276 = vmatmul.mubr.bf16.vlgmr.msra.gmra.mxu1 %v8119_v39  ;;  %5421 = vmatpush1.bf16.msra.mxu0 %v8122_v40  ;;  %v8126_v1 = vld [vmem:[%s11613_s0 + $0xf0] ss:$100 sps:$4 sm:$0xff]   ;;  %v8134_v39 = vld [vmem:[%s11613_s0 + $0x1b8] ss:$100 sps:$4 sm:$0xff]   ;;  %v8153_v40 = vld [vmem:[%s11612_s1 + $0x3a0] sm:$0xff]  }
 0x163   :  { %v4490_v62 = vpop.f32.mrf.mxu0  ;;  %5106 = vmatprep.mubr.bf16.mxu0 %v8125_v49  ;;  %5283 = vmatprep.mubr.bf16.mxu1 %v8128_v50  ;;  %v8144_v50 = vld [vmem:[%s11613_s0 + $0x284] ss:$100 sps:$4 sm:$0xff]  }
 0x164   :  { %v9621_v5 = vadd.f32 %v4665_v60, %v4489_v59  ;;  %v4667_v6 = vpop.f32.mrf.mxu1  ;;  %5422 = vmatprep.subr.bf16.mxu0 %v8671_v0  ;;  %5598 = vmatpush1.bf16.msra.mxu1 %v8129_v54  ;;  %v8162_v60 = vld [vmem:[%s11612_s1 + $0x310] sm:$0xff]  }
 0x165   :  { %v4491_v8 = vpop.f32.mrf.mxu0  ;;  %5599 = vmatprep.subr.bf16.mxu1 %v8671_v0  ;;  %v8139_v6 = vld [vmem:[%s11613_s0 + $0x278] ss:$100 sps:$4 sm:$0xff]  }
 0x166   :  { %v4492_v10 = vadd.f32 %v9634_v9, %v4491_v8  ;;  %v4668_v15 = vpop.f32.mrf.mxu1  ;;  %5423 = vmatpush1.bf16.msra.mxu0 %v8130_v58  ;;  %v8161_v58 = vld [vmem:[%s11612_s1 + $0x398] sm:$0xff]   ;;  %v8142_v8 = vld [vmem:[%s11613_s0 + $0x280] ss:$100 sps:$4 sm:$0xff]  }
 0x167   :  { %v4493_v16 = vpop.f32.mrf.mxu0  ;;  %5424 = vmatprep.subr.bf16.mxu0 %v8671_v0 }
 0x168   :  { %v9644_v20 = vadd.f32 %v4668_v15, %v4492_v10  ;;  %v4670_v21 = vpop.f32.mrf.mxu1  ;;  %5600 = vmatpush1.bf16.msra.mxu1 %v8137_v61  ;;  %v8149_v10 = vld [vmem:[%s11613_s0 + $0x344] ss:$100 sps:$4 sm:$0xff]   ;;  %v8169_v15 = vld [vmem:[%s11612_s1 + $0x390] sm:$0xff]  }
 0x169   :  { %v4496_v25 = vpop.f32.mrf.mxu0  ;;  %5107 = vmatmul.mubr.bf16.gmra.mxu0 %v8123_v63  ;;  %5601 = vmatprep.subr.bf16.mxu1 %v8671_v0 }
 0x16a   :  { %v4497_v28 = vadd.f32 %v9634_v9, %v4496_v25  ;;  %v4673_v30 = vpop.f32.mrf.mxu1  ;;  %5284 = vmatmul.mubr.bf16.gmra.mxu1 %v8126_v1  ;;  %5114 = vmatprep.mubr.bf16.mxu0 %v8133_v7  ;;  %v8176_v25 = vld [vmem:[%s11612_s1 + $0x308] sm:$0xff]  }
 0x16b   :  { %v4498_v31 = vpop.f32.mrf.mxu0  ;;  %5291 = vmatprep.mubr.bf16.mxu1 %v8136_v17  ;;  %5425 = vmatpush1.bf16.msra.mxu0 %v8138_v18 }
 0x16c   :  { %v9657_v35 = vadd.f32 %v4673_v30, %v4497_v28  ;;  %v4675_v38 = vpop.f32.mrf.mxu1  ;;  %5426 = vmatprep.subr.bf16.mxu0 %v8671_v0  ;;  %5602 = vmatpush1.bf16.msra.mxu1 %v8145_v23  ;;  %v8152_v23 = vld [vmem:[%s11613_s0 + $0x34c] ss:$100 sps:$4 sm:$0xff]  }
 0x16d   :  { %v4499_v42 = vpop.f32.mrf.mxu0  ;;  %5603 = vmatprep.subr.bf16.mxu1 %v8671_v0  ;;  %v8183_v30 = vld [vmem:[%s11612_s1 + $0x388] sm:$0xff]  }
 0x16e   :  { %v4500_v45 = vadd.f32 %v9634_v9, %v4499_v42  ;;  %v4676_v46 = vpop.f32.mrf.mxu1  ;;  %v8147_v42 = vld [vmem:[%s11613_s0 + $0x340] ss:$100 sps:$4 sm:$0xff]  }
 0x16f   :  { %v4501_v49 = vpop.f32.mrf.mxu0  ;;  %5427 = vmatpush1.bf16.msra.mxu0 %v8146_v27 }
 0x170   :  { %v9677_v54 = vadd.f32 %v4676_v46, %v4500_v45  ;;  %v4678_v56 = vpop.f32.mrf.mxu1  ;;  %5428 = vmatprep.subr.bf16.mxu0 %v8671_v0  ;;  %5604 = vmatpush1.bf16.msra.mxu1 %v8153_v40  ;;  %v8150_v46 = vld [vmem:[%s11613_s0 + $0x348] ss:$100 sps:$4 sm:$0xff]  }
 0x171   :  { %v4504_v59 = vpop.f32.mrf.mxu0  ;;  %5115 = vmatmul.mubr.bf16.gmra.mxu0 %v8131_v34  ;;  %5605 = vmatprep.subr.bf16.mxu1 %v8671_v0  ;;  %v8184_v34 = vld [vmem:[%s11612_s1 + $0x300] sm:$0xff]   ;;  %v8157_v49 = vld [vmem:[%s11613_s0 + $0x40c] ss:$100 sps:$4 sm:$0xff]  }
 0x172   :  { %v4505_v61 = vadd.f32 %v9634_v9, %v4504_v59  ;;  %v4681_v62 = vpop.f32.mrf.mxu1  ;;  %5292 = vmatmul.mubr.bf16.gmra.mxu1 %v8134_v39  ;;  %5122 = vmatprep.mubr.bf16.mxu0 %v8141_v43 }
 0x173   :  { %v4506_v63 = vpop.f32.mrf.mxu0  ;;  %5299 = vmatprep.mubr.bf16.mxu1 %v8144_v50  ;;  %5429 = vmatpush1.bf16.msra.mxu0 %v8154_v52  ;;  %v8191_v50 = vld [vmem:[%s11612_s1 + $0x380] sm:$0xff]  }
 0x174   :  { %v9691_v1 = vadd.f32 %v4681_v62, %v4505_v61  ;;  %v4683_v7 = vpop.f32.mrf.mxu1  ;;  %5430 = vmatprep.subr.bf16.mxu0 %v8671_v0  ;;  %5606 = vmatpush1.bf16.msra.mxu1 %v8161_v58  ;;  %v8192_v61 = vld [vmem:[%s11612_s1 + $0x378] sm:$0xff]  }
 0x175   :  { %v4507_v16 = vpop.f32.mrf.mxu0  ;;  %5607 = vmatprep.subr.bf16.mxu1 %v8671_v0 }
 0x176   :  { %v4508_v17 = vadd.f32 %v9634_v9, %v4507_v16  ;;  %v4684_v18 = vpop.f32.mrf.mxu1 }
 0x177   :  { %v4509_v21 = vpop.f32.mrf.mxu0  ;;  %5431 = vmatpush1.bf16.msra.mxu0 %v8162_v60  ;;  %v8160_v60 = vld [vmem:[%s11613_s0 + $0x414] ss:$100 sps:$4 sm:$0xff]  }
 0x178   :  { %v9711_v27 = vadd.f32 %v4684_v18, %v4508_v17  ;;  %v4686_v28 = vpop.f32.mrf.mxu1  ;;  %5432 = vmatprep.subr.bf16.mxu0 %v8671_v0  ;;  %5608 = vmatpush1.bf16.msra.mxu1 %v8169_v15  ;;  %v8155_v17 = vld [vmem:[%s11613_s0 + $0x408] ss:$100 sps:$4 sm:$0xff]  }
 0x179   :  { %v4512_v31 = vpop.f32.mrf.mxu0  ;;  %5123 = vmatmul.mubr.bf16.gmra.mxu0 %v8139_v6  ;;  %5609 = vmatprep.subr.bf16.mxu1 %v8671_v0  ;;  %v8199_v6 = vld [vmem:[%s11612_s1 + $0x3f8] sm:$0xff]   ;;  %v8207_v28 = vld [vmem:[%s11612_s1 + $0x3f0] sm:$0xff]  }
 0x17a   :  { %v4513_v38 = vadd.f32 %v9634_v9, %v4512_v31  ;;  %v4689_v39 = vpop.f32.mrf.mxu1  ;;  %5300 = vmatmul.mubr.bf16.gmra.mxu1 %v8142_v8  ;;  %5130 = vmatprep.mubr.bf16.mxu0 %v8149_v10  ;;  %v8200_v8 = vld [vmem:[%s11612_s1 + $0x370] sm:$0xff]  }
 0x17b   :  { %v4514_v40 = vpop.f32.mrf.mxu0  ;;  %5307 = vmatprep.mubr.bf16.mxu1 %v8152_v23  ;;  %5433 = vmatpush1.bf16.msra.mxu0 %v8176_v25  ;;  %v8158_v23 = vld [vmem:[%s11613_s0 + $0x410] ss:$100 sps:$4 sm:$0xff]  }
 0x17c   :  { %v9725_v43 = vadd.f32 %v4689_v39, %v4513_v38  ;;  %v4691_v45 = vpop.f32.mrf.mxu1  ;;  %5434 = vmatprep.subr.bf16.mxu0 %v8671_v0  ;;  %5610 = vmatpush1.bf16.msra.mxu1 %v8183_v30  ;;  %v8165_v25 = vld [vmem:[%s11613_s0 + $0x4d4] ss:$100 sps:$4 sm:$0xff]   ;;  %v8168_v39 = vld [vmem:[%s11613_s0 + $0x4dc] ss:$100 sps:$4 sm:$0xff]   ;;  %v8208_v40 = vld [vmem:[%s11612_s1 + $0x368] sm:$0xff]  }
 0x17d   :  { %v4515_v52 = vpop.f32.mrf.mxu0  ;;  %5611 = vmatprep.subr.bf16.mxu1 %v8671_v0 }
 0x17e   :  { %v4516_v56 = vadd.f32 %v9634_v9, %v4515_v52  ;;  %v4692_v58 = vpop.f32.mrf.mxu1 }
 0x17f   :  { %v4517_v59 = vpop.f32.mrf.mxu0  ;;  %5435 = vmatpush1.bf16.msra.mxu0 %v8184_v34 }
 0x180   :  { %v9745_v62 = vadd.f32 %v4692_v58, %v4516_v56  ;;  %v4694_v63 = vpop.f32.mrf.mxu1  ;;  %5436 = vmatprep.subr.bf16.mxu0 %v8671_v0  ;;  %5612 = vmatpush1.bf16.msra.mxu1 %v8191_v50  ;;  %v8216_v50 = vld [vmem:[%s11612_s1 + $0x360] sm:$0xff]   ;;  %v8163_v59 = vld [vmem:[%s11613_s0 + $0x4d0] ss:$100 sps:$4 sm:$0xff]  }
 0x181   :  { %v4520_v7 = vpop.f32.mrf.mxu0  ;;  %5131 = vmatmul.mubr.bf16.gmra.mxu0 %v8147_v42  ;;  %5613 = vmatprep.subr.bf16.mxu1 %v8671_v0  ;;  %v8166_v63 = vld [vmem:[%s11613_s0 + $0x4d8] ss:$100 sps:$4 sm:$0xff]  }
 0x182   :  { %v4521_v10 = vadd.f32 %v9634_v9, %v4520_v7  ;;  %v4697_v15 = vpop.f32.mrf.mxu1  ;;  %5308 = vmatmul.mubr.bf16.gmra.mxu1 %v8150_v46  ;;  %5138 = vmatprep.mubr.bf16.mxu0 %v8157_v49  ;;  %v8215_v46 = vld [vmem:[%s11612_s1 + $0x3e8] sm:$0xff]   ;;  %v8223_v7 = vld [vmem:[%s11612_s1 + $0x3e0] sm:$0xff]  }
 0x183   :  { %v4522_v16 = vpop.f32.mrf.mxu0  ;;  %5315 = vmatprep.mubr.bf16.mxu1 %v8160_v60  ;;  %5437 = vmatpush2.bf16.msra.mxu0 %v8192_v61 }
 0x184   :  { %v9759_v18 = vadd.f32 %v4697_v15, %v4521_v10  ;;  %v4699_v21 = vpop.f32.mrf.mxu1  ;;  %5438 = vmatprep.subr.bf16.mxu0 %v8671_v0  ;;  %5614 = vmatpush2.bf16.msra.mxu1 %v8199_v6  ;;  %v8172_v6 = vld [vmem:[%s11613_s0 + $0x59c] ss:$100 sps:$4 sm:$0xff]  }
 0x185   :  { %v4523_v30 = vpop.f32.mrf.mxu0  ;;  %5615 = vmatprep.subr.bf16.mxu1 %v8671_v0  ;;  %v8224_v21 = vld [vmem:[%s11612_s1 + $0x358] sm:$0xff]  }
 0x186   :  { %v4524_v31 = vadd.f32 %v9634_v9, %v4523_v30  ;;  %v4700_v34 = vpop.f32.mrf.mxu1  ;;  %v8232_v30 = vld [vmem:[%s11612_s1 + $0x350] sm:$0xff]  }
 0x187   :  { %v4525_v38 = vpop.f32.mrf.mxu0  ;;  %5439 = vmatpush2.bf16.msra.mxu0 %v8200_v8 }
 0x188   :  { %v9779_v42 = vadd.f32 %v4700_v34, %v4524_v31  ;;  %v4702_v45 = vpop.f32.mrf.mxu1  ;;  %5440 = vmatprep.subr.bf16.mxu0 %v8671_v0  ;;  %5616 = vmatpush2.bf16.msra.mxu1 %v8207_v28  ;;  %v8239_v38 = vld [vmem:[%s11612_s1 + $0x3d0] sm:$0xff]  }
 0x189   :  { %v4528_v49 = vpop.f32.mrf.mxu0  ;;  %5139 = vmatmul.mubr.bf16.gmra.mxu0 %v8155_v17  ;;  %5617 = vmatprep.subr.bf16.mxu1 %v8671_v0  ;;  %v8175_v17 = vld [vmem:[%s11613_s0 + $0x5a4] ss:$100 sps:$4 sm:$0xff]  }
 0x18a   :  { %v4529_v52 = vadd.f32 %v9634_v9, %v4528_v49  ;;  %v4705_v56 = vpop.f32.mrf.mxu1  ;;  %5316 = vmatmul.mubr.bf16.gmra.mxu1 %v8158_v23  ;;  %5146 = vmatprep.mubr.bf16.mxu0 %v8165_v25  ;;  %v8179_v49 = vld [vmem:[%s11613_s0 + $0x664] ss:$100 sps:$4 sm:$0xff]  }
 0x18b   :  { %v4530_v58 = vpop.f32.mrf.mxu0  ;;  %5323 = vmatprep.mubr.bf16.mxu1 %v8168_v39  ;;  %5441 = vmatpush2.bf16.msra.mxu0 %v8208_v40  ;;  %v8170_v40 = vld [vmem:[%s11613_s0 + $0x598] ss:$100 sps:$4 sm:$0xff]  }
 0x18c   :  { %v9793_v60 = vadd.f32 %v4705_v56, %v4529_v52  ;;  %v4707_v61 = vpop.f32.mrf.mxu1  ;;  %5442 = vmatprep.subr.bf16.mxu0 %v8671_v0  ;;  %5618 = vmatpush2.bf16.msra.mxu1 %v8215_v46 }
 0x18d   :  { %v4531_v8 = vpop.f32.mrf.mxu0  ;;  %5619 = vmatprep.subr.bf16.mxu1 %v8671_v0  ;;  %v8246_v61 = vld [vmem:[%s11612_s1 + $0x348] sm:$0xff]  }
 0x18e   :  { %v4532_v10 = vadd.f32 %v9634_v9, %v4531_v8  ;;  %v4708_v15 = vpop.f32.mrf.mxu1  ;;  %v8231_v9 = vld [vmem:[%s11612_s1 + $0x3d8] sm:$0xff]   ;;  %v8254_v8 = vld [vmem:[%s11612_s1 + $0x340] sm:$0xff]  }
 0x18f   :  { %v4533_v16 = vpop.f32.mrf.mxu0  ;;  %5443 = vmatpush2.bf16.msra.mxu0 %v8216_v50 }
 0x190   :  { %v9813_v23 = vadd.f32 %v4708_v15, %v4532_v10  ;;  %v4710_v25 = vpop.f32.mrf.mxu1  ;;  %5444 = vmatprep.subr.bf16.mxu0 %v8671_v0  ;;  %5620 = vmatpush2.bf16.msra.mxu1 %v8223_v7  ;;  %v8255_v16 = vld [vmem:[%s11612_s1 + $0x3c0] sm:$0xff]  }
 0x191   :  { %v4746_v28 = vpop.f32.mrf.mxu0  ;;  %5147 = vmatmul.mubr.bf16.gmra.mxu0 %v8163_v59  ;;  %5621 = vmatprep.subr.bf16.mxu1 %v8671_v0  ;;  %v8182_v59 = vld [vmem:[%s11613_s0 + $0x66c] ss:$100 sps:$4 sm:$0xff]  }
 0x192   :  { %v4747_v31 = vadd.f32 %v4746_v28, %v9373_v12  ;;  %v4923_v34 = vpop.f32.mrf.mxu1  ;;  %5324 = vmatmul.mubr.bf16.gmra.mxu1 %v8166_v63  ;;  %5154 = vmatprep.mubr.bf16.mxu0 %v8172_v6  ;;  %v8173_v12 = vld [vmem:[%s11613_s0 + $0x5a0] ss:$100 sps:$4 sm:$0xff]   ;;  %v8187_v28 = vld [vmem:[%s11613_s0 + $0x72c] ss:$100 sps:$4 sm:$0xff]  }
 0x193   :  { %v4748_v39 = vpop.f32.mrf.mxu0  ;;  %5331 = vmatprep.mubr.bf16.mxu1 %v8175_v17  ;;  %5445 = vmatpush2.bf16.msra.mxu0 %v8224_v21  ;;  %v8177_v21 = vld [vmem:[%s11613_s0 + $0x660] ss:$100 sps:$4 sm:$0xff]  }
 0x194   :  { %v9830_v45 = vadd.f32 %v4923_v34, %v4747_v31  ;;  %v4925_v46 = vpop.f32.mrf.mxu1  ;;  %5446 = vmatprep.subr.bf16.mxu0 %v8671_v0  ;;  %5622 = vmatpush2.bf16.msra.mxu1 %v8231_v9  ;;  %v8190_v39 = vld [vmem:[%s11613_s0 + $0x734] ss:$100 sps:$4 sm:$0xff]  }
 0x195   :  { %v4749_v50 = vpop.f32.mrf.mxu0  ;;  %5623 = vmatprep.subr.bf16.mxu1 %v8671_v0 }
 0x196   :  { %v4750_v52 = vadd.f32 %v4749_v50, %v9390_v22  ;;  %v4926_v56 = vpop.f32.mrf.mxu1  ;;  %v8253_v22 = vld [vmem:[%s11612_s1 + $0x3c8] sm:$0xff]  }
 0x197   :  { %v4751_v58 = vpop.f32.mrf.mxu0  ;;  %5447 = vmatpush2.bf16.msra.mxu0 %v8232_v30 }
 0x198   :  { %v9847_v63 = vadd.f32 %v4926_v56, %v4750_v52  ;;  %v4928_v6 = vpop.f32.mrf.mxu1  ;;  %5448 = vmatprep.subr.bf16.mxu0 %v8671_v0  ;;  %5624 = vmatpush2.bf16.msra.mxu1 %v8239_v38 }
 0x199   :  { %v4754_v7 = vpop.f32.mrf.mxu0  ;;  %5155 = vmatmul.mubr.bf16.gmra.mxu0 %v8170_v40  ;;  %5625 = vmatprep.subr.bf16.mxu1 %v8671_v0 }
 0x19a   :  { %v4755_v10 = vadd.f32 %v4754_v7, %v9407_v32  ;;  %v4931_v15 = vpop.f32.mrf.mxu1  ;;  %5332 = vmatmul.mubr.bf16.gmra.mxu1 %v8173_v12  ;;  %5162 = vmatprep.mubr.bf16.mxu0 %v8179_v49  ;;  %v8180_v32 = vld [vmem:[%s11613_s0 + $0x668] ss:$100 sps:$4 sm:$0xff]  }
 0x19b   :  { %v4756_v17 = vpop.f32.mrf.mxu0  ;;  %5339 = vmatprep.mubr.bf16.mxu1 %v8182_v59  ;;  %5449 = vmatpush2.bf16.msra.mxu0 %v8246_v61  ;;  %v8185_v59 = vld [vmem:[%s11613_s0 + $0x728] ss:$100 sps:$4 sm:$0xff]  }
 0x19c   :  { %v9864_v25 = vadd.f32 %v4931_v15, %v4755_v10  ;;  %v4933_v9 = vpop.f32.mrf.mxu1  ;;  %5450 = vmatprep.subr.bf16.mxu0 %v8671_v0  ;;  %5626 = vmatpush2.bf16.msra.mxu1 %v8253_v22  ;;  %v8195_v22 = vld [vmem:[%s11613_s0 + $0x7f4] ss:$100 sps:$4 sm:$0xff]  }
 0x19d   :  { %v4757_v30 = vpop.f32.mrf.mxu0  ;;  %5627 = vmatprep.subr.bf16.mxu1 %v8671_v0 }
 0x19e   :  { %v4758_v31 = vadd.f32 %v4757_v30, %v9421_v41  ;;  %v4934_v34 = vpop.f32.mrf.mxu1  ;;  %v8193_v30 = vld [vmem:[%s11613_s0 + $0x7f0] ss:$100 sps:$4 sm:$0xff]  }
 0x19f   :  { %v4759_v38 = vpop.f32.mrf.mxu0  ;;  %5451 = vmatpush2.bf16.msra.mxu0 %v8254_v8  ;;  %v8198_v8 = vld [vmem:[%s11613_s0 + $0x7fc] ss:$100 sps:$4 sm:$0xff]  }
 0x1a0   :  { %v9878_v40 = vadd.f32 %v4934_v34, %v4758_v31  ;;  %v4936_v46 = vpop.f32.mrf.mxu1  ;;  %5628 = vmatpush2.bf16.msra.mxu1 %v8255_v16  ;;  %5774 = vmatprep.subr.bf16.mxu0 %v8671_v0  ;;  %v8203_v38 = vld [vmem:[%s11613_s0 + $0x8bc] ss:$100 sps:$4 sm:$0xff]  }
 0x1a1   :  { %v4762_v12 = vpop.f32.mrf.mxu0  ;;  %5163 = vmatmul.mubr.bf16.gmra.mxu0 %v8177_v21  ;;  %5951 = vmatprep.subr.bf16.mxu1 %v8671_v0  ;;  %v8206_v46 = vld [vmem:[%s11613_s0 + $0x8c4] ss:$100 sps:$4 sm:$0xff]  }
 0x1a2   :  { %v4763_v49 = vadd.f32 %v4762_v12, %v9429_v48  ;;  %v4939_v41 = vpop.f32.mrf.mxu1  ;;  %5340 = vmatmul.mubr.bf16.gmra.mxu1 %v8180_v32  ;;  %5170 = vmatprep.mubr.bf16.mxu0 %v8187_v28  ;;  %v8188_v48 = vld [vmem:[%s11613_s0 + $0x730] ss:$100 sps:$4 sm:$0xff]  }
 0x1a3   :  { %v4764_v50 = vpop.f32.mrf.mxu0  ;;  %5347 = vmatprep.mubr.bf16.mxu1 %v8190_v39 }
 0x1a4   :  { %v9883_v52 = vadd.f32 %v4939_v41, %v4763_v49  ;;  %v4941_v56 = vpop.f32.mrf.mxu1 }
 0x1a5   :  { %v4765_v58 = vpop.f32.mrf.mxu0 }
 0x1a6   :  { %v4766_v61 = vadd.f32 %v4765_v58, %v9441_v57  ;;  %v4942_v6 = vpop.f32.mrf.mxu1 }
 0x1a7   :  { %v4767_v7 = vpop.f32.mrf.mxu0 }
 0x1a8   :  { %v9898_v10 = vadd.f32 %v4942_v6, %v4766_v61  ;;  %v4944_v15 = vpop.f32.mrf.mxu1  ;;  %v8201_v6 = vld [vmem:[%s11613_s0 + $0x8b8] ss:$100 sps:$4 sm:$0xff]   ;;  %v8211_v7 = vld [vmem:[%s11613_s0 + $0x984] ss:$100 sps:$4 sm:$0xff]  }
 0x1a9   :  { %v4770_v16 = vpop.f32.mrf.mxu0  ;;  %5171 = vmatmul.mubr.bf16.gmra.mxu0 %v8185_v59  ;;  %v8214_v15 = vld [vmem:[%s11613_s0 + $0x98c] ss:$100 sps:$4 sm:$0xff]  }
 0x1aa   :  { %v4771_v57 = vadd.f32 %v4770_v16, %v9447_v2  ;;  %v4947_v17 = vpop.f32.mrf.mxu1  ;;  %5348 = vmatmul.mubr.bf16.gmra.mxu1 %v8188_v48  ;;  %5178 = vmatprep.mubr.bf16.mxu0 %v8195_v22  ;;  %v8196_v2 = vld [vmem:[%s11613_s0 + $0x7f8] ss:$100 sps:$4 sm:$0xff]  }
 0x1ab   :  { %v4772_v21 = vpop.f32.mrf.mxu0  ;;  %5355 = vmatprep.mubr.bf16.mxu1 %v8198_v8 }
 0x1ac   :  { %v9901_v9 = vadd.f32 %v4947_v17, %v4771_v57  ;;  %v4949_v32 = vpop.f32.mrf.mxu1 }
 0x1ad   :  { %v4773_v28 = vpop.f32.mrf.mxu0 }
 0x1ae   :  { %v4774_v31 = vadd.f32 %v4773_v28, %v9459_v11  ;;  %v4950_v34 = vpop.f32.mrf.mxu1 }
 0x1af   :  { %v4775_v39 = vpop.f32.mrf.mxu0 }
 0x1b0   :  { %v9916_v12 = vadd.f32 %v4950_v34, %v4774_v31  ;;  %v4952_v49 = vpop.f32.mrf.mxu1  ;;  %v8209_v34 = vld [vmem:[%s11613_s0 + $0x980] ss:$100 sps:$4 sm:$0xff]   ;;  %v8219_v39 = vld [vmem:[%s11613_s0 + $0xa4c] ss:$100 sps:$4 sm:$0xff]  }
 0x1b1   :  { %v4778_v41 = vpop.f32.mrf.mxu0  ;;  %5179 = vmatmul.mubr.bf16.gmra.mxu0 %v8193_v30  ;;  %v8222_v49 = vld [vmem:[%s11613_s0 + $0xa54] ss:$100 sps:$4 sm:$0xff]  }
 0x1b2   :  { %v4779_v11 = vadd.f32 %v4778_v41, %v9465_v19  ;;  %v4955_v50 = vpop.f32.mrf.mxu1  ;;  %5356 = vmatmul.mubr.bf16.gmra.mxu1 %v8196_v2  ;;  %5186 = vmatprep.mubr.bf16.mxu0 %v8203_v38  ;;  %v8204_v19 = vld [vmem:[%s11613_s0 + $0x8c0] ss:$100 sps:$4 sm:$0xff]  }
 0x1b3   :  { %v4780_v56 = vpop.f32.mrf.mxu0  ;;  %5363 = vmatprep.mubr.bf16.mxu1 %v8206_v46 }
 0x1b4   :  { %v9919_v58 = vadd.f32 %v4955_v50, %v4779_v11  ;;  %v4957_v59 = vpop.f32.mrf.mxu1 }
 0x1b5   :  { %v4781_v61 = vpop.f32.mrf.mxu0 }
 0x1b6   :  { %v4782_v48 = vadd.f32 %v4781_v61, %v9477_v29  ;;  %v4958_v22 = vpop.f32.mrf.mxu1 }
 0x1b7   :  { %v4783_v8 = vpop.f32.mrf.mxu0 }
 0x1b8   :  { %v9934_v16 = vadd.f32 %v4958_v22, %v4782_v48  ;;  %v4960_v57 = vpop.f32.mrf.mxu1  ;;  %v8217_v22 = vld [vmem:[%s11613_s0 + $0xa48] ss:$100 sps:$4 sm:$0xff]   ;;  %v8227_v8 = vld [vmem:[%s11613_s0 + $0xb14] ss:$100 sps:$4 sm:$0xff]  }
 0x1b9   :  { %v4786_v17 = vpop.f32.mrf.mxu0  ;;  %5187 = vmatmul.mubr.bf16.gmra.mxu0 %v8201_v6  ;;  %v8230_v57 = vld [vmem:[%s11613_s0 + $0xb1c] ss:$100 sps:$4 sm:$0xff]  }
 0x1ba   :  { %v4787_v29 = vadd.f32 %v4786_v17, %v9483_v37  ;;  %v4963_v21 = vpop.f32.mrf.mxu1  ;;  %5364 = vmatmul.mubr.bf16.gmra.mxu1 %v8204_v19  ;;  %5194 = vmatprep.mubr.bf16.mxu0 %v8211_v7  ;;  %v8212_v37 = vld [vmem:[%s11613_s0 + $0x988] ss:$100 sps:$4 sm:$0xff]  }
 0x1bb   :  { %v4788_v32 = vpop.f32.mrf.mxu0  ;;  %5371 = vmatprep.mubr.bf16.mxu1 %v8214_v15 }
 0x1bc   :  { %v9937_v28 = vadd.f32 %v4963_v21, %v4787_v29  ;;  %v4965_v30 = vpop.f32.mrf.mxu1 }
 0x1bd   :  { %v4789_v31 = vpop.f32.mrf.mxu0 }
 0x1be   :  { %v4790_v2 = vadd.f32 %v4789_v31, %v9495_v47  ;;  %v4966_v38 = vpop.f32.mrf.mxu1 }
 0x1bf   :  { %v4791_v46 = vpop.f32.mrf.mxu0 }
 0x1c0   :  { %v9952_v41 = vadd.f32 %v4966_v38, %v4790_v2  ;;  %v4968_v11 = vpop.f32.mrf.mxu1  ;;  %v8225_v38 = vld [vmem:[%s11613_s0 + $0xb10] ss:$100 sps:$4 sm:$0xff]   ;;  %v8235_v46 = vld [vmem:[%s11613_s0 + $0xbdc] ss:$100 sps:$4 sm:$0xff]  }
 0x1c1   :  { %v4794_v50 = vpop.f32.mrf.mxu0  ;;  %5195 = vmatmul.mubr.bf16.gmra.mxu0 %v8209_v34  ;;  %v8238_v11 = vld [vmem:[%s11613_s0 + $0xbe4] ss:$100 sps:$4 sm:$0xff]  }
 0x1c2   :  { %v4795_v47 = vadd.f32 %v4794_v50, %v9501_v55  ;;  %v4971_v56 = vpop.f32.mrf.mxu1  ;;  %5372 = vmatmul.mubr.bf16.gmra.mxu1 %v8212_v37  ;;  %5202 = vmatprep.mubr.bf16.mxu0 %v8219_v39  ;;  %v8220_v55 = vld [vmem:[%s11613_s0 + $0xa50] ss:$100 sps:$4 sm:$0xff]  }
 0x1c3   :  { %v4796_v59 = vpop.f32.mrf.mxu0  ;;  %5379 = vmatprep.mubr.bf16.mxu1 %v8222_v49 }
 0x1c4   :  { %v9955_v61 = vadd.f32 %v4971_v56, %v4795_v47  ;;  %v4973_v6 = vpop.f32.mrf.mxu1 }
 0x1c5   :  { %v4797_v48 = vpop.f32.mrf.mxu0 }
 0x1c6   :  { %v4798_v19 = vadd.f32 %v4797_v48, %v9513_v4  ;;  %v4974_v7 = vpop.f32.mrf.mxu1 }
 0x1c7   :  { %v4799_v15 = vpop.f32.mrf.mxu0 }
 0x1c8   :  { %v9970_v17 = vadd.f32 %v4974_v7, %v4798_v19  ;;  %v4976_v29 = vpop.f32.mrf.mxu1  ;;  %v8233_v7 = vld [vmem:[%s11613_s0 + $0xbd8] ss:$100 sps:$4 sm:$0xff]   ;;  %v8242_v15 = vld [vmem:[%s11613_s0 + $0xca4] ss:$100 sps:$4 sm:$0xff]  }
 0x1c9   :  { %v4802_v21 = vpop.f32.mrf.mxu0  ;;  %5203 = vmatmul.mubr.bf16.gmra.mxu0 %v8217_v22  ;;  %v8245_v29 = vld [vmem:[%s11613_s0 + $0xcac] ss:$100 sps:$4 sm:$0xff]  }
 0x1ca   :  { %v4803_v4 = vadd.f32 %v4802_v21, %v9519_v13  ;;  %v4979_v32 = vpop.f32.mrf.mxu1  ;;  %5380 = vmatmul.mubr.bf16.gmra.mxu1 %v8220_v55  ;;  %5210 = vmatprep.mubr.bf16.mxu0 %v8227_v8  ;;  %v8228_v13 = vld [vmem:[%s11613_s0 + $0xb18] ss:$100 sps:$4 sm:$0xff]  }
 0x1cb   :  { %v4804_v30 = vpop.f32.mrf.mxu0  ;;  %5387 = vmatprep.mubr.bf16.mxu1 %v8230_v57 }
 0x1cc   :  { %v9973_v31 = vadd.f32 %v4979_v32, %v4803_v4  ;;  %v4981_v34 = vpop.f32.mrf.mxu1 }
 0x1cd   :  { %v4805_v2 = vpop.f32.mrf.mxu0 }
 0x1ce   :  { %v4806_v37 = vadd.f32 %v4805_v2, %v9531_v24  ;;  %v4982_v39 = vpop.f32.mrf.mxu1 }
 0x1cf   :  { %v4807_v49 = vpop.f32.mrf.mxu0 }
 0x1d0   :  { %v9988_v50 = vadd.f32 %v4982_v39, %v4806_v37  ;;  %v4984_v47 = vpop.f32.mrf.mxu1  ;;  %v8240_v39 = vld [vmem:[%s11613_s0 + $0xca0] ss:$100 sps:$4 sm:$0xff]   ;;  %v8249_v49 = vld [vmem:[%s11613_s0 + $0xd6c] ss:$100 sps:$4 sm:$0xff]  }
 0x1d1   :  { %v4810_v56 = vpop.f32.mrf.mxu0  ;;  %5211 = vmatmul.mubr.bf16.gmra.mxu0 %v8225_v38  ;;  %v8252_v47 = vld [vmem:[%s11613_s0 + $0xd74] ss:$100 sps:$4 sm:$0xff]  }
 0x1d2   :  { %v4811_v24 = vadd.f32 %v4810_v56, %v9537_v33  ;;  %v4987_v59 = vpop.f32.mrf.mxu1  ;;  %5388 = vmatmul.mubr.bf16.gmra.mxu1 %v8228_v13  ;;  %5218 = vmatprep.mubr.bf16.mxu0 %v8235_v46  ;;  %v8236_v33 = vld [vmem:[%s11613_s0 + $0xbe0] ss:$100 sps:$4 sm:$0xff]  }
 0x1d3   :  { %v4812_v6 = vpop.f32.mrf.mxu0  ;;  %5395 = vmatprep.mubr.bf16.mxu1 %v8238_v11 }
 0x1d4   :  { %v9991_v48 = vadd.f32 %v4987_v59, %v4811_v24  ;;  %v4989_v22 = vpop.f32.mrf.mxu1 }
 0x1d5   :  { %v4813_v19 = vpop.f32.mrf.mxu0 }
 0x1d6   :  { %v4814_v55 = vadd.f32 %v4813_v19, %v9549_v44  ;;  %v4990_v8 = vpop.f32.mrf.mxu1 }
 0x1d7   :  { %v4815_v57 = vpop.f32.mrf.mxu0 }
 0x1d8   :  { %v10006_v21 = vadd.f32 %v4990_v8, %v4814_v55  ;;  %v4992_v4 = vpop.f32.mrf.mxu1  ;;  %v8247_v8 = vld [vmem:[%s11613_s0 + $0xd68] ss:$100 sps:$4 sm:$0xff]   ;;  %v8258_v57 = vld [vmem:[%s11613_s0 + $0x34] ss:$100 sps:$4 sm:$0xff]  }
 0x1d9   :  { %v4818_v32 = vpop.f32.mrf.mxu0  ;;  %5219 = vmatmul.mubr.bf16.gmra.mxu0 %v8233_v7  ;;  %v8261_v4 = vld [vmem:[%s11613_s0 + $0x3c] ss:$100 sps:$4 sm:$0xff]  }
 0x1da   :  { %v4819_v44 = vadd.f32 %v4818_v32, %v9555_v53  ;;  %v4995_v30 = vpop.f32.mrf.mxu1  ;;  %5396 = vmatmul.mubr.bf16.gmra.mxu1 %v8236_v33  ;;  %5226 = vmatprep.mubr.bf16.mxu0 %v8242_v15  ;;  %v8243_v53 = vld [vmem:[%s11613_s0 + $0xca8] ss:$100 sps:$4 sm:$0xff]  }
 0x1db   :  { %v4820_v34 = vpop.f32.mrf.mxu0  ;;  %5403 = vmatprep.mubr.bf16.mxu1 %v8245_v29 }
 0x1dc   :  { %v10009_v2 = vadd.f32 %v4995_v30, %v4819_v44  ;;  %v4997_v38 = vpop.f32.mrf.mxu1 }
 0x1dd   :  { %v4821_v37 = vpop.f32.mrf.mxu0 }
 0x1de   :  { %v4822_v13 = vadd.f32 %v4821_v37, %v9567_v3  ;;  %v4998_v46 = vpop.f32.mrf.mxu1 }
 0x1df   :  { %v4823_v11 = vpop.f32.mrf.mxu0 }
 0x1e0   :  { %v10024_v56 = vadd.f32 %v4998_v46, %v4822_v13  ;;  %v5000_v24 = vpop.f32.mrf.mxu1  ;;  %v8256_v46 = vld [vmem:[%s11613_s0 + $0x30] ss:$100 sps:$4 sm:$0xff]   ;;  %v8262_v11 = vld [vmem:[%s11612_s1 + $0x438] sm:$0xff]  }
 0x1e1   :  { %v4826_v59 = vpop.f32.mrf.mxu0  ;;  %5227 = vmatmul.mubr.bf16.gmra.mxu0 %v8240_v39  ;;  %v8265_v24 = vld [vmem:[%s11613_s0 + $0xfc] ss:$100 sps:$4 sm:$0xff]  }
 0x1e2   :  { %v4827_v3 = vadd.f32 %v4826_v59, %v9573_v14  ;;  %v5003_v6 = vpop.f32.mrf.mxu1  ;;  %5404 = vmatmul.mubr.bf16.gmra.mxu1 %v8243_v53  ;;  %5234 = vmatprep.mubr.bf16.mxu0 %v8249_v49  ;;  %v8250_v14 = vld [vmem:[%s11613_s0 + $0xd70] ss:$100 sps:$4 sm:$0xff]   ;;  %v8268_v59 = vld [vmem:[%s11613_s0 + $0x104] ss:$100 sps:$4 sm:$0xff]  }
 0x1e3   :  { %v4828_v22 = vpop.f32.mrf.mxu0  ;;  %5411 = vmatprep.mubr.bf16.mxu1 %v8252_v47 }
 0x1e4   :  { %v10027_v19 = vadd.f32 %v5003_v6, %v4827_v3  ;;  %v5005_v7 = vpop.f32.mrf.mxu1  ;;  %v8269_v6 = vld [vmem:[%s11612_s1 + $0x4b8] sm:$0xff]  }
 0x1e5   :  { %v4829_v55 = vpop.f32.mrf.mxu0 }
 0x1e6   :  { %v4830_v33 = vadd.f32 %v4829_v55, %v9585_v26  ;;  %v5006_v15 = vpop.f32.mrf.mxu1 }
 0x1e7   :  { %v4831_v29 = vpop.f32.mrf.mxu0 }
 0x1e8   :  { %v10042_v32 = vadd.f32 %v5006_v15, %v4830_v33  ;;  %v5008_v44 = vpop.f32.mrf.mxu1  ;;  %v8263_v29 = vld [vmem:[%s11613_s0 + $0xf8] ss:$100 sps:$4 sm:$0xff]  }
 0x1e9   :  { %v4834_v30 = vpop.f32.mrf.mxu0  ;;  %5235 = vmatmul.mubr.bf16.gmra.mxu0 %v8247_v8  ;;  %v8270_v8 = vld [vmem:[%s11612_s1 + $0x430] sm:$0xff]  }
 0x1ea   :  { %v4835_v26 = vadd.f32 %v4834_v30, %v9591_v36  ;;  %v5011_v34 = vpop.f32.mrf.mxu1  ;;  %5412 = vmatmul.mubr.bf16.gmra.mxu1 %v8250_v14  ;;  %5452 = vmatprep.mubr.bf16.mxu0 %v8258_v57  ;;  %v8259_v36 = vld [vmem:[%s11613_s0 + $0x38] ss:$100 sps:$4 sm:$0xff]   ;;  %v8266_v30 = vld [vmem:[%s11613_s0 + $0x100] ss:$100 sps:$4 sm:$0xff]  }
 0x1eb   :  { %v4836_v38 = vpop.f32.mrf.mxu0  ;;  %5629 = vmatprep.mubr.bf16.mxu1 %v8261_v4 }
 0x1ec   :  { %v10045_v37 = vadd.f32 %v5011_v34, %v4835_v26  ;;  %v5013_v39 = vpop.f32.mrf.mxu1  ;;  %v8273_v26 = vld [vmem:[%s11613_s0 + $0x1c4] ss:$100 sps:$4 sm:$0xff]   ;;  %v8276_v38 = vld [vmem:[%s11613_s0 + $0x1cc] ss:$100 sps:$4 sm:$0xff]  }
 0x1ed   :  { %v4837_v13 = vpop.f32.mrf.mxu0 }
 0x1ee   :  { %v4838_v53 = vadd.f32 %v4837_v13, %v9606_v51  ;;  %v5014_v49 = vpop.f32.mrf.mxu1 }
 0x1ef   :  { %v4839_v47 = vpop.f32.mrf.mxu0 }
 0x1f0   :  { %v10063_v3 = vadd.f32 %v5014_v49, %v4838_v53  ;;  %v5016_v51 = vpop.f32.mrf.mxu1  ;;  %v8286_v47 = vld [vmem:[%s11612_s1 + $0x420] sm:$0xff]  }
 0x1f1   :  { %v4842_v22 = vpop.f32.mrf.mxu0  ;;  %5453 = vmatmul.mubr.bf16.vlgmr.msra.gmra.mxu0 %v8256_v46  ;;  %v8285_v46 = vld [vmem:[%s11612_s1 + $0x4a8] sm:$0xff]  }
 0x1f2   :  { %v4843_v7 = vadd.f32 %v4842_v22, %v9621_v5  ;;  %v5019_v55 = vpop.f32.mrf.mxu1  ;;  %5630 = vmatmul.mubr.bf16.vlgmr.msra.gmra.mxu1 %v8259_v36  ;;  %5775 = vmatpush1.bf16.msra.mxu0 %v8262_v11  ;;  %v8277_v5 = vld [vmem:[%s11612_s1 + $0x4b0] sm:$0xff]  }
 0x1f3   :  { %v4844_v33 = vpop.f32.mrf.mxu0  ;;  %5460 = vmatprep.mubr.bf16.mxu0 %v8265_v24  ;;  %5637 = vmatprep.mubr.bf16.mxu1 %v8268_v59 }
 0x1f4   :  { %v10072_v15 = vadd.f32 %v5019_v55, %v4843_v7  ;;  %v5021_v14 = vpop.f32.mrf.mxu1  ;;  %5776 = vmatprep.subr.bf16.mxu0 %v8671_v0  ;;  %5952 = vmatpush1.bf16.msra.mxu1 %v8269_v6  ;;  %v8271_v6 = vld [vmem:[%s11613_s0 + $0x1c0] ss:$100 sps:$4 sm:$0xff]   ;;  %v8274_v55 = vld [vmem:[%s11613_s0 + $0x1c8] ss:$100 sps:$4 sm:$0xff]  }
 0x1f5   :  { %v4845_v57 = vpop.f32.mrf.mxu0  ;;  %5953 = vmatprep.subr.bf16.mxu1 %v8671_v0  ;;  %v8284_v14 = vld [vmem:[%s11613_s0 + $0x294] ss:$100 sps:$4 sm:$0xff]  }
 0x1f6   :  { %v4846_v4 = vadd.f32 %v4845_v57, %v9644_v20  ;;  %v5022_v44 = vpop.f32.mrf.mxu1  ;;  %5777 = vmatpush1.bf16.msra.mxu0 %v8270_v8  ;;  %v8278_v20 = vld [vmem:[%s11612_s1 + $0x428] sm:$0xff]  }
 0x1f7   :  { %v4847_v34 = vpop.f32.mrf.mxu0  ;;  %5778 = vmatprep.subr.bf16.mxu0 %v8671_v0  ;;  %v8281_v8 = vld [vmem:[%s11613_s0 + $0x28c] ss:$100 sps:$4 sm:$0xff]  }
 0x1f8   :  { %v10096_v39 = vadd.f32 %v5022_v44, %v4846_v4  ;;  %v5024_v13 = vpop.f32.mrf.mxu1  ;;  %5954 = vmatpush1.bf16.msra.mxu1 %v8277_v5  ;;  %v8294_v5 = vld [vmem:[%s11612_s1 + $0x418] sm:$0xff]   ;;  %v8302_v34 = vld [vmem:[%s11612_s1 + $0x410] sm:$0xff]  }
 0x1f9   :  { %v4850_v53 = vpop.f32.mrf.mxu0  ;;  %5461 = vmatmul.mubr.bf16.gmra.mxu0 %v8263_v29  ;;  %5955 = vmatprep.subr.bf16.mxu1 %v8671_v0  ;;  %v8301_v29 = vld [vmem:[%s11612_s1 + $0x498] sm:$0xff]  }
 0x1fa   :  { %v4851_v49 = vadd.f32 %v4850_v53, %v9657_v35  ;;  %v5027_v36 = vpop.f32.mrf.mxu1  ;;  %5638 = vmatmul.mubr.bf16.gmra.mxu1 %v8266_v30  ;;  %5468 = vmatprep.mubr.bf16.mxu0 %v8273_v26  ;;  %v8293_v35 = vld [vmem:[%s11612_s1 + $0x4a0] sm:$0xff]  }
 0x1fb   :  { %v4852_v11 = vpop.f32.mrf.mxu0  ;;  %5645 = vmatprep.mubr.bf16.mxu1 %v8276_v38  ;;  %5779 = vmatpush1.bf16.msra.mxu0 %v8278_v20 }
 0x1fc   :  { %v10106_v24 = vadd.f32 %v5027_v36, %v4851_v49  ;;  %v5029_v59 = vpop.f32.mrf.mxu1  ;;  %5780 = vmatprep.subr.bf16.mxu0 %v8671_v0  ;;  %5956 = vmatpush1.bf16.msra.mxu1 %v8285_v46  ;;  %v8279_v46 = vld [vmem:[%s11613_s0 + $0x288] ss:$100 sps:$4 sm:$0xff]   ;;  %v8282_v36 = vld [vmem:[%s11613_s0 + $0x290] ss:$100 sps:$4 sm:$0xff]  }
 0x1fd   :  { %v4853_v51 = vpop.f32.mrf.mxu0  ;;  %5957 = vmatprep.subr.bf16.mxu1 %v8671_v0  ;;  %v8289_v11 = vld [vmem:[%s11613_s0 + $0x354] ss:$100 sps:$4 sm:$0xff]   ;;  %v8292_v59 = vld [vmem:[%s11613_s0 + $0x35c] ss:$100 sps:$4 sm:$0xff]  }
 0x1fe   :  { %v4854_v22 = vadd.f32 %v4853_v51, %v9677_v54  ;;  %v5030_v7 = vpop.f32.mrf.mxu1 }
 0x1ff   :  { %v4855_v33 = vpop.f32.mrf.mxu0  ;;  %5781 = vmatpush1.bf16.msra.mxu0 %v8286_v47 }
 0x200   :  { %v10129_v54 = vadd.f32 %v5030_v7, %v4854_v22  ;;  %v5032_v57 = vpop.f32.mrf.mxu1  ;;  %5782 = vmatprep.subr.bf16.mxu0 %v8671_v0  ;;  %5958 = vmatpush1.bf16.msra.mxu1 %v8293_v35  ;;  %v8316_v35 = vld [vmem:[%s11612_s1 + $0x408] sm:$0xff]   ;;  %v8324_v33 = vld [vmem:[%s11612_s1 + $0x400] sm:$0xff]  }
 0x201   :  { %v4858_v4 = vpop.f32.mrf.mxu0  ;;  %5469 = vmatmul.mubr.bf16.gmra.mxu0 %v8271_v6  ;;  %5959 = vmatprep.subr.bf16.mxu1 %v8671_v0  ;;  %v8323_v6 = vld [vmem:[%s11612_s1 + $0x488] sm:$0xff]  }
 0x202   :  { %v4859_v44 = vadd.f32 %v4858_v4, %v9691_v1  ;;  %v5035_v30 = vpop.f32.mrf.mxu1  ;;  %5646 = vmatmul.mubr.bf16.gmra.mxu1 %v8274_v55  ;;  %5476 = vmatprep.mubr.bf16.mxu0 %v8281_v8  ;;  %v8309_v1 = vld [vmem:[%s11612_s1 + $0x490] sm:$0xff]  }
 0x203   :  { %v4860_v26 = vpop.f32.mrf.mxu0  ;;  %5653 = vmatprep.mubr.bf16.mxu1 %v8284_v14  ;;  %5783 = vmatpush1.bf16.msra.mxu0 %v8294_v5 }
 0x204   :  { %v10140_v38 = vadd.f32 %v5035_v30, %v4859_v44  ;;  %v5037_v20 = vpop.f32.mrf.mxu1  ;;  %5784 = vmatprep.subr.bf16.mxu0 %v8671_v0  ;;  %5960 = vmatpush1.bf16.msra.mxu1 %v8301_v29  ;;  %v8287_v29 = vld [vmem:[%s11613_s0 + $0x350] ss:$100 sps:$4 sm:$0xff]   ;;  %v8290_v30 = vld [vmem:[%s11613_s0 + $0x358] ss:$100 sps:$4 sm:$0xff]  }
 0x205   :  { %v4861_v13 = vpop.f32.mrf.mxu0  ;;  %5961 = vmatprep.subr.bf16.mxu1 %v8671_v0  ;;  %v8297_v26 = vld [vmem:[%s11613_s0 + $0x41c] ss:$100 sps:$4 sm:$0xff]   ;;  %v8300_v20 = vld [vmem:[%s11613_s0 + $0x424] ss:$100 sps:$4 sm:$0xff]  }
 0x206   :  { %v4862_v53 = vadd.f32 %v4861_v13, %v9711_v27  ;;  %v5038_v49 = vpop.f32.mrf.mxu1 }
 0x207   :  { %v4863_v47 = vpop.f32.mrf.mxu0  ;;  %5785 = vmatpush1.bf16.msra.mxu0 %v8302_v34 }
 0x208   :  { %v10163_v27 = vadd.f32 %v5038_v49, %v4862_v53  ;;  %v5040_v51 = vpop.f32.mrf.mxu1  ;;  %5786 = vmatprep.subr.bf16.mxu0 %v8671_v0  ;;  %5962 = vmatpush1.bf16.msra.mxu1 %v8309_v1  ;;  %v8332_v1 = vld [vmem:[%s11612_s1 + $0x478] sm:$0xff]   ;;  %v8340_v47 = vld [vmem:[%s11612_s1 + $0x470] sm:$0xff]  }
 0x209   :  { %v4866_v22 = vpop.f32.mrf.mxu0  ;;  %5477 = vmatmul.mubr.bf16.gmra.mxu0 %v8279_v46  ;;  %5963 = vmatprep.subr.bf16.mxu1 %v8671_v0  ;;  %v8339_v46 = vld [vmem:[%s11612_s1 + $0x4f8] sm:$0xff]  }
 0x20a   :  { %v4867_v7 = vadd.f32 %v4866_v22, %v9725_v43  ;;  %v5043_v55 = vpop.f32.mrf.mxu1  ;;  %5654 = vmatmul.mubr.bf16.gmra.mxu1 %v8282_v36  ;;  %5484 = vmatprep.mubr.bf16.mxu0 %v8289_v11  ;;  %v8331_v43 = vld [vmem:[%s11612_s1 + $0x480] sm:$0xff]  }
 0x20b   :  { %v4868_v8 = vpop.f32.mrf.mxu0  ;;  %5661 = vmatprep.mubr.bf16.mxu1 %v8292_v59  ;;  %5787 = vmatpush1.bf16.msra.mxu0 %v8316_v35 }
 0x20c   :  { %v10174_v14 = vadd.f32 %v5043_v55, %v4867_v7  ;;  %v5045_v5 = vpop.f32.mrf.mxu1  ;;  %5788 = vmatprep.subr.bf16.mxu0 %v8671_v0  ;;  %5964 = vmatpush1.bf16.msra.mxu1 %v8323_v6  ;;  %v8295_v6 = vld [vmem:[%s11613_s0 + $0x418] ss:$100 sps:$4 sm:$0xff]   ;;  %v8298_v55 = vld [vmem:[%s11613_s0 + $0x420] ss:$100 sps:$4 sm:$0xff]  }
 0x20d   :  { %v4869_v57 = vpop.f32.mrf.mxu0  ;;  %5965 = vmatprep.subr.bf16.mxu1 %v8671_v0  ;;  %v8305_v8 = vld [vmem:[%s11613_s0 + $0x4e4] ss:$100 sps:$4 sm:$0xff]   ;;  %v8308_v5 = vld [vmem:[%s11613_s0 + $0x4ec] ss:$100 sps:$4 sm:$0xff]  }
 0x20e   :  { %v4870_v4 = vadd.f32 %v4869_v57, %v9745_v62  ;;  %v5046_v44 = vpop.f32.mrf.mxu1 }
 0x20f   :  { %v4871_v34 = vpop.f32.mrf.mxu0  ;;  %5789 = vmatpush1.bf16.msra.mxu0 %v8324_v33 }
 0x210   :  { %v10197_v62 = vadd.f32 %v5046_v44, %v4870_v4  ;;  %v5048_v13 = vpop.f32.mrf.mxu1  ;;  %5790 = vmatprep.subr.bf16.mxu0 %v8671_v0  ;;  %5966 = vmatpush1.bf16.msra.mxu1 %v8331_v43  ;;  %v8348_v43 = vld [vmem:[%s11612_s1 + $0x468] sm:$0xff]   ;;  %v8356_v34 = vld [vmem:[%s11612_s1 + $0x460] sm:$0xff]  }
 0x211   :  { %v4874_v53 = vpop.f32.mrf.mxu0  ;;  %5485 = vmatmul.mubr.bf16.gmra.mxu0 %v8287_v29  ;;  %5967 = vmatprep.subr.bf16.mxu1 %v8671_v0  ;;  %v8355_v29 = vld [vmem:[%s11612_s1 + $0x4e8] sm:$0xff]  }
 0x212   :  { %v4875_v49 = vadd.f32 %v4874_v53, %v9759_v18  ;;  %v5051_v36 = vpop.f32.mrf.mxu1  ;;  %5662 = vmatmul.mubr.bf16.gmra.mxu1 %v8290_v30  ;;  %5492 = vmatprep.mubr.bf16.mxu0 %v8297_v26  ;;  %v8347_v18 = vld [vmem:[%s11612_s1 + $0x4f0] sm:$0xff]  }
 0x213   :  { %v4876_v11 = vpop.f32.mrf.mxu0  ;;  %5669 = vmatprep.mubr.bf16.mxu1 %v8300_v20  ;;  %5791 = vmatpush2.bf16.msra.mxu0 %v8332_v1 }
 0x214   :  { %v10208_v59 = vadd.f32 %v5051_v36, %v4875_v49  ;;  %v5053_v35 = vpop.f32.mrf.mxu1  ;;  %5792 = vmatprep.subr.bf16.mxu0 %v8671_v0  ;;  %5968 = vmatpush2.bf16.msra.mxu1 %v8339_v46  ;;  %v8303_v46 = vld [vmem:[%s11613_s0 + $0x4e0] ss:$100 sps:$4 sm:$0xff]   ;;  %v8306_v36 = vld [vmem:[%s11613_s0 + $0x4e8] ss:$100 sps:$4 sm:$0xff]  }
 0x215   :  { %v4877_v51 = vpop.f32.mrf.mxu0  ;;  %5969 = vmatprep.subr.bf16.mxu1 %v8671_v0  ;;  %v8312_v11 = vld [vmem:[%s11613_s0 + $0x5ac] ss:$100 sps:$4 sm:$0xff]   ;;  %v8315_v35 = vld [vmem:[%s11613_s0 + $0x5b4] ss:$100 sps:$4 sm:$0xff]  }
 0x216   :  { %v4878_v22 = vadd.f32 %v4877_v51, %v9779_v42  ;;  %v5054_v7 = vpop.f32.mrf.mxu1 }
 0x217   :  { %v4879_v33 = vpop.f32.mrf.mxu0  ;;  %5793 = vmatpush2.bf16.msra.mxu0 %v8340_v47 }
 0x218   :  { %v10231_v42 = vadd.f32 %v5054_v7, %v4878_v22  ;;  %v5056_v57 = vpop.f32.mrf.mxu1  ;;  %5794 = vmatprep.subr.bf16.mxu0 %v8671_v0  ;;  %5970 = vmatpush2.bf16.msra.mxu1 %v8347_v18  ;;  %v8364_v18 = vld [vmem:[%s11612_s1 + $0x458] sm:$0xff]   ;;  %v8372_v33 = vld [vmem:[%s11612_s1 + $0x450] sm:$0xff]  }
 0x219   :  { %v4882_v4 = vpop.f32.mrf.mxu0  ;;  %5493 = vmatmul.mubr.bf16.gmra.mxu0 %v8295_v6  ;;  %5971 = vmatprep.subr.bf16.mxu1 %v8671_v0  ;;  %v8371_v6 = vld [vmem:[%s11612_s1 + $0x4d8] sm:$0xff]  }
 0x21a   :  { %v4883_v44 = vadd.f32 %v4882_v4, %v9793_v60  ;;  %v5059_v30 = vpop.f32.mrf.mxu1  ;;  %5670 = vmatmul.mubr.bf16.gmra.mxu1 %v8298_v55  ;;  %5500 = vmatprep.mubr.bf16.mxu0 %v8305_v8  ;;  %v8363_v60 = vld [vmem:[%s11612_s1 + $0x4e0] sm:$0xff]  }
 0x21b   :  { %v4884_v26 = vpop.f32.mrf.mxu0  ;;  %5677 = vmatprep.mubr.bf16.mxu1 %v8308_v5  ;;  %5795 = vmatpush2.bf16.msra.mxu0 %v8348_v43 }
 0x21c   :  { %v10242_v20 = vadd.f32 %v5059_v30, %v4883_v44  ;;  %v5061_v1 = vpop.f32.mrf.mxu1  ;;  %5796 = vmatprep.subr.bf16.mxu0 %v8671_v0  ;;  %5972 = vmatpush2.bf16.msra.mxu1 %v8355_v29  ;;  %v8310_v29 = vld [vmem:[%s11613_s0 + $0x5a8] ss:$100 sps:$4 sm:$0xff]   ;;  %v8313_v30 = vld [vmem:[%s11613_s0 + $0x5b0] ss:$100 sps:$4 sm:$0xff]  }
 0x21d   :  { %v4885_v13 = vpop.f32.mrf.mxu0  ;;  %5973 = vmatprep.subr.bf16.mxu1 %v8671_v0  ;;  %v8319_v26 = vld [vmem:[%s11613_s0 + $0x674] ss:$100 sps:$4 sm:$0xff]   ;;  %v8322_v1 = vld [vmem:[%s11613_s0 + $0x67c] ss:$100 sps:$4 sm:$0xff]  }
 0x21e   :  { %v4886_v53 = vadd.f32 %v4885_v13, %v9813_v23  ;;  %v5062_v49 = vpop.f32.mrf.mxu1 }
 0x21f   :  { %v4887_v47 = vpop.f32.mrf.mxu0  ;;  %5797 = vmatpush2.bf16.msra.mxu0 %v8356_v34 }
 0x220   :  { %v10265_v23 = vadd.f32 %v5062_v49, %v4886_v53  ;;  %v5064_v51 = vpop.f32.mrf.mxu1  ;;  %5798 = vmatprep.subr.bf16.mxu0 %v8671_v0  ;;  %5974 = vmatpush2.bf16.msra.mxu1 %v8363_v60  ;;  %v8386_v60 = vld [vmem:[%s11612_s1 + $0x448] sm:$0xff]   ;;  %v8394_v47 = vld [vmem:[%s11612_s1 + $0x440] sm:$0xff]  }
 0x221   :  { %v5100_v22 = vpop.f32.mrf.mxu0  ;;  %5501 = vmatmul.mubr.bf16.gmra.mxu0 %v8303_v46  ;;  %5975 = vmatprep.subr.bf16.mxu1 %v8671_v0  ;;  %v8393_v46 = vld [vmem:[%s11612_s1 + $0x4c8] sm:$0xff]  }
 0x222   :  { %v5101_v7 = vadd.f32 %v5100_v22, %v9830_v45  ;;  %v5277_v55 = vpop.f32.mrf.mxu1  ;;  %5678 = vmatmul.mubr.bf16.gmra.mxu1 %v8306_v36  ;;  %5508 = vmatprep.mubr.bf16.mxu0 %v8312_v11  ;;  %v8379_v45 = vld [vmem:[%s11612_s1 + $0x4d0] sm:$0xff]  }
 0x223   :  { %v5102_v8 = vpop.f32.mrf.mxu0  ;;  %5685 = vmatprep.mubr.bf16.mxu1 %v8315_v35  ;;  %5799 = vmatpush2.bf16.msra.mxu0 %v8364_v18 }
 0x224   :  { %v10276_v5 = vadd.f32 %v5277_v55, %v5101_v7  ;;  %v5279_v43 = vpop.f32.mrf.mxu1  ;;  %5800 = vmatprep.subr.bf16.mxu0 %v8671_v0  ;;  %5976 = vmatpush2.bf16.msra.mxu1 %v8371_v6  ;;  %v8317_v6 = vld [vmem:[%s11613_s0 + $0x670] ss:$100 sps:$4 sm:$0xff]   ;;  %v8320_v55 = vld [vmem:[%s11613_s0 + $0x678] ss:$100 sps:$4 sm:$0xff]  }
 0x225   :  { %v5103_v57 = vpop.f32.mrf.mxu0  ;;  %5977 = vmatprep.subr.bf16.mxu1 %v8671_v0  ;;  %v8327_v8 = vld [vmem:[%s11613_s0 + $0x73c] ss:$100 sps:$4 sm:$0xff]   ;;  %v8330_v43 = vld [vmem:[%s11613_s0 + $0x744] ss:$100 sps:$4 sm:$0xff]  }
 0x226   :  { %v5104_v4 = vadd.f32 %v5103_v57, %v9847_v63  ;;  %v5280_v44 = vpop.f32.mrf.mxu1 }
 0x227   :  { %v5105_v34 = vpop.f32.mrf.mxu0  ;;  %5801 = vmatpush2.bf16.msra.mxu0 %v8372_v33 }
 0x228   :  { %v10299_v63 = vadd.f32 %v5280_v44, %v5104_v4  ;;  %v5282_v13 = vpop.f32.mrf.mxu1  ;;  %5802 = vmatprep.subr.bf16.mxu0 %v8671_v0  ;;  %5978 = vmatpush2.bf16.msra.mxu1 %v8379_v45 }
 0x229   :  { %v5108_v53 = vpop.f32.mrf.mxu0  ;;  %5509 = vmatmul.mubr.bf16.gmra.mxu0 %v8310_v29  ;;  %5979 = vmatprep.subr.bf16.mxu1 %v8671_v0 }
 0x22a   :  { %v5109_v49 = vadd.f32 %v5108_v53, %v9864_v25  ;;  %v5285_v36 = vpop.f32.mrf.mxu1  ;;  %5686 = vmatmul.mubr.bf16.gmra.mxu1 %v8313_v30  ;;  %5516 = vmatprep.mubr.bf16.mxu0 %v8319_v26  ;;  %v8395_v25 = vld [vmem:[%s11612_s1 + $0x4c0] sm:$0xff]  }
 0x22b   :  { %v5110_v11 = vpop.f32.mrf.mxu0  ;;  %5693 = vmatprep.mubr.bf16.mxu1 %v8322_v1  ;;  %5803 = vmatpush2.bf16.msra.mxu0 %v8386_v60  ;;  %v8325_v1 = vld [vmem:[%s11613_s0 + $0x738] ss:$100 sps:$4 sm:$0xff]  }
 0x22c   :  { %v10310_v35 = vadd.f32 %v5285_v36, %v5109_v49  ;;  %v5287_v18 = vpop.f32.mrf.mxu1  ;;  %5804 = vmatprep.subr.bf16.mxu0 %v8671_v0  ;;  %5980 = vmatpush2.bf16.msra.mxu1 %v8393_v46  ;;  %v8335_v46 = vld [vmem:[%s11613_s0 + $0x804] ss:$100 sps:$4 sm:$0xff]   ;;  %v8338_v49 = vld [vmem:[%s11613_s0 + $0x80c] ss:$100 sps:$4 sm:$0xff]  }
 0x22d   :  { %v5111_v51 = vpop.f32.mrf.mxu0  ;;  %5981 = vmatprep.subr.bf16.mxu1 %v8671_v0 }
 0x22e   :  { %v5112_v22 = vadd.f32 %v5111_v51, %v9878_v40  ;;  %v5288_v7 = vpop.f32.mrf.mxu1 }
 0x22f   :  { %v5113_v33 = vpop.f32.mrf.mxu0  ;;  %5805 = vmatpush2.bf16.msra.mxu0 %v8394_v47 }
 0x230   :  { %v10330_v45 = vadd.f32 %v5288_v7, %v5112_v22  ;;  %v5290_v57 = vpop.f32.mrf.mxu1  ;;  %5982 = vmatpush2.bf16.msra.mxu1 %v8395_v25  ;;  %6128 = vmatprep.subr.bf16.mxu0 %v8671_v0  ;;  %v8333_v7 = vld [vmem:[%s11613_s0 + $0x800] ss:$100 sps:$4 sm:$0xff]   ;;  %v8343_v33 = vld [vmem:[%s11613_s0 + $0x8cc] ss:$100 sps:$4 sm:$0xff]  }
 0x231   :  { %v5116_v40 = vpop.f32.mrf.mxu0  ;;  %5517 = vmatmul.mubr.bf16.gmra.mxu0 %v8317_v6  ;;  %6305 = vmatprep.subr.bf16.mxu1 %v8671_v0  ;;  %v8346_v57 = vld [vmem:[%s11613_s0 + $0x8d4] ss:$100 sps:$4 sm:$0xff]  }
 0x232   :  { %v5117_v29 = vadd.f32 %v5116_v40, %v9883_v52  ;;  %v5293_v4 = vpop.f32.mrf.mxu1  ;;  %5694 = vmatmul.mubr.bf16.gmra.mxu1 %v8320_v55  ;;  %5524 = vmatprep.mubr.bf16.mxu0 %v8327_v8  ;;  %v8328_v52 = vld [vmem:[%s11613_s0 + $0x740] ss:$100 sps:$4 sm:$0xff]  }
 0x233   :  { %v5118_v44 = vpop.f32.mrf.mxu0  ;;  %5701 = vmatprep.mubr.bf16.mxu1 %v8330_v43 }
 0x234   :  { %v10335_v30 = vadd.f32 %v5293_v4, %v5117_v29  ;;  %v5295_v26 = vpop.f32.mrf.mxu1 }
 0x235   :  { %v5119_v34 = vpop.f32.mrf.mxu0 }
 0x236   :  { %v5120_v60 = vadd.f32 %v5119_v34, %v9898_v10  ;;  %v5296_v13 = vpop.f32.mrf.mxu1 }
 0x237   :  { %v5121_v53 = vpop.f32.mrf.mxu0 }
 0x238   :  { %v10350_v36 = vadd.f32 %v5296_v13, %v5120_v60  ;;  %v5298_v11 = vpop.f32.mrf.mxu1  ;;  %v8341_v13 = vld [vmem:[%s11613_s0 + $0x8c8] ss:$100 sps:$4 sm:$0xff]   ;;  %v8351_v53 = vld [vmem:[%s11613_s0 + $0x994] ss:$100 sps:$4 sm:$0xff]  }
 0x239   :  { %v5124_v47 = vpop.f32.mrf.mxu0  ;;  %5525 = vmatmul.mubr.bf16.gmra.mxu0 %v8325_v1  ;;  %v8354_v11 = vld [vmem:[%s11613_s0 + $0x99c] ss:$100 sps:$4 sm:$0xff]  }
 0x23a   :  { %v5125_v10 = vadd.f32 %v5124_v47, %v9901_v9  ;;  %v5301_v18 = vpop.f32.mrf.mxu1  ;;  %5702 = vmatmul.mubr.bf16.gmra.mxu1 %v8328_v52  ;;  %5532 = vmatprep.mubr.bf16.mxu0 %v8335_v46  ;;  %v8336_v9 = vld [vmem:[%s11613_s0 + $0x808] ss:$100 sps:$4 sm:$0xff]  }
 0x23b   :  { %v5126_v25 = vpop.f32.mrf.mxu0  ;;  %5709 = vmatprep.mubr.bf16.mxu1 %v8338_v49 }
 0x23c   :  { %v10353_v51 = vadd.f32 %v5301_v18, %v5125_v10  ;;  %v5303_v6 = vpop.f32.mrf.mxu1 }
 0x23d   :  { %v5127_v22 = vpop.f32.mrf.mxu0 }
 0x23e   :  { %v5128_v55 = vadd.f32 %v5127_v22, %v9916_v12  ;;  %v5304_v8 = vpop.f32.mrf.mxu1 }
 0x23f   :  { %v5129_v43 = vpop.f32.mrf.mxu0 }
 0x240   :  { %v10368_v40 = vadd.f32 %v5304_v8, %v5128_v55  ;;  %v5306_v29 = vpop.f32.mrf.mxu1  ;;  %v8349_v8 = vld [vmem:[%s11613_s0 + $0x990] ss:$100 sps:$4 sm:$0xff]   ;;  %v8359_v43 = vld [vmem:[%s11613_s0 + $0xa5c] ss:$100 sps:$4 sm:$0xff]  }
 0x241   :  { %v5132_v4 = vpop.f32.mrf.mxu0  ;;  %5533 = vmatmul.mubr.bf16.gmra.mxu0 %v8333_v7  ;;  %v8362_v29 = vld [vmem:[%s11613_s0 + $0xa64] ss:$100 sps:$4 sm:$0xff]  }
 0x242   :  { %v5133_v12 = vadd.f32 %v5132_v4, %v9919_v58  ;;  %v5309_v44 = vpop.f32.mrf.mxu1  ;;  %5710 = vmatmul.mubr.bf16.gmra.mxu1 %v8336_v9  ;;  %5540 = vmatprep.mubr.bf16.mxu0 %v8343_v33  ;;  %v8344_v58 = vld [vmem:[%s11613_s0 + $0x8d0] ss:$100 sps:$4 sm:$0xff]  }
 0x243   :  { %v5134_v26 = vpop.f32.mrf.mxu0  ;;  %5717 = vmatprep.mubr.bf16.mxu1 %v8346_v57 }
 0x244   :  { %v10371_v34 = vadd.f32 %v5309_v44, %v5133_v12  ;;  %v5311_v1 = vpop.f32.mrf.mxu1 }
 0x245   :  { %v5135_v60 = vpop.f32.mrf.mxu0 }
 0x246   :  { %v5136_v52 = vadd.f32 %v5135_v60, %v9934_v16  ;;  %v5312_v46 = vpop.f32.mrf.mxu1 }
 0x247   :  { %v5137_v49 = vpop.f32.mrf.mxu0 }
 0x248   :  { %v10386_v47 = vadd.f32 %v5312_v46, %v5136_v52  ;;  %v5314_v10 = vpop.f32.mrf.mxu1  ;;  %v8357_v46 = vld [vmem:[%s11613_s0 + $0xa58] ss:$100 sps:$4 sm:$0xff]   ;;  %v8367_v49 = vld [vmem:[%s11613_s0 + $0xb24] ss:$100 sps:$4 sm:$0xff]  }
 0x249   :  { %v5140_v18 = vpop.f32.mrf.mxu0  ;;  %5541 = vmatmul.mubr.bf16.gmra.mxu0 %v8341_v13  ;;  %v8370_v10 = vld [vmem:[%s11613_s0 + $0xb2c] ss:$100 sps:$4 sm:$0xff]  }
 0x24a   :  { %v5141_v16 = vadd.f32 %v5140_v18, %v9937_v28  ;;  %v5317_v25 = vpop.f32.mrf.mxu1  ;;  %5718 = vmatmul.mubr.bf16.gmra.mxu1 %v8344_v58  ;;  %5548 = vmatprep.mubr.bf16.mxu0 %v8351_v53  ;;  %v8352_v28 = vld [vmem:[%s11613_s0 + $0x998] ss:$100 sps:$4 sm:$0xff]  }
 0x24b   :  { %v5142_v6 = vpop.f32.mrf.mxu0  ;;  %5725 = vmatprep.mubr.bf16.mxu1 %v8354_v11 }
 0x24c   :  { %v10389_v22 = vadd.f32 %v5317_v25, %v5141_v16  ;;  %v5319_v7 = vpop.f32.mrf.mxu1 }
 0x24d   :  { %v5143_v55 = vpop.f32.mrf.mxu0 }
 0x24e   :  { %v5144_v9 = vadd.f32 %v5143_v55, %v9952_v41  ;;  %v5320_v33 = vpop.f32.mrf.mxu1 }
 0x24f   :  { %v5145_v57 = vpop.f32.mrf.mxu0 }
 0x250   :  { %v10404_v4 = vadd.f32 %v5320_v33, %v5144_v9  ;;  %v5322_v12 = vpop.f32.mrf.mxu1  ;;  %v8365_v33 = vld [vmem:[%s11613_s0 + $0xb20] ss:$100 sps:$4 sm:$0xff]   ;;  %v8375_v57 = vld [vmem:[%s11613_s0 + $0xbec] ss:$100 sps:$4 sm:$0xff]  }
 0x251   :  { %v5148_v44 = vpop.f32.mrf.mxu0  ;;  %5549 = vmatmul.mubr.bf16.gmra.mxu0 %v8349_v8  ;;  %v8378_v12 = vld [vmem:[%s11613_s0 + $0xbf4] ss:$100 sps:$4 sm:$0xff]  }
 0x252   :  { %v5149_v41 = vadd.f32 %v5148_v44, %v9955_v61  ;;  %v5325_v26 = vpop.f32.mrf.mxu1  ;;  %5726 = vmatmul.mubr.bf16.gmra.mxu1 %v8352_v28  ;;  %5556 = vmatprep.mubr.bf16.mxu0 %v8359_v43  ;;  %v8360_v61 = vld [vmem:[%s11613_s0 + $0xa60] ss:$100 sps:$4 sm:$0xff]  }
 0x253   :  { %v5150_v1 = vpop.f32.mrf.mxu0  ;;  %5733 = vmatprep.mubr.bf16.mxu1 %v8362_v29 }
 0x254   :  { %v10407_v60 = vadd.f32 %v5325_v26, %v5149_v41  ;;  %v5327_v13 = vpop.f32.mrf.mxu1 }
 0x255   :  { %v5151_v52 = vpop.f32.mrf.mxu0 }
 0x256   :  { %v5152_v58 = vadd.f32 %v5151_v52, %v9970_v17  ;;  %v5328_v53 = vpop.f32.mrf.mxu1 }
 0x257   :  { %v5153_v11 = vpop.f32.mrf.mxu0 }
 0x258   :  { %v10422_v18 = vadd.f32 %v5328_v53, %v5152_v58  ;;  %v5330_v16 = vpop.f32.mrf.mxu1  ;;  %v8373_v53 = vld [vmem:[%s11613_s0 + $0xbe8] ss:$100 sps:$4 sm:$0xff]   ;;  %v8382_v11 = vld [vmem:[%s11613_s0 + $0xcb4] ss:$100 sps:$4 sm:$0xff]  }
 0x259   :  { %v5156_v25 = vpop.f32.mrf.mxu0  ;;  %5557 = vmatmul.mubr.bf16.gmra.mxu0 %v8357_v46  ;;  %v8385_v16 = vld [vmem:[%s11613_s0 + $0xcbc] ss:$100 sps:$4 sm:$0xff]  }
 0x25a   :  { %v5157_v17 = vadd.f32 %v5156_v25, %v9973_v31  ;;  %v5333_v6 = vpop.f32.mrf.mxu1  ;;  %5734 = vmatmul.mubr.bf16.gmra.mxu1 %v8360_v61  ;;  %5564 = vmatprep.mubr.bf16.mxu0 %v8367_v49  ;;  %v8368_v31 = vld [vmem:[%s11613_s0 + $0xb28] ss:$100 sps:$4 sm:$0xff]  }
 0x25b   :  { %v5158_v7 = vpop.f32.mrf.mxu0  ;;  %5741 = vmatprep.mubr.bf16.mxu1 %v8370_v10 }
 0x25c   :  { %v10425_v55 = vadd.f32 %v5333_v6, %v5157_v17  ;;  %v5335_v8 = vpop.f32.mrf.mxu1 }
 0x25d   :  { %v5159_v9 = vpop.f32.mrf.mxu0 }
 0x25e   :  { %v5160_v28 = vadd.f32 %v5159_v9, %v9988_v50  ;;  %v5336_v43 = vpop.f32.mrf.mxu1 }
 0x25f   :  { %v5161_v29 = vpop.f32.mrf.mxu0 }
 0x260   :  { %v10440_v44 = vadd.f32 %v5336_v43, %v5160_v28  ;;  %v5338_v41 = vpop.f32.mrf.mxu1  ;;  %v8380_v43 = vld [vmem:[%s11613_s0 + $0xcb0] ss:$100 sps:$4 sm:$0xff]   ;;  %v8389_v29 = vld [vmem:[%s11613_s0 + $0xd7c] ss:$100 sps:$4 sm:$0xff]  }
 0x261   :  { %v5164_v26 = vpop.f32.mrf.mxu0  ;;  %5565 = vmatmul.mubr.bf16.gmra.mxu0 %v8365_v33  ;;  %v8392_v41 = vld [vmem:[%s11613_s0 + $0xd84] ss:$100 sps:$4 sm:$0xff]  }
 0x262   :  { %v5165_v50 = vadd.f32 %v5164_v26, %v9991_v48  ;;  %v5341_v1 = vpop.f32.mrf.mxu1  ;;  %5742 = vmatmul.mubr.bf16.gmra.mxu1 %v8368_v31  ;;  %5572 = vmatprep.mubr.bf16.mxu0 %v8375_v57  ;;  %v8376_v48 = vld [vmem:[%s11613_s0 + $0xbf0] ss:$100 sps:$4 sm:$0xff]  }
 0x263   :  { %v5166_v13 = vpop.f32.mrf.mxu0  ;;  %5749 = vmatprep.mubr.bf16.mxu1 %v8378_v12 }
 0x264   :  { %v10443_v52 = vadd.f32 %v5341_v1, %v5165_v50  ;;  %v5343_v46 = vpop.f32.mrf.mxu1 }
 0x265   :  { %v5167_v58 = vpop.f32.mrf.mxu0 }
 0x266   :  { %v5168_v61 = vadd.f32 %v5167_v58, %v10006_v21  ;;  %v5344_v49 = vpop.f32.mrf.mxu1 }
 0x267   :  { %v5169_v10 = vpop.f32.mrf.mxu0 }
 0x268   :  { %v10458_v25 = vadd.f32 %v5344_v49, %v5168_v61  ;;  %v5346_v17 = vpop.f32.mrf.mxu1  ;;  %v8387_v49 = vld [vmem:[%s11613_s0 + $0xd78] ss:$100 sps:$4 sm:$0xff]   ;;  %v8398_v10 = vld [vmem:[%s11613_s0 + $0x44] ss:$100 sps:$4 sm:$0xff]  }
 0x269   :  { %v5172_v6 = vpop.f32.mrf.mxu0  ;;  %5573 = vmatmul.mubr.bf16.gmra.mxu0 %v8373_v53  ;;  %v8401_v17 = vld [vmem:[%s11613_s0 + $0x4c] ss:$100 sps:$4 sm:$0xff]  }
 0x26a   :  { %v5173_v21 = vadd.f32 %v5172_v6, %v10009_v2  ;;  %v5349_v7 = vpop.f32.mrf.mxu1  ;;  %5750 = vmatmul.mubr.bf16.gmra.mxu1 %v8376_v48  ;;  %5580 = vmatprep.mubr.bf16.mxu0 %v8382_v11  ;;  %v8383_v2 = vld [vmem:[%s11613_s0 + $0xcb8] ss:$100 sps:$4 sm:$0xff]  }
 0x26b   :  { %v5174_v8 = vpop.f32.mrf.mxu0  ;;  %5757 = vmatprep.mubr.bf16.mxu1 %v8385_v16 }
 0x26c   :  { %v10461_v9 = vadd.f32 %v5349_v7, %v5173_v21  ;;  %v5351_v33 = vpop.f32.mrf.mxu1 }
 0x26d   :  { %v5175_v28 = vpop.f32.mrf.mxu0 }
 0x26e   :  { %v5176_v31 = vadd.f32 %v5175_v28, %v10024_v56  ;;  %v5352_v57 = vpop.f32.mrf.mxu1 }
 0x26f   :  { %v5177_v12 = vpop.f32.mrf.mxu0 }
 0x270   :  { %v10476_v26 = vadd.f32 %v5352_v57, %v5176_v31  ;;  %v5354_v50 = vpop.f32.mrf.mxu1  ;;  %v8396_v57 = vld [vmem:[%s11613_s0 + $0x40] ss:$100 sps:$4 sm:$0xff]   ;;  %v8402_v12 = vld [vmem:[%s11612_s1 + $0x538] sm:$0xff]  }
 0x271   :  { %v5180_v1 = vpop.f32.mrf.mxu0  ;;  %5581 = vmatmul.mubr.bf16.gmra.mxu0 %v8380_v43  ;;  %v8405_v50 = vld [vmem:[%s11613_s0 + $0x10c] ss:$100 sps:$4 sm:$0xff]  }
 0x272   :  { %v5181_v56 = vadd.f32 %v5180_v1, %v10027_v19  ;;  %v5357_v13 = vpop.f32.mrf.mxu1  ;;  %5758 = vmatmul.mubr.bf16.gmra.mxu1 %v8383_v2  ;;  %5588 = vmatprep.mubr.bf16.mxu0 %v8389_v29  ;;  %v8390_v19 = vld [vmem:[%s11613_s0 + $0xd80] ss:$100 sps:$4 sm:$0xff]   ;;  %v8408_v1 = vld [vmem:[%s11613_s0 + $0x114] ss:$100 sps:$4 sm:$0xff]  }
 0x273   :  { %v5182_v46 = vpop.f32.mrf.mxu0  ;;  %5765 = vmatprep.mubr.bf16.mxu1 %v8392_v41 }
 0x274   :  { %v10479_v58 = vadd.f32 %v5357_v13, %v5181_v56  ;;  %v5359_v53 = vpop.f32.mrf.mxu1  ;;  %v8409_v13 = vld [vmem:[%s11612_s1 + $0x5b8] sm:$0xff]  }
 0x275   :  { %v5183_v61 = vpop.f32.mrf.mxu0 }
 0x276   :  { %v5184_v48 = vadd.f32 %v5183_v61, %v10042_v32  ;;  %v5360_v11 = vpop.f32.mrf.mxu1 }
 0x277   :  { %v5185_v16 = vpop.f32.mrf.mxu0 }
 0x278   :  { %v10494_v6 = vadd.f32 %v5360_v11, %v5184_v48  ;;  %v5362_v21 = vpop.f32.mrf.mxu1  ;;  %v8403_v16 = vld [vmem:[%s11613_s0 + $0x108] ss:$100 sps:$4 sm:$0xff]  }
 0x279   :  { %v5188_v7 = vpop.f32.mrf.mxu0  ;;  %5589 = vmatmul.mubr.bf16.gmra.mxu0 %v8387_v49  ;;  %v8410_v49 = vld [vmem:[%s11612_s1 + $0x530] sm:$0xff]  }
 0x27a   :  { %v5189_v32 = vadd.f32 %v5188_v7, %v10045_v37  ;;  %v5365_v8 = vpop.f32.mrf.mxu1  ;;  %5766 = vmatmul.mubr.bf16.gmra.mxu1 %v8390_v19  ;;  %5806 = vmatprep.mubr.bf16.mxu0 %v8398_v10  ;;  %v8399_v37 = vld [vmem:[%s11613_s0 + $0x48] ss:$100 sps:$4 sm:$0xff]   ;;  %v8406_v7 = vld [vmem:[%s11613_s0 + $0x110] ss:$100 sps:$4 sm:$0xff]  }
 0x27b   :  { %v5190_v33 = vpop.f32.mrf.mxu0  ;;  %5983 = vmatprep.mubr.bf16.mxu1 %v8401_v17 }
 0x27c   :  { %v10497_v28 = vadd.f32 %v5365_v8, %v5189_v32  ;;  %v5367_v43 = vpop.f32.mrf.mxu1  ;;  %v8413_v32 = vld [vmem:[%s11613_s0 + $0x1d4] ss:$100 sps:$4 sm:$0xff]   ;;  %v8416_v33 = vld [vmem:[%s11613_s0 + $0x1dc] ss:$100 sps:$4 sm:$0xff]  }
 0x27d   :  { %v5191_v31 = vpop.f32.mrf.mxu0 }
 0x27e   :  { %v5192_v2 = vadd.f32 %v5191_v31, %v10063_v3  ;;  %v5368_v29 = vpop.f32.mrf.mxu1 }
 0x27f   :  { %v5193_v41 = vpop.f32.mrf.mxu0 }
 0x280   :  { %v10515_v56 = vadd.f32 %v5368_v29, %v5192_v2  ;;  %v5370_v3 = vpop.f32.mrf.mxu1  ;;  %v8426_v41 = vld [vmem:[%s11612_s1 + $0x520] sm:$0xff]  }
 0x281   :  { %v5196_v46 = vpop.f32.mrf.mxu0  ;;  %5807 = vmatmul.mubr.bf16.vlgmr.msra.gmra.mxu0 %v8396_v57  ;;  %v8425_v57 = vld [vmem:[%s11612_s1 + $0x5a8] sm:$0xff]  }
 0x282   :  { %v5197_v53 = vadd.f32 %v5196_v46, %v10072_v15  ;;  %v5373_v61 = vpop.f32.mrf.mxu1  ;;  %5984 = vmatmul.mubr.bf16.vlgmr.msra.gmra.mxu1 %v8399_v37  ;;  %6129 = vmatpush1.bf16.msra.mxu0 %v8402_v12  ;;  %v8417_v15 = vld [vmem:[%s11612_s1 + $0x5b0] sm:$0xff]  }
 0x283   :  { %v5198_v48 = vpop.f32.mrf.mxu0  ;;  %5814 = vmatprep.mubr.bf16.mxu0 %v8405_v50  ;;  %5991 = vmatprep.mubr.bf16.mxu1 %v8408_v1 }
 0x284   :  { %v10524_v11 = vadd.f32 %v5373_v61, %v5197_v53  ;;  %v5375_v19 = vpop.f32.mrf.mxu1  ;;  %6130 = vmatprep.subr.bf16.mxu0 %v8671_v0  ;;  %6306 = vmatpush1.bf16.msra.mxu1 %v8409_v13  ;;  %v8411_v13 = vld [vmem:[%s11613_s0 + $0x1d0] ss:$100 sps:$4 sm:$0xff]   ;;  %v8414_v61 = vld [vmem:[%s11613_s0 + $0x1d8] ss:$100 sps:$4 sm:$0xff]  }
 0x285   :  { %v5199_v10 = vpop.f32.mrf.mxu0  ;;  %6307 = vmatprep.subr.bf16.mxu1 %v8671_v0  ;;  %v8424_v19 = vld [vmem:[%s11613_s0 + $0x2a4] ss:$100 sps:$4 sm:$0xff]  }
 0x286   :  { %v5200_v17 = vadd.f32 %v5199_v10, %v10096_v39  ;;  %v5376_v21 = vpop.f32.mrf.mxu1  ;;  %6131 = vmatpush1.bf16.msra.mxu0 %v8410_v49  ;;  %v8418_v39 = vld [vmem:[%s11612_s1 + $0x528] sm:$0xff]   ;;  %v8421_v49 = vld [vmem:[%s11613_s0 + $0x29c] ss:$100 sps:$4 sm:$0xff]  }
 0x287   :  { %v5201_v8 = vpop.f32.mrf.mxu0  ;;  %6132 = vmatprep.subr.bf16.mxu0 %v8671_v0 }
 0x288   :  { %v10548_v43 = vadd.f32 %v5376_v21, %v5200_v17  ;;  %v5378_v31 = vpop.f32.mrf.mxu1  ;;  %6308 = vmatpush1.bf16.msra.mxu1 %v8417_v15  ;;  %v8434_v15 = vld [vmem:[%s11612_s1 + $0x518] sm:$0xff]   ;;  %v8442_v8 = vld [vmem:[%s11612_s1 + $0x510] sm:$0xff]  }
 0x289   :  { %v5204_v2 = vpop.f32.mrf.mxu0  ;;  %5815 = vmatmul.mubr.bf16.gmra.mxu0 %v8403_v16  ;;  %6309 = vmatprep.subr.bf16.mxu1 %v8671_v0  ;;  %v8441_v16 = vld [vmem:[%s11612_s1 + $0x598] sm:$0xff]  }
 0x28a   :  { %v5205_v29 = vadd.f32 %v5204_v2, %v10106_v24  ;;  %v5381_v37 = vpop.f32.mrf.mxu1  ;;  %5992 = vmatmul.mubr.bf16.gmra.mxu1 %v8406_v7  ;;  %5822 = vmatprep.mubr.bf16.mxu0 %v8413_v32  ;;  %v8433_v24 = vld [vmem:[%s11612_s1 + $0x5a0] sm:$0xff]  }
 0x28b   :  { %v5206_v12 = vpop.f32.mrf.mxu0  ;;  %5999 = vmatprep.mubr.bf16.mxu1 %v8416_v33  ;;  %6133 = vmatpush1.bf16.msra.mxu0 %v8418_v39 }
 0x28c   :  { %v10558_v50 = vadd.f32 %v5381_v37, %v5205_v29  ;;  %v5383_v1 = vpop.f32.mrf.mxu1  ;;  %6134 = vmatprep.subr.bf16.mxu0 %v8671_v0  ;;  %6310 = vmatpush1.bf16.msra.mxu1 %v8425_v57  ;;  %v8419_v57 = vld [vmem:[%s11613_s0 + $0x298] ss:$100 sps:$4 sm:$0xff]   ;;  %v8422_v37 = vld [vmem:[%s11613_s0 + $0x2a0] ss:$100 sps:$4 sm:$0xff]  }
 0x28d   :  { %v5207_v3 = vpop.f32.mrf.mxu0  ;;  %6311 = vmatprep.subr.bf16.mxu1 %v8671_v0  ;;  %v8429_v12 = vld [vmem:[%s11613_s0 + $0x364] ss:$100 sps:$4 sm:$0xff]   ;;  %v8432_v1 = vld [vmem:[%s11613_s0 + $0x36c] ss:$100 sps:$4 sm:$0xff]  }
 0x28e   :  { %v5208_v46 = vadd.f32 %v5207_v3, %v10129_v54  ;;  %v5384_v53 = vpop.f32.mrf.mxu1 }
 0x28f   :  { %v5209_v48 = vpop.f32.mrf.mxu0  ;;  %6135 = vmatpush1.bf16.msra.mxu0 %v8426_v41 }
 0x290   :  { %v10581_v54 = vadd.f32 %v5384_v53, %v5208_v46  ;;  %v5386_v10 = vpop.f32.mrf.mxu1  ;;  %6136 = vmatprep.subr.bf16.mxu0 %v8671_v0  ;;  %6312 = vmatpush1.bf16.msra.mxu1 %v8433_v24  ;;  %v8456_v24 = vld [vmem:[%s11612_s1 + $0x508] sm:$0xff]   ;;  %v8464_v48 = vld [vmem:[%s11612_s1 + $0x500] sm:$0xff]  }
 0x291   :  { %v5212_v17 = vpop.f32.mrf.mxu0  ;;  %5823 = vmatmul.mubr.bf16.gmra.mxu0 %v8411_v13  ;;  %6313 = vmatprep.subr.bf16.mxu1 %v8671_v0  ;;  %v8463_v13 = vld [vmem:[%s11612_s1 + $0x588] sm:$0xff]  }
 0x292   :  { %v5213_v21 = vadd.f32 %v5212_v17, %v10140_v38  ;;  %v5389_v7 = vpop.f32.mrf.mxu1  ;;  %6000 = vmatmul.mubr.bf16.gmra.mxu1 %v8414_v61  ;;  %5830 = vmatprep.mubr.bf16.mxu0 %v8421_v49  ;;  %v8449_v38 = vld [vmem:[%s11612_s1 + $0x590] sm:$0xff]  }
 0x293   :  { %v5214_v32 = vpop.f32.mrf.mxu0  ;;  %6007 = vmatprep.mubr.bf16.mxu1 %v8424_v19  ;;  %6137 = vmatpush1.bf16.msra.mxu0 %v8434_v15 }
 0x294   :  { %v10592_v33 = vadd.f32 %v5389_v7, %v5213_v21  ;;  %v5391_v39 = vpop.f32.mrf.mxu1  ;;  %6138 = vmatprep.subr.bf16.mxu0 %v8671_v0  ;;  %6314 = vmatpush1.bf16.msra.mxu1 %v8441_v16  ;;  %v8427_v16 = vld [vmem:[%s11613_s0 + $0x360] ss:$100 sps:$4 sm:$0xff]   ;;  %v8430_v7 = vld [vmem:[%s11613_s0 + $0x368] ss:$100 sps:$4 sm:$0xff]  }
 0x295   :  { %v5215_v31 = vpop.f32.mrf.mxu0  ;;  %6315 = vmatprep.subr.bf16.mxu1 %v8671_v0  ;;  %v8437_v32 = vld [vmem:[%s11613_s0 + $0x42c] ss:$100 sps:$4 sm:$0xff]   ;;  %v8440_v39 = vld [vmem:[%s11613_s0 + $0x434] ss:$100 sps:$4 sm:$0xff]  }
 0x296   :  { %v5216_v2 = vadd.f32 %v5215_v31, %v10163_v27  ;;  %v5392_v29 = vpop.f32.mrf.mxu1 }
 0x297   :  { %v5217_v41 = vpop.f32.mrf.mxu0  ;;  %6139 = vmatpush1.bf16.msra.mxu0 %v8442_v8 }
 0x298   :  { %v10615_v27 = vadd.f32 %v5392_v29, %v5216_v2  ;;  %v5394_v3 = vpop.f32.mrf.mxu1  ;;  %6140 = vmatprep.subr.bf16.mxu0 %v8671_v0  ;;  %6316 = vmatpush1.bf16.msra.mxu1 %v8449_v38  ;;  %v8472_v38 = vld [vmem:[%s11612_s1 + $0x578] sm:$0xff]   ;;  %v8480_v41 = vld [vmem:[%s11612_s1 + $0x570] sm:$0xff]  }
 0x299   :  { %v5220_v46 = vpop.f32.mrf.mxu0  ;;  %5831 = vmatmul.mubr.bf16.gmra.mxu0 %v8419_v57  ;;  %6317 = vmatprep.subr.bf16.mxu1 %v8671_v0  ;;  %v8479_v57 = vld [vmem:[%s11612_s1 + $0x5f8] sm:$0xff]  }
 0x29a   :  { %v5221_v53 = vadd.f32 %v5220_v46, %v10174_v14  ;;  %v5397_v61 = vpop.f32.mrf.mxu1  ;;  %6008 = vmatmul.mubr.bf16.gmra.mxu1 %v8422_v37  ;;  %5838 = vmatprep.mubr.bf16.mxu0 %v8429_v12  ;;  %v8471_v14 = vld [vmem:[%s11612_s1 + $0x580] sm:$0xff]  }
 0x29b   :  { %v5222_v49 = vpop.f32.mrf.mxu0  ;;  %6015 = vmatprep.mubr.bf16.mxu1 %v8432_v1  ;;  %6141 = vmatpush1.bf16.msra.mxu0 %v8456_v24 }
 0x29c   :  { %v10626_v19 = vadd.f32 %v5397_v61, %v5221_v53  ;;  %v5399_v15 = vpop.f32.mrf.mxu1  ;;  %6142 = vmatprep.subr.bf16.mxu0 %v8671_v0  ;;  %6318 = vmatpush1.bf16.msra.mxu1 %v8463_v13  ;;  %v8435_v13 = vld [vmem:[%s11613_s0 + $0x428] ss:$100 sps:$4 sm:$0xff]   ;;  %v8438_v61 = vld [vmem:[%s11613_s0 + $0x430] ss:$100 sps:$4 sm:$0xff]  }
 0x29d   :  { %v5223_v10 = vpop.f32.mrf.mxu0  ;;  %6319 = vmatprep.subr.bf16.mxu1 %v8671_v0  ;;  %v8445_v49 = vld [vmem:[%s11613_s0 + $0x4f4] ss:$100 sps:$4 sm:$0xff]   ;;  %v8448_v15 = vld [vmem:[%s11613_s0 + $0x4fc] ss:$100 sps:$4 sm:$0xff]  }
 0x29e   :  { %v5224_v17 = vadd.f32 %v5223_v10, %v10197_v62  ;;  %v5400_v21 = vpop.f32.mrf.mxu1 }
 0x29f   :  { %v5225_v8 = vpop.f32.mrf.mxu0  ;;  %6143 = vmatpush1.bf16.msra.mxu0 %v8464_v48 }
 0x2a0   :  { %v10649_v62 = vadd.f32 %v5400_v21, %v5224_v17  ;;  %v5402_v31 = vpop.f32.mrf.mxu1  ;;  %6144 = vmatprep.subr.bf16.mxu0 %v8671_v0  ;;  %6320 = vmatpush1.bf16.msra.mxu1 %v8471_v14  ;;  %v8488_v14 = vld [vmem:[%s11612_s1 + $0x568] sm:$0xff]   ;;  %v8496_v8 = vld [vmem:[%s11612_s1 + $0x560] sm:$0xff]  }
 0x2a1   :  { %v5228_v2 = vpop.f32.mrf.mxu0  ;;  %5839 = vmatmul.mubr.bf16.gmra.mxu0 %v8427_v16  ;;  %6321 = vmatprep.subr.bf16.mxu1 %v8671_v0  ;;  %v8495_v16 = vld [vmem:[%s11612_s1 + $0x5e8] sm:$0xff]  }
 0x2a2   :  { %v5229_v29 = vadd.f32 %v5228_v2, %v10208_v59  ;;  %v5405_v37 = vpop.f32.mrf.mxu1  ;;  %6016 = vmatmul.mubr.bf16.gmra.mxu1 %v8430_v7  ;;  %5846 = vmatprep.mubr.bf16.mxu0 %v8437_v32  ;;  %v8487_v59 = vld [vmem:[%s11612_s1 + $0x5f0] sm:$0xff]  }
 0x2a3   :  { %v5230_v12 = vpop.f32.mrf.mxu0  ;;  %6023 = vmatprep.mubr.bf16.mxu1 %v8440_v39  ;;  %6145 = vmatpush2.bf16.msra.mxu0 %v8472_v38 }
 0x2a4   :  { %v10660_v1 = vadd.f32 %v5405_v37, %v5229_v29  ;;  %v5407_v24 = vpop.f32.mrf.mxu1  ;;  %6146 = vmatprep.subr.bf16.mxu0 %v8671_v0  ;;  %6322 = vmatpush2.bf16.msra.mxu1 %v8479_v57  ;;  %v8443_v57 = vld [vmem:[%s11613_s0 + $0x4f0] ss:$100 sps:$4 sm:$0xff]   ;;  %v8446_v37 = vld [vmem:[%s11613_s0 + $0x4f8] ss:$100 sps:$4 sm:$0xff]  }
 0x2a5   :  { %v5231_v3 = vpop.f32.mrf.mxu0  ;;  %6323 = vmatprep.subr.bf16.mxu1 %v8671_v0  ;;  %v8452_v12 = vld [vmem:[%s11613_s0 + $0x5bc] ss:$100 sps:$4 sm:$0xff]   ;;  %v8455_v24 = vld [vmem:[%s11613_s0 + $0x5c4] ss:$100 sps:$4 sm:$0xff]  }
 0x2a6   :  { %v5232_v46 = vadd.f32 %v5231_v3, %v10231_v42  ;;  %v5408_v53 = vpop.f32.mrf.mxu1 }
 0x2a7   :  { %v5233_v48 = vpop.f32.mrf.mxu0  ;;  %6147 = vmatpush2.bf16.msra.mxu0 %v8480_v41 }
 0x2a8   :  { %v10683_v42 = vadd.f32 %v5408_v53, %v5232_v46  ;;  %v5410_v10 = vpop.f32.mrf.mxu1  ;;  %6148 = vmatprep.subr.bf16.mxu0 %v8671_v0  ;;  %6324 = vmatpush2.bf16.msra.mxu1 %v8487_v59  ;;  %v8504_v59 = vld [vmem:[%s11612_s1 + $0x558] sm:$0xff]   ;;  %v8512_v48 = vld [vmem:[%s11612_s1 + $0x550] sm:$0xff]  }
 0x2a9   :  { %v5236_v17 = vpop.f32.mrf.mxu0  ;;  %5847 = vmatmul.mubr.bf16.gmra.mxu0 %v8435_v13  ;;  %6325 = vmatprep.subr.bf16.mxu1 %v8671_v0  ;;  %v8511_v13 = vld [vmem:[%s11612_s1 + $0x5d8] sm:$0xff]  }
 0x2aa   :  { %v5237_v21 = vadd.f32 %v5236_v17, %v10242_v20  ;;  %v5413_v7 = vpop.f32.mrf.mxu1  ;;  %6024 = vmatmul.mubr.bf16.gmra.mxu1 %v8438_v61  ;;  %5854 = vmatprep.mubr.bf16.mxu0 %v8445_v49  ;;  %v8503_v20 = vld [vmem:[%s11612_s1 + $0x5e0] sm:$0xff]  }
 0x2ab   :  { %v5238_v32 = vpop.f32.mrf.mxu0  ;;  %6031 = vmatprep.mubr.bf16.mxu1 %v8448_v15  ;;  %6149 = vmatpush2.bf16.msra.mxu0 %v8488_v14 }
 0x2ac   :  { %v10694_v39 = vadd.f32 %v5413_v7, %v5237_v21  ;;  %v5415_v38 = vpop.f32.mrf.mxu1  ;;  %6150 = vmatprep.subr.bf16.mxu0 %v8671_v0  ;;  %6326 = vmatpush2.bf16.msra.mxu1 %v8495_v16  ;;  %v8450_v16 = vld [vmem:[%s11613_s0 + $0x5b8] ss:$100 sps:$4 sm:$0xff]   ;;  %v8453_v7 = vld [vmem:[%s11613_s0 + $0x5c0] ss:$100 sps:$4 sm:$0xff]  }
 0x2ad   :  { %v5239_v31 = vpop.f32.mrf.mxu0  ;;  %6327 = vmatprep.subr.bf16.mxu1 %v8671_v0  ;;  %v8459_v32 = vld [vmem:[%s11613_s0 + $0x684] ss:$100 sps:$4 sm:$0xff]   ;;  %v8462_v38 = vld [vmem:[%s11613_s0 + $0x68c] ss:$100 sps:$4 sm:$0xff]  }
 0x2ae   :  { %v5240_v2 = vadd.f32 %v5239_v31, %v10265_v23  ;;  %v5416_v29 = vpop.f32.mrf.mxu1 }
 0x2af   :  { %v5241_v41 = vpop.f32.mrf.mxu0  ;;  %6151 = vmatpush2.bf16.msra.mxu0 %v8496_v8 }
 0x2b0   :  { %v10717_v23 = vadd.f32 %v5416_v29, %v5240_v2  ;;  %v5418_v3 = vpop.f32.mrf.mxu1  ;;  %6152 = vmatprep.subr.bf16.mxu0 %v8671_v0  ;;  %6328 = vmatpush2.bf16.msra.mxu1 %v8503_v20  ;;  %v8526_v20 = vld [vmem:[%s11612_s1 + $0x548] sm:$0xff]   ;;  %v8534_v41 = vld [vmem:[%s11612_s1 + $0x540] sm:$0xff]  }
 0x2b1   :  { %v5454_v46 = vpop.f32.mrf.mxu0  ;;  %5855 = vmatmul.mubr.bf16.gmra.mxu0 %v8443_v57  ;;  %6329 = vmatprep.subr.bf16.mxu1 %v8671_v0  ;;  %v8533_v57 = vld [vmem:[%s11612_s1 + $0x5c8] sm:$0xff]   ;;  %v10771_v3 = vld [vmem:[%s11612_s1 + $0x638] sm:$0xff]  }
 0x2b2   :  { %v5455_v53 = vadd.f32 %v5454_v46, %v10276_v5  ;;  %v5631_v61 = vpop.f32.mrf.mxu1  ;;  %6032 = vmatmul.mubr.bf16.gmra.mxu1 %v8446_v37  ;;  %5862 = vmatprep.mubr.bf16.mxu0 %v8452_v12  ;;  %v8519_v5 = vld [vmem:[%s11612_s1 + $0x5d0] sm:$0xff]   ;;  %v8457_v46 = vld [vmem:[%s11613_s0 + $0x680] ss:$100 sps:$4 sm:$0xff]  }
 0x2b3   :  { %v5456_v49 = vpop.f32.mrf.mxu0  ;;  %6039 = vmatprep.mubr.bf16.mxu1 %v8455_v24  ;;  %6153 = vmatpush2.bf16.msra.mxu0 %v8504_v59 }
 0x2b4   :  { %v10728_v15 = vadd.f32 %v5631_v61, %v5455_v53  ;;  %v5633_v14 = vpop.f32.mrf.mxu1  ;;  %6154 = vmatprep.subr.bf16.mxu0 %v8671_v0  ;;  %6330 = vmatpush2.bf16.msra.mxu1 %v8511_v13  ;;  %v8460_v49 = vld [vmem:[%s11613_s0 + $0x688] ss:$100 sps:$4 sm:$0xff]  }
 0x2b5   :  { %v5457_v10 = vpop.f32.mrf.mxu0  ;;  %6331 = vmatprep.subr.bf16.mxu1 %v8671_v0 }
 0x2b6   :  { %v5458_v17 = vadd.f32 %v5457_v10, %v10299_v63  ;;  %v5634_v21 = vpop.f32.mrf.mxu1 }
 0x2b7   :  { %v5459_v8 = vpop.f32.mrf.mxu0  ;;  %6155 = vmatpush2.bf16.msra.mxu0 %v8512_v48  ;;  %v8467_v48 = vld [vmem:[%s11613_s0 + $0x74c] ss:$100 sps:$4 sm:$0xff]  }
 0x2b8   :  { %v10751_v63 = vadd.f32 %v5634_v21, %v5458_v17  ;;  %v5636_v31 = vpop.f32.mrf.mxu1  ;;  %6156 = vmatprep.subr.bf16.mxu0 %v8671_v0  ;;  %6332 = vmatpush2.bf16.msra.mxu1 %v8519_v5  ;;  %v8470_v5 = vld [vmem:[%s11613_s0 + $0x754] ss:$100 sps:$4 sm:$0xff]  }
 0x2b9   :  { %v5462_v2 = vpop.f32.mrf.mxu0  ;;  %5863 = vmatmul.mubr.bf16.gmra.mxu0 %v8450_v16  ;;  %6333 = vmatprep.subr.bf16.mxu1 %v8671_v0 }
 0x2ba   :  { %v5463_v29 = vadd.f32 %v5462_v2, %v10310_v35  ;;  %v5639_v37 = vpop.f32.mrf.mxu1  ;;  %6040 = vmatmul.mubr.bf16.gmra.mxu1 %v8453_v7  ;;  %5870 = vmatprep.mubr.bf16.mxu0 %v8459_v32  ;;  %v8535_v35 = vld [vmem:[%s11612_s1 + $0x5c0] sm:$0xff]  }
 0x2bb   :  { %v5464_v12 = vpop.f32.mrf.mxu0  ;;  %6047 = vmatprep.mubr.bf16.mxu1 %v8462_v38  ;;  %6157 = vmatpush2.bf16.msra.mxu0 %v8526_v20  ;;  %v8465_v38 = vld [vmem:[%s11613_s0 + $0x748] ss:$100 sps:$4 sm:$0xff]  }
 0x2bc   :  { %v10762_v24 = vadd.f32 %v5639_v37, %v5463_v29  ;;  %v5641_v59 = vpop.f32.mrf.mxu1  ;;  %6158 = vmatprep.subr.bf16.mxu0 %v8671_v0  ;;  %6334 = vmatpush2.bf16.msra.mxu1 %v8533_v57  ;;  %v8475_v57 = vld [vmem:[%s11613_s0 + $0x814] ss:$100 sps:$4 sm:$0xff]   ;;  %v8478_v29 = vld [vmem:[%s11613_s0 + $0x81c] ss:$100 sps:$4 sm:$0xff]  }
 0x2bd   :  { %v5465_v13 = vpop.f32.mrf.mxu0  ;;  %6335 = vmatprep.subr.bf16.mxu1 %v8671_v0 }
 0x2be   :  { %v5466_v53 = vadd.f32 %v5465_v13, %v10330_v45  ;;  %v5642_v61 = vpop.f32.mrf.mxu1 }
 0x2bf   :  { %v5467_v14 = vpop.f32.mrf.mxu0  ;;  %6159 = vmatpush2.bf16.msra.mxu0 %v8534_v41 }
 0x2c0   :  { %v10787_v10 = vadd.f32 %v5642_v61, %v5466_v53  ;;  %v5644_v0 = vpop.f32.mrf.mxu1  ;;  %6336 = vmatpush2.bf16.msra.mxu1 %v8535_v35  ;;  %7735 = vmatprep.subr.bf16.mxu0 %v10771_v3  ;;  %v8473_v61 = vld [vmem:[%s11613_s0 + $0x810] ss:$100 sps:$4 sm:$0xff]   ;;  %v8483_v14 = vld [vmem:[%s11613_s0 + $0x8dc] ss:$100 sps:$4 sm:$0xff]  }
 0x2c1   :  { %v5470_v45 = vpop.f32.mrf.mxu0  ;;  %5871 = vmatmul.mubr.bf16.gmra.mxu0 %v8457_v46  ;;  %7787 = vmatprep.subr.bf16.mxu1 %v10771_v3  ;;  %v8486_v0 = vld [vmem:[%s11613_s0 + $0x8e4] ss:$100 sps:$4 sm:$0xff]  }
 0x2c2   :  { %v5471_v16 = vadd.f32 %v5470_v45, %v10335_v30  ;;  %v5647_v17 = vpop.f32.mrf.mxu1  ;;  %6048 = vmatmul.mubr.bf16.gmra.mxu1 %v8460_v49  ;;  %5878 = vmatprep.mubr.bf16.mxu0 %v8467_v48  ;;  %v8468_v30 = vld [vmem:[%s11613_s0 + $0x750] ss:$100 sps:$4 sm:$0xff]  }
 0x2c3   :  { %v5472_v21 = vpop.f32.mrf.mxu0  ;;  %6055 = vmatprep.mubr.bf16.mxu1 %v8470_v5 }
 0x2c4   :  { %v10792_v7 = vadd.f32 %v5647_v17, %v5471_v16  ;;  %v5649_v32 = vpop.f32.mrf.mxu1 }
 0x2c5   :  { %v5473_v8 = vpop.f32.mrf.mxu0 }
 0x2c6   :  { %v5474_v20 = vadd.f32 %v5473_v8, %v10350_v36  ;;  %v5650_v31 = vpop.f32.mrf.mxu1 }
 0x2c7   :  { %v5475_v2 = vpop.f32.mrf.mxu0 }
 0x2c8   :  { %v10807_v37 = vadd.f32 %v5650_v31, %v5474_v20  ;;  %v5652_v12 = vpop.f32.mrf.mxu1  ;;  %v8481_v31 = vld [vmem:[%s11613_s0 + $0x8d8] ss:$100 sps:$4 sm:$0xff]   ;;  %v8491_v2 = vld [vmem:[%s11613_s0 + $0x9a4] ss:$100 sps:$4 sm:$0xff]  }
 0x2c9   :  { %v5478_v41 = vpop.f32.mrf.mxu0  ;;  %5879 = vmatmul.mubr.bf16.gmra.mxu0 %v8465_v38  ;;  %v8494_v12 = vld [vmem:[%s11613_s0 + $0x9ac] ss:$100 sps:$4 sm:$0xff]  }
 0x2ca   :  { %v5479_v36 = vadd.f32 %v5478_v41, %v10353_v51  ;;  %v5655_v59 = vpop.f32.mrf.mxu1  ;;  %6056 = vmatmul.mubr.bf16.gmra.mxu1 %v8468_v30  ;;  %5886 = vmatprep.mubr.bf16.mxu0 %v8475_v57  ;;  %v8476_v51 = vld [vmem:[%s11613_s0 + $0x818] ss:$100 sps:$4 sm:$0xff]  }
 0x2cb   :  { %v5480_v35 = vpop.f32.mrf.mxu0  ;;  %6063 = vmatprep.mubr.bf16.mxu1 %v8478_v29 }
 0x2cc   :  { %v10810_v13 = vadd.f32 %v5655_v59, %v5479_v36  ;;  %v5657_v46 = vpop.f32.mrf.mxu1 }
 0x2cd   :  { %v5481_v53 = vpop.f32.mrf.mxu0 }
 0x2ce   :  { %v5482_v49 = vadd.f32 %v5481_v53, %v10368_v40  ;;  %v5658_v48 = vpop.f32.mrf.mxu1 }
 0x2cf   :  { %v5483_v5 = vpop.f32.mrf.mxu0 }
 0x2d0   :  { %v10825_v45 = vadd.f32 %v5658_v48, %v5482_v49  ;;  %v5660_v16 = vpop.f32.mrf.mxu1  ;;  %v8489_v48 = vld [vmem:[%s11613_s0 + $0x9a0] ss:$100 sps:$4 sm:$0xff]   ;;  %v8499_v5 = vld [vmem:[%s11613_s0 + $0xa6c] ss:$100 sps:$4 sm:$0xff]  }
 0x2d1   :  { %v5486_v17 = vpop.f32.mrf.mxu0  ;;  %5887 = vmatmul.mubr.bf16.gmra.mxu0 %v8473_v61  ;;  %v8502_v16 = vld [vmem:[%s11613_s0 + $0xa74] ss:$100 sps:$4 sm:$0xff]  }
 0x2d2   :  { %v5487_v40 = vadd.f32 %v5486_v17, %v10371_v34  ;;  %v5663_v21 = vpop.f32.mrf.mxu1  ;;  %6064 = vmatmul.mubr.bf16.gmra.mxu1 %v8476_v51  ;;  %5894 = vmatprep.mubr.bf16.mxu0 %v8483_v14  ;;  %v8484_v34 = vld [vmem:[%s11613_s0 + $0x8e0] ss:$100 sps:$4 sm:$0xff]  }
 0x2d3   :  { %v5488_v32 = vpop.f32.mrf.mxu0  ;;  %6071 = vmatprep.mubr.bf16.mxu1 %v8486_v0 }
 0x2d4   :  { %v10828_v8 = vadd.f32 %v5663_v21, %v5487_v40  ;;  %v5665_v38 = vpop.f32.mrf.mxu1 }
 0x2d5   :  { %v5489_v20 = vpop.f32.mrf.mxu0 }
 0x2d6   :  { %v5490_v30 = vadd.f32 %v5489_v20, %v10386_v47  ;;  %v5666_v57 = vpop.f32.mrf.mxu1 }
 0x2d7   :  { %v5491_v29 = vpop.f32.mrf.mxu0 }
 0x2d8   :  { %v10843_v41 = vadd.f32 %v5666_v57, %v5490_v30  ;;  %v5668_v36 = vpop.f32.mrf.mxu1  ;;  %v8497_v57 = vld [vmem:[%s11613_s0 + $0xa68] ss:$100 sps:$4 sm:$0xff]   ;;  %v8507_v29 = vld [vmem:[%s11613_s0 + $0xb34] ss:$100 sps:$4 sm:$0xff]  }
 0x2d9   :  { %v5494_v59 = vpop.f32.mrf.mxu0  ;;  %5895 = vmatmul.mubr.bf16.gmra.mxu0 %v8481_v31  ;;  %v8510_v36 = vld [vmem:[%s11613_s0 + $0xb3c] ss:$100 sps:$4 sm:$0xff]  }
 0x2da   :  { %v5495_v47 = vadd.f32 %v5494_v59, %v10389_v22  ;;  %v5671_v35 = vpop.f32.mrf.mxu1  ;;  %6072 = vmatmul.mubr.bf16.gmra.mxu1 %v8484_v34  ;;  %5902 = vmatprep.mubr.bf16.mxu0 %v8491_v2  ;;  %v8492_v22 = vld [vmem:[%s11613_s0 + $0x9a8] ss:$100 sps:$4 sm:$0xff]  }
 0x2db   :  { %v5496_v46 = vpop.f32.mrf.mxu0  ;;  %6079 = vmatprep.mubr.bf16.mxu1 %v8494_v12 }
 0x2dc   :  { %v10846_v53 = vadd.f32 %v5671_v35, %v5495_v47  ;;  %v5673_v61 = vpop.f32.mrf.mxu1 }
 0x2dd   :  { %v5497_v49 = vpop.f32.mrf.mxu0 }
 0x2de   :  { %v5498_v51 = vadd.f32 %v5497_v49, %v10404_v4  ;;  %v5674_v14 = vpop.f32.mrf.mxu1 }
 0x2df   :  { %v5499_v0 = vpop.f32.mrf.mxu0 }
 0x2e0   :  { %v10861_v17 = vadd.f32 %v5674_v14, %v5498_v51  ;;  %v5676_v40 = vpop.f32.mrf.mxu1  ;;  %v8505_v14 = vld [vmem:[%s11613_s0 + $0xb30] ss:$100 sps:$4 sm:$0xff]   ;;  %v8515_v0 = vld [vmem:[%s11613_s0 + $0xbfc] ss:$100 sps:$4 sm:$0xff]  }
 0x2e1   :  { %v5502_v21 = vpop.f32.mrf.mxu0  ;;  %5903 = vmatmul.mubr.bf16.gmra.mxu0 %v8489_v48  ;;  %v8518_v40 = vld [vmem:[%s11613_s0 + $0xc04] ss:$100 sps:$4 sm:$0xff]  }
 0x2e2   :  { %v5503_v4 = vadd.f32 %v5502_v21, %v10407_v60  ;;  %v5679_v32 = vpop.f32.mrf.mxu1  ;;  %6080 = vmatmul.mubr.bf16.gmra.mxu1 %v8492_v22  ;;  %5910 = vmatprep.mubr.bf16.mxu0 %v8499_v5  ;;  %v8500_v60 = vld [vmem:[%s11613_s0 + $0xa70] ss:$100 sps:$4 sm:$0xff]  }
 0x2e3   :  { %v5504_v38 = vpop.f32.mrf.mxu0  ;;  %6087 = vmatprep.mubr.bf16.mxu1 %v8502_v16 }
 0x2e4   :  { %v10864_v20 = vadd.f32 %v5679_v32, %v5503_v4  ;;  %v5681_v31 = vpop.f32.mrf.mxu1 }
 0x2e5   :  { %v5505_v30 = vpop.f32.mrf.mxu0 }
 0x2e6   :  { %v5506_v34 = vadd.f32 %v5505_v30, %v10422_v18  ;;  %v5682_v2 = vpop.f32.mrf.mxu1 }
 0x2e7   :  { %v5507_v12 = vpop.f32.mrf.mxu0 }
 0x2e8   :  { %v10879_v59 = vadd.f32 %v5682_v2, %v5506_v34  ;;  %v5684_v47 = vpop.f32.mrf.mxu1  ;;  %v8513_v2 = vld [vmem:[%s11613_s0 + $0xbf8] ss:$100 sps:$4 sm:$0xff]   ;;  %v8522_v12 = vld [vmem:[%s11613_s0 + $0xcc4] ss:$100 sps:$4 sm:$0xff]  }
 0x2e9   :  { %v5510_v35 = vpop.f32.mrf.mxu0  ;;  %5911 = vmatmul.mubr.bf16.gmra.mxu0 %v8497_v57  ;;  %v8525_v47 = vld [vmem:[%s11613_s0 + $0xccc] ss:$100 sps:$4 sm:$0xff]  }
 0x2ea   :  { %v5511_v18 = vadd.f32 %v5510_v35, %v10425_v55  ;;  %v5687_v46 = vpop.f32.mrf.mxu1  ;;  %6088 = vmatmul.mubr.bf16.gmra.mxu1 %v8500_v60  ;;  %5918 = vmatprep.mubr.bf16.mxu0 %v8507_v29  ;;  %v8508_v55 = vld [vmem:[%s11613_s0 + $0xb38] ss:$100 sps:$4 sm:$0xff]  }
 0x2eb   :  { %v5512_v61 = vpop.f32.mrf.mxu0  ;;  %6095 = vmatprep.mubr.bf16.mxu1 %v8510_v36 }
 0x2ec   :  { %v10882_v49 = vadd.f32 %v5687_v46, %v5511_v18  ;;  %v5689_v48 = vpop.f32.mrf.mxu1 }
 0x2ed   :  { %v5513_v51 = vpop.f32.mrf.mxu0 }
 0x2ee   :  { %v5514_v22 = vadd.f32 %v5513_v51, %v10440_v44  ;;  %v5690_v5 = vpop.f32.mrf.mxu1 }
 0x2ef   :  { %v5515_v16 = vpop.f32.mrf.mxu0 }
 0x2f0   :  { %v10897_v21 = vadd.f32 %v5690_v5, %v5514_v22  ;;  %v5692_v4 = vpop.f32.mrf.mxu1  ;;  %v8520_v5 = vld [vmem:[%s11613_s0 + $0xcc0] ss:$100 sps:$4 sm:$0xff]   ;;  %v8529_v16 = vld [vmem:[%s11613_s0 + $0xd8c] ss:$100 sps:$4 sm:$0xff]  }
 0x2f1   :  { %v5518_v32 = vpop.f32.mrf.mxu0  ;;  %5919 = vmatmul.mubr.bf16.gmra.mxu0 %v8505_v14  ;;  %v8532_v4 = vld [vmem:[%s11613_s0 + $0xd94] ss:$100 sps:$4 sm:$0xff]  }
 0x2f2   :  { %v5519_v44 = vadd.f32 %v5518_v32, %v10443_v52  ;;  %v5695_v38 = vpop.f32.mrf.mxu1  ;;  %6096 = vmatmul.mubr.bf16.gmra.mxu1 %v8508_v55  ;;  %5926 = vmatprep.mubr.bf16.mxu0 %v8515_v0  ;;  %v8516_v52 = vld [vmem:[%s11613_s0 + $0xc00] ss:$100 sps:$4 sm:$0xff]  }
 0x2f3   :  { %v5520_v31 = vpop.f32.mrf.mxu0  ;;  %6103 = vmatprep.mubr.bf16.mxu1 %v8518_v40 }
 0x2f4   :  { %v10900_v30 = vadd.f32 %v5695_v38, %v5519_v44  ;;  %v5697_v57 = vpop.f32.mrf.mxu1 }
 0x2f5   :  { %v5521_v34 = vpop.f32.mrf.mxu0 }
 0x2f6   :  { %v5522_v60 = vadd.f32 %v5521_v34, %v10458_v25  ;;  %v5698_v29 = vpop.f32.mrf.mxu1 }
 0x2f7   :  { %v5523_v36 = vpop.f32.mrf.mxu0 }
 0x2f8   :  { %v10915_v35 = vadd.f32 %v5698_v29, %v5522_v60  ;;  %v5700_v18 = vpop.f32.mrf.mxu1  ;;  %v8527_v29 = vld [vmem:[%s11613_s0 + $0xd88] ss:$100 sps:$4 sm:$0xff]   ;;  %v8538_v36 = vld [vmem:[%s11613_s0 + $0x54] ss:$100 sps:$4 sm:$0xff]  }
 0x2f9   :  { %v5526_v46 = vpop.f32.mrf.mxu0  ;;  %5927 = vmatmul.mubr.bf16.gmra.mxu0 %v8513_v2  ;;  %v8541_v18 = vld [vmem:[%s11613_s0 + $0x5c] ss:$100 sps:$4 sm:$0xff]  }
 0x2fa   :  { %v5527_v25 = vadd.f32 %v5526_v46, %v10461_v9  ;;  %v5703_v61 = vpop.f32.mrf.mxu1  ;;  %6104 = vmatmul.mubr.bf16.gmra.mxu1 %v8516_v52  ;;  %5934 = vmatprep.mubr.bf16.mxu0 %v8522_v12  ;;  %v8523_v9 = vld [vmem:[%s11613_s0 + $0xcc8] ss:$100 sps:$4 sm:$0xff]  }
 0x2fb   :  { %v5528_v48 = vpop.f32.mrf.mxu0  ;;  %6111 = vmatprep.mubr.bf16.mxu1 %v8525_v47 }
 0x2fc   :  { %v10918_v51 = vadd.f32 %v5703_v61, %v5527_v25  ;;  %v5705_v14 = vpop.f32.mrf.mxu1 }
 0x2fd   :  { %v5529_v22 = vpop.f32.mrf.mxu0 }
 0x2fe   :  { %v5530_v55 = vadd.f32 %v5529_v22, %v10476_v26  ;;  %v5706_v0 = vpop.f32.mrf.mxu1 }
 0x2ff   :  { %v5531_v40 = vpop.f32.mrf.mxu0 }
 0x300   :  { %v10933_v32 = vadd.f32 %v5706_v0, %v5530_v55  ;;  %v5708_v44 = vpop.f32.mrf.mxu1  ;;  %v8536_v0 = vld [vmem:[%s11613_s0 + $0x50] ss:$100 sps:$4 sm:$0xff]  }
 0x301   :  { %v5534_v38 = vpop.f32.mrf.mxu0  ;;  %5935 = vmatmul.mubr.bf16.gmra.mxu0 %v8520_v5  ;;  %v8548_v44 = vld [vmem:[%s11613_s0 + $0x124] ss:$100 sps:$4 sm:$0xff]  }
 0x302   :  { %v5535_v26 = vadd.f32 %v5534_v38, %v10479_v58  ;;  %v5711_v31 = vpop.f32.mrf.mxu1  ;;  %6112 = vmatmul.mubr.bf16.gmra.mxu1 %v8523_v9  ;;  %5942 = vmatprep.mubr.bf16.mxu0 %v8529_v16  ;;  %v8530_v58 = vld [vmem:[%s11613_s0 + $0xd90] ss:$100 sps:$4 sm:$0xff]  }
 0x303   :  { %v5536_v57 = vpop.f32.mrf.mxu0  ;;  %6119 = vmatprep.mubr.bf16.mxu1 %v8532_v4  ;;  %v8545_v4 = vld [vmem:[%s11613_s0 + $0x11c] ss:$100 sps:$4 sm:$0xff]  }
 0x304   :  { %v10936_v34 = vadd.f32 %v5711_v31, %v5535_v26  ;;  %v5713_v2 = vpop.f32.mrf.mxu1 }
 0x305   :  { %v5537_v60 = vpop.f32.mrf.mxu0 }
 0x306   :  { %v5538_v52 = vadd.f32 %v5537_v60, %v10494_v6  ;;  %v5714_v12 = vpop.f32.mrf.mxu1 }
 0x307   :  { %v5539_v47 = vpop.f32.mrf.mxu0 }
 0x308   :  { %v10951_v46 = vadd.f32 %v5714_v12, %v5538_v52  ;;  %v5716_v25 = vpop.f32.mrf.mxu1 }
 0x309   :  { %v5542_v61 = vpop.f32.mrf.mxu0  ;;  %5943 = vmatmul.mubr.bf16.gmra.mxu0 %v8527_v29  ;;  %v8568_v29 = vld [vmem:[%s11612_s1 + $0x628] sm:$0xff]  }
 0x30a   :  { %v5543_v6 = vadd.f32 %v5542_v61, %v10497_v28  ;;  %v5719_v48 = vpop.f32.mrf.mxu1  ;;  %6120 = vmatmul.mubr.bf16.gmra.mxu1 %v8530_v58  ;;  %6160 = vmatprep.mubr.bf16.mxu0 %v8538_v36  ;;  %v8539_v28 = vld [vmem:[%s11613_s0 + $0x58] ss:$100 sps:$4 sm:$0xff]   ;;  %v8551_v25 = vld [vmem:[%s11613_s0 + $0x1e4] ss:$100 sps:$4 sm:$0xff]   ;;  %v8554_v61 = vld [vmem:[%s11613_s0 + $0x1ec] ss:$100 sps:$4 sm:$0xff]  }
 0x30b   :  { %v5544_v14 = vpop.f32.mrf.mxu0  ;;  %6337 = vmatprep.mubr.bf16.mxu1 %v8541_v18  ;;  %v8546_v18 = vld [vmem:[%s11613_s0 + $0x120] ss:$100 sps:$4 sm:$0xff]  }
 0x30c   :  { %v10954_v22 = vadd.f32 %v5719_v48, %v5543_v6  ;;  %v5721_v5 = vpop.f32.mrf.mxu1 }
 0x30d   :  { %v5545_v55 = vpop.f32.mrf.mxu0 }
 0x30e   :  { %v5546_v9 = vadd.f32 %v5545_v55, %v10515_v56  ;;  %v5722_v16 = vpop.f32.mrf.mxu1  ;;  %v8555_v56 = vld [vmem:[%s11612_s1 + $0x630] sm:$0xff]  }
 0x30f   :  { %v5547_v40 = vpop.f32.mrf.mxu0 }
 0x310   :  { %v10969_v38 = vadd.f32 %v5722_v16, %v5546_v9  ;;  %v5724_v26 = vpop.f32.mrf.mxu1 }
 0x311   :  { %v5550_v31 = vpop.f32.mrf.mxu0  ;;  %6161 = vmatmul.mubr.bf16.vlgmr.msra.gmra.mxu0 %v8536_v0  ;;  %v8552_v26 = vld [vmem:[%s11613_s0 + $0x1e8] ss:$100 sps:$4 sm:$0xff]  }
 0x312   :  { %v5551_v57 = vadd.f32 %v5550_v31, %v10524_v11  ;;  %v5727_v2 = vpop.f32.mrf.mxu1  ;;  %6338 = vmatmul.mubr.bf16.vlgmr.msra.gmra.mxu1 %v8539_v28  ;;  %7736 = vmatpush3.bf16.msra.mxu0 %v10771_v3  ;;  %v8543_v11 = vld [vmem:[%s11613_s0 + $0x118] ss:$100 sps:$4 sm:$0xff]  }
 0x313   :  { %v5552_v60 = vpop.f32.mrf.mxu0  ;;  %6168 = vmatprep.mubr.bf16.mxu0 %v8545_v4  ;;  %6345 = vmatprep.mubr.bf16.mxu1 %v8548_v44  ;;  %v8600_v28 = vld [vmem:[%s11612_s1 + $0x618] sm:$0xff]  }
 0x314   :  { %v10979_v52 = vadd.f32 %v5727_v2, %v5551_v57  ;;  %v5729_v12 = vpop.f32.mrf.mxu1  ;;  %7795 = vmatpush3.bf16.msra.mxu1 %v10771_v3  ;;  %7737 = vmatprep.subr.bf16.mxu0 %v8555_v56  ;;  %v8561_v57 = vld [vmem:[%s11613_s0 + $0x2b4] ss:$100 sps:$4 sm:$0xff]  }
 0x315   :  { %v5553_v58 = vpop.f32.mrf.mxu0  ;;  %7788 = vmatprep.subr.bf16.mxu1 %v8555_v56 }
 0x316   :  { %v5554_v36 = vadd.f32 %v5553_v58, %v10548_v43  ;;  %v5730_v47 = vpop.f32.mrf.mxu1  ;;  %7738 = vmatpush3.bf16.msra.mxu0 %v8555_v56  ;;  %v8581_v43 = vld [vmem:[%s11612_s1 + $0x620] sm:$0xff]  }
 0x317   :  { %v5555_v3 = vpop.f32.mrf.mxu0  ;;  %7739 = vmatprep.subr.bf16.mxu0 %v8568_v29 }
 0x318   :  { %v10995_v6 = vadd.f32 %v5730_v47, %v5554_v36  ;;  %v5732_v48 = vpop.f32.mrf.mxu1  ;;  %7796 = vmatpush3.bf16.msra.mxu1 %v8555_v56  ;;  %v8558_v56 = vld [vmem:[%s11613_s0 + $0x2ac] ss:$100 sps:$4 sm:$0xff]  }
 0x319   :  { %v5558_v14 = vpop.f32.mrf.mxu0  ;;  %6169 = vmatmul.mubr.bf16.gmra.mxu0 %v8543_v11  ;;  %7789 = vmatprep.subr.bf16.mxu1 %v8568_v29  ;;  %v8559_v48 = vld [vmem:[%s11613_s0 + $0x2b0] ss:$100 sps:$4 sm:$0xff]  }
 0x31a   :  { %v5559_v5 = vadd.f32 %v5558_v14, %v10558_v50  ;;  %v5735_v55 = vpop.f32.mrf.mxu1  ;;  %6346 = vmatmul.mubr.bf16.gmra.mxu1 %v8546_v18  ;;  %6176 = vmatprep.mubr.bf16.mxu0 %v8551_v25  ;;  %v8549_v50 = vld [vmem:[%s11613_s0 + $0x1e0] ss:$100 sps:$4 sm:$0xff]   ;;  %v8626_v18 = vld [vmem:[%s11612_s1 + $0x608] sm:$0xff]  }
 0x31b   :  { %v5560_v0 = vpop.f32.mrf.mxu0  ;;  %6353 = vmatprep.mubr.bf16.mxu1 %v8554_v61  ;;  %7740 = vmatpush3.bf16.msra.mxu0 %v8568_v29 }
 0x31c   :  { %v11001_v9 = vadd.f32 %v5735_v55, %v5559_v5  ;;  %v5737_v16 = vpop.f32.mrf.mxu1  ;;  %7797 = vmatpush3.bf16.msra.mxu1 %v8568_v29  ;;  %7741 = vmatprep.subr.bf16.mxu0 %v8581_v43  ;;  %v8567_v5 = vld [vmem:[%s11613_s0 + $0x37c] ss:$100 sps:$4 sm:$0xff]  }
 0x31d   :  { %v5561_v40 = vpop.f32.mrf.mxu0  ;;  %7790 = vmatprep.subr.bf16.mxu1 %v8581_v43 }
 0x31e   :  { %v5562_v4 = vadd.f32 %v5561_v40, %v10581_v54  ;;  %v5738_v44 = vpop.f32.mrf.mxu1  ;;  %v8613_v54 = vld [vmem:[%s11612_s1 + $0x610] sm:$0xff]  }
 0x31f   :  { %v5563_v31 = vpop.f32.mrf.mxu0  ;;  %7742 = vmatpush3.bf16.msra.mxu0 %v8581_v43 }
 0x320   :  { %v11019_v2 = vadd.f32 %v5738_v44, %v5562_v4  ;;  %v5740_v60 = vpop.f32.mrf.mxu1  ;;  %7798 = vmatpush3.bf16.msra.mxu1 %v8581_v43  ;;  %7743 = vmatprep.subr.bf16.mxu0 %v8600_v28  ;;  %v8564_v43 = vld [vmem:[%s11613_s0 + $0x374] ss:$100 sps:$4 sm:$0xff]  }
 0x321   :  { %v5566_v29 = vpop.f32.mrf.mxu0  ;;  %6177 = vmatmul.mubr.bf16.gmra.mxu0 %v8549_v50  ;;  %7791 = vmatprep.subr.bf16.mxu1 %v8600_v28  ;;  %v8571_v60 = vld [vmem:[%s11613_s0 + $0x43c] ss:$100 sps:$4 sm:$0xff]  }
 0x322   :  { %v5567_v12 = vadd.f32 %v5566_v29, %v10592_v33  ;;  %v5743_v58 = vpop.f32.mrf.mxu1  ;;  %6354 = vmatmul.mubr.bf16.gmra.mxu1 %v8552_v26  ;;  %6184 = vmatprep.mubr.bf16.mxu0 %v8558_v56  ;;  %v8556_v33 = vld [vmem:[%s11613_s0 + $0x2a8] ss:$100 sps:$4 sm:$0xff]   ;;  %v8562_v56 = vld [vmem:[%s11613_s0 + $0x370] ss:$100 sps:$4 sm:$0xff]  }
 0x323   :  { %v5568_v11 = vpop.f32.mrf.mxu0  ;;  %6361 = vmatprep.mubr.bf16.mxu1 %v8561_v57  ;;  %7744 = vmatpush3.bf16.msra.mxu0 %v8600_v28  ;;  %v8565_v57 = vld [vmem:[%s11613_s0 + $0x378] ss:$100 sps:$4 sm:$0xff]   ;;  %v8574_v29 = vld [vmem:[%s11613_s0 + $0x444] ss:$100 sps:$4 sm:$0xff]  }
 0x324   :  { %v11025_v36 = vadd.f32 %v5743_v58, %v5567_v12  ;;  %v5745_v47 = vpop.f32.mrf.mxu1  ;;  %7799 = vmatpush3.bf16.msra.mxu1 %v8600_v28  ;;  %7745 = vmatprep.subr.bf16.mxu0 %v8613_v54 }
 0x325   :  { %v5569_v25 = vpop.f32.mrf.mxu0  ;;  %7792 = vmatprep.subr.bf16.mxu1 %v8613_v54 }
 0x326   :  { %v5570_v3 = vadd.f32 %v5569_v25, %v10615_v27  ;;  %v5746_v61 = vpop.f32.mrf.mxu1  ;;  %v8639_v27 = vld [vmem:[%s11612_s1 + $0x600] sm:$0xff]  }
 0x327   :  { %v5571_v14 = vpop.f32.mrf.mxu0  ;;  %7746 = vmatpush3.bf16.msra.mxu0 %v8613_v54 }
 0x328   :  { %v11043_v55 = vadd.f32 %v5746_v61, %v5570_v3  ;;  %v5748_v0 = vpop.f32.mrf.mxu1  ;;  %7800 = vmatpush3.bf16.msra.mxu1 %v8613_v54  ;;  %7747 = vmatprep.subr.bf16.mxu0 %v8626_v18  ;;  %v8569_v61 = vld [vmem:[%s11613_s0 + $0x438] ss:$100 sps:$4 sm:$0xff]   ;;  %v8577_v14 = vld [vmem:[%s11613_s0 + $0x504] ss:$100 sps:$4 sm:$0xff]  }
 0x329   :  { %v5574_v16 = vpop.f32.mrf.mxu0  ;;  %6185 = vmatmul.mubr.bf16.gmra.mxu0 %v8556_v33  ;;  %7793 = vmatprep.subr.bf16.mxu1 %v8626_v18  ;;  %v8580_v0 = vld [vmem:[%s11613_s0 + $0x50c] ss:$100 sps:$4 sm:$0xff]  }
 0x32a   :  { %v5575_v28 = vadd.f32 %v5574_v16, %v10626_v19  ;;  %v5751_v40 = vpop.f32.mrf.mxu1  ;;  %6362 = vmatmul.mubr.bf16.gmra.mxu1 %v8559_v48  ;;  %6192 = vmatprep.mubr.bf16.mxu0 %v8564_v43 }
 0x32b   :  { %v5576_v50 = vpop.f32.mrf.mxu0  ;;  %6369 = vmatprep.mubr.bf16.mxu1 %v8567_v5  ;;  %7748 = vmatpush3.bf16.msra.mxu0 %v8626_v18 }
 0x32c   :  { %v11049_v4 = vadd.f32 %v5751_v40, %v5575_v28  ;;  %v5753_v44 = vpop.f32.mrf.mxu1  ;;  %7801 = vmatpush3.bf16.msra.mxu1 %v8626_v18  ;;  %7749 = vmatprep.subr.bf16.mxu0 %v8639_v27 }
 0x32d   :  { %v5577_v26 = vpop.f32.mrf.mxu0  ;;  %7794 = vmatprep.subr.bf16.mxu1 %v8639_v27 }
 0x32e   :  { %v5578_v31 = vadd.f32 %v5577_v26, %v10649_v62  ;;  %v5754_v19 = vpop.f32.mrf.mxu1 }
 0x32f   :  { %v5579_v54 = vpop.f32.mrf.mxu0  ;;  %7750 = vmatpush3.bf16.msra.mxu0 %v8639_v27 }
 0x330   :  { %v11064_v12 = vadd.f32 %v5754_v19, %v5578_v31  ;;  %v5756_v58 = vpop.f32.mrf.mxu1  ;;  %7802 = vmatpush3.bf16.msra.mxu1 %v8639_v27  ;;  %v8575_v31 = vld [vmem:[%s11613_s0 + $0x500] ss:$100 sps:$4 sm:$0xff]  }
 0x331   :  { %v5582_v62 = vpop.f32.mrf.mxu0  ;;  %6193 = vmatmul.mubr.bf16.gmra.mxu0 %v8562_v56 }
 0x332   :  { %v5583_v11 = vadd.f32 %v5582_v62, %v10660_v1  ;;  %v5759_v47 = vpop.f32.mrf.mxu1  ;;  %6370 = vmatmul.mubr.bf16.gmra.mxu1 %v8565_v57  ;;  %6200 = vmatprep.mubr.bf16.mxu0 %v8571_v60  ;;  %v8572_v1 = vld [vmem:[%s11613_s0 + $0x440] ss:$100 sps:$4 sm:$0xff]   ;;  %v8584_v60 = vld [vmem:[%s11613_s0 + $0x5cc] ss:$100 sps:$4 sm:$0xff]  }
 0x333   :  { %v5584_v18 = vpop.f32.mrf.mxu0  ;;  %6377 = vmatprep.mubr.bf16.mxu1 %v8574_v29  ;;  %v8587_v29 = vld [vmem:[%s11613_s0 + $0x5d4] ss:$100 sps:$4 sm:$0xff]  }
 0x334   :  { %v11067_v25 = vadd.f32 %v5759_v47, %v5583_v11  ;;  %v5761_v33 = vpop.f32.mrf.mxu1 }
 0x335   :  { %v5585_v3 = vpop.f32.mrf.mxu0 }
 0x336   :  { %v5586_v48 = vadd.f32 %v5585_v3, %v10683_v42  ;;  %v5762_v43 = vpop.f32.mrf.mxu1 }
 0x337   :  { %v5587_v5 = vpop.f32.mrf.mxu0 }
 0x338   :  { %v11082_v27 = vadd.f32 %v5762_v43, %v5586_v48  ;;  %v5764_v16 = vpop.f32.mrf.mxu1  ;;  %v8582_v48 = vld [vmem:[%s11613_s0 + $0x5c8] ss:$100 sps:$4 sm:$0xff]  }
 0x339   :  { %v5590_v28 = vpop.f32.mrf.mxu0  ;;  %6201 = vmatmul.mubr.bf16.gmra.mxu0 %v8569_v61 }
 0x33a   :  { %v5591_v42 = vadd.f32 %v5590_v28, %v10694_v39  ;;  %v5767_v40 = vpop.f32.mrf.mxu1  ;;  %6378 = vmatmul.mubr.bf16.gmra.mxu1 %v8572_v1  ;;  %6208 = vmatprep.mubr.bf16.mxu0 %v8577_v14  ;;  %v8578_v39 = vld [vmem:[%s11613_s0 + $0x508] ss:$100 sps:$4 sm:$0xff]   ;;  %v8590_v14 = vld [vmem:[%s11613_s0 + $0x694] ss:$100 sps:$4 sm:$0xff]  }
 0x33b   :  { %v5592_v50 = vpop.f32.mrf.mxu0  ;;  %6385 = vmatprep.mubr.bf16.mxu1 %v8580_v0  ;;  %v8593_v0 = vld [vmem:[%s11613_s0 + $0x69c] ss:$100 sps:$4 sm:$0xff]  }
 0x33c   :  { %v11085_v44 = vadd.f32 %v5767_v40, %v5591_v42  ;;  %v5769_v26 = vpop.f32.mrf.mxu1 }
 0x33d   :  { %v5593_v56 = vpop.f32.mrf.mxu0 }
 0x33e   :  { %v5594_v19 = vadd.f32 %v5593_v56, %v10717_v23  ;;  %v5770_v57 = vpop.f32.mrf.mxu1 }
 0x33f   :  { %v5595_v54 = vpop.f32.mrf.mxu0 }
 0x340   :  { %v11100_v58 = vadd.f32 %v5770_v57, %v5594_v19  ;;  %v5772_v62 = vpop.f32.mrf.mxu1  ;;  %v8588_v19 = vld [vmem:[%s11613_s0 + $0x690] ss:$100 sps:$4 sm:$0xff]  }
 0x341   :  { %v5808_v11 = vpop.f32.mrf.mxu0  ;;  %6209 = vmatmul.mubr.bf16.gmra.mxu0 %v8575_v31 }
 0x342   :  { %v5809_v23 = vadd.f32 %v5808_v11, %v10728_v15  ;;  %v5985_v47 = vpop.f32.mrf.mxu1  ;;  %6386 = vmatmul.mubr.bf16.gmra.mxu1 %v8578_v39  ;;  %6216 = vmatprep.mubr.bf16.mxu0 %v8584_v60  ;;  %v8585_v15 = vld [vmem:[%s11613_s0 + $0x5d0] ss:$100 sps:$4 sm:$0xff]   ;;  %v8596_v60 = vld [vmem:[%s11613_s0 + $0x75c] ss:$100 sps:$4 sm:$0xff]  }
 0x343   :  { %v5810_v18 = vpop.f32.mrf.mxu0  ;;  %6393 = vmatprep.mubr.bf16.mxu1 %v8587_v29  ;;  %v8599_v29 = vld [vmem:[%s11613_s0 + $0x764] ss:$100 sps:$4 sm:$0xff]  }
 0x344   :  { %v11103_v33 = vadd.f32 %v5985_v47, %v5809_v23  ;;  %v5987_v3 = vpop.f32.mrf.mxu1 }
 0x345   :  { %v5811_v61 = vpop.f32.mrf.mxu0 }
 0x346   :  { %v5812_v43 = vadd.f32 %v5811_v61, %v10751_v63  ;;  %v5988_v1 = vpop.f32.mrf.mxu1 }
 0x347   :  { %v5813_v5 = vpop.f32.mrf.mxu0 }
 0x348   :  { %v11118_v16 = vadd.f32 %v5988_v1, %v5812_v43  ;;  %v5990_v28 = vpop.f32.mrf.mxu1  ;;  %v8594_v43 = vld [vmem:[%s11613_s0 + $0x758] ss:$100 sps:$4 sm:$0xff]  }
 0x349   :  { %v5816_v42 = vpop.f32.mrf.mxu0  ;;  %6217 = vmatmul.mubr.bf16.gmra.mxu0 %v8582_v48 }
 0x34a   :  { %v5817_v63 = vadd.f32 %v5816_v42, %v10762_v24  ;;  %v5993_v40 = vpop.f32.mrf.mxu1  ;;  %6394 = vmatmul.mubr.bf16.gmra.mxu1 %v8585_v15  ;;  %6224 = vmatprep.mubr.bf16.mxu0 %v8590_v14  ;;  %v8591_v24 = vld [vmem:[%s11613_s0 + $0x698] ss:$100 sps:$4 sm:$0xff]   ;;  %v8603_v14 = vld [vmem:[%s11613_s0 + $0x824] ss:$100 sps:$4 sm:$0xff]  }
 0x34b   :  { %v5818_v50 = vpop.f32.mrf.mxu0  ;;  %6401 = vmatprep.mubr.bf16.mxu1 %v8593_v0  ;;  %v8606_v0 = vld [vmem:[%s11613_s0 + $0x82c] ss:$100 sps:$4 sm:$0xff]  }
 0x34c   :  { %v11121_v26 = vadd.f32 %v5993_v40, %v5817_v63  ;;  %v5995_v56 = vpop.f32.mrf.mxu1 }
 0x34d   :  { %v5819_v31 = vpop.f32.mrf.mxu0 }
 0x34e   :  { %v5820_v57 = vadd.f32 %v5819_v31, %v10787_v10  ;;  %v5996_v39 = vpop.f32.mrf.mxu1 }
 0x34f   :  { %v5821_v54 = vpop.f32.mrf.mxu0 }
 0x350   :  { %v11136_v62 = vadd.f32 %v5996_v39, %v5820_v57  ;;  %v5998_v11 = vpop.f32.mrf.mxu1  ;;  %v8601_v57 = vld [vmem:[%s11613_s0 + $0x820] ss:$100 sps:$4 sm:$0xff]  }
 0x351   :  { %v5824_v23 = vpop.f32.mrf.mxu0  ;;  %6225 = vmatmul.mubr.bf16.gmra.mxu0 %v8588_v19 }
 0x352   :  { %v5825_v10 = vadd.f32 %v5824_v23, %v10792_v7  ;;  %v6001_v47 = vpop.f32.mrf.mxu1  ;;  %6402 = vmatmul.mubr.bf16.gmra.mxu1 %v8591_v24  ;;  %6232 = vmatprep.mubr.bf16.mxu0 %v8596_v60  ;;  %v8597_v7 = vld [vmem:[%s11613_s0 + $0x760] ss:$100 sps:$4 sm:$0xff]   ;;  %v8609_v60 = vld [vmem:[%s11613_s0 + $0x8ec] ss:$100 sps:$4 sm:$0xff]  }
 0x353   :  { %v5826_v18 = vpop.f32.mrf.mxu0  ;;  %6409 = vmatprep.mubr.bf16.mxu1 %v8599_v29  ;;  %v8612_v29 = vld [vmem:[%s11613_s0 + $0x8f4] ss:$100 sps:$4 sm:$0xff]  }
 0x354   :  { %v11139_v3 = vadd.f32 %v6001_v47, %v5825_v10  ;;  %v6003_v61 = vpop.f32.mrf.mxu1 }
 0x355   :  { %v5827_v48 = vpop.f32.mrf.mxu0 }
 0x356   :  { %v5828_v1 = vadd.f32 %v5827_v48, %v10807_v37  ;;  %v6004_v15 = vpop.f32.mrf.mxu1 }
 0x357   :  { %v5829_v5 = vpop.f32.mrf.mxu0 }
 0x358   :  { %v11154_v28 = vadd.f32 %v6004_v15, %v5828_v1  ;;  %v6006_v42 = vpop.f32.mrf.mxu1  ;;  %v8607_v1 = vld [vmem:[%s11613_s0 + $0x8e8] ss:$100 sps:$4 sm:$0xff]  }
 0x359   :  { %v5832_v63 = vpop.f32.mrf.mxu0  ;;  %6233 = vmatmul.mubr.bf16.gmra.mxu0 %v8594_v43 }
 0x35a   :  { %v5833_v37 = vadd.f32 %v5832_v63, %v10810_v13  ;;  %v6009_v40 = vpop.f32.mrf.mxu1  ;;  %6410 = vmatmul.mubr.bf16.gmra.mxu1 %v8597_v7  ;;  %6240 = vmatprep.mubr.bf16.mxu0 %v8603_v14  ;;  %v8604_v13 = vld [vmem:[%s11613_s0 + $0x828] ss:$100 sps:$4 sm:$0xff]   ;;  %v8616_v14 = vld [vmem:[%s11613_s0 + $0x9b4] ss:$100 sps:$4 sm:$0xff]  }
 0x35b   :  { %v5834_v50 = vpop.f32.mrf.mxu0  ;;  %6417 = vmatprep.mubr.bf16.mxu1 %v8606_v0  ;;  %v8619_v0 = vld [vmem:[%s11613_s0 + $0x9bc] ss:$100 sps:$4 sm:$0xff]  }
 0x35c   :  { %v11157_v56 = vadd.f32 %v6009_v40, %v5833_v37  ;;  %v6011_v31 = vpop.f32.mrf.mxu1 }
 0x35d   :  { %v5835_v19 = vpop.f32.mrf.mxu0 }
 0x35e   :  { %v5836_v39 = vadd.f32 %v5835_v19, %v10825_v45  ;;  %v6012_v24 = vpop.f32.mrf.mxu1 }
 0x35f   :  { %v5837_v54 = vpop.f32.mrf.mxu0 }
 0x360   :  { %v11172_v11 = vadd.f32 %v6012_v24, %v5836_v39  ;;  %v6014_v23 = vpop.f32.mrf.mxu1  ;;  %v8614_v39 = vld [vmem:[%s11613_s0 + $0x9b0] ss:$100 sps:$4 sm:$0xff]  }
 0x361   :  { %v5840_v10 = vpop.f32.mrf.mxu0  ;;  %6241 = vmatmul.mubr.bf16.gmra.mxu0 %v8601_v57 }
 0x362   :  { %v5841_v45 = vadd.f32 %v5840_v10, %v10828_v8  ;;  %v6017_v47 = vpop.f32.mrf.mxu1  ;;  %6418 = vmatmul.mubr.bf16.gmra.mxu1 %v8604_v13  ;;  %6248 = vmatprep.mubr.bf16.mxu0 %v8609_v60  ;;  %v8610_v8 = vld [vmem:[%s11613_s0 + $0x8f0] ss:$100 sps:$4 sm:$0xff]   ;;  %v8622_v60 = vld [vmem:[%s11613_s0 + $0xa7c] ss:$100 sps:$4 sm:$0xff]  }
 0x363   :  { %v5842_v18 = vpop.f32.mrf.mxu0  ;;  %6425 = vmatprep.mubr.bf16.mxu1 %v8612_v29  ;;  %v8625_v29 = vld [vmem:[%s11613_s0 + $0xa84] ss:$100 sps:$4 sm:$0xff]  }
 0x364   :  { %v11175_v61 = vadd.f32 %v6017_v47, %v5841_v45  ;;  %v6019_v48 = vpop.f32.mrf.mxu1 }
 0x365   :  { %v5843_v43 = vpop.f32.mrf.mxu0 }
 0x366   :  { %v5844_v15 = vadd.f32 %v5843_v43, %v10843_v41  ;;  %v6020_v7 = vpop.f32.mrf.mxu1 }
 0x367   :  { %v5845_v5 = vpop.f32.mrf.mxu0 }
 0x368   :  { %v11190_v42 = vadd.f32 %v6020_v7, %v5844_v15  ;;  %v6022_v63 = vpop.f32.mrf.mxu1  ;;  %v8620_v15 = vld [vmem:[%s11613_s0 + $0xa78] ss:$100 sps:$4 sm:$0xff]  }
 0x369   :  { %v5848_v37 = vpop.f32.mrf.mxu0  ;;  %6249 = vmatmul.mubr.bf16.gmra.mxu0 %v8607_v1 }
 0x36a   :  { %v5849_v41 = vadd.f32 %v5848_v37, %v10846_v53  ;;  %v6025_v40 = vpop.f32.mrf.mxu1  ;;  %6426 = vmatmul.mubr.bf16.gmra.mxu1 %v8610_v8  ;;  %6256 = vmatprep.mubr.bf16.mxu0 %v8616_v14  ;;  %v8617_v53 = vld [vmem:[%s11613_s0 + $0x9b8] ss:$100 sps:$4 sm:$0xff]   ;;  %v8629_v14 = vld [vmem:[%s11613_s0 + $0xb44] ss:$100 sps:$4 sm:$0xff]  }
 0x36b   :  { %v5850_v50 = vpop.f32.mrf.mxu0  ;;  %6433 = vmatprep.mubr.bf16.mxu1 %v8619_v0  ;;  %v8632_v0 = vld [vmem:[%s11613_s0 + $0xb4c] ss:$100 sps:$4 sm:$0xff]  }
 0x36c   :  { %v11193_v31 = vadd.f32 %v6025_v40, %v5849_v41  ;;  %v6027_v19 = vpop.f32.mrf.mxu1 }
 0x36d   :  { %v5851_v57 = vpop.f32.mrf.mxu0 }
 0x36e   :  { %v5852_v24 = vadd.f32 %v5851_v57, %v10861_v17  ;;  %v6028_v13 = vpop.f32.mrf.mxu1 }
 0x36f   :  { %v5853_v54 = vpop.f32.mrf.mxu0 }
 0x370   :  { %v11208_v23 = vadd.f32 %v6028_v13, %v5852_v24  ;;  %v6030_v10 = vpop.f32.mrf.mxu1  ;;  %v8627_v24 = vld [vmem:[%s11613_s0 + $0xb40] ss:$100 sps:$4 sm:$0xff]  }
 0x371   :  { %v5856_v45 = vpop.f32.mrf.mxu0  ;;  %6257 = vmatmul.mubr.bf16.gmra.mxu0 %v8614_v39 }
 0x372   :  { %v5857_v17 = vadd.f32 %v5856_v45, %v10864_v20  ;;  %v6033_v47 = vpop.f32.mrf.mxu1  ;;  %6434 = vmatmul.mubr.bf16.gmra.mxu1 %v8617_v53  ;;  %6264 = vmatprep.mubr.bf16.mxu0 %v8622_v60  ;;  %v8623_v20 = vld [vmem:[%s11613_s0 + $0xa80] ss:$100 sps:$4 sm:$0xff]   ;;  %v8635_v60 = vld [vmem:[%s11613_s0 + $0xc0c] ss:$100 sps:$4 sm:$0xff]  }
 0x373   :  { %v5858_v18 = vpop.f32.mrf.mxu0  ;;  %6441 = vmatprep.mubr.bf16.mxu1 %v8625_v29  ;;  %v8638_v29 = vld [vmem:[%s11613_s0 + $0xc14] ss:$100 sps:$4 sm:$0xff]  }
 0x374   :  { %v11211_v48 = vadd.f32 %v6033_v47, %v5857_v17  ;;  %v6035_v43 = vpop.f32.mrf.mxu1 }
 0x375   :  { %v5859_v1 = vpop.f32.mrf.mxu0 }
 0x376   :  { %v5860_v7 = vadd.f32 %v5859_v1, %v10879_v59  ;;  %v6036_v8 = vpop.f32.mrf.mxu1 }
 0x377   :  { %v5861_v5 = vpop.f32.mrf.mxu0 }
 0x378   :  { %v11226_v63 = vadd.f32 %v6036_v8, %v5860_v7  ;;  %v6038_v37 = vpop.f32.mrf.mxu1  ;;  %v8633_v7 = vld [vmem:[%s11613_s0 + $0xc08] ss:$100 sps:$4 sm:$0xff]  }
 0x379   :  { %v5864_v41 = vpop.f32.mrf.mxu0  ;;  %6265 = vmatmul.mubr.bf16.gmra.mxu0 %v8620_v15 }
 0x37a   :  { %v5865_v59 = vadd.f32 %v5864_v41, %v10882_v49  ;;  %v6041_v40 = vpop.f32.mrf.mxu1  ;;  %6442 = vmatmul.mubr.bf16.gmra.mxu1 %v8623_v20  ;;  %6272 = vmatprep.mubr.bf16.mxu0 %v8629_v14  ;;  %v8630_v49 = vld [vmem:[%s11613_s0 + $0xb48] ss:$100 sps:$4 sm:$0xff]   ;;  %v8642_v14 = vld [vmem:[%s11613_s0 + $0xcd4] ss:$100 sps:$4 sm:$0xff]  }
 0x37b   :  { %v5866_v50 = vpop.f32.mrf.mxu0  ;;  %6449 = vmatprep.mubr.bf16.mxu1 %v8632_v0  ;;  %v8645_v0 = vld [vmem:[%s11613_s0 + $0xcdc] ss:$100 sps:$4 sm:$0xff]  }
 0x37c   :  { %v11229_v19 = vadd.f32 %v6041_v40, %v5865_v59  ;;  %v6043_v57 = vpop.f32.mrf.mxu1 }
 0x37d   :  { %v5867_v39 = vpop.f32.mrf.mxu0 }
 0x37e   :  { %v5868_v13 = vadd.f32 %v5867_v39, %v10897_v21  ;;  %v6044_v53 = vpop.f32.mrf.mxu1 }
 0x37f   :  { %v5869_v54 = vpop.f32.mrf.mxu0 }
 0x380   :  { %v11244_v10 = vadd.f32 %v6044_v53, %v5868_v13  ;;  %v6046_v45 = vpop.f32.mrf.mxu1  ;;  %v8640_v13 = vld [vmem:[%s11613_s0 + $0xcd0] ss:$100 sps:$4 sm:$0xff]  }
 0x381   :  { %v5872_v17 = vpop.f32.mrf.mxu0  ;;  %6273 = vmatmul.mubr.bf16.gmra.mxu0 %v8627_v24 }
 0x382   :  { %v5873_v21 = vadd.f32 %v5872_v17, %v10900_v30  ;;  %v6049_v47 = vpop.f32.mrf.mxu1  ;;  %6450 = vmatmul.mubr.bf16.gmra.mxu1 %v8630_v49  ;;  %6280 = vmatprep.mubr.bf16.mxu0 %v8635_v60  ;;  %v8636_v30 = vld [vmem:[%s11613_s0 + $0xc10] ss:$100 sps:$4 sm:$0xff]   ;;  %v8648_v60 = vld [vmem:[%s11613_s0 + $0xd9c] ss:$100 sps:$4 sm:$0xff]  }
 0x383   :  { %v5874_v18 = vpop.f32.mrf.mxu0  ;;  %6457 = vmatprep.mubr.bf16.mxu1 %v8638_v29  ;;  %v8651_v29 = vld [vmem:[%s11613_s0 + $0xda4] ss:$100 sps:$4 sm:$0xff]  }
 0x384   :  { %v11247_v43 = vadd.f32 %v6049_v47, %v5873_v21  ;;  %v6051_v1 = vpop.f32.mrf.mxu1 }
 0x385   :  { %v5875_v15 = vpop.f32.mrf.mxu0 }
 0x386   :  { %v5876_v8 = vadd.f32 %v5875_v15, %v10915_v35  ;;  %v6052_v20 = vpop.f32.mrf.mxu1 }
 0x387   :  { %v5877_v5 = vpop.f32.mrf.mxu0 }
 0x388   :  { %v11262_v37 = vadd.f32 %v6052_v20, %v5876_v8  ;;  %v6054_v41 = vpop.f32.mrf.mxu1  ;;  %v8646_v8 = vld [vmem:[%s11613_s0 + $0xd98] ss:$100 sps:$4 sm:$0xff]  }
 0x389   :  { %v5880_v59 = vpop.f32.mrf.mxu0  ;;  %6281 = vmatmul.mubr.bf16.gmra.mxu0 %v8633_v7 }
 0x38a   :  { %v5881_v35 = vadd.f32 %v5880_v59, %v10918_v51  ;;  %v6057_v40 = vpop.f32.mrf.mxu1  ;;  %6458 = vmatmul.mubr.bf16.gmra.mxu1 %v8636_v30  ;;  %6288 = vmatprep.mubr.bf16.mxu0 %v8642_v14  ;;  %v8643_v51 = vld [vmem:[%s11613_s0 + $0xcd8] ss:$100 sps:$4 sm:$0xff]   ;;  %v8652_v14 = vld [vmem:[%s11613_s0 + $0x60] ss:$100 sps:$4 sm:$0xff]  }
 0x38b   :  { %v5882_v50 = vpop.f32.mrf.mxu0  ;;  %6465 = vmatprep.mubr.bf16.mxu1 %v8645_v0  ;;  %v8653_v0 = vld [vmem:[%s11613_s0 + $0x830] ss:$100 sps:$4 sm:$0xff]  }
 0x38c   :  { %v11265_v57 = vadd.f32 %v6057_v40, %v5881_v35  ;;  %v6059_v39 = vpop.f32.mrf.mxu1 }
 0x38d   :  { %v5883_v24 = vpop.f32.mrf.mxu0 }
 0x38e   :  { %v5884_v53 = vadd.f32 %v5883_v24, %v10933_v32  ;;  %v6060_v49 = vpop.f32.mrf.mxu1 }
 0x38f   :  { %v5885_v54 = vpop.f32.mrf.mxu0 }
 0x390   :  { %v11280_v45 = vadd.f32 %v6060_v49, %v5884_v53  ;;  %v6062_v17 = vpop.f32.mrf.mxu1  ;;  %v8654_v53 = vld [vmem:[%s11613_s0 + $0x128] ss:$100 sps:$4 sm:$0xff]  }
 0x391   :  { %v5888_v21 = vpop.f32.mrf.mxu0  ;;  %6289 = vmatmul.mubr.bf16.gmra.mxu0 %v8640_v13 }
 0x392   :  { %v5889_v32 = vadd.f32 %v5888_v21, %v10936_v34  ;;  %v6065_v47 = vpop.f32.mrf.mxu1  ;;  %6466 = vmatmul.mubr.bf16.gmra.mxu1 %v8643_v51  ;;  %6296 = vmatprep.mubr.bf16.mxu0 %v8648_v60  ;;  %v8649_v34 = vld [vmem:[%s11613_s0 + $0xda0] ss:$100 sps:$4 sm:$0xff]   ;;  %v8656_v60 = vld [vmem:[%s11613_s0 + $0x1f0] ss:$100 sps:$4 sm:$0xff]  }
 0x393   :  { %v5890_v18 = vpop.f32.mrf.mxu0  ;;  %6473 = vmatprep.mubr.bf16.mxu1 %v8651_v29  ;;  %v8657_v29 = vld [vmem:[%s11613_s0 + $0x9c0] ss:$100 sps:$4 sm:$0xff]  }
 0x394   :  { %v11283_v1 = vadd.f32 %v6065_v47, %v5889_v32  ;;  %v6067_v15 = vpop.f32.mrf.mxu1 }
 0x395   :  { %v5891_v7 = vpop.f32.mrf.mxu0 }
 0x396   :  { %v5892_v20 = vadd.f32 %v5891_v7, %v10951_v46  ;;  %v6068_v30 = vpop.f32.mrf.mxu1 }
 0x397   :  { %v5893_v5 = vpop.f32.mrf.mxu0 }
 0x398   :  { %v11298_v41 = vadd.f32 %v6068_v30, %v5892_v20  ;;  %v6070_v59 = vpop.f32.mrf.mxu1  ;;  %v8658_v20 = vld [vmem:[%s11613_s0 + $0x2b8] ss:$100 sps:$4 sm:$0xff]  }
 0x399   :  { %v5896_v35 = vpop.f32.mrf.mxu0  ;;  %6297 = vmatmul.mubr.bf16.gmra.mxu0 %v8646_v8 }
 0x39a   :  { %v5897_v46 = vadd.f32 %v5896_v35, %v10954_v22  ;;  %v6073_v40 = vpop.f32.mrf.mxu1  ;;  %6474 = vmatmul.mubr.bf16.gmra.mxu1 %v8649_v34  ;;  %7751 = vmatprep.mubr.bf16.mxu0 %v8652_v14  ;;  %v8655_v22 = vld [vmem:[%s11613_s0 + $0x8f8] ss:$100 sps:$4 sm:$0xff]   ;;  %v8660_v14 = vld [vmem:[%s11613_s0 + $0x380] ss:$100 sps:$4 sm:$0xff]  }
 0x39b   :  { %v5898_v50 = vpop.f32.mrf.mxu0  ;;  %7771 = vmatprep.mubr.bf16.mxu1 %v8653_v0  ;;  %v8661_v0 = vld [vmem:[%s11613_s0 + $0xb50] ss:$100 sps:$4 sm:$0xff]  }
 0x39c   :  { %v11301_v39 = vadd.f32 %v6073_v40, %v5897_v46  ;;  %v6075_v24 = vpop.f32.mrf.mxu1 }
 0x39d   :  { %v5899_v13 = vpop.f32.mrf.mxu0 }
 0x39e   :  { %v5900_v49 = vadd.f32 %v5899_v13, %v10969_v38  ;;  %v6076_v51 = vpop.f32.mrf.mxu1 }
 0x39f   :  { %v5901_v54 = vpop.f32.mrf.mxu0 }
 0x3a0   :  { %v11316_v17 = vadd.f32 %v6076_v51, %v5900_v49  ;;  %v6078_v21 = vpop.f32.mrf.mxu1  ;;  %v8662_v49 = vld [vmem:[%s11613_s0 + $0x448] ss:$100 sps:$4 sm:$0xff]  }
 0x3a1   :  { %v5904_v32 = vpop.f32.mrf.mxu0  ;;  %7752 = vmatmul.mubr.bf16.vlgmr.msra.gmra.mxu0 %v8654_v53 }
 0x3a2   :  { %v5905_v38 = vadd.f32 %v5904_v32, %v10979_v52  ;;  %v6081_v47 = vpop.f32.mrf.mxu1  ;;  %7772 = vmatmul.mubr.bf16.vlgmr.msra.gmra.mxu1 %v8655_v22  ;;  %7755 = vmatprep.mubr.bf16.mxu0 %v8656_v60  ;;  %v8659_v52 = vld [vmem:[%s11613_s0 + $0xa88] ss:$100 sps:$4 sm:$0xff]   ;;  %v8664_v60 = vld [vmem:[%s11613_s0 + $0x510] ss:$100 sps:$4 sm:$0xff]  }
 0x3a3   :  { %v5906_v18 = vpop.f32.mrf.mxu0  ;;  %7775 = vmatprep.mubr.bf16.mxu1 %v8657_v29  ;;  %v8665_v29 = vld [vmem:[%s11613_s0 + $0xce0] ss:$100 sps:$4 sm:$0xff]  }
 0x3a4   :  { %v11319_v15 = vadd.f32 %v6081_v47, %v5905_v38  ;;  %v6083_v7 = vpop.f32.mrf.mxu1 }
 0x3a5   :  { %v5907_v8 = vpop.f32.mrf.mxu0 }
 0x3a6   :  { %v5908_v30 = vadd.f32 %v5907_v8, %v10995_v6  ;;  %v6084_v34 = vpop.f32.mrf.mxu1 }
 0x3a7   :  { %v5909_v5 = vpop.f32.mrf.mxu0 }
 0x3a8   :  { %v11334_v59 = vadd.f32 %v6084_v34, %v5908_v30  ;;  %v6086_v35 = vpop.f32.mrf.mxu1  ;;  %v8666_v30 = vld [vmem:[%s11613_s0 + $0x5d8] ss:$100 sps:$4 sm:$0xff]  }
 0x3a9   :  { %v5912_v46 = vpop.f32.mrf.mxu0  ;;  %7756 = vmatmul.mubr.bf16.gmra.mxu0 %v8658_v20 }
 0x3aa   :  { %v5913_v6 = vadd.f32 %v5912_v46, %v11001_v9  ;;  %v6089_v40 = vpop.f32.mrf.mxu1  ;;  %7776 = vmatmul.mubr.bf16.gmra.mxu1 %v8659_v52  ;;  %7759 = vmatprep.mubr.bf16.mxu0 %v8660_v14  ;;  %v8663_v9 = vld [vmem:[%s11613_s0 + $0xc18] ss:$100 sps:$4 sm:$0xff]   ;;  %v8668_v14 = vld [vmem:[%s11613_s0 + $0x6a0] ss:$100 sps:$4 sm:$0xff]  }
 0x3ab   :  { %v5914_v50 = vpop.f32.mrf.mxu0  ;;  %7779 = vmatprep.mubr.bf16.mxu1 %v8661_v0 }
 0x3ac   :  { %v11337_v24 = vadd.f32 %v6089_v40, %v5913_v6  ;;  %v6091_v13 = vpop.f32.mrf.mxu1 }
 0x3ad   :  { %v5915_v53 = vpop.f32.mrf.mxu0 }
 0x3ae   :  { %v5916_v51 = vadd.f32 %v5915_v53, %v11019_v2  ;;  %v6092_v22 = vpop.f32.mrf.mxu1 }
 0x3af   :  { %v5917_v54 = vpop.f32.mrf.mxu0 }
 0x3b0   :  { %v11352_v21 = vadd.f32 %v6092_v22, %v5916_v51  ;;  %v6094_v32 = vpop.f32.mrf.mxu1 }
 0x3b1   :  { %v5920_v38 = vpop.f32.mrf.mxu0  ;;  %7760 = vmatmul.mubr.bf16.gmra.mxu0 %v8662_v49  ;;  %v8669_v49 = vld [vmem:[%s11613_s0 + $0x768] ss:$100 sps:$4 sm:$0xff]  }
 0x3b2   :  { %v5921_v2 = vadd.f32 %v5920_v38, %v11025_v36  ;;  %v6097_v47 = vpop.f32.mrf.mxu1  ;;  %7780 = vmatmul.mubr.bf16.gmra.mxu1 %v8663_v9  ;;  %7763 = vmatprep.mubr.bf16.mxu0 %v8664_v60  ;;  %v8667_v36 = vld [vmem:[%s11613_s0 + $0xda8] ss:$100 sps:$4 sm:$0xff]  }
 0x3b3   :  { %v5922_v18 = vpop.f32.mrf.mxu0  ;;  %7783 = vmatprep.mubr.bf16.mxu1 %v8665_v29 }
 0x3b4   :  { %v11355_v7 = vadd.f32 %v6097_v47, %v5921_v2  ;;  %v6099_v8 = vpop.f32.mrf.mxu1 }
 0x3b5   :  { %v5923_v20 = vpop.f32.mrf.mxu0 }
 0x3b6   :  { %v5924_v34 = vadd.f32 %v5923_v20, %v11043_v55  ;;  %v6100_v52 = vpop.f32.mrf.mxu1 }
 0x3b7   :  { %v5925_v5 = vpop.f32.mrf.mxu0 }
 0x3b8   :  { %v11367_v0 = vadd.f32 %v6100_v52, %v5924_v34  ;;  %v6102_v35 = vpop.f32.mrf.mxu1 }
 0x3b9   :  { %v5928_v46 = vpop.f32.mrf.mxu0  ;;  %7764 = vmatmul.mubr.bf16.gmra.mxu0 %v8666_v30 }
 0x3ba   :  { %v5929_v6 = vadd.f32 %v5928_v46, %v11049_v4  ;;  %v6105_v40 = vpop.f32.mrf.mxu1  ;;  %7784 = vmatmul.mubr.bf16.gmra.mxu1 %v8667_v36  ;;  %7767 = vmatprep.mubr.bf16.mxu0 %v8668_v14 }
 0x3bb   :  { %v5930_v55 = vpop.f32.mrf.mxu0 }
 0x3bc   :  { %v11370_v50 = vadd.f32 %v6105_v40, %v5929_v6  ;;  %v6107_v13 = vpop.f32.mrf.mxu1 }
 0x3bd   :  { %v5931_v53 = vpop.f32.mrf.mxu0 }
 0x3be   :  { %v5932_v51 = vadd.f32 %v5931_v53, %v11064_v12  ;;  %v6108_v22 = vpop.f32.mrf.mxu1 }
 0x3bf   :  { %v5933_v9 = vpop.f32.mrf.mxu0 }
 0x3c0   :  { %v11376_v60 = vadd.f32 %v6108_v22, %v5932_v51  ;;  %v6110_v54 = vpop.f32.mrf.mxu1 }
 0x3c1   :  { %v5936_v4 = vpop.f32.mrf.mxu0  ;;  %7768 = vmatmul.mubr.bf16.gmra.mxu0 %v8669_v49 }
 0x3c2   :  { %v5937_v29 = vadd.f32 %v5936_v4, %v11067_v25  ;;  %v6113_v32 = vpop.f32.mrf.mxu1 }
 0x3c3   :  { %v5938_v38 = vpop.f32.mrf.mxu0 }
 0x3c4   :  { %v11379_v2 = vadd.f32 %v6113_v32, %v5937_v29  ;;  %v6115_v47 = vpop.f32.mrf.mxu1 }
 0x3c5   :  { %v5939_v18 = vpop.f32.mrf.mxu0 }
 0x3c6   :  { %v5940_v8 = vadd.f32 %v5939_v18, %v11082_v27  ;;  %v6116_v20 = vpop.f32.mrf.mxu1 }
 0x3c7   :  { %v5941_v30 = vpop.f32.mrf.mxu0 }
 0x3c8   :  { %v11382_v12 = vadd.f32 %v6116_v20, %v5940_v8  ;;  %v6118_v34 = vpop.f32.mrf.mxu1 }
 0x3c9   :  { %v5944_v52 = vpop.f32.mrf.mxu0 }
 0x3ca   :  { %11616 = vst [vmem:[#allocation2_spill] sm:$0xff] %v11382_v12  ;;  %v5945_v36 = vadd.f32 %v5944_v52, %v11085_v44  ;;  %v6121_v14 = vpop.f32.mrf.mxu1 }
 0x3cb   :  { %v5946_v5 = vpop.f32.mrf.mxu0 }
 0x3cc   :  { %v11385_v35 = vadd.f32 %v6121_v14, %v5945_v36  ;;  %v6123_v25 = vpop.f32.mrf.mxu1 }
 0x3cd   :  { %v5947_v46 = vpop.f32.mrf.mxu0 }
 0x3ce   :  { %v5948_v6 = vadd.f32 %v5947_v46, %v11100_v58  ;;  %v6124_v40 = vpop.f32.mrf.mxu1 }
 0x3cf   :  { %v5949_v55 = vpop.f32.mrf.mxu0 }
 0x3d0   :  { %v11388_v13 = vadd.f32 %v6124_v40, %v5948_v6  ;;  %v6126_v27 = vpop.f32.mrf.mxu1 }
 0x3d1   :  { %v6162_v53 = vpop.f32.mrf.mxu0 }
 0x3d2   :  { %11617 = vst [vmem:[#allocation3_spill] sm:$0xff] %v11388_v13  ;;  %v6163_v49 = vadd.f32 %v6162_v53, %v11103_v33  ;;  %v6339_v51 = vpop.f32.mrf.mxu1 }
 0x3d3   :  { %v6164_v22 = vpop.f32.mrf.mxu0 }
 0x3d4   :  { %v11391_v9 = vadd.f32 %v6339_v51, %v6163_v49  ;;  %v6341_v44 = vpop.f32.mrf.mxu1 }
 0x3d5   :  { %v6165_v54 = vpop.f32.mrf.mxu0 }
 0x3d6   :  { %v6166_v4 = vadd.f32 %v6165_v54, %v11118_v16  ;;  %v6342_v29 = vpop.f32.mrf.mxu1 }
 0x3d7   :  { %v6167_v32 = vpop.f32.mrf.mxu0 }
 0x3d8   :  { %v11394_v38 = vadd.f32 %v6342_v29, %v6166_v4  ;;  %v6344_v58 = vpop.f32.mrf.mxu1 }
 0x3d9   :  { %v6170_v47 = vpop.f32.mrf.mxu0 }
 0x3da   :  { %v6171_v18 = vadd.f32 %v6170_v47, %v11121_v26  ;;  %v6347_v8 = vpop.f32.mrf.mxu1 }
 0x3db   :  { %v6172_v20 = vpop.f32.mrf.mxu0 }
 0x3dc   :  { %v11397_v30 = vadd.f32 %v6347_v8, %v6171_v18  ;;  %v6349_v33 = vpop.f32.mrf.mxu1 }
 0x3dd   :  { %v6173_v34 = vpop.f32.mrf.mxu0 }
 0x3de   :  { %v6174_v52 = vadd.f32 %v6173_v34, %v11136_v62  ;;  %v6350_v36 = vpop.f32.mrf.mxu1 }
 0x3df   :  { %v6175_v14 = vpop.f32.mrf.mxu0 }
 0x3e0   :  { %v11400_v5 = vadd.f32 %v6350_v36, %v6174_v52  ;;  %v6352_v16 = vpop.f32.mrf.mxu1 }
 0x3e1   :  { %v6178_v25 = vpop.f32.mrf.mxu0 }
 0x3e2   :  { %v6179_v46 = vadd.f32 %v6178_v25, %v11139_v3  ;;  %v6355_v6 = vpop.f32.mrf.mxu1 }
 0x3e3   :  { %v6180_v40 = vpop.f32.mrf.mxu0 }
 0x3e4   :  { %v11403_v55 = vadd.f32 %v6355_v6, %v6179_v46  ;;  %v6357_v26 = vpop.f32.mrf.mxu1 }
 0x3e5   :  { %v6181_v27 = vpop.f32.mrf.mxu0 }
 0x3e6   :  { %v6182_v53 = vadd.f32 %v6181_v27, %v11154_v28  ;;  %v6358_v49 = vpop.f32.mrf.mxu1 }
 0x3e7   :  { %v6183_v51 = vpop.f32.mrf.mxu0 }
 0x3e8   :  { %v11406_v22 = vadd.f32 %v6358_v49, %v6182_v53  ;;  %v6360_v62 = vpop.f32.mrf.mxu1 }
 0x3e9   :  { %v6186_v44 = vpop.f32.mrf.mxu0 }
 0x3ea   :  { %v6187_v54 = vadd.f32 %v6186_v44, %v11157_v56  ;;  %v6363_v4 = vpop.f32.mrf.mxu1 }
 0x3eb   :  { %v6188_v29 = vpop.f32.mrf.mxu0 }
 0x3ec   :  { %v11409_v32 = vadd.f32 %v6363_v4, %v6187_v54  ;;  %v6365_v3 = vpop.f32.mrf.mxu1 }
 0x3ed   :  { %v6189_v58 = vpop.f32.mrf.mxu0 }
 0x3ee   :  { %v6190_v47 = vadd.f32 %v6189_v58, %v11172_v11  ;;  %v6366_v18 = vpop.f32.mrf.mxu1 }
 0x3ef   :  { %v6191_v8 = vpop.f32.mrf.mxu0 }
 0x3f0   :  { %v11412_v20 = vadd.f32 %v6366_v18, %v6190_v47  ;;  %v6368_v28 = vpop.f32.mrf.mxu1 }
 0x3f1   :  { %v6194_v33 = vpop.f32.mrf.mxu0 }
 0x3f2   :  { %v6195_v34 = vadd.f32 %v6194_v33, %v11175_v61  ;;  %v6371_v52 = vpop.f32.mrf.mxu1 }
 0x3f3   :  { %v6196_v36 = vpop.f32.mrf.mxu0 }
 0x3f4   :  { %v11415_v14 = vadd.f32 %v6371_v52, %v6195_v34  ;;  %v6373_v56 = vpop.f32.mrf.mxu1 }
 0x3f5   :  { %v6197_v16 = vpop.f32.mrf.mxu0 }
 0x3f6   :  { %v6198_v25 = vadd.f32 %v6197_v16, %v11190_v42  ;;  %v6374_v46 = vpop.f32.mrf.mxu1 }
 0x3f7   :  { %v6199_v6 = vpop.f32.mrf.mxu0 }
 0x3f8   :  { %v11418_v40 = vadd.f32 %v6374_v46, %v6198_v25  ;;  %v6376_v11 = vpop.f32.mrf.mxu1 }
 0x3f9   :  { %v6202_v26 = vpop.f32.mrf.mxu0 }
 0x3fa   :  { %v6203_v27 = vadd.f32 %v6202_v26, %v11193_v31  ;;  %v6379_v53 = vpop.f32.mrf.mxu1 }
 0x3fb   :  { %v6204_v49 = vpop.f32.mrf.mxu0 }
 0x3fc   :  { %v11421_v51 = vadd.f32 %v6379_v53, %v6203_v27  ;;  %v6381_v61 = vpop.f32.mrf.mxu1 }
 0x3fd   :  { %v6205_v62 = vpop.f32.mrf.mxu0 }
 0x3fe   :  { %v6206_v44 = vadd.f32 %v6205_v62, %v11208_v23  ;;  %v6382_v54 = vpop.f32.mrf.mxu1 }
 0x3ff   :  { %v6207_v4 = vpop.f32.mrf.mxu0 }
 0x400   :  { %v11424_v29 = vadd.f32 %v6382_v54, %v6206_v44  ;;  %v6384_v42 = vpop.f32.mrf.mxu1 }
 0x401   :  { %v6210_v3 = vpop.f32.mrf.mxu0 }
 0x402   :  { %v6211_v58 = vadd.f32 %v6210_v3, %v11211_v48  ;;  %v6387_v47 = vpop.f32.mrf.mxu1 }
 0x403   :  { %v6212_v18 = vpop.f32.mrf.mxu0 }
 0x404   :  { %v11427_v8 = vadd.f32 %v6387_v47, %v6211_v58  ;;  %v6389_v31 = vpop.f32.mrf.mxu1 }
 0x405   :  { %v6213_v28 = vpop.f32.mrf.mxu0 }
 0x406   :  { %11618 = vst [vmem:[#allocation4_spill] sm:$0xff] %v11427_v8  ;;  %v6214_v33 = vadd.f32 %v6213_v28, %v11226_v63  ;;  %v6390_v34 = vpop.f32.mrf.mxu1 }
 0x407   :  { %v6215_v52 = vpop.f32.mrf.mxu0 }
 0x408   :  { %v11430_v36 = vadd.f32 %v6390_v34, %v6214_v33  ;;  %v6392_v23 = vpop.f32.mrf.mxu1 }
 0x409   :  { %v6218_v56 = vpop.f32.mrf.mxu0 }
 0x40a   :  { %11619 = vst [vmem:[#allocation5_spill] sm:$0xff] %v11430_v36  ;;  %v6219_v16 = vadd.f32 %v6218_v56, %v11229_v19  ;;  %v6395_v25 = vpop.f32.mrf.mxu1 }
 0x40b   :  { %v6220_v46 = vpop.f32.mrf.mxu0 }
 0x40c   :  { %v11433_v6 = vadd.f32 %v6395_v25, %v6219_v16  ;;  %v6397_v48 = vpop.f32.mrf.mxu1 }
 0x40d   :  { %v6221_v11 = vpop.f32.mrf.mxu0 }
 0x40e   :  { %11620 = vst [vmem:[#allocation6_spill] sm:$0xff] %v11433_v6  ;;  %v6222_v26 = vadd.f32 %v6221_v11, %v11244_v10  ;;  %v6398_v27 = vpop.f32.mrf.mxu1 }
 0x40f   :  { %v6223_v53 = vpop.f32.mrf.mxu0 }
 0x410   :  { %v11436_v49 = vadd.f32 %v6398_v27, %v6222_v26  ;;  %v6400_v63 = vpop.f32.mrf.mxu1 }
 0x411   :  { %v6226_v61 = vpop.f32.mrf.mxu0 }
 0x412   :  { %11621 = vst [vmem:[#allocation7_spill] sm:$0xff] %v11436_v49  ;;  %v6227_v62 = vadd.f32 %v6226_v61, %v11247_v43  ;;  %v6403_v44 = vpop.f32.mrf.mxu1 }
 0x413   :  { %v6228_v54 = vpop.f32.mrf.mxu0 }
 0x414   :  { %v11439_v4 = vadd.f32 %v6403_v44, %v6227_v62  ;;  %v6405_v19 = vpop.f32.mrf.mxu1 }
 0x415   :  { %v6229_v42 = vpop.f32.mrf.mxu0 }
 0x416   :  { %11622 = vst [vmem:[#allocation8_spill] sm:$0xff] %v11439_v4  ;;  %v6230_v3 = vadd.f32 %v6229_v42, %v11262_v37  ;;  %v6406_v58 = vpop.f32.mrf.mxu1 }
 0x417   :  { %v6231_v47 = vpop.f32.mrf.mxu0 }
 0x418   :  { %v11442_v18 = vadd.f32 %v6406_v58, %v6230_v3  ;;  %v6408_v10 = vpop.f32.mrf.mxu1 }
 0x419   :  { %v6234_v31 = vpop.f32.mrf.mxu0 }
 0x41a   :  { %11623 = vst [vmem:[#allocation9_spill] sm:$0xff] %v11442_v18  ;;  %v6235_v28 = vadd.f32 %v6234_v31, %v11265_v57  ;;  %v6411_v33 = vpop.f32.mrf.mxu1 }
 0x41b   :  { %v6236_v34 = vpop.f32.mrf.mxu0 }
 0x41c   :  { %v11445_v52 = vadd.f32 %v6411_v33, %v6235_v28  ;;  %v6413_v43 = vpop.f32.mrf.mxu1 }
 0x41d   :  { %v6237_v23 = vpop.f32.mrf.mxu0 }
 0x41e   :  { %11624 = vst [vmem:[#allocation10_spill] sm:$0xff] %v11445_v52  ;;  %v6238_v56 = vadd.f32 %v6237_v23, %v11280_v45  ;;  %v6414_v16 = vpop.f32.mrf.mxu1 }
 0x41f   :  { %v6239_v25 = vpop.f32.mrf.mxu0 }
 0x420   :  { %v11448_v46 = vadd.f32 %v6414_v16, %v6238_v56  ;;  %v6416_v37 = vpop.f32.mrf.mxu1 }
 0x421   :  { %v6242_v48 = vpop.f32.mrf.mxu0 }
 0x422   :  { %11625 = vst [vmem:[#allocation11_spill] sm:$0xff] %v11448_v46  ;;  %v6243_v11 = vadd.f32 %v6242_v48, %v11283_v1  ;;  %v6419_v26 = vpop.f32.mrf.mxu1 }
 0x423   :  { %v6244_v27 = vpop.f32.mrf.mxu0 }
 0x424   :  { %v11451_v53 = vadd.f32 %v6419_v26, %v6243_v11  ;;  %v6421_v57 = vpop.f32.mrf.mxu1 }
 0x425   :  { %v6245_v63 = vpop.f32.mrf.mxu0 }
 0x426   :  { %v6246_v61 = vadd.f32 %v6245_v63, %v11298_v41  ;;  %v6422_v62 = vpop.f32.mrf.mxu1 }
 0x427   :  { %v6247_v44 = vpop.f32.mrf.mxu0 }
 0x428   :  { %v11454_v54 = vadd.f32 %v6422_v62, %v6246_v61  ;;  %v6424_v45 = vpop.f32.mrf.mxu1 }
 0x429   :  { %v6250_v19 = vpop.f32.mrf.mxu0 }
 0x42a   :  { %v6427_v42 = vpop.f32.mrf.mxu1  ;;  %v6251_v8 = vadd.f32 %v6250_v19, %v11301_v39 }
 0x42b   :  { %v6252_v3 = vpop.f32.mrf.mxu0 }
 0x42c   :  { %v6429_v58 = vpop.f32.mrf.mxu1 }
 0x42d   :  { %v6253_v47 = vpop.f32.mrf.mxu0 }
 0x42e   :  { %v6430_v10 = vpop.f32.mrf.mxu1 }
 0x42f   :  { %v6255_v1 = vpop.f32.mrf.mxu0 }
 0x430   :  { %v6432_v31 = vpop.f32.mrf.mxu1 }
 0x431   :  { %v11456_v28 = vpop.f32.mrf.mxu0 }
 0x432   :  { %v11458_v33 = vpop.f32.mrf.mxu1 }
 0x433   :  { %v6260_v34 = vpop.f32.mrf.mxu0 }
 0x434   :  { %v6437_v43 = vpop.f32.mrf.mxu1 }
 0x435   :  { %v11460_v41 = vpop.f32.mrf.mxu0 }
 0x436   :  { %v11462_v23 = vpop.f32.mrf.mxu1 }
 0x437   :  { %v6263_v56 = vpop.f32.mrf.mxu0 }
 0x438   :  { %v6440_v16 = vpop.f32.mrf.mxu1 }
 0x439   :  { %v6266_v25 = vpop.f32.mrf.mxu0 }
 0x43a   :  { %v11464_v37 = vpop.f32.mrf.mxu1  ;;  %v6267_v39 = vadd.f32 %v6266_v25, %v11337_v24  ;;  %v6262_v24 = vadd.f32 %v11460_v41, %v11334_v59 }
 0x43b   :  { %v6268_v48 = vpop.f32.mrf.mxu0 }
 0x43c   :  { %v6445_v11 = vpop.f32.mrf.mxu1 }
 0x43d   :  { %v6269_v26 = vpop.f32.mrf.mxu0 }
 0x43e   :  { %v11466_v27 = vpop.f32.mrf.mxu1 }
 0x43f   :  { %v6271_v57 = vpop.f32.mrf.mxu0 }
 0x440   :  { %v6448_v63 = vpop.f32.mrf.mxu1 }
 0x441   :  { %v11468_v61 = vpop.f32.mrf.mxu0 }
 0x442   :  { %v11470_v62 = vpop.f32.mrf.mxu1 }
 0x443   :  { %v6276_v44 = vpop.f32.mrf.mxu0 }
 0x444   :  { %v6453_v45 = vpop.f32.mrf.mxu1 }
 0x445   :  { %v11472_v3 = vpop.f32.mrf.mxu0 }
 0x446   :  { %v11474_v58 = vpop.f32.mrf.mxu1 }
 0x447   :  { %v6279_v1 = vpop.f32.mrf.mxu0 }
 0x448   :  { %v6456_v31 = vpop.f32.mrf.mxu1 }
 0x449   :  { %v11476_v34 = vpop.f32.mrf.mxu0 }
 0x44a   :  { %v11478_v43 = vpop.f32.mrf.mxu1 }
 0x44b   :  { %v6284_v56 = vpop.f32.mrf.mxu0 }
 0x44c   :  { %v6461_v16 = vpop.f32.mrf.mxu1 }
 0x44d   :  { %v11480_v48 = vpop.f32.mrf.mxu0 }
 0x44e   :  { %v11482_v11 = vpop.f32.mrf.mxu1 }
 0x44f   :  { %v6287_v57 = vpop.f32.mrf.mxu0 }
 0x450   :  { %v6464_v63 = vpop.f32.mrf.mxu1 }
 0x451   :  { %v11484_v44 = vpop.f32.mrf.mxu0 }
 0x452   :  { %v11486_v45 = vpop.f32.mrf.mxu1 }
 0x453   :  { %11626 = vst [vmem:[#allocation12_spill] sm:$0xff] %v11486_v45  ;;  %v6292_v18 = vpop.f32.mrf.mxu0  ;;  %v6254_v45 = vadd.f32 %v6253_v47, %v11316_v17 }
 0x454   :  { %v6469_v46 = vpop.f32.mrf.mxu1 }
 0x455   :  { %v11488_v1 = vpop.f32.mrf.mxu0 }
 0x456   :  { %11627 = vst [vmem:[#allocation13_spill] sm:$0xff] %v11488_v1  ;;  %v11490_v31 = vpop.f32.mrf.mxu1 }
 0x457   :  { %11628 = vst [vmem:[#allocation14_spill] sm:$0xff] %v11490_v31  ;;  %v6295_v4 = vpop.f32.mrf.mxu0 }
 0x458   :  { %v6472_v52 = vpop.f32.mrf.mxu1  ;;  %v6428_v4 = vadd.f32 %v6427_v42, %v6251_v8  ;;  %v6259_v8 = vadd.f32 %v11456_v28, %v11319_v15  ;;  %v6444_v15 = vadd.f32 %v11464_v37, %v6267_v39  ;;  %v6275_v39 = vadd.f32 %v11468_v61, %v11355_v7 }
 0x459   :  { %v11492_v56 = vpop.f32.mrf.mxu0 }
 0x45a   :  { %v11494_v16 = vpop.f32.mrf.mxu1  ;;  %v6436_v59 = vadd.f32 %v11458_v33, %v6259_v8  ;;  %v6439_v33 = vadd.f32 %v11462_v23, %v6262_v24  ;;  %v6286_v23 = vadd.f32 %v11480_v48, %v11376_v60 }
 0x45b   :  { %11629 = vst [vmem:[#allocation15_spill] sm:$0xff] %v11494_v16  ;;  %v6300_v36 = vpop.f32.mrf.mxu0  ;;  %v6431_v16 = vadd.f32 %v6430_v10, %v6254_v45  ;;  %v6270_v45 = vadd.f32 %v6269_v26, %v11352_v21 }
 0x45c   :  { %v6477_v49 = vpop.f32.mrf.mxu1 }
 0x45d   :  { %v11496_v57 = vpop.f32.mrf.mxu0  ;;  %v6447_v41 = vadd.f32 %v11466_v27, %v6270_v45  ;;  %v6283_v27 = vadd.f32 %v11476_v34, %v11370_v50 }
 0x45e   :  { %11630 = vst [vmem:[#allocation16_spill] sm:$0xff] %v11496_v57  ;;  %v11498_v63 = vpop.f32.mrf.mxu1 }
 0x45f   :  { %11631 = vst [vmem:[#allocation17_spill] sm:$0xff] %v11498_v63  ;;  %v6303_v18 = vpop.f32.mrf.mxu0  ;;  %v6460_v7 = vadd.f32 %v11478_v43, %v6283_v27 }
 0x460   :  { %v6480_v46 = vpop.f32.mrf.mxu1 }
 0x461   :  { %v7753_v6 = vpop.f32.mrf.mxu0 }
 0x462   :  { %v7773_v31 = vpop.f32.mrf.mxu1  ;;  %v6525_v1 = vadd.f32 %v7753_v6, %v11397_v30 }
 0x463   :  { %v6516_v52 = vpop.f32.mrf.mxu0  ;;  %v6605_v36 = vadd.f32 %v7773_v31, %v6428_v4 }
 0x464   :  { %v6596_v12 = vpop.f32.mrf.mxu1  ;;  %v6517_v57 = vadd.f32 %v6516_v52, %v11391_v9  ;;  %v6661_v42 = vmax.f32 %v6525_v1, 0.0 }
 0x465   :  { %v7754_v49 = vpop.f32.mrf.mxu0  ;;  %v6597_v19 = vadd.f32 %v6596_v12, %v11451_v53  ;;  %v6681_v9 = vmax.f32 %v6605_v36, 0.0 }
 0x466   :  { %v6528_v63 = vadd.f32 %v7754_v49, %v11400_v5  ;;  %v7774_v13 = vpop.f32.mrf.mxu1  ;;  %v6659_v12 = vmax.f32 %v6517_v57, 0.0 }
 0x467   :  { %v6608_v17 = vadd.f32 %v7774_v13, %v6431_v16  ;;  %v6519_v47 = vpop.f32.mrf.mxu0  ;;  %v6679_v28 = vmax.f32 %v6597_v19, 0.0 }
 0x468   :  { %v6662_v30 = vmax.f32 %v6528_v63, 0.0  ;;  %v6520_v6 = vadd.f32 %v6519_v47, %v11394_v38  ;;  %v6599_v10 = vpop.f32.mrf.mxu1 }
 0x469   :  { %v6682_v31 = vmax.f32 %v6608_v17, 0.0  ;;  %v6600_v5 = vadd.f32 %v6599_v10, %v11454_v54  ;;  %v7757_v18 = vpop.f32.mrf.mxu0 }
 0x46a   :  { %v7610_v13 = vpack.c.bf16 %v6662_v30, %v6661_v42  ;;  %v6660_v53 = vmax.f32 %v6520_v6, 0.0  ;;  %v7777_v25 = vpop.f32.mrf.mxu1  ;;  %v6541_v54 = vadd.f32 %v7757_v18, %v11409_v32  ;;  %v6278_v42 = vadd.f32 %v11472_v3, %v11367_v0 }
 0x46b   :  { %v7660_v1 = vpack.c.bf16 %v6682_v31, %v6681_v9  ;;  %v6680_v38 = vmax.f32 %v6600_v5, 0.0  ;;  %v6532_v16 = vpop.f32.mrf.mxu0  ;;  %v6621_v57 = vadd.f32 %v7777_v25, %v6444_v15  ;;  %v6452_v0 = vadd.f32 %v11470_v62, %v6275_v39 }
 0x46c   :  { %7692 = vst [vmem:[%s11615_s3 + $0x8] sm:$0xff] %v7610_v13   ;;  %v7605_v21 = vpack.c.bf16 %v6660_v53, %v6659_v12  ;;  %v6612_v26 = vpop.f32.mrf.mxu1  ;;  %v6533_v46 = vadd.f32 %v6532_v16, %v11403_v55  ;;  %v6665_v19 = vmax.f32 %v6541_v54, 0.0  ;;  %v6463_v3 = vadd.f32 %v11482_v11, %v6286_v23  ;;  %v11632_v16 = vld [vmem:[#allocation3_spill] sm:$0xff] }
 0x46d   :  { %7702 = vst [vmem:[%s11615_s3 + $0x58] sm:$0xff] %v7660_v1   ;;  %v7655_v37 = vpack.c.bf16 %v6680_v38, %v6679_v28  ;;  %v7758_v63 = vpop.f32.mrf.mxu0  ;;  %v6613_v52 = vadd.f32 %v6612_v26, %v6436_v59  ;;  %v6685_v47 = vmax.f32 %v6621_v57, 0.0  ;;  %v6455_v62 = vadd.f32 %v11474_v58, %v6278_v42  ;;  %v11633_v58 = vld [vmem:[#allocation16_spill] sm:$0xff]  ;;  %v11634_v59 = vld [vmem:[#allocation2_spill] sm:$0xff]  ;;  %v11641_v42 = vld [vmem:[#allocation7_spill] sm:$0xff] }
 0x46e   :  { %7606 = vst [vmem:[%s11615_s3] sm:$0xff] %v7605_v21   ;;  %v6544_v32 = vadd.f32 %v7758_v63, %v11412_v20  ;;  %v7778_v4 = vpop.f32.mrf.mxu1  ;;  %v6663_v30 = vmax.f32 %v6533_v46, 0.0  ;;  %v6299_v11 = vadd.f32 %v11492_v56, %v11385_v35  ;;  %v6291_v28 = vadd.f32 %v11484_v44, %v11379_v2  ;;  %v11636_v2 = vld [vmem:[#allocation15_spill] sm:$0xff] }
 0x46f   :  { %7701 = vst [vmem:[%s11615_s3 + $0x50] sm:$0xff] %v7655_v37   ;;  %v6624_v36 = vadd.f32 %v7778_v4, %v6447_v41  ;;  %v6535_v49 = vpop.f32.mrf.mxu0  ;;  %v6683_v61 = vmax.f32 %v6613_v52, 0.0  ;;  %v6302_v21 = vadd.f32 %v11633_v58, %v11632_v16  ;;  %v11635_v41 = vld [vmem:[#allocation13_spill] sm:$0xff]  ;;  %v11646_v16 = vld [vmem:[#allocation11_spill] sm:$0xff] }
 0x470   :  { %v6666_v55 = vmax.f32 %v6544_v32, 0.0  ;;  %v6536_v20 = vadd.f32 %v6535_v49, %v11406_v22  ;;  %v6615_v17 = vpop.f32.mrf.mxu1  ;;  %v6294_v37 = vadd.f32 %v11635_v41, %v11634_v59  ;;  %v6476_v44 = vadd.f32 %v11636_v2, %v6299_v11 }
 0x471   :  { %v6686_v50 = vmax.f32 %v6624_v36, 0.0  ;;  %v6616_v34 = vadd.f32 %v6615_v17, %v6439_v33  ;;  %v7761_v8 = vpop.f32.mrf.mxu0  ;;  %v11637_v36 = vld [vmem:[#allocation6_spill] sm:$0xff] }
 0x472   :  { %v7620_v6 = vpack.c.bf16 %v6666_v55, %v6665_v19  ;;  %v6664_v10 = vmax.f32 %v6536_v20, 0.0  ;;  %v7781_v45 = vpop.f32.mrf.mxu1  ;;  %v6557_v48 = vadd.f32 %v7761_v8, %v11421_v51  ;;  %v11638_v19 = vld [vmem:[#allocation12_spill] sm:$0xff]  ;;  %v11639_v20 = vld [vmem:[#allocation17_spill] sm:$0xff] }
 0x473   :  { %v7670_v9 = vpack.c.bf16 %v6686_v50, %v6685_v47  ;;  %v6684_v22 = vmax.f32 %v6616_v34, 0.0  ;;  %v6548_v31 = vpop.f32.mrf.mxu0  ;;  %v6637_v18 = vadd.f32 %v7781_v45, %v6460_v7  ;;  %v6468_v55 = vadd.f32 %v11638_v19, %v6291_v28  ;;  %v11640_v34 = vld [vmem:[#allocation4_spill] sm:$0xff] }
 0x474   :  { %7694 = vst [vmem:[%s11615_s3 + $0x18] sm:$0xff] %v7620_v6   ;;  %v7615_v60 = vpack.c.bf16 %v6664_v10, %v6663_v30  ;;  %v6628_v5 = vpop.f32.mrf.mxu1  ;;  %v6549_v12 = vadd.f32 %v6548_v31, %v11415_v14  ;;  %v6669_v1 = vmax.f32 %v6557_v48, 0.0  ;;  %v6479_v17 = vadd.f32 %v11639_v20, %v6302_v21  ;;  %v11642_v10 = vld [vmem:[#allocation14_spill] sm:$0xff] }
 0x475   :  { %7704 = vst [vmem:[%s11615_s3 + $0x68] sm:$0xff] %v7670_v9   ;;  %v7665_v43 = vpack.c.bf16 %v6684_v22, %v6683_v61  ;;  %v7762_v24 = vpop.f32.mrf.mxu0  ;;  %v6629_v53 = vadd.f32 %v6628_v5, %v6452_v0  ;;  %v6689_v54 = vmax.f32 %v6637_v18, 0.0  ;;  %v6471_v45 = vadd.f32 %v11642_v10, %v6294_v37 }
 0x476   :  { %7693 = vst [vmem:[%s11615_s3 + $0x10] sm:$0xff] %v7615_v60   ;;  %v6560_v51 = vadd.f32 %v7762_v24, %v11424_v29  ;;  %v7782_v13 = vpop.f32.mrf.mxu1  ;;  %v6667_v57 = vmax.f32 %v6549_v12, 0.0  ;;  %v11643_v60 = vld [vmem:[#allocation5_spill] sm:$0xff] }
 0x477   :  { %7703 = vst [vmem:[%s11615_s3 + $0x60] sm:$0xff] %v7665_v43   ;;  %v6640_v25 = vadd.f32 %v7782_v13, %v6463_v3  ;;  %v6551_v15 = vpop.f32.mrf.mxu0  ;;  %v6687_v4 = vmax.f32 %v6629_v53, 0.0 }
 0x478   :  { %v6670_v14 = vmax.f32 %v6560_v51, 0.0  ;;  %v6552_v29 = vadd.f32 %v6551_v15, %v11418_v40  ;;  %v6631_v38 = vpop.f32.mrf.mxu1  ;;  %v11644_v15 = vld [vmem:[#allocation10_spill] sm:$0xff] }
 0x479   :  { %v6690_v35 = vmax.f32 %v6640_v25, 0.0  ;;  %v6632_v56 = vadd.f32 %v6631_v38, %v6455_v62  ;;  %v7765_v26 = vpop.f32.mrf.mxu0 }
 0x47a   :  { %v7630_v63 = vpack.c.bf16 %v6670_v14, %v6669_v1  ;;  %v6668_v46 = vmax.f32 %v6552_v29, 0.0  ;;  %v7785_v32 = vpop.f32.mrf.mxu1  ;;  %v6573_v49 = vadd.f32 %v7765_v26, %v11637_v36  ;;  %v11645_v29 = vld [vmem:[#allocation8_spill] sm:$0xff] }
 0x47b   :  { %v7680_v33 = vpack.c.bf16 %v6690_v35, %v6689_v54  ;;  %v6688_v40 = vmax.f32 %v6632_v56, 0.0  ;;  %v6564_v27 = vpop.f32.mrf.mxu0  ;;  %v6653_v47 = vadd.f32 %v7785_v32, %v6476_v44  ;;  %v11647_v56 = vld [vmem:[#allocation9_spill] sm:$0xff] }
 0x47c   :  { %7696 = vst [vmem:[%s11615_s3 + $0x28] sm:$0xff] %v7630_v63   ;;  %v7625_v52 = vpack.c.bf16 %v6668_v46, %v6667_v57  ;;  %v6644_v39 = vpop.f32.mrf.mxu1  ;;  %v6565_v8 = vadd.f32 %v6564_v27, %v11640_v34  ;;  %v6673_v22 = vmax.f32 %v6573_v49, 0.0 }
 0x47d   :  { %7706 = vst [vmem:[%s11615_s3 + $0x78] sm:$0xff] %v7680_v33   ;;  %v7675_v23 = vpack.c.bf16 %v6688_v40, %v6687_v4  ;;  %v7766_v50 = vpop.f32.mrf.mxu0  ;;  %v6645_v7 = vadd.f32 %v6644_v39, %v6468_v55  ;;  %v6693_v0 = vmax.f32 %v6653_v47, 0.0 }
 0x47e   :  { %7695 = vst [vmem:[%s11615_s3 + $0x20] sm:$0xff] %v7625_v52   ;;  %v6576_v30 = vadd.f32 %v7766_v50, %v11641_v42  ;;  %v7786_v6 = vpop.f32.mrf.mxu1  ;;  %v6671_v24 = vmax.f32 %v6565_v8, 0.0 }
 0x47f   :  { %7705 = vst [vmem:[%s11615_s3 + $0x70] sm:$0xff] %v7675_v23   ;;  %v6656_v61 = vadd.f32 %v7786_v6, %v6479_v17  ;;  %v6567_v9 = vpop.f32.mrf.mxu0  ;;  %v6691_v13 = vmax.f32 %v6645_v7, 0.0 }
 0x480   :  { %v6674_v31 = vmax.f32 %v6576_v30, 0.0  ;;  %v6568_v48 = vadd.f32 %v6567_v9, %v11643_v60  ;;  %v6647_v5 = vpop.f32.mrf.mxu1 }
 0x481   :  { %v6694_v3 = vmax.f32 %v6656_v61, 0.0  ;;  %v6648_v43 = vadd.f32 %v6647_v5, %v6471_v45  ;;  %v7769_v18 = vpop.f32.mrf.mxu0 }
 0x482   :  { %v7640_v12 = vpack.c.bf16 %v6674_v31, %v6673_v22  ;;  %v6672_v51 = vmax.f32 %v6568_v48, 0.0  ;;  %v6589_v28 = vadd.f32 %v7769_v18, %v11644_v15 }
 0x483   :  { %v7690_v62 = vpack.c.bf16 %v6694_v3, %v6693_v0  ;;  %v6692_v11 = vmax.f32 %v6648_v43, 0.0  ;;  %v6580_v53 = vpop.f32.mrf.mxu0 }
 0x484   :  { %7698 = vst [vmem:[%s11615_s3 + $0x38] sm:$0xff] %v7640_v12   ;;  %v7635_v25 = vpack.c.bf16 %v6672_v51, %v6671_v24  ;;  %v6581_v38 = vadd.f32 %v6580_v53, %v11645_v29  ;;  %v6677_v54 = vmax.f32 %v6589_v28, 0.0 }
 0x485   :  { %7708 = vst [vmem:[%s11615_s3 + $0x88] sm:$0xff] %v7690_v62   ;;  %v7685_v1 = vpack.c.bf16 %v6692_v11, %v6691_v13  ;;  %v7770_v14 = vpop.f32.mrf.mxu0 }
 0x486   :  { %7697 = vst [vmem:[%s11615_s3 + $0x30] sm:$0xff] %v7635_v25   ;;  %v6592_v58 = vadd.f32 %v7770_v14, %v11646_v16  ;;  %v6675_v59 = vmax.f32 %v6581_v38, 0.0 }
 0x487   :  { %7707 = vst [vmem:[%s11615_s3 + $0x80] sm:$0xff] %v7685_v1   ;;  %v6583_v21 = vpop.f32.mrf.mxu0 }
 0x488   :  { %v6678_v35 = vmax.f32 %v6592_v58, 0.0  ;;  %v6584_v26 = vadd.f32 %v6583_v21, %v11647_v56 }
 0x48a   :  { %v7650_v41 = vpack.c.bf16 %v6678_v35, %v6677_v54  ;;  %v6676_v37 = vmax.f32 %v6584_v26, 0.0 }
 0x48c   :  { %7700 = vst [vmem:[%s11615_s3 + $0x48] sm:$0xff] %v7650_v41   ;;  %v7645_v57 = vpack.c.bf16 %v6676_v37, %v6675_v59 }
 0x48e   :  { %7699 = vst [vmem:[%s11615_s3 + $0x40] sm:$0xff] %v7645_v57  }

// kernel: candidate_detector_forward.7
= control target key start
LH: loop header
LB: loop body
LE: loop exit
PB: predicated region body
PF: predicated region fallthrough
CT: control target
= control target key end

     0   :  { %vm3174_vm0 = vmmov 0   ;;  %s4003_s1 = inlined_call_operand.vmem [shape: bf16[1152,128], index: 1, kind: input, shape index: {}]   ;;  %s4004_s0 = inlined_call_operand.vmem [shape: bf16[200,1152], index: 0, kind: input, shape index: {}]   ;;  %s4005_s2 = inlined_call_operand.vmem [shape: f32[1,128], index: 2, kind: input, shape index: {}]   ;;  %s4006_s3 = inlined_call_operand.vmem [shape: bf16[200,128], index: 3, kind: output, shape index: {}]  }
   0x1   :  { %v2936_v0 = vld [vmem:[%s4003_s1 + $0x78] sm:$0xff]   ;;  %v2938_v2 = vld [vmem:[%s4003_s1 + $0x70] sm:$0xff]   ;;  %v2940_v4 = vld [vmem:[%s4003_s1 + $0x68] sm:$0xff]  }
   0x2   :  { %v2937_v1 = vld [vmem:[%s4003_s1 + $0x38] sm:$0xff]   ;;  %2453 = vmatprep.subr.bf16.mxu0 %v2936_v0  ;;  %2918 = vmatprep.subr.bf16.mxu1 %v2936_v0  ;;  %v2939_v3 = vld [vmem:[%s4003_s1 + $0x30] sm:$0xff]   ;;  %v2941_v5 = vld [vmem:[%s4003_s1 + $0x28] sm:$0xff]  }
   0x3   :  { %2454 = vmatpush3.bf16.msra.mxu0 %v2937_v1  ;;  %2926 = vmatpush3.bf16.msra.mxu1 %v2937_v1  ;;  %v2942_v6 = vld [vmem:[%s4003_s1 + $0x60] sm:$0xff]   ;;  %v2944_v8 = vld [vmem:[%s4003_s1 + $0x58] sm:$0xff]   ;;  %v2946_v10 = vld [vmem:[%s4003_s1 + $0x50] sm:$0xff]  }
   0x4   :  { %2455 = vmatprep.subr.bf16.mxu0 %v2938_v2  ;;  %2919 = vmatprep.subr.bf16.mxu1 %v2938_v2  ;;  %v2943_v7 = vld [vmem:[%s4003_s1 + $0x20] sm:$0xff]   ;;  %v2945_v9 = vld [vmem:[%s4003_s1 + $0x18] sm:$0xff]   ;;  %v2947_v13 = vld [vmem:[%s4003_s1 + $0x10] sm:$0xff]  }
   0x5   :  { %v2954_v11 = vld [vmem:[%s4004_s0 + $0x4] ss:$36 sps:$4 sm:$0xff]   ;;  %v2957_v12 = vld [vmem:[%s4004_s0 + $0x1fc] ss:$36 sps:$4 sm:$0xff]   ;;  %v2962_v24 = vld [vmem:[%s4004_s0 + $0x4c] ss:$36 sps:$4 sm:$0xff]  }
   0x6   :  { %v2948_v14 = vld [vmem:[%s4003_s1 + $0x48] sm:$0xff]   ;;  %1339 = vmatprep.mubr.bf16.mxu0 %v2954_v11  ;;  %1395 = vmatprep.mubr.bf16.mxu1 %v2957_v12  ;;  %v2950_v16 = vld [vmem:[%s4003_s1 + $0x40] sm:$0xff]   ;;  %v2958_v18 = vld [vmem:[%s4003_s1 + $0x178] sm:$0xff]   ;;  %v3173_v11 = vmov 0.0  }
   0x7   :  { %2456 = vmatpush3.bf16.msra.mxu0 %v2939_v3  ;;  %2927 = vmatpush3.bf16.msra.mxu1 %v2939_v3  ;;  %v2949_v15 = vld [vmem:[%s4003_s1 + $0x8] sm:$0xff]   ;;  %v2951_v17 = vld [vmem:[%s4003_s1] sm:$0xff]   ;;  %v2955_v20 = vld [vmem:[%s4004_s0 + $0x1f8] ss:$36 sps:$4 sm:$0xff]  }
   0x8   :  { %2457 = vmatprep.subr.bf16.mxu0 %v2940_v4  ;;  %2920 = vmatprep.subr.bf16.mxu1 %v2940_v4  ;;  %v2952_v19 = vld [vmem:[%s4004_s0] ss:$36 sps:$4 sm:$0xff]   ;;  %v2960_v21 = vld [vmem:[%s4003_s1 + $0xf8] sm:$0xff]   ;;  %v2966_v26 = vld [vmem:[%s4003_s1 + $0x170] sm:$0xff]  }
   0x9   :  { %v2959_v22 = vld [vmem:[%s4003_s1 + $0x138] sm:$0xff]   ;;  %v2964_v25 = vld [vmem:[%s4004_s0 + $0x244] ss:$36 sps:$4 sm:$0xff]   ;;  %v2969_v27 = vld [vmem:[%s4003_s1 + $0xf0] sm:$0xff]  }
   0xa   :  { %v2961_v23 = vld [vmem:[%s4003_s1 + $0xb8] sm:$0xff]   ;;  %v2970_v28 = vld [vmem:[%s4003_s1 + $0x130] sm:$0xff]   ;;  %v2972_v30 = vld [vmem:[%s4003_s1 + $0xe8] sm:$0xff]  }
   0xb   :  { %2458 = vmatpush3.bf16.msra.mxu0 %v2941_v5  ;;  %2928 = vmatpush3.bf16.msra.mxu1 %v2941_v5  ;;  %v2971_v29 = vld [vmem:[%s4003_s1 + $0xb0] sm:$0xff]   ;;  %v2967_v31 = vld [vmem:[%s4004_s0 + $0x48] ss:$36 sps:$4 sm:$0xff]   ;;  %v2968_v32 = vld [vmem:[%s4004_s0 + $0x240] ss:$36 sps:$4 sm:$0xff]  }
   0xc   :  { %2459 = vmatprep.subr.bf16.mxu0 %v2942_v6  ;;  %2921 = vmatprep.subr.bf16.mxu1 %v2942_v6  ;;  %v2973_v33 = vld [vmem:[%s4003_s1 + $0x168] sm:$0xff]   ;;  %v2974_v34 = vld [vmem:[%s4004_s0 + $0x94] ss:$36 sps:$4 sm:$0xff]   ;;  %v2982_v38 = vld [vmem:[%s4003_s1 + $0xe0] sm:$0xff]  }
   0xd   :  { %v2976_v35 = vld [vmem:[%s4004_s0 + $0x28c] ss:$36 sps:$4 sm:$0xff]   ;;  %v2984_v39 = vld [vmem:[%s4003_s1 + $0x160] sm:$0xff]   ;;  %v2992_v44 = vld [vmem:[%s4003_s1 + $0xd8] sm:$0xff]  }
   0xe   :  { %v2978_v36 = vld [vmem:[%s4003_s1 + $0xa8] sm:$0xff]   ;;  %v2983_v40 = vld [vmem:[%s4003_s1 + $0xa0] sm:$0xff]   ;;  %v2980_v42 = vld [vmem:[%s4004_s0 + $0x90] ss:$36 sps:$4 sm:$0xff]  }
   0xf   :  { %2460 = vmatpush3.bf16.msra.mxu0 %v2943_v7  ;;  %2929 = vmatpush3.bf16.msra.mxu1 %v2943_v7  ;;  %v2979_v37 = vld [vmem:[%s4003_s1 + $0x128] sm:$0xff]   ;;  %v2985_v41 = vld [vmem:[%s4003_s1 + $0x120] sm:$0xff]   ;;  %v2994_v45 = vld [vmem:[%s4003_s1 + $0x158] sm:$0xff]  }
  0x10   :  { %2461 = vmatprep.subr.bf16.mxu0 %v2944_v8  ;;  %2922 = vmatprep.subr.bf16.mxu1 %v2944_v8  ;;  %v2981_v43 = vld [vmem:[%s4004_s0 + $0x288] ss:$36 sps:$4 sm:$0xff]   ;;  %v2986_v46 = vld [vmem:[%s4004_s0 + $0xdc] ss:$36 sps:$4 sm:$0xff]   ;;  %v2988_v47 = vld [vmem:[%s4004_s0 + $0x2d4] ss:$36 sps:$4 sm:$0xff]  }
  0x11   :  { %v2993_v48 = vld [vmem:[%s4003_s1 + $0x98] sm:$0xff]   ;;  %v3002_v50 = vld [vmem:[%s4003_s1 + $0xd0] sm:$0xff]   ;;  %v3006_v56 = vld [vmem:[%s4003_s1 + $0xc8] sm:$0xff]  }
  0x12   :  { %v2995_v49 = vld [vmem:[%s4003_s1 + $0x118] sm:$0xff]   ;;  %v3003_v51 = vld [vmem:[%s4003_s1 + $0x90] sm:$0xff]   ;;  %v2996_v57 = vld [vmem:[%s4004_s0 + $0x124] ss:$36 sps:$4 sm:$0xff]  }
  0x13   :  { %2462 = vmatpush3.bf16.msra.mxu0 %v2945_v9  ;;  %2930 = vmatpush3.bf16.msra.mxu1 %v2945_v9  ;;  %v2990_v52 = vld [vmem:[%s4004_s0 + $0xd8] ss:$36 sps:$4 sm:$0xff]   ;;  %v2991_v53 = vld [vmem:[%s4004_s0 + $0x2d0] ss:$36 sps:$4 sm:$0xff]   ;;  %v3010_v59 = vld [vmem:[%s4003_s1 + $0x88] sm:$0xff]  }
  0x14   :  { %2463 = vmatprep.subr.bf16.mxu0 %v2946_v10  ;;  %2923 = vmatprep.subr.bf16.mxu1 %v2946_v10  ;;  %v3004_v54 = vld [vmem:[%s4003_s1 + $0x150] sm:$0xff]   ;;  %v2998_v58 = vld [vmem:[%s4004_s0 + $0x31c] ss:$36 sps:$4 sm:$0xff]   ;;  %v3013_v60 = vld [vmem:[%s4003_s1 + $0x148] sm:$0xff]  }
  0x15   :  { %v3005_v55 = vld [vmem:[%s4003_s1 + $0x110] sm:$0xff]   ;;  %v135_v61 = vld [vmem:[%s4004_s0 + $0x360] sm:$0xff]  ;;  %v3014_v62 = vld [vmem:[%s4003_s1 + $0x108] sm:$0xff]  }
  0x16   :  { %v3015_v63 = vld [vmem:[%s4003_s1 + $0xc0] sm:$0xff]   ;;  %v3001_v2 = vld [vmem:[%s4004_s0 + $0x318] ss:$36 sps:$4 sm:$0xff]   ;;  %v3007_v3 = vld [vmem:[%s4004_s0 + $0x16c] ss:$36 sps:$4 sm:$0xff]   ;;  %v2252_v4 = vcombine.high %v135_v61, %v135_v61  ;;  %v2251_v9 = vcombine.low %v135_v61, %v135_v61 }
  0x17   :  { %2464 = vmatpush3.bf16.msra.mxu0 %v2947_v13  ;;  %2931 = vmatpush3.bf16.msra.mxu1 %v2947_v13  ;;  %v3016_v0 = vld [vmem:[%s4003_s1 + $0x80] sm:$0xff]   ;;  %v3025_v7 = vld [vmem:[%s4003_s1 + $0x1f8] sm:$0xff]   ;;  %v3011_v8 = vld [vmem:[%s4004_s0 + $0x168] ss:$36 sps:$4 sm:$0xff]  }
  0x18   :  { %2465 = vmatprep.subr.bf16.mxu0 %v2948_v14  ;;  %2924 = vmatprep.subr.bf16.mxu1 %v2948_v14  ;;  %v3000_v1 = vld [vmem:[%s4004_s0 + $0x120] ss:$36 sps:$4 sm:$0xff]   ;;  %v3017_v10 = vld [vmem:[%s4004_s0 + $0x1b4] ss:$36 sps:$4 sm:$0xff]   ;;  %v3021_v12 = vld [vmem:[%s4004_s0 + $0xc] ss:$36 sps:$4 sm:$0xff]  }
  0x19   :  { %v3023_v5 = vld [vmem:[%s4003_s1 + $0x140] sm:$0xff]   ;;  %v3019_v13 = vld [vmem:[%s4004_s0 + $0x8] ss:$36 sps:$4 sm:$0xff]   ;;  %v3022_v14 = vld [vmem:[%s4004_s0 + $0x1b0] ss:$36 sps:$4 sm:$0xff]  }
  0x1a   :  { %v3024_v6 = vld [vmem:[%s4003_s1 + $0x100] sm:$0xff]   ;;  %v3071_v61 = vld [vmem:[%s4004_s0 + $0x178] ss:$36 sps:$4 sm:$0xff]  }
  0x1b   :  { %2466 = vmatpush3.bf16.msra.mxu0 %v2949_v15  ;;  %2932 = vmatpush3.bf16.msra.mxu1 %v2949_v15  ;;  %v3026_v15 = vld [vmem:[%s4003_s1 + $0x1b8] sm:$0xff]  }
  0x1c   :  { %2467 = vmatprep.subr.bf16.mxu0 %v2950_v16  ;;  %2925 = vmatprep.subr.bf16.mxu1 %v2950_v16  ;;  %v3027_v16 = vld [vmem:[%s4004_s0 + $0x54] ss:$36 sps:$4 sm:$0xff]  }
  0x1f   :  { %2468 = vmatpush3.bf16.msra.mxu0 %v2951_v17  ;;  %2933 = vmatpush3.bf16.msra.mxu1 %v2951_v17  ;;  %v3031_v17 = vld [vmem:[%s4004_s0 + $0x14] ss:$36 sps:$4 sm:$0xff]  }
  0x20   :  { %2641 = vmatprep.subr.bf16.mxu0 %v2958_v18  ;;  %2547 = vmatprep.subr.bf16.mxu1 %v2960_v21  ;;  %v3038_v18 = vld [vmem:[%s4003_s1 + $0x1f0] sm:$0xff]  }
  0x21   :  { %v3029_v21 = vld [vmem:[%s4004_s0 + $0x10] ss:$36 sps:$4 sm:$0xff]  }
  0x22   :  { %1340 = vmatmul.mubr.bf16.vlgmr.msra.gmra.mxu0 %v2952_v19  ;;  %1396 = vmatmul.mubr.bf16.vlgmr.msra.gmra.mxu1 %v2955_v20  ;;  %v3041_v19 = vld [vmem:[%s4003_s1 + $0x1b0] sm:$0xff]   ;;  %v3049_v20 = vld [vmem:[%s4003_s1 + $0x1e8] sm:$0xff]  }
  0x23   :  { %2642 = vmatpush3.bf16.msra.mxu0 %v2959_v22  ;;  %2548 = vmatpush3.bf16.msra.mxu1 %v2961_v23  ;;  %v3032_v22 = vld [vmem:[%s4004_s0 + $0x50] ss:$36 sps:$4 sm:$0xff]   ;;  %v3033_v23 = vld [vmem:[%s4003_s1 + $0x238] sm:$0xff]  }
  0x24   :  { %1347 = vmatprep.mubr.bf16.mxu0 %v2962_v24  ;;  %1403 = vmatprep.mubr.bf16.mxu1 %v2964_v25  ;;  %v3034_v24 = vld [vmem:[%s4004_s0 + $0x9c] ss:$36 sps:$4 sm:$0xff]  }
  0x25   :  { %2643 = vmatprep.subr.bf16.mxu0 %v2966_v26  ;;  %2549 = vmatprep.subr.bf16.mxu1 %v2969_v27  ;;  %v3036_v25 = vld [vmem:[%s4004_s0 + $0x5c] ss:$36 sps:$4 sm:$0xff]   ;;  %v3050_v26 = vld [vmem:[%s4003_s1 + $0x1a8] sm:$0xff]  }
  0x26   :  { %v3064_v27 = vld [vmem:[%s4003_s1 + $0x1e0] sm:$0xff]  }
  0x27   :  { %2644 = vmatpush3.bf16.msra.mxu0 %v2970_v28  ;;  %2550 = vmatpush3.bf16.msra.mxu1 %v2971_v29  ;;  %v3042_v28 = vld [vmem:[%s4003_s1 + $0x230] sm:$0xff]   ;;  %v3039_v29 = vld [vmem:[%s4004_s0 + $0x98] ss:$36 sps:$4 sm:$0xff]  }
  0x28   :  { %2551 = vmatprep.subr.bf16.mxu1 %v2972_v30  ;;  %2645 = vmatprep.subr.bf16.mxu0 %v2973_v33  ;;  %v3040_v30 = vld [vmem:[%s4004_s0 + $0x58] ss:$36 sps:$4 sm:$0xff]   ;;  %v3045_v33 = vld [vmem:[%s4004_s0 + $0xa4] ss:$36 sps:$4 sm:$0xff]  }
  0x2a   :  { %1348 = vmatmul.mubr.bf16.gmra.mxu0 %v2967_v31  ;;  %1404 = vmatmul.mubr.bf16.gmra.mxu1 %v2968_v32  ;;  %v3043_v31 = vld [vmem:[%s4004_s0 + $0xe4] ss:$36 sps:$4 sm:$0xff]  }
  0x2b   :  { %1355 = vmatprep.mubr.bf16.mxu0 %v2974_v34  ;;  %1411 = vmatprep.mubr.bf16.mxu1 %v2976_v35  ;;  %v3065_v32 = vld [vmem:[%s4003_s1 + $0x1a0] sm:$0xff]   ;;  %v3057_v34 = vld [vmem:[%s4003_s1 + $0x228] sm:$0xff]   ;;  %v3073_v35 = vld [vmem:[%s4003_s1 + $0x1d8] sm:$0xff]  }
  0x2c   :  { %2552 = vmatpush3.bf16.msra.mxu1 %v2978_v36  ;;  %2646 = vmatpush3.bf16.msra.mxu0 %v2979_v37  ;;  %v3078_v36 = vld [vmem:[%s4003_s1 + $0x198] sm:$0xff]   ;;  %v3047_v37 = vld [vmem:[%s4004_s0 + $0xe0] ss:$36 sps:$4 sm:$0xff]  }
  0x2d   :  { %2553 = vmatprep.subr.bf16.mxu1 %v2982_v38  ;;  %2647 = vmatprep.subr.bf16.mxu0 %v2984_v39  ;;  %v3072_v38 = vld [vmem:[%s4003_s1 + $0x220] sm:$0xff]  }
  0x2e   :  { %v3048_v39 = vld [vmem:[%s4004_s0 + $0xa0] ss:$36 sps:$4 sm:$0xff]  }
  0x30   :  { %2554 = vmatpush3.bf16.msra.mxu1 %v2983_v40  ;;  %2648 = vmatpush3.bf16.msra.mxu0 %v2985_v41  ;;  %v3051_v40 = vld [vmem:[%s4004_s0 + $0x12c] ss:$36 sps:$4 sm:$0xff]  }
  0x31   :  { %2555 = vmatprep.subr.bf16.mxu1 %v2992_v44  ;;  %2649 = vmatprep.subr.bf16.mxu0 %v2994_v45  ;;  %v3053_v41 = vld [vmem:[%s4004_s0 + $0xec] ss:$36 sps:$4 sm:$0xff]   ;;  %v3081_v44 = vld [vmem:[%s4003_s1 + $0x218] sm:$0xff]  }
  0x32   :  { %1356 = vmatmul.mubr.bf16.gmra.mxu0 %v2980_v42  ;;  %1412 = vmatmul.mubr.bf16.gmra.mxu1 %v2981_v43  ;;  %v3088_v42 = vld [vmem:[%s4003_s1 + $0x1d0] sm:$0xff]   ;;  %v3055_v45 = vld [vmem:[%s4004_s0 + $0x128] ss:$36 sps:$4 sm:$0xff]  }
  0x33   :  { %1363 = vmatprep.mubr.bf16.mxu0 %v2986_v46  ;;  %1419 = vmatprep.mubr.bf16.mxu1 %v2988_v47  ;;  %v3089_v43 = vld [vmem:[%s4003_s1 + $0x190] sm:$0xff]   ;;  %v3056_v47 = vld [vmem:[%s4004_s0 + $0xe8] ss:$36 sps:$4 sm:$0xff]  }
  0x34   :  { %2556 = vmatpush3.bf16.msra.mxu1 %v2993_v48  ;;  %2650 = vmatpush3.bf16.msra.mxu0 %v2995_v49  ;;  %v3096_v46 = vld [vmem:[%s4003_s1 + $0x210] sm:$0xff]  }
  0x35   :  { %2557 = vmatprep.subr.bf16.mxu1 %v3002_v50  ;;  %2651 = vmatprep.subr.bf16.mxu0 %v3004_v54  ;;  %v3058_v48 = vld [vmem:[%s4004_s0 + $0x174] ss:$36 sps:$4 sm:$0xff]   ;;  %v3103_v50 = vld [vmem:[%s4003_s1 + $0x1c8] sm:$0xff]   ;;  %v3112_v54 = vld [vmem:[%s4003_s1 + $0x1c0] sm:$0xff]  }
  0x36   :  { %v3060_v49 = vld [vmem:[%s4004_s0 + $0x134] ss:$36 sps:$4 sm:$0xff]  }
  0x38   :  { %2558 = vmatpush3.bf16.msra.mxu1 %v3003_v51  ;;  %2652 = vmatpush3.bf16.msra.mxu0 %v3005_v55  ;;  %v3104_v51 = vld [vmem:[%s4003_s1 + $0x188] sm:$0xff]   ;;  %v3113_v55 = vld [vmem:[%s4003_s1 + $0x180] sm:$0xff]  }
  0x39   :  { %2559 = vmatprep.subr.bf16.mxu1 %v3006_v56  ;;  %2653 = vmatprep.subr.bf16.mxu0 %v3013_v60  ;;  %v3063_v56 = vld [vmem:[%s4004_s0 + $0x130] ss:$36 sps:$4 sm:$0xff]   ;;  %v3070_v60 = vld [vmem:[%s4004_s0 + $0x1b8] ss:$36 sps:$4 sm:$0xff]  }
  0x3a   :  { %1364 = vmatmul.mubr.bf16.gmra.mxu0 %v2990_v52  ;;  %1420 = vmatmul.mubr.bf16.gmra.mxu1 %v2991_v53  ;;  %v3109_v52 = vld [vmem:[%s4003_s1 + $0x208] sm:$0xff]   ;;  %v3062_v53 = vld [vmem:[%s4004_s0 + $0x170] ss:$36 sps:$4 sm:$0xff]  }
  0x3b   :  { %1371 = vmatprep.mubr.bf16.mxu0 %v2996_v57  ;;  %1427 = vmatprep.mubr.bf16.mxu1 %v2998_v58  ;;  %v3066_v57 = vld [vmem:[%s4004_s0 + $0x1bc] ss:$36 sps:$4 sm:$0xff]  }
  0x3c   :  { %2560 = vmatpush3.bf16.msra.mxu1 %v3010_v59  ;;  %2654 = vmatpush3.bf16.msra.mxu0 %v3014_v62  ;;  %v3068_v58 = vld [vmem:[%s4004_s0 + $0x17c] ss:$36 sps:$4 sm:$0xff]   ;;  %v3074_v62 = vld [vmem:[%s4004_s0 + $0x204] ss:$36 sps:$4 sm:$0xff]  }
  0x3d   :  { %2561 = vmatprep.subr.bf16.mxu1 %v3015_v63  ;;  %2655 = vmatprep.subr.bf16.mxu0 %v3023_v5  ;;  %v3119_v59 = vld [vmem:[%s4003_s1 + $0x200] sm:$0xff]   ;;  %v3087_v5 = vld [vmem:[%s4004_s0 + $0x208] ss:$36 sps:$4 sm:$0xff]  }
  0x3e   :  { %v3076_v63 = vld [vmem:[%s4004_s0 + $0x1c4] ss:$36 sps:$4 sm:$0xff]  }
  0x40   :  { %2562 = vmatpush3.bf16.msra.mxu1 %v3016_v0  ;;  %2656 = vmatpush3.bf16.msra.mxu0 %v3024_v6  ;;  %v3079_v0 = vld [vmem:[%s4004_s0 + $0x200] ss:$36 sps:$4 sm:$0xff]   ;;  %v3090_v6 = vld [vmem:[%s4004_s0 + $0x294] ss:$36 sps:$4 sm:$0xff]  }
  0x41   :  { %2735 = vmatprep.subr.bf16.mxu1 %v3025_v7  ;;  %2850 = vmatprep.subr.bf16.mxu0 %v3173_v11  ;;  %v3092_v7 = vld [vmem:[%s4004_s0 + $0x254] ss:$36 sps:$4 sm:$0xff]  }
  0x42   :  { %1372 = vmatmul.mubr.bf16.gmra.mxu0 %v3000_v1  ;;  %1428 = vmatmul.mubr.bf16.gmra.mxu1 %v3001_v2  ;;  %v3080_v1 = vld [vmem:[%s4004_s0 + $0x1c0] ss:$36 sps:$4 sm:$0xff]   ;;  %v3082_v2 = vld [vmem:[%s4004_s0 + $0x24c] ss:$36 sps:$4 sm:$0xff]  }
  0x43   :  { %1379 = vmatprep.mubr.bf16.mxu0 %v3007_v3  ;;  %1435 = vmatprep.mubr.bf16.mxu1 %v2252_v4  ;;  %v3084_v3 = vld [vmem:[%s4004_s0 + $0x20c] ss:$36 sps:$4 sm:$0xff]  }
  0x44   :  { %v3086_v4 = vld [vmem:[%s4004_s0 + $0x248] ss:$36 sps:$4 sm:$0xff]  }
  0x4a   :  { %1380 = vmatmul.mubr.bf16.gmra.mxu0 %v3011_v8  ;;  %1436 = vmatmul.mubr.bf16.gmra.mxu1 %v2251_v9  ;;  %v3094_v8 = vld [vmem:[%s4004_s0 + $0x290] ss:$36 sps:$4 sm:$0xff]  }
  0x4b   :  { %1387 = vmatprep.mubr.bf16.mxu0 %v3017_v10  ;;  %1475 = vmatprep.mubr.bf16.mxu1 %v3021_v12  ;;  %v3095_v9 = vld [vmem:[%s4004_s0 + $0x250] ss:$36 sps:$4 sm:$0xff]   ;;  %v3097_v10 = vld [vmem:[%s4004_s0 + $0x2dc] ss:$36 sps:$4 sm:$0xff]  }
  0x4c   :  { %v3099_v12 = vld [vmem:[%s4004_s0 + $0x29c] ss:$36 sps:$4 sm:$0xff]  }
  0x52   :  { %1388 = vmatmul.mubr.bf16.gmra.mxu0 %v3022_v14  ;;  %1476 = vmatmul.mubr.bf16.vlgmr.msra.gmra.mxu1 %v3019_v13  ;;  %v3101_v13 = vld [vmem:[%s4004_s0 + $0x2d8] ss:$36 sps:$4 sm:$0xff]  }
  0x53   :  { %2736 = vmatpush3.bf16.msra.mxu1 %v3026_v15  ;;  %1483 = vmatprep.mubr.bf16.mxu1 %v3027_v16  ;;  %v3102_v14 = vld [vmem:[%s4004_s0 + $0x298] ss:$36 sps:$4 sm:$0xff]   ;;  %v3105_v15 = vld [vmem:[%s4004_s0 + $0x324] ss:$36 sps:$4 sm:$0xff]  }
  0x54   :  { %1611 = vmatprep.mubr.bf16.mxu0 %v3031_v17  ;;  %2737 = vmatprep.subr.bf16.mxu1 %v3038_v18  ;;  %v3107_v16 = vld [vmem:[%s4004_s0 + $0x2e4] ss:$36 sps:$4 sm:$0xff]  }
  0x55   :  { %v136_v17 = vld [vmem:[%s4004_s0 + $0x368] sm:$0xff]  ;;  %v3110_v18 = vld [vmem:[%s4004_s0 + $0x320] ss:$36 sps:$4 sm:$0xff]  }
  0x57   :  { %2738 = vmatpush3.bf16.msra.mxu1 %v3041_v19  ;;  %v3111_v19 = vld [vmem:[%s4004_s0 + $0x2e0] ss:$36 sps:$4 sm:$0xff]  }
  0x58   :  { %2739 = vmatprep.subr.bf16.mxu1 %v3049_v20  ;;  %v2254_v20 = vcombine.high %v136_v17, %v136_v17 }
  0x5a   :  { %1484 = vmatmul.mubr.bf16.gmra.mxu1 %v3032_v22  ;;  %1612 = vmatmul.mubr.bf16.vlgmr.msra.gmra.mxu0 %v3029_v21  ;;  %v3115_v21 = vld [vmem:[%s4004_s0 + $0x32c] ss:$36 sps:$4 sm:$0xff]  }
  0x5b   :  { %2851 = vmatpush3.bf16.msra.mxu0 %v3033_v23  ;;  %1491 = vmatprep.mubr.bf16.mxu1 %v3034_v24  ;;  %v137_v22 = vld [vmem:[%s4004_s0 + $0x370] sm:$0xff]  ;;  %v2253_v23 = vcombine.low %v136_v17, %v136_v17  ;;  %v3118_v24 = vld [vmem:[%s4004_s0 + $0x328] ss:$36 sps:$4 sm:$0xff]  }
  0x5c   :  { %1619 = vmatprep.mubr.bf16.mxu0 %v3036_v25  ;;  %2852 = vmatprep.subr.bf16.mxu0 %v3173_v11  ;;  %v2256_v25 = vcombine.high %v137_v22, %v137_v22 }
  0x5d   :  { %2740 = vmatpush3.bf16.msra.mxu1 %v3050_v26  ;;  %v3123_v26 = vld [vmem:[%s4004_s0 + $0x1c] ss:$36 sps:$4 sm:$0xff]  }
  0x5e   :  { %2741 = vmatprep.subr.bf16.mxu1 %v3064_v27  ;;  %v3121_v27 = vld [vmem:[%s4004_s0 + $0x18] ss:$36 sps:$4 sm:$0xff]  }
  0x5f   :  { %2853 = vmatpush3.bf16.msra.mxu0 %v3042_v28  ;;  %v2255_v28 = vcombine.low %v137_v22, %v137_v22 }
  0x60   :  { %2854 = vmatprep.subr.bf16.mxu0 %v3173_v11 }
  0x61   :  { %2742 = vmatpush3.bf16.msra.mxu1 %v3065_v32  ;;  %v3129_v32 = vld [vmem:[%s4004_s0 + $0xac] ss:$36 sps:$4 sm:$0xff]  }
  0x62   :  { %1492 = vmatmul.mubr.bf16.gmra.mxu1 %v3039_v29  ;;  %1620 = vmatmul.mubr.bf16.gmra.mxu0 %v3040_v30  ;;  %v3125_v29 = vld [vmem:[%s4004_s0 + $0x64] ss:$36 sps:$4 sm:$0xff]  }
  0x63   :  { %1499 = vmatprep.mubr.bf16.mxu1 %v3043_v31  ;;  %1627 = vmatprep.mubr.bf16.mxu0 %v3045_v33  ;;  %v3127_v30 = vld [vmem:[%s4004_s0 + $0x60] ss:$36 sps:$4 sm:$0xff]   ;;  %v3131_v33 = vld [vmem:[%s4004_s0 + $0xa8] ss:$36 sps:$4 sm:$0xff]  }
  0x64   :  { %2855 = vmatpush3.bf16.msra.mxu0 %v3057_v34  ;;  %2743 = vmatprep.subr.bf16.mxu1 %v3073_v35  ;;  %v3128_v31 = vld [vmem:[%s4004_s0 + $0x20] ss:$36 sps:$4 sm:$0xff]   ;;  %v3132_v34 = vld [vmem:[%s4004_s0 + $0x68] ss:$36 sps:$4 sm:$0xff]   ;;  %v3133_v35 = vld [vmem:[%s4004_s0 + $0xf4] ss:$36 sps:$4 sm:$0xff]  }
  0x65   :  { %2856 = vmatprep.subr.bf16.mxu0 %v3173_v11  ;;  %2744 = vmatpush3.bf16.msra.mxu1 %v3078_v36  ;;  %v3135_v36 = vld [vmem:[%s4004_s0 + $0xf0] ss:$36 sps:$4 sm:$0xff]  }
  0x66   :  { %2745 = vmatprep.subr.bf16.mxu1 %v3088_v42  ;;  %v3143_v42 = vld [vmem:[%s4004_s0 + $0x180] ss:$36 sps:$4 sm:$0xff]  }
  0x68   :  { %2857 = vmatpush3.bf16.msra.mxu0 %v3072_v38  ;;  %v3137_v38 = vld [vmem:[%s4004_s0 + $0x13c] ss:$36 sps:$4 sm:$0xff]  }
  0x69   :  { %2858 = vmatprep.subr.bf16.mxu0 %v3173_v11  ;;  %2746 = vmatpush3.bf16.msra.mxu1 %v3089_v43  ;;  %v3144_v43 = vld [vmem:[%s4004_s0 + $0x140] ss:$36 sps:$4 sm:$0xff]  }
  0x6a   :  { %1500 = vmatmul.mubr.bf16.gmra.mxu1 %v3047_v37  ;;  %1628 = vmatmul.mubr.bf16.gmra.mxu0 %v3048_v39  ;;  %v3136_v37 = vld [vmem:[%s4004_s0 + $0xb0] ss:$36 sps:$4 sm:$0xff]   ;;  %v3139_v39 = vld [vmem:[%s4004_s0 + $0x138] ss:$36 sps:$4 sm:$0xff]  }
  0x6b   :  { %1507 = vmatprep.mubr.bf16.mxu1 %v3051_v40  ;;  %1635 = vmatprep.mubr.bf16.mxu0 %v3053_v41  ;;  %v3140_v40 = vld [vmem:[%s4004_s0 + $0xf8] ss:$36 sps:$4 sm:$0xff]   ;;  %v3141_v41 = vld [vmem:[%s4004_s0 + $0x184] ss:$36 sps:$4 sm:$0xff]  }
  0x6c   :  { %2859 = vmatpush3.bf16.msra.mxu0 %v3081_v44  ;;  %2747 = vmatprep.subr.bf16.mxu1 %v3103_v50  ;;  %v3145_v44 = vld [vmem:[%s4004_s0 + $0x1cc] ss:$36 sps:$4 sm:$0xff]  }
  0x6d   :  { %2860 = vmatprep.subr.bf16.mxu0 %v3173_v11  ;;  %2748 = vmatpush3.bf16.msra.mxu1 %v3104_v51 }
  0x6e   :  { %2749 = vmatprep.subr.bf16.mxu1 %v3112_v54  ;;  %v3148_v54 = vld [vmem:[%s4004_s0 + $0x188] ss:$36 sps:$4 sm:$0xff]  }
  0x70   :  { %2861 = vmatpush3.bf16.msra.mxu0 %v3096_v46 }
  0x71   :  { %2862 = vmatprep.subr.bf16.mxu0 %v3173_v11  ;;  %2750 = vmatpush3.bf16.msra.mxu1 %v3113_v55  ;;  %v3149_v55 = vld [vmem:[%s4004_s0 + $0x214] ss:$36 sps:$4 sm:$0xff]  }
  0x72   :  { %1508 = vmatmul.mubr.bf16.gmra.mxu1 %v3055_v45  ;;  %1636 = vmatmul.mubr.bf16.gmra.mxu0 %v3056_v47 }
  0x73   :  { %1515 = vmatprep.mubr.bf16.mxu1 %v3058_v48  ;;  %1643 = vmatprep.mubr.bf16.mxu0 %v3060_v49 }
  0x74   :  { %2863 = vmatpush3.bf16.msra.mxu0 %v3109_v52 }
  0x75   :  { %2864 = vmatprep.subr.bf16.mxu0 %v3173_v11 }
  0x78   :  { %2865 = vmatpush3.bf16.msra.mxu0 %v3119_v59 }
  0x7a   :  { %1516 = vmatmul.mubr.bf16.gmra.mxu1 %v3062_v53  ;;  %1644 = vmatmul.mubr.bf16.gmra.mxu0 %v3063_v56  ;;  %v3147_v53 = vld [vmem:[%s4004_s0 + $0x1c8] ss:$36 sps:$4 sm:$0xff]  }
  0x7b   :  { %1523 = vmatprep.mubr.bf16.mxu1 %v3066_v57  ;;  %1651 = vmatprep.mubr.bf16.mxu0 %v3068_v58 }
  0x82   :  { %1524 = vmatmul.mubr.bf16.gmra.mxu1 %v3070_v60  ;;  %1652 = vmatmul.mubr.bf16.gmra.mxu0 %v3071_v61 }
  0x83   :  { %1531 = vmatprep.mubr.bf16.mxu1 %v3074_v62  ;;  %1659 = vmatprep.mubr.bf16.mxu0 %v3076_v63 }
  0x8a   :  { %1532 = vmatmul.mubr.bf16.gmra.mxu1 %v3079_v0  ;;  %1660 = vmatmul.mubr.bf16.gmra.mxu0 %v3080_v1 }
  0x8b   :  { %1539 = vmatprep.mubr.bf16.mxu1 %v3082_v2  ;;  %1667 = vmatprep.mubr.bf16.mxu0 %v3084_v3  ;;  %v3734_v2 = vld [vmem:[%s4005_s2] ss:$0 sm:$0xff] }
  0x92   :  { %1540 = vmatmul.mubr.bf16.gmra.mxu1 %v3086_v4  ;;  %1668 = vmatmul.mubr.bf16.gmra.mxu0 %v3087_v5  ;;  %v3151_v5 = vld [vmem:[%s4004_s0 + $0x210] ss:$36 sps:$4 sm:$0xff]  }
  0x93   :  { %1547 = vmatprep.mubr.bf16.mxu1 %v3090_v6  ;;  %1675 = vmatprep.mubr.bf16.mxu0 %v3092_v7  ;;  %v3152_v6 = vld [vmem:[%s4004_s0 + $0x1d0] ss:$36 sps:$4 sm:$0xff]  }
  0x9a   :  { %1548 = vmatmul.mubr.bf16.gmra.mxu1 %v3094_v8  ;;  %1676 = vmatmul.mubr.bf16.gmra.mxu0 %v3095_v9  ;;  %v3153_v8 = vld [vmem:[%s4004_s0 + $0x25c] ss:$36 sps:$4 sm:$0xff]  }
  0x9b   :  { %1555 = vmatprep.mubr.bf16.mxu1 %v3097_v10  ;;  %1683 = vmatprep.mubr.bf16.mxu0 %v3099_v12 }
  0xa2   :  { %1556 = vmatmul.mubr.bf16.gmra.mxu1 %v3101_v13  ;;  %1684 = vmatmul.mubr.bf16.gmra.mxu0 %v3102_v14 }
  0xa3   :  { %1563 = vmatprep.mubr.bf16.mxu1 %v3105_v15  ;;  %1691 = vmatprep.mubr.bf16.mxu0 %v3107_v16 }
  0xaa   :  { %1564 = vmatmul.mubr.bf16.gmra.mxu1 %v3110_v18  ;;  %1692 = vmatmul.mubr.bf16.gmra.mxu0 %v3111_v19 }
  0xab   :  { %1571 = vmatprep.mubr.bf16.mxu1 %v2254_v20  ;;  %1699 = vmatprep.mubr.bf16.mxu0 %v3115_v21 }
  0xb2   :  { %1572 = vmatmul.mubr.bf16.gmra.mxu1 %v2253_v23  ;;  %1700 = vmatmul.mubr.bf16.gmra.mxu0 %v3118_v24  ;;  %v3155_v23 = vld [vmem:[%s4004_s0 + $0x258] ss:$36 sps:$4 sm:$0xff]  }
  0xb3   :  { %1707 = vmatprep.mubr.bf16.mxu0 %v2256_v25  ;;  %1747 = vmatprep.mubr.bf16.mxu1 %v3123_v26  ;;  %v3156_v24 = vld [vmem:[%s4004_s0 + $0x218] ss:$36 sps:$4 sm:$0xff]   ;;  %v3159_v26 = vld [vmem:[%s4004_s0 + $0x2a4] ss:$36 sps:$4 sm:$0xff]  }
  0xba   :  { %1708 = vmatmul.mubr.bf16.gmra.mxu0 %v2255_v28  ;;  %1748 = vmatmul.mubr.bf16.vlgmr.msra.gmra.mxu1 %v3121_v27 }
  0xbb   :  { %1755 = vmatprep.mubr.bf16.mxu1 %v3125_v29  ;;  %2866 = vmatprep.mubr.msk.bf16.mxu0 %vm3174_vm0, %v3173_v11 }
  0xc2   :  { %1756 = vmatmul.mubr.bf16.gmra.mxu1 %v3127_v30  ;;  %2867 = vmatmul.mubr.bf16.vlgmr.msra.gmra.mxu0 %v3128_v31 }
  0xc3   :  { %1763 = vmatprep.mubr.bf16.mxu1 %v3129_v32  ;;  %2870 = vmatprep.mubr.msk.bf16.mxu0 %vm3174_vm0, %v3173_v11 }
  0xca   :  { %1764 = vmatmul.mubr.bf16.gmra.mxu1 %v3131_v33  ;;  %2871 = vmatmul.mubr.bf16.gmra.mxu0 %v3132_v34 }
  0xcb   :  { %1771 = vmatprep.mubr.bf16.mxu1 %v3133_v35  ;;  %2874 = vmatprep.mubr.msk.bf16.mxu0 %vm3174_vm0, %v3173_v11 }
  0xd2   :  { %1772 = vmatmul.mubr.bf16.gmra.mxu1 %v3135_v36  ;;  %2875 = vmatmul.mubr.bf16.gmra.mxu0 %v3136_v37 }
  0xd3   :  { %1779 = vmatprep.mubr.bf16.mxu1 %v3137_v38  ;;  %2878 = vmatprep.mubr.msk.bf16.mxu0 %vm3174_vm0, %v3173_v11 }
  0xda   :  { %1780 = vmatmul.mubr.bf16.gmra.mxu1 %v3139_v39  ;;  %2879 = vmatmul.mubr.bf16.gmra.mxu0 %v3140_v40  ;;  %v3157_v40 = vld [vmem:[%s4004_s0 + $0x2a0] ss:$36 sps:$4 sm:$0xff]  }
  0xdb   :  { %1787 = vmatprep.mubr.bf16.mxu1 %v3141_v41  ;;  %2882 = vmatprep.mubr.msk.bf16.mxu0 %vm3174_vm0, %v3173_v11  ;;  %v3160_v41 = vld [vmem:[%s4004_s0 + $0x260] ss:$36 sps:$4 sm:$0xff]  }
  0xe2   :  { %v2469_v45 = vpop.f32.mrf.mxu0  ;;  %v2511_v46 = vpop.f32.mrf.mxu1  ;;  %1788 = vmatmul.mubr.bf16.gmra.mxu1 %v3143_v42  ;;  %2883 = vmatmul.mubr.bf16.gmra.mxu0 %v3144_v43  ;;  %v3163_v43 = vld [vmem:[%s4004_s0 + $0x2ec] ss:$36 sps:$4 sm:$0xff]  }
  0xe3   :  { %1795 = vmatprep.mubr.bf16.mxu1 %v3145_v44  ;;  %2886 = vmatprep.mubr.msk.bf16.mxu0 %vm3174_vm0, %v3173_v11 }
  0xe4   :  { %v2470_v47 = vpop.f32.mrf.mxu0  ;;  %v2512_v48 = vpop.f32.mrf.mxu1 }
  0xe5   :  { %v3710_v49 = vadd.f32 %v2470_v47, %v2469_v45  ;;  %v3712_v50 = vadd.f32 %v2512_v48, %v2511_v46 }
  0xe6   :  { %v2472_v51 = vpop.f32.mrf.mxu0  ;;  %v2514_v52 = vpop.f32.mrf.mxu1 }
  0xe8   :  { %v2473_v56 = vpop.f32.mrf.mxu0  ;;  %v2515_v57 = vpop.f32.mrf.mxu1 }
  0xe9   :  { %v3723_v58 = vadd.f32 %v2473_v56, %v2472_v51  ;;  %v3725_v59 = vadd.f32 %v2515_v57, %v2514_v52 }
  0xea   :  { %v2475_v60 = vpop.f32.mrf.mxu0  ;;  %v2517_v61 = vpop.f32.mrf.mxu1  ;;  %1796 = vmatmul.mubr.bf16.gmra.mxu1 %v3147_v53  ;;  %2887 = vmatmul.mubr.bf16.gmra.mxu0 %v3148_v54 }
  0xeb   :  { %1803 = vmatprep.mubr.bf16.mxu1 %v3149_v55  ;;  %2890 = vmatprep.mubr.msk.bf16.mxu0 %vm3174_vm0, %v3173_v11 }
  0xec   :  { %v2476_v62 = vpop.f32.mrf.mxu0  ;;  %v2518_v63 = vpop.f32.mrf.mxu1 }
  0xed   :  { %v3729_v0 = vadd.f32 %v2476_v62, %v2475_v60  ;;  %v2519_v1 = vadd.f32 %v2518_v63, %v2517_v61  ;;  %v3161_v61 = vld [vmem:[%s4004_s0 + $0x2e8] ss:$36 sps:$4 sm:$0xff]  }
  0xee   :  { %v2478_v3 = vpop.f32.mrf.mxu0  ;;  %v2520_v4 = vpop.f32.mrf.mxu1  ;;  %v3164_v62 = vld [vmem:[%s4004_s0 + $0x2a8] ss:$36 sps:$4 sm:$0xff]  }
  0xef   :  { %v3743_v7 = vadd.f32 %v2519_v1, %v3734_v2  ;;  %v3167_v1 = vld [vmem:[%s4004_s0 + $0x334] ss:$36 sps:$4 sm:$0xff]  }
  0xf0   :  { %v2479_v9 = vpop.f32.mrf.mxu0  ;;  %v2521_v10 = vpop.f32.mrf.mxu1 }
  0xf1   :  { %v3748_v12 = vadd.f32 %v2479_v9, %v2478_v3  ;;  %v2522_v13 = vadd.f32 %v2521_v10, %v2520_v4 }
  0xf2   :  { %v2481_v14 = vpop.f32.mrf.mxu0  ;;  %v2523_v15 = vpop.f32.mrf.mxu1  ;;  %1804 = vmatmul.mubr.bf16.gmra.mxu1 %v3151_v5  ;;  %2891 = vmatmul.mubr.bf16.gmra.mxu0 %v3152_v6 }
  0xf3   :  { %v3751_v16 = vadd.f32 %v2522_v13, %v3734_v2  ;;  %1811 = vmatprep.mubr.bf16.mxu1 %v3153_v8  ;;  %2894 = vmatprep.mubr.msk.bf16.mxu0 %vm3174_vm0, %v3173_v11 }
  0xf4   :  { %v2482_v17 = vpop.f32.mrf.mxu0  ;;  %v2524_v18 = vpop.f32.mrf.mxu1 }
  0xf5   :  { %v3755_v19 = vadd.f32 %v2482_v17, %v2481_v14  ;;  %v2525_v20 = vadd.f32 %v2524_v18, %v2523_v15  ;;  %v138_v15 = vld [vmem:[%s4004_s0 + $0x378] sm:$0xff] }
  0xf6   :  { %v2484_v21 = vpop.f32.mrf.mxu0  ;;  %v2526_v22 = vpop.f32.mrf.mxu1 }
  0xf7   :  { %v3764_v25 = vadd.f32 %v2525_v20, %v3734_v2 }
  0xf8   :  { %v2485_v27 = vpop.f32.mrf.mxu0  ;;  %v2527_v28 = vpop.f32.mrf.mxu1 }
  0xf9   :  { %v3769_v29 = vadd.f32 %v2485_v27, %v2484_v21  ;;  %v2528_v30 = vadd.f32 %v2527_v28, %v2526_v22  ;;  %v3165_v22 = vld [vmem:[%s4004_s0 + $0x330] ss:$36 sps:$4 sm:$0xff]  }
  0xfa   :  { %v2487_v31 = vpop.f32.mrf.mxu0  ;;  %v2529_v32 = vpop.f32.mrf.mxu1  ;;  %1812 = vmatmul.mubr.bf16.gmra.mxu1 %v3155_v23  ;;  %2895 = vmatmul.mubr.bf16.gmra.mxu0 %v3156_v24  ;;  %v3168_v23 = vld [vmem:[%s4004_s0 + $0x2f0] ss:$36 sps:$4 sm:$0xff]  }
  0xfb   :  { %v3772_v33 = vadd.f32 %v2528_v30, %v3734_v2  ;;  %1819 = vmatprep.mubr.bf16.mxu1 %v3159_v26  ;;  %2898 = vmatprep.mubr.msk.bf16.mxu0 %vm3174_vm0, %v3173_v11  ;;  %v2258_v26 = vcombine.high %v138_v15, %v138_v15 }
  0xfc   :  { %v2488_v34 = vpop.f32.mrf.mxu0  ;;  %v2530_v35 = vpop.f32.mrf.mxu1 }
  0xfd   :  { %v3776_v36 = vadd.f32 %v2488_v34, %v2487_v31  ;;  %v2531_v37 = vadd.f32 %v2530_v35, %v2529_v32 }
  0xfe   :  { %v2490_v38 = vpop.f32.mrf.mxu0  ;;  %v2532_v39 = vpop.f32.mrf.mxu1 }
  0xff   :  { %v3785_v42 = vadd.f32 %v2531_v37, %v3734_v2  ;;  %v1342_v37 = vadd.f32 %v3710_v49, %v3734_v2 }
 0x100   :  { %v2491_v44 = vpop.f32.mrf.mxu0  ;;  %v2533_v45 = vpop.f32.mrf.mxu1 }
 0x101   :  { %v3790_v46 = vadd.f32 %v2491_v44, %v2490_v38  ;;  %v2534_v47 = vadd.f32 %v2533_v45, %v2532_v39  ;;  %v3171_v44 = vld [vmem:[%s4004_s0 + $0x338] ss:$36 sps:$4 sm:$0xff]  }
 0x102   :  { %v2493_v48 = vpop.f32.mrf.mxu0  ;;  %v2535_v51 = vpop.f32.mrf.mxu1  ;;  %1820 = vmatmul.mubr.bf16.gmra.mxu1 %v3157_v40  ;;  %2899 = vmatmul.mubr.bf16.gmra.mxu0 %v3160_v41 }
 0x103   :  { %v3793_v52 = vadd.f32 %v2534_v47, %v3734_v2  ;;  %1827 = vmatprep.mubr.bf16.mxu1 %v3163_v43  ;;  %2902 = vmatprep.mubr.msk.bf16.mxu0 %vm3174_vm0, %v3173_v11  ;;  %v2257_v43 = vcombine.low %v138_v15, %v138_v15 }
 0x104   :  { %v2494_v53 = vpop.f32.mrf.mxu0  ;;  %v2536_v54 = vpop.f32.mrf.mxu1 }
 0x105   :  { %v3797_v55 = vadd.f32 %v2494_v53, %v2493_v48  ;;  %v2537_v56 = vadd.f32 %v2536_v54, %v2535_v51  ;;  %v1345_v51 = vadd.f32 %v3723_v58, %v3734_v2 }
 0x106   :  { %v2496_v57 = vpop.f32.mrf.mxu0  ;;  %v2538_v60 = vpop.f32.mrf.mxu1 }
 0x107   :  { %v3806_v63 = vadd.f32 %v2537_v56, %v3734_v2 }
 0x108   :  { %v2497_v3 = vpop.f32.mrf.mxu0  ;;  %v2539_v4 = vpop.f32.mrf.mxu1 }
 0x109   :  { %v3811_v5 = vadd.f32 %v2497_v3, %v2496_v57  ;;  %v2540_v6 = vadd.f32 %v2539_v4, %v2538_v60 }
 0x10a   :  { %v2499_v8 = vpop.f32.mrf.mxu0  ;;  %v2541_v9 = vpop.f32.mrf.mxu1  ;;  %1828 = vmatmul.mubr.bf16.gmra.mxu1 %v3161_v61  ;;  %2903 = vmatmul.mubr.bf16.gmra.mxu0 %v3164_v62  ;;  %v1350_v62 = vadd.f32 %v3729_v0, %v3734_v2 }
 0x10b   :  { %v3814_v10 = vadd.f32 %v2540_v6, %v3734_v2  ;;  %1835 = vmatprep.mubr.bf16.mxu1 %v3167_v1  ;;  %2906 = vmatprep.mubr.msk.bf16.mxu0 %vm3174_vm0, %v3173_v11  ;;  %v3172_v6 = vld [vmem:[%s4004_s0 + $0x380] ss:$0 sps:$4 sm:$0xff]  }
 0x10c   :  { %v2500_v13 = vpop.f32.mrf.mxu0  ;;  %v2542_v14 = vpop.f32.mrf.mxu1 }
 0x10d   :  { %v3821_v17 = vadd.f32 %v2500_v13, %v2499_v8  ;;  %v2543_v18 = vadd.f32 %v2542_v14, %v2541_v9 }
 0x10e   :  { %v2502_v20 = vpop.f32.mrf.mxu0  ;;  %v2544_v21 = vpop.f32.mrf.mxu1 }
 0x10f   :  { %v3830_v24 = vadd.f32 %v2543_v18, %v3734_v2 }
 0x110   :  { %v2503_v27 = vpop.f32.mrf.mxu0  ;;  %v2545_v28 = vpop.f32.mrf.mxu1 }
 0x111   :  { %v3832_v30 = vadd.f32 %v2503_v27, %v2502_v20  ;;  %v1358_v27 = vadd.f32 %v3755_v19, %v3734_v2 }
 0x112   :  { %v2505_v31 = vpop.f32.mrf.mxu0  ;;  %v2563_v32 = vpop.f32.mrf.mxu1  ;;  %1836 = vmatmul.mubr.bf16.gmra.mxu1 %v3165_v22  ;;  %2907 = vmatmul.mubr.bf16.gmra.mxu0 %v3168_v23 }
 0x113   :  { %1843 = vmatprep.mubr.bf16.mxu1 %v2258_v26  ;;  %2910 = vmatprep.mubr.msk.bf16.mxu0 %vm3174_vm0, %v3173_v11 }
 0x114   :  { %v2506_v34 = vpop.f32.mrf.mxu0  ;;  %v2564_v35 = vpop.f32.mrf.mxu1 }
 0x115   :  { %v3838_v38 = vadd.f32 %v2506_v34, %v2505_v31  ;;  %v2565_v39 = vadd.f32 %v2564_v35, %v2563_v32 }
 0x116   :  { %v2508_v40 = vpop.f32.mrf.mxu0  ;;  %v2566_v41 = vpop.f32.mrf.mxu1 }
 0x117   :  { %v1478_v45 = vadd.f32 %v2565_v39, %v1342_v37 }
 0x118   :  { %v2509_v47 = vpop.f32.mrf.mxu0  ;;  %v2567_v48 = vpop.f32.mrf.mxu1 }
 0x119   :  { %v3845_v53 = vadd.f32 %v2509_v47, %v2508_v40  ;;  %v2568_v54 = vadd.f32 %v2567_v48, %v2566_v41  ;;  %v1361_v40 = vadd.f32 %v3769_v29, %v3734_v2 }
 0x11a   :  { %v2569_v49 = vpop.f32.mrf.mxu1  ;;  %v2657_v56 = vpop.f32.mrf.mxu0  ;;  %1844 = vmatmul.mubr.bf16.gmra.mxu1 %v2257_v43  ;;  %2911 = vmatmul.mubr.bf16.gmra.mxu0 %v3171_v44 }
 0x11b   :  { %v1481_v57 = vadd.f32 %v2568_v54, %v1345_v51  ;;  %2914 = vmatprep.mubr.msk.bf16.mxu0 %vm3174_vm0, %v3173_v11  ;;  %v1353_v11 = vadd.f32 %v3748_v12, %v3734_v2  ;;  %v1366_v54 = vadd.f32 %v3776_v36, %v3734_v2 }
 0x11c   :  { %v2570_v60 = vpop.f32.mrf.mxu1  ;;  %v2658_v61 = vpop.f32.mrf.mxu0 }
 0x11d   :  { %v2571_v1 = vadd.f32 %v2570_v60, %v2569_v49  ;;  %v2659_v3 = vadd.f32 %v2658_v61, %v2657_v56 }
 0x11e   :  { %v2572_v4 = vpop.f32.mrf.mxu1  ;;  %v2660_v58 = vpop.f32.mrf.mxu0 }
 0x11f   :  { %v1486_v8 = vadd.f32 %v2571_v1, %v1350_v62  ;;  %v3854_v9 = vadd.f32 %v2659_v3, %v1478_v45  ;;  %v1369_v3 = vadd.f32 %v3790_v46, %v3734_v2 }
 0x120   :  { %v2573_v13 = vpop.f32.mrf.mxu1  ;;  %v2661_v14 = vpop.f32.mrf.mxu0 }
 0x121   :  { %v2574_v15 = vadd.f32 %v2573_v13, %v2572_v4  ;;  %v2662_v18 = vadd.f32 %v2661_v14, %v2660_v58 }
 0x122   :  { %v2575_v20 = vpop.f32.mrf.mxu1  ;;  %v2663_v0 = vpop.f32.mrf.mxu0  ;;  %2915 = vmatmul.mubr.bf16.gmra.mxu0 %v3172_v6 }
 0x123   :  { %v1489_v21 = vadd.f32 %v2574_v15, %v1353_v11  ;;  %v3858_v22 = vadd.f32 %v2662_v18, %v1481_v57  ;;  %v1374_v15 = vadd.f32 %v3797_v55, %v3734_v2 }
 0x124   :  { %v2576_v23 = vpop.f32.mrf.mxu1  ;;  %v2664_v26 = vpop.f32.mrf.mxu0 }
 0x125   :  { %v2577_v28 = vadd.f32 %v2576_v23, %v2575_v20  ;;  %v2665_v31 = vadd.f32 %v2664_v26, %v2663_v0 }
 0x126   :  { %v2578_v32 = vpop.f32.mrf.mxu1  ;;  %v2666_v34 = vpop.f32.mrf.mxu0 }
 0x127   :  { %v1494_v35 = vadd.f32 %v2577_v28, %v1358_v27  ;;  %v3862_v37 = vadd.f32 %v2665_v31, %v1486_v8  ;;  %v1377_v28 = vadd.f32 %v3811_v5, %v3734_v2 }
 0x128   :  { %v2579_v12 = vpop.f32.mrf.mxu1  ;;  %v2667_v39 = vpop.f32.mrf.mxu0 }
 0x129   :  { %v2580_v41 = vadd.f32 %v2579_v12, %v2578_v32  ;;  %v2668_v43 = vadd.f32 %v2667_v39, %v2666_v34 }
 0x12a   :  { %v2581_v44 = vpop.f32.mrf.mxu1  ;;  %v2669_v45 = vpop.f32.mrf.mxu0 }
 0x12b   :  { %v1497_v47 = vadd.f32 %v2580_v41, %v1361_v40  ;;  %v3866_v48 = vadd.f32 %v2668_v43, %v1489_v21  ;;  %v1382_v41 = vadd.f32 %v3821_v17, %v3734_v2 }
 0x12c   :  { %v2582_v19 = vpop.f32.mrf.mxu1  ;;  %v2670_v51 = vpop.f32.mrf.mxu0 }
 0x12d   :  { %v2583_v49 = vadd.f32 %v2582_v19, %v2581_v44  ;;  %v2671_v56 = vadd.f32 %v2670_v51, %v2669_v45 }
 0x12e   :  { %v2584_v57 = vpop.f32.mrf.mxu1  ;;  %v2672_v60 = vpop.f32.mrf.mxu0 }
 0x12f   :  { %v1502_v61 = vadd.f32 %v2583_v49, %v1366_v54  ;;  %v3870_v62 = vadd.f32 %v2671_v56, %v1494_v35  ;;  %v1385_v49 = vadd.f32 %v3832_v30, %v3734_v2 }
 0x130   :  { %v2585_v29 = vpop.f32.mrf.mxu1  ;;  %v2673_v1 = vpop.f32.mrf.mxu0 }
 0x131   :  { %v2586_v4 = vadd.f32 %v2585_v29, %v2584_v57  ;;  %v2674_v58 = vadd.f32 %v2673_v1, %v2672_v60 }
 0x132   :  { %v2587_v6 = vpop.f32.mrf.mxu1  ;;  %v2675_v8 = vpop.f32.mrf.mxu0 }
 0x133   :  { %v1505_v13 = vadd.f32 %v2586_v4, %v1369_v3  ;;  %v3874_v14 = vadd.f32 %v2674_v58, %v1497_v47  ;;  %v1390_v4 = vadd.f32 %v3838_v38, %v3734_v2 }
 0x134   :  { %v2588_v36 = vpop.f32.mrf.mxu1  ;;  %v2676_v11 = vpop.f32.mrf.mxu0 }
 0x135   :  { %v2589_v18 = vadd.f32 %v2588_v36, %v2587_v6  ;;  %v2677_v20 = vadd.f32 %v2676_v11, %v2675_v8 }
 0x136   :  { %v2590_v0 = vpop.f32.mrf.mxu1  ;;  %v2678_v21 = vpop.f32.mrf.mxu0 }
 0x137   :  { %v1510_v23 = vadd.f32 %v2589_v18, %v1374_v15  ;;  %v3878_v26 = vadd.f32 %v2677_v20, %v1502_v61  ;;  %v1393_v18 = vadd.f32 %v3845_v53, %v3734_v2 }
 0x138   :  { %v2591_v46 = vpop.f32.mrf.mxu1  ;;  %v2679_v27 = vpop.f32.mrf.mxu0 }
 0x139   :  { %v2592_v31 = vadd.f32 %v2591_v46, %v2590_v0  ;;  %v2680_v32 = vadd.f32 %v2679_v27, %v2678_v21 }
 0x13a   :  { %v2593_v34 = vpop.f32.mrf.mxu1  ;;  %v2681_v35 = vpop.f32.mrf.mxu0 }
 0x13b   :  { %v1513_v12 = vadd.f32 %v2592_v31, %v1377_v28  ;;  %v3882_v39 = vadd.f32 %v2680_v32, %v1505_v13  ;;  %v1398_v31 = vadd.f32 %v3712_v50, %v3734_v2 }
 0x13c   :  { %v2594_v55 = vpop.f32.mrf.mxu1  ;;  %v2682_v40 = vpop.f32.mrf.mxu0 }
 0x13d   :  { %v2595_v43 = vadd.f32 %v2594_v55, %v2593_v34  ;;  %v2683_v44 = vadd.f32 %v2682_v40, %v2681_v35 }
 0x13e   :  { %v2596_v45 = vpop.f32.mrf.mxu1  ;;  %v2684_v47 = vpop.f32.mrf.mxu0 }
 0x13f   :  { %v1518_v19 = vadd.f32 %v2595_v43, %v1382_v41  ;;  %v3886_v51 = vadd.f32 %v2683_v44, %v1510_v23  ;;  %v1401_v43 = vadd.f32 %v3725_v59, %v3734_v2 }
 0x140   :  { %v2597_v5 = vpop.f32.mrf.mxu1  ;;  %v2685_v54 = vpop.f32.mrf.mxu0 }
 0x141   :  { %v2598_v56 = vadd.f32 %v2597_v5, %v2596_v45  ;;  %v2686_v57 = vadd.f32 %v2685_v54, %v2684_v47 }
 0x142   :  { %v2599_v60 = vpop.f32.mrf.mxu1  ;;  %v2687_v61 = vpop.f32.mrf.mxu0 }
 0x143   :  { %v1521_v29 = vadd.f32 %v2598_v56, %v1385_v49  ;;  %v3890_v1 = vadd.f32 %v2686_v57, %v1513_v12 }
 0x144   :  { %v2600_v17 = vpop.f32.mrf.mxu1  ;;  %v2688_v3 = vpop.f32.mrf.mxu0 }
 0x145   :  { %v2601_v58 = vadd.f32 %v2600_v17, %v2599_v60  ;;  %v2689_v6 = vadd.f32 %v2688_v3, %v2687_v61 }
 0x146   :  { %v2602_v8 = vpop.f32.mrf.mxu1  ;;  %v2690_v13 = vpop.f32.mrf.mxu0 }
 0x147   :  { %v1526_v36 = vadd.f32 %v2601_v58, %v1390_v4  ;;  %v3894_v11 = vadd.f32 %v2689_v6, %v1518_v19 }
 0x148   :  { %v2603_v30 = vpop.f32.mrf.mxu1  ;;  %v2691_v15 = vpop.f32.mrf.mxu0 }
 0x149   :  { %v2604_v20 = vadd.f32 %v2603_v30, %v2602_v8  ;;  %v2692_v0 = vadd.f32 %v2691_v15, %v2690_v13 }
 0x14a   :  { %v2605_v21 = vpop.f32.mrf.mxu1  ;;  %v2693_v23 = vpop.f32.mrf.mxu0 }
 0x14b   :  { %v1529_v46 = vadd.f32 %v2604_v20, %v1393_v18  ;;  %v3898_v27 = vadd.f32 %v2692_v0, %v1521_v29 }
 0x14c   :  { %v2606_v38 = vpop.f32.mrf.mxu1  ;;  %v2694_v28 = vpop.f32.mrf.mxu0 }
 0x14d   :  { %v2607_v32 = vadd.f32 %v2606_v38, %v2605_v21  ;;  %v2695_v34 = vadd.f32 %v2694_v28, %v2693_v23 }
 0x14e   :  { %v2608_v35 = vpop.f32.mrf.mxu1  ;;  %v2696_v12 = vpop.f32.mrf.mxu0 }
 0x14f   :  { %v1534_v55 = vadd.f32 %v2607_v32, %v1398_v31  ;;  %v3902_v40 = vadd.f32 %v2695_v34, %v1526_v36 }
 0x150   :  { %v2609_v53 = vpop.f32.mrf.mxu1  ;;  %v2697_v41 = vpop.f32.mrf.mxu0 }
 0x151   :  { %v2610_v44 = vadd.f32 %v2609_v53, %v2608_v35  ;;  %v2698_v45 = vadd.f32 %v2697_v41, %v2696_v12 }
 0x152   :  { %v2611_v47 = vpop.f32.mrf.mxu1  ;;  %v2699_v19 = vpop.f32.mrf.mxu0 }
 0x153   :  { %v1537_v5 = vadd.f32 %v2610_v44, %v1401_v43  ;;  %v3906_v54 = vadd.f32 %v2698_v45, %v1529_v46 }
 0x154   :  { %v2612_v50 = vpop.f32.mrf.mxu1  ;;  %v2700_v49 = vpop.f32.mrf.mxu0 }
 0x155   :  { %v2613_v56 = vadd.f32 %v2612_v50, %v2611_v47  ;;  %v2701_v57 = vadd.f32 %v2700_v49, %v2699_v19 }
 0x156   :  { %v2614_v60 = vpop.f32.mrf.mxu1  ;;  %v2702_v61 = vpop.f32.mrf.mxu0 }
 0x157   :  { %v1542_v29 = vadd.f32 %v2613_v56, %v3743_v7  ;;  %v3909_v17 = vadd.f32 %v2701_v57, %v1534_v55 }
 0x158   :  { %v2615_v3 = vpop.f32.mrf.mxu1  ;;  %v2703_v4 = vpop.f32.mrf.mxu0 }
 0x159   :  { %v2616_v59 = vadd.f32 %v2615_v3, %v2614_v60  ;;  %v2704_v2 = vadd.f32 %v2703_v4, %v2702_v61 }
 0x15a   :  { %v2617_v58 = vpop.f32.mrf.mxu1  ;;  %v2705_v6 = vpop.f32.mrf.mxu0 }
 0x15b   :  { %v1545_v8 = vadd.f32 %v2616_v59, %v3751_v16  ;;  %v3912_v13 = vadd.f32 %v2704_v2, %v1537_v5 }
 0x15c   :  { %v2618_v36 = vpop.f32.mrf.mxu1  ;;  %v2706_v30 = vpop.f32.mrf.mxu0 }
 0x15d   :  { %v2619_v15 = vadd.f32 %v2618_v36, %v2617_v58  ;;  %v2707_v18 = vadd.f32 %v2706_v30, %v2705_v6 }
 0x15e   :  { %v2620_v20 = vpop.f32.mrf.mxu1  ;;  %v2708_v0 = vpop.f32.mrf.mxu0 }
 0x15f   :  { %v1550_v7 = vadd.f32 %v2619_v15, %v3764_v25  ;;  %v3915_v21 = vadd.f32 %v2707_v18, %v1542_v29 }
 0x160   :  { %v2621_v23 = vpop.f32.mrf.mxu1  ;;  %v2709_v46 = vpop.f32.mrf.mxu0 }
 0x161   :  { %v2622_v38 = vadd.f32 %v2621_v23, %v2620_v20  ;;  %v2710_v28 = vadd.f32 %v2709_v46, %v2708_v0 }
 0x162   :  { %v2623_v31 = vpop.f32.mrf.mxu1  ;;  %v2711_v32 = vpop.f32.mrf.mxu0 }
 0x163   :  { %v1553_v16 = vadd.f32 %v2622_v38, %v3772_v33  ;;  %v3918_v34 = vadd.f32 %v2710_v28, %v1545_v8 }
 0x164   :  { %v2624_v35 = vpop.f32.mrf.mxu1  ;;  %v2712_v12 = vpop.f32.mrf.mxu0 }
 0x165   :  { %v2625_v55 = vadd.f32 %v2624_v35, %v2623_v31  ;;  %v2713_v53 = vadd.f32 %v2712_v12, %v2711_v32 }
 0x166   :  { %v2626_v41 = vpop.f32.mrf.mxu1  ;;  %v2714_v43 = vpop.f32.mrf.mxu0 }
 0x167   :  { %v1558_v25 = vadd.f32 %v2625_v55, %v3785_v42  ;;  %v3921_v44 = vadd.f32 %v2713_v53, %v1550_v7 }
 0x168   :  { %v2627_v45 = vpop.f32.mrf.mxu1  ;;  %v2715_v47 = vpop.f32.mrf.mxu0 }
 0x169   :  { %v2628_v19 = vadd.f32 %v2627_v45, %v2626_v41  ;;  %v2716_v5 = vadd.f32 %v2715_v47, %v2714_v43 }
 0x16a   :  { %v2629_v50 = vpop.f32.mrf.mxu1  ;;  %v2717_v49 = vpop.f32.mrf.mxu0 }
 0x16b   :  { %v1561_v33 = vadd.f32 %v2628_v19, %v3793_v52  ;;  %v3924_v56 = vadd.f32 %v2716_v5, %v1553_v16 }
 0x16c   :  { %v2630_v57 = vpop.f32.mrf.mxu1  ;;  %v2718_v60 = vpop.f32.mrf.mxu0 }
 0x16d   :  { %v2631_v61 = vadd.f32 %v2630_v57, %v2629_v50  ;;  %v2719_v29 = vadd.f32 %v2718_v60, %v2717_v49 }
 0x16e   :  { %v2632_v3 = vpop.f32.mrf.mxu1  ;;  %v2720_v4 = vpop.f32.mrf.mxu0 }
 0x16f   :  { %v1566_v42 = vadd.f32 %v2631_v61, %v3806_v63  ;;  %v3927_v59 = vadd.f32 %v2719_v29, %v1558_v25 }
 0x170   :  { %v2633_v2 = vpop.f32.mrf.mxu1  ;;  %v2721_v58 = vpop.f32.mrf.mxu0 }
 0x171   :  { %v2634_v6 = vadd.f32 %v2633_v2, %v2632_v3  ;;  %v2722_v8 = vadd.f32 %v2721_v58, %v2720_v4 }
 0x172   :  { %v2635_v36 = vpop.f32.mrf.mxu1  ;;  %v2723_v30 = vpop.f32.mrf.mxu0 }
 0x173   :  { %v1569_v52 = vadd.f32 %v2634_v6, %v3814_v10  ;;  %v3930_v15 = vadd.f32 %v2722_v8, %v1561_v33 }
 0x174   :  { %v2636_v18 = vpop.f32.mrf.mxu1  ;;  %v2724_v20 = vpop.f32.mrf.mxu0 }
 0x175   :  { %v2637_v0 = vadd.f32 %v2636_v18, %v2635_v36  ;;  %v2725_v7 = vadd.f32 %v2724_v20, %v2723_v30 }
 0x176   :  { %v2638_v23 = vpop.f32.mrf.mxu1  ;;  %v2726_v46 = vpop.f32.mrf.mxu0 }
 0x177   :  { %v1574_v63 = vadd.f32 %v2637_v0, %v3830_v24  ;;  %v3933_v38 = vadd.f32 %v2725_v7, %v1566_v42 }
 0x178   :  { %v2639_v28 = vpop.f32.mrf.mxu1  ;;  %v2727_v31 = vpop.f32.mrf.mxu0 }
 0x179   :  { %v2728_v32 = vadd.f32 %v2727_v31, %v2726_v46 }
 0x17a   :  { %v2729_v16 = vpop.f32.mrf.mxu0  ;;  %v2751_v35 = vpop.f32.mrf.mxu1 }
 0x17b   :  { %v3935_v12 = vadd.f32 %v2728_v32, %v1569_v52 }
 0x17c   :  { %v2730_v10 = vpop.f32.mrf.mxu0  ;;  %v2752_v55 = vpop.f32.mrf.mxu1 }
 0x17d   :  { %v2731_v53 = vadd.f32 %v2730_v10, %v2729_v16  ;;  %v2753_v45 = vadd.f32 %v2752_v55, %v2751_v35 }
 0x17e   :  { %v2732_v41 = vpop.f32.mrf.mxu0  ;;  %v2754_v43 = vpop.f32.mrf.mxu1 }
 0x17f   :  { %v3937_v25 = vadd.f32 %v2731_v53, %v1574_v63  ;;  %v1750_v49 = vadd.f32 %v2753_v45, %v3854_v9 }
 0x180   :  { %v2733_v47 = vpop.f32.mrf.mxu0  ;;  %v2755_v19 = vpop.f32.mrf.mxu1 }
 0x181   :  { %v2756_v24 = vadd.f32 %v2755_v19, %v2754_v43 }
 0x182   :  { %v2757_v5 = vpop.f32.mrf.mxu1  ;;  %v1885_v50 = vpop.f32.mrf.mxu0 }
 0x183   :  { %v1886_v60 = vadd.f32 %v1885_v50, %v1750_v49  ;;  %v1753_v61 = vadd.f32 %v2756_v24, %v3858_v22 }
 0x184   :  { %v2758_v33 = vpop.f32.mrf.mxu1  ;;  %v2868_v57 = vpop.f32.mrf.mxu0 }
 0x185   :  { %v2759_v4 = vadd.f32 %v2758_v33, %v2757_v5  ;;  %v1987_v6 = vmax.f32 %v1886_v60, 0.0 }
 0x186   :  { %v2760_v29 = vpop.f32.mrf.mxu1  ;;  %v1888_v3 = vpop.f32.mrf.mxu0 }
 0x187   :  { %v1889_v42 = vadd.f32 %v1888_v3, %v1753_v61  ;;  %v1758_v20 = vadd.f32 %v2759_v4, %v3862_v37 }
 0x188   :  { %v2761_v2 = vpop.f32.mrf.mxu1  ;;  %v2869_v58 = vpop.f32.mrf.mxu0 }
 0x189   :  { %v1988_v8 = vmax.f32 %v1889_v42, 0.0  ;;  %v2762_v36 = vadd.f32 %v2761_v2, %v2760_v29 }
 0x18a   :  { %v2763_v30 = vpop.f32.mrf.mxu1  ;;  %v1893_v52 = vpop.f32.mrf.mxu0 }
 0x18b   :  { %v2385_v18 = vpack.c.bf16 %v1988_v8, %v1987_v6  ;;  %v1894_v22 = vadd.f32 %v1893_v52, %v1758_v20  ;;  %v1761_v7 = vadd.f32 %v2762_v36, %v3866_v48 }
 0x18c   :  { %v2764_v9 = vpop.f32.mrf.mxu1  ;;  %v2872_v0 = vpop.f32.mrf.mxu0 }
 0x18d   :  { %2386 = vst [vmem:[%s4006_s3] sm:$0xff] %v2385_v18   ;;  %v2765_v63 = vadd.f32 %v2764_v9, %v2763_v30  ;;  %v1989_v16 = vmax.f32 %v1894_v22, 0.0 }
 0x18e   :  { %v2766_v23 = vpop.f32.mrf.mxu1  ;;  %v1896_v46 = vpop.f32.mrf.mxu0 }
 0x18f   :  { %v1897_v28 = vadd.f32 %v1896_v46, %v1761_v7  ;;  %v1766_v41 = vadd.f32 %v2765_v63, %v3870_v62 }
 0x190   :  { %v2767_v31 = vpop.f32.mrf.mxu1  ;;  %v2873_v32 = vpop.f32.mrf.mxu0 }
 0x191   :  { %v1990_v35 = vmax.f32 %v1897_v28, 0.0  ;;  %v2768_v10 = vadd.f32 %v2767_v31, %v2766_v23 }
 0x192   :  { %v2769_v55 = vpop.f32.mrf.mxu1  ;;  %v1901_v37 = vpop.f32.mrf.mxu0 }
 0x193   :  { %v2390_v53 = vpack.c.bf16 %v1990_v35, %v1989_v16  ;;  %v1902_v48 = vadd.f32 %v1901_v37, %v1766_v41  ;;  %v1769_v47 = vadd.f32 %v2768_v10, %v3874_v14 }
 0x194   :  { %v2770_v43 = vpop.f32.mrf.mxu1  ;;  %v2876_v45 = vpop.f32.mrf.mxu0 }
 0x195   :  { %2442 = vst [vmem:[%s4006_s3 + $0x8] sm:$0xff] %v2390_v53   ;;  %v2771_v5 = vadd.f32 %v2770_v43, %v2769_v55  ;;  %v1991_v57 = vmax.f32 %v1902_v48, 0.0 }
 0x196   :  { %v2772_v19 = vpop.f32.mrf.mxu1  ;;  %v1904_v24 = vpop.f32.mrf.mxu0 }
 0x197   :  { %v1905_v50 = vadd.f32 %v1904_v24, %v1769_v47  ;;  %v1774_v4 = vadd.f32 %v2771_v5, %v3878_v26 }
 0x198   :  { %v2773_v49 = vpop.f32.mrf.mxu1  ;;  %v2877_v33 = vpop.f32.mrf.mxu0 }
 0x199   :  { %v1992_v60 = vmax.f32 %v1905_v50, 0.0  ;;  %v2774_v61 = vadd.f32 %v2773_v49, %v2772_v19 }
 0x19a   :  { %v2775_v29 = vpop.f32.mrf.mxu1  ;;  %v1909_v62 = vpop.f32.mrf.mxu0 }
 0x19b   :  { %v2395_v3 = vpack.c.bf16 %v1992_v60, %v1991_v57  ;;  %v1910_v14 = vadd.f32 %v1909_v62, %v1774_v4  ;;  %v1777_v58 = vadd.f32 %v2774_v61, %v3882_v39 }
 0x19c   :  { %v2776_v42 = vpop.f32.mrf.mxu1  ;;  %v2880_v2 = vpop.f32.mrf.mxu0 }
 0x19d   :  { %2443 = vst [vmem:[%s4006_s3 + $0x10] sm:$0xff] %v2395_v3   ;;  %v2777_v36 = vadd.f32 %v2776_v42, %v2775_v29  ;;  %v1993_v20 = vmax.f32 %v1910_v14, 0.0 }
 0x19e   :  { %v2778_v6 = vpop.f32.mrf.mxu1  ;;  %v1912_v8 = vpop.f32.mrf.mxu0 }
 0x19f   :  { %v1913_v30 = vadd.f32 %v1912_v8, %v1777_v58  ;;  %v1782_v23 = vadd.f32 %v2777_v36, %v3886_v51 }
 0x1a0   :  { %v2779_v52 = vpop.f32.mrf.mxu1  ;;  %v2881_v18 = vpop.f32.mrf.mxu0 }
 0x1a1   :  { %v1994_v9 = vmax.f32 %v1913_v30, 0.0  ;;  %v2780_v0 = vadd.f32 %v2779_v52, %v2778_v6 }
 0x1a2   :  { %v2781_v22 = vpop.f32.mrf.mxu1  ;;  %v1917_v26 = vpop.f32.mrf.mxu0 }
 0x1a3   :  { %v2400_v7 = vpack.c.bf16 %v1994_v9, %v1993_v20  ;;  %v1918_v39 = vadd.f32 %v1917_v26, %v1782_v23  ;;  %v1785_v28 = vadd.f32 %v2780_v0, %v3890_v1 }
 0x1a4   :  { %v2782_v46 = vpop.f32.mrf.mxu1  ;;  %v2884_v63 = vpop.f32.mrf.mxu0 }
 0x1a5   :  { %2444 = vst [vmem:[%s4006_s3 + $0x18] sm:$0xff] %v2400_v7   ;;  %v2783_v16 = vadd.f32 %v2782_v46, %v2781_v22  ;;  %v1995_v37 = vmax.f32 %v1918_v39, 0.0 }
 0x1a6   :  { %v2784_v31 = vpop.f32.mrf.mxu1  ;;  %v1920_v32 = vpop.f32.mrf.mxu0 }
 0x1a7   :  { %v1921_v35 = vadd.f32 %v1920_v32, %v1785_v28  ;;  %v1790_v48 = vadd.f32 %v2783_v16, %v3894_v11 }
 0x1a8   :  { %v2785_v10 = vpop.f32.mrf.mxu1  ;;  %v2885_v55 = vpop.f32.mrf.mxu0 }
 0x1a9   :  { %v1996_v53 = vmax.f32 %v1921_v35, 0.0  ;;  %v2786_v41 = vadd.f32 %v2785_v10, %v2784_v31 }
 0x1aa   :  { %v2787_v43 = vpop.f32.mrf.mxu1  ;;  %v1925_v51 = vpop.f32.mrf.mxu0 }
 0x1ab   :  { %v2405_v45 = vpack.c.bf16 %v1996_v53, %v1995_v37  ;;  %v1926_v1 = vadd.f32 %v1925_v51, %v1790_v48  ;;  %v1793_v24 = vadd.f32 %v2786_v41, %v3898_v27 }
 0x1ac   :  { %v2788_v47 = vpop.f32.mrf.mxu1  ;;  %v2888_v19 = vpop.f32.mrf.mxu0 }
 0x1ad   :  { %2445 = vst [vmem:[%s4006_s3 + $0x20] sm:$0xff] %v2405_v45   ;;  %v2789_v49 = vadd.f32 %v2788_v47, %v2787_v43  ;;  %v1997_v61 = vmax.f32 %v1926_v1, 0.0 }
 0x1ae   :  { %v2790_v5 = vpop.f32.mrf.mxu1  ;;  %v1928_v50 = vpop.f32.mrf.mxu0 }
 0x1af   :  { %v1929_v33 = vadd.f32 %v1928_v50, %v1793_v24  ;;  %v1798_v42 = vadd.f32 %v2789_v49, %v3902_v40 }
 0x1b0   :  { %v2791_v57 = vpop.f32.mrf.mxu1  ;;  %v2889_v60 = vpop.f32.mrf.mxu0 }
 0x1b1   :  { %v1998_v29 = vmax.f32 %v1929_v33, 0.0  ;;  %v2792_v62 = vadd.f32 %v2791_v57, %v2790_v5 }
 0x1b2   :  { %v2793_v3 = vpop.f32.mrf.mxu1  ;;  %v1933_v11 = vpop.f32.mrf.mxu0 }
 0x1b3   :  { %v2410_v4 = vpack.c.bf16 %v1998_v29, %v1997_v61  ;;  %v1934_v27 = vadd.f32 %v1933_v11, %v1798_v42  ;;  %v1801_v58 = vadd.f32 %v2792_v62, %v3906_v54 }
 0x1b4   :  { %v2794_v2 = vpop.f32.mrf.mxu1  ;;  %v2892_v14 = vpop.f32.mrf.mxu0 }
 0x1b5   :  { %2446 = vst [vmem:[%s4006_s3 + $0x28] sm:$0xff] %v2410_v4   ;;  %v2795_v36 = vadd.f32 %v2794_v2, %v2793_v3  ;;  %v1999_v20 = vmax.f32 %v1934_v27, 0.0 }
 0x1b6   :  { %v2796_v6 = vpop.f32.mrf.mxu1  ;;  %v1936_v8 = vpop.f32.mrf.mxu0 }
 0x1b7   :  { %v1937_v30 = vadd.f32 %v1936_v8, %v1801_v58  ;;  %v1806_v7 = vadd.f32 %v2795_v36, %v3909_v17 }
 0x1b8   :  { %v2797_v52 = vpop.f32.mrf.mxu1  ;;  %v2893_v18 = vpop.f32.mrf.mxu0 }
 0x1b9   :  { %v2000_v9 = vmax.f32 %v1937_v30, 0.0  ;;  %v2798_v0 = vadd.f32 %v2797_v52, %v2796_v6 }
 0x1ba   :  { %v2799_v22 = vpop.f32.mrf.mxu1  ;;  %v1941_v40 = vpop.f32.mrf.mxu0 }
 0x1bb   :  { %v2415_v26 = vpack.c.bf16 %v2000_v9, %v1999_v20  ;;  %v1942_v54 = vadd.f32 %v1941_v40, %v1806_v7  ;;  %v1809_v63 = vadd.f32 %v2798_v0, %v3912_v13 }
 0x1bc   :  { %v2800_v23 = vpop.f32.mrf.mxu1  ;;  %v2896_v46 = vpop.f32.mrf.mxu0 }
 0x1bd   :  { %2447 = vst [vmem:[%s4006_s3 + $0x30] sm:$0xff] %v2415_v26   ;;  %v2801_v31 = vadd.f32 %v2800_v23, %v2799_v22  ;;  %v2001_v10 = vmax.f32 %v1942_v54, 0.0 }
 0x1be   :  { %v2802_v39 = vpop.f32.mrf.mxu1  ;;  %v1944_v28 = vpop.f32.mrf.mxu0 }
 0x1bf   :  { %v1945_v32 = vadd.f32 %v1944_v28, %v1809_v63  ;;  %v1814_v43 = vadd.f32 %v2801_v31, %v3915_v21 }
 0x1c0   :  { %v2803_v16 = vpop.f32.mrf.mxu1  ;;  %v2897_v35 = vpop.f32.mrf.mxu0 }
 0x1c1   :  { %v2002_v55 = vmax.f32 %v1945_v32, 0.0  ;;  %v2804_v37 = vadd.f32 %v2803_v16, %v2802_v39 }
 0x1c2   :  { %v2805_v53 = vpop.f32.mrf.mxu1  ;;  %v1949_v17 = vpop.f32.mrf.mxu0 }
 0x1c3   :  { %v2420_v41 = vpack.c.bf16 %v2002_v55, %v2001_v10  ;;  %v1950_v13 = vadd.f32 %v1949_v17, %v1814_v43  ;;  %v1817_v48 = vadd.f32 %v2804_v37, %v3918_v34 }
 0x1c4   :  { %v2806_v51 = vpop.f32.mrf.mxu1  ;;  %v2900_v45 = vpop.f32.mrf.mxu0 }
 0x1c5   :  { %2448 = vst [vmem:[%s4006_s3 + $0x38] sm:$0xff] %v2420_v41   ;;  %v2807_v1 = vadd.f32 %v2806_v51, %v2805_v53  ;;  %v2003_v49 = vmax.f32 %v1950_v13, 0.0 }
 0x1c6   :  { %v2808_v47 = vpop.f32.mrf.mxu1  ;;  %v1952_v19 = vpop.f32.mrf.mxu0 }
 0x1c7   :  { %v1953_v24 = vadd.f32 %v1952_v19, %v1817_v48  ;;  %v1822_v29 = vadd.f32 %v2807_v1, %v3921_v44 }
 0x1c8   :  { %v2809_v5 = vpop.f32.mrf.mxu1  ;;  %v2901_v50 = vpop.f32.mrf.mxu0 }
 0x1c9   :  { %v2004_v33 = vmax.f32 %v1953_v24, 0.0  ;;  %v2810_v57 = vadd.f32 %v2809_v5, %v2808_v47 }
 0x1ca   :  { %v2811_v60 = vpop.f32.mrf.mxu1  ;;  %v1957_v21 = vpop.f32.mrf.mxu0 }
 0x1cb   :  { %v2425_v61 = vpack.c.bf16 %v2004_v33, %v2003_v49  ;;  %v1958_v34 = vadd.f32 %v1957_v21, %v1822_v29  ;;  %v1825_v11 = vadd.f32 %v2810_v57, %v3924_v56 }
 0x1cc   :  { %v2812_v62 = vpop.f32.mrf.mxu1  ;;  %v2904_v3 = vpop.f32.mrf.mxu0 }
 0x1cd   :  { %2449 = vst [vmem:[%s4006_s3 + $0x40] sm:$0xff] %v2425_v61   ;;  %v2813_v2 = vadd.f32 %v2812_v62, %v2811_v60  ;;  %v2005_v6 = vmax.f32 %v1958_v34, 0.0 }
 0x1ce   :  { %v2814_v4 = vpop.f32.mrf.mxu1  ;;  %v1960_v42 = vpop.f32.mrf.mxu0 }
 0x1cf   :  { %v1961_v14 = vadd.f32 %v1960_v42, %v1825_v11  ;;  %v1830_v18 = vadd.f32 %v2813_v2, %v3927_v59 }
 0x1d0   :  { %v2815_v27 = vpop.f32.mrf.mxu1  ;;  %v2905_v58 = vpop.f32.mrf.mxu0 }
 0x1d1   :  { %v2006_v8 = vmax.f32 %v1961_v14, 0.0  ;;  %v2816_v36 = vadd.f32 %v2815_v27, %v2814_v4 }
 0x1d2   :  { %v2817_v30 = vpop.f32.mrf.mxu1  ;;  %v1965_v44 = vpop.f32.mrf.mxu0 }
 0x1d3   :  { %v2430_v52 = vpack.c.bf16 %v2006_v8, %v2005_v6  ;;  %v1966_v56 = vadd.f32 %v1965_v44, %v1830_v18  ;;  %v1833_v0 = vadd.f32 %v2816_v36, %v3930_v15 }
 0x1d4   :  { %v2818_v20 = vpop.f32.mrf.mxu1  ;;  %v2908_v9 = vpop.f32.mrf.mxu0 }
 0x1d5   :  { %2450 = vst [vmem:[%s4006_s3 + $0x48] sm:$0xff] %v2430_v52   ;;  %v2819_v26 = vadd.f32 %v2818_v20, %v2817_v30  ;;  %v2007_v54 = vmax.f32 %v1966_v56, 0.0 }
 0x1d6   :  { %v2820_v22 = vpop.f32.mrf.mxu1  ;;  %v1968_v40 = vpop.f32.mrf.mxu0 }
 0x1d7   :  { %v1969_v7 = vadd.f32 %v1968_v40, %v1833_v0  ;;  %v1838_v32 = vadd.f32 %v2819_v26, %v3933_v38 }
 0x1d8   :  { %v2821_v23 = vpop.f32.mrf.mxu1  ;;  %v2909_v46 = vpop.f32.mrf.mxu0 }
 0x1d9   :  { %v2008_v63 = vmax.f32 %v1969_v7, 0.0  ;;  %v2822_v39 = vadd.f32 %v2821_v23, %v2820_v22 }
 0x1da   :  { %v2823_v28 = vpop.f32.mrf.mxu1  ;;  %v1973_v59 = vpop.f32.mrf.mxu0 }
 0x1db   :  { %v2435_v31 = vpack.c.bf16 %v2008_v63, %v2007_v54  ;;  %v1974_v15 = vadd.f32 %v1973_v59, %v1838_v32  ;;  %v1841_v55 = vadd.f32 %v2822_v39, %v3935_v12 }
 0x1dc   :  { %v2824_v16 = vpop.f32.mrf.mxu1  ;;  %v2912_v35 = vpop.f32.mrf.mxu0 }
 0x1dd   :  { %2451 = vst [vmem:[%s4006_s3 + $0x50] sm:$0xff] %v2435_v31   ;;  %v2825_v10 = vadd.f32 %v2824_v16, %v2823_v28  ;;  %v2009_v51 = vmax.f32 %v1974_v15, 0.0 }
 0x1de   :  { %v2826_v37 = vpop.f32.mrf.mxu1  ;;  %v1976_v53 = vpop.f32.mrf.mxu0 }
 0x1df   :  { %v1977_v17 = vadd.f32 %v1976_v53, %v1841_v55  ;;  %v1846_v13 = vadd.f32 %v2825_v10, %v3937_v25 }
 0x1e0   :  { %v2827_v41 = vpop.f32.mrf.mxu1  ;;  %v2913_v43 = vpop.f32.mrf.mxu0 }
 0x1e1   :  { %v2010_v45 = vmax.f32 %v1977_v17, 0.0 }
 0x1e2   :  { %v1981_v38 = vpop.f32.mrf.mxu0 }
 0x1e3   :  { %v2440_v48 = vpack.c.bf16 %v2010_v45, %v2009_v51  ;;  %v1982_v47 = vadd.f32 %v1981_v38, %v1846_v13 }
 0x1e4   :  { %v2916_v19 = vpop.f32.mrf.mxu0 }
 0x1e5   :  { %2452 = vst [vmem:[%s4006_s3 + $0x58] sm:$0xff] %v2440_v48   ;;  %v2011_v1 = vmax.f32 %v1982_v47, 0.0 }
 0x1e6   :  { %v1984_v24 = vpop.f32.mrf.mxu0 }
 0x1e7   :  { %v2381_v12 = vpack.c.bf16 %v2011_v1, %v2011_v1 }
 0x1e8   :  { %v2917_v5 = vpop.f32.mrf.mxu0 }
 0x1e9   :  { %2137 = vst [vmem:[%s4006_s3 + $0x60] sm:$0xf] %v2381_v12 }

// kernel: candidate_detector_forward.8
= control target key start
LH: loop header
LB: loop body
LE: loop exit
PB: predicated region body
PF: predicated region fallthrough
CT: control target
= control target key end

     0   :  { %s2950_s1 = inlined_call_operand.vmem [shape: bf16[1152,128], index: 1, kind: input, shape index: {}]   ;;  %s2951_s0 = inlined_call_operand.vmem [shape: bf16[128,1152], index: 0, kind: input, shape index: {}]   ;;  %s2952_s2 = inlined_call_operand.vmem [shape: f32[1,128], index: 2, kind: input, shape index: {}]   ;;  %s2953_s3 = inlined_call_operand.vmem [shape: bf16[128,128], index: 3, kind: output, shape index: {}]  }
   0x1   :  { %v2175_v0 = vld [vmem:[%s2950_s1 + $0x78] sm:$0xff]   ;;  %v2179_v4 = vld [vmem:[%s2950_s1 + $0x70] sm:$0xff]   ;;  %v2183_v8 = vld [vmem:[%s2950_s1 + $0x68] sm:$0xff]  }
   0x2   :  { %v2176_v1 = vld [vmem:[%s2950_s1 + $0xf8] sm:$0xff]   ;;  %1855 = vmatprep.subr.bf16.mxu0 %v2175_v0  ;;  %v2180_v5 = vld [vmem:[%s2950_s1 + $0xf0] sm:$0xff]   ;;  %v2184_v9 = vld [vmem:[%s2950_s1 + $0xe8] sm:$0xff]  }
   0x3   :  { %v2177_v2 = vld [vmem:[%s2950_s1 + $0x38] sm:$0xff]   ;;  %1919 = vmatprep.subr.bf16.mxu1 %v2176_v1  ;;  %v2181_v6 = vld [vmem:[%s2950_s1 + $0x30] sm:$0xff]   ;;  %v2185_v10 = vld [vmem:[%s2950_s1 + $0x28] sm:$0xff]  }
   0x4   :  { %v2178_v3 = vld [vmem:[%s2950_s1 + $0xb8] sm:$0xff]   ;;  %1856 = vmatpush3.bf16.msra.mxu0 %v2177_v2  ;;  %v2182_v7 = vld [vmem:[%s2950_s1 + $0xb0] sm:$0xff]   ;;  %v2186_v11 = vld [vmem:[%s2950_s1 + $0xa8] sm:$0xff]  }
   0x5   :  { %1920 = vmatpush3.bf16.msra.mxu1 %v2178_v3  ;;  %1857 = vmatprep.subr.bf16.mxu0 %v2179_v4  ;;  %v2187_v12 = vld [vmem:[%s2950_s1 + $0x60] sm:$0xff]   ;;  %v2191_v16 = vld [vmem:[%s2950_s1 + $0x58] sm:$0xff]   ;;  %v2195_v20 = vld [vmem:[%s2950_s1 + $0x50] sm:$0xff]  }
   0x6   :  { %1921 = vmatprep.subr.bf16.mxu1 %v2180_v5  ;;  %v2188_v13 = vld [vmem:[%s2950_s1 + $0xe0] sm:$0xff]   ;;  %v2192_v17 = vld [vmem:[%s2950_s1 + $0xd8] sm:$0xff]   ;;  %v2196_v21 = vld [vmem:[%s2950_s1 + $0xd0] sm:$0xff]  }
   0x7   :  { %v2189_v14 = vld [vmem:[%s2950_s1 + $0x20] sm:$0xff]   ;;  %v2193_v18 = vld [vmem:[%s2950_s1 + $0x18] sm:$0xff]   ;;  %v2197_v22 = vld [vmem:[%s2950_s1 + $0x10] sm:$0xff]  }
   0x8   :  { %1858 = vmatpush3.bf16.msra.mxu0 %v2181_v6  ;;  %v2190_v15 = vld [vmem:[%s2950_s1 + $0xa0] sm:$0xff]   ;;  %v2194_v19 = vld [vmem:[%s2950_s1 + $0x98] sm:$0xff]   ;;  %v2198_v23 = vld [vmem:[%s2950_s1 + $0x90] sm:$0xff]  }
   0x9   :  { %1922 = vmatpush3.bf16.msra.mxu1 %v2182_v7  ;;  %1859 = vmatprep.subr.bf16.mxu0 %v2183_v8  ;;  %v2199_v24 = vld [vmem:[%s2950_s1 + $0x48] sm:$0xff]   ;;  %v2203_v28 = vld [vmem:[%s2950_s1 + $0x40] sm:$0xff]   ;;  %v2213_v36 = vld [vmem:[%s2950_s1 + $0x178] sm:$0xff]  }
   0xa   :  { %1923 = vmatprep.subr.bf16.mxu1 %v2184_v9  ;;  %v2200_v25 = vld [vmem:[%s2950_s1 + $0xc8] sm:$0xff]   ;;  %v2204_v29 = vld [vmem:[%s2950_s1 + $0xc0] sm:$0xff]   ;;  %v2214_v37 = vld [vmem:[%s2950_s1 + $0x1f8] sm:$0xff]  }
   0xb   :  { %v2201_v26 = vld [vmem:[%s2950_s1 + $0x8] sm:$0xff]   ;;  %v2205_v30 = vld [vmem:[%s2950_s1] sm:$0xff]   ;;  %v2215_v38 = vld [vmem:[%s2950_s1 + $0x138] sm:$0xff]  }
   0xc   :  { %1860 = vmatpush3.bf16.msra.mxu0 %v2185_v10  ;;  %v2202_v27 = vld [vmem:[%s2950_s1 + $0x88] sm:$0xff]   ;;  %v2206_v31 = vld [vmem:[%s2950_s1 + $0x80] sm:$0xff]   ;;  %v2216_v39 = vld [vmem:[%s2950_s1 + $0x1b8] sm:$0xff]  }
   0xd   :  { %1924 = vmatpush3.bf16.msra.mxu1 %v2186_v11  ;;  %1861 = vmatprep.subr.bf16.mxu0 %v2187_v12  ;;  %v2207_v32 = vld [vmem:[%s2951_s0] ss:$36 sps:$4 sm:$0xff]   ;;  %v2210_v34 = vld [vmem:[%s2951_s0 + $0x8] ss:$36 sps:$4 sm:$0xff]   ;;  %v2219_v41 = vld [vmem:[%s2951_s0 + $0x54] ss:$36 sps:$4 sm:$0xff]  }
   0xe   :  { %1925 = vmatprep.subr.bf16.mxu1 %v2188_v13  ;;  %v2209_v33 = vld [vmem:[%s2951_s0 + $0x4] ss:$36 sps:$4 sm:$0xff]   ;;  %v2212_v35 = vld [vmem:[%s2951_s0 + $0xc] ss:$36 sps:$4 sm:$0xff]   ;;  %v2227_v48 = vld [vmem:[%s2951_s0 + $0x94] ss:$36 sps:$4 sm:$0xff]  }
   0xf   :  { %1078 = vmatprep.mubr.bf16.mxu0 %v2209_v33  ;;  %1175 = vmatprep.mubr.bf16.mxu1 %v2212_v35  ;;  %v2217_v40 = vld [vmem:[%s2951_s0 + $0x4c] ss:$36 sps:$4 sm:$0xff]   ;;  %v2229_v49 = vld [vmem:[%s2951_s0 + $0x9c] ss:$36 sps:$4 sm:$0xff]   ;;  %v2239_v57 = vld [vmem:[%s2951_s0 + $0xe4] ss:$36 sps:$4 sm:$0xff]  }
  0x10   :  { %1862 = vmatpush3.bf16.msra.mxu0 %v2189_v14  ;;  %v2221_v42 = vld [vmem:[%s2951_s0 + $0x48] ss:$36 sps:$4 sm:$0xff]   ;;  %v2222_v43 = vld [vmem:[%s2951_s0 + $0x50] ss:$36 sps:$4 sm:$0xff]   ;;  %v2232_v51 = vld [vmem:[%s2951_s0 + $0x98] ss:$36 sps:$4 sm:$0xff]  }
  0x11   :  { %1926 = vmatpush3.bf16.msra.mxu1 %v2190_v15  ;;  %1863 = vmatprep.subr.bf16.mxu0 %v2191_v16  ;;  %v2223_v44 = vld [vmem:[%s2950_s1 + $0x170] sm:$0xff]   ;;  %v2233_v52 = vld [vmem:[%s2950_s1 + $0x168] sm:$0xff]   ;;  %v2237_v56 = vld [vmem:[%s2951_s0 + $0xdc] ss:$36 sps:$4 sm:$0xff]  }
  0x12   :  { %1927 = vmatprep.subr.bf16.mxu1 %v2192_v17  ;;  %v2224_v45 = vld [vmem:[%s2950_s1 + $0x1f0] sm:$0xff]   ;;  %v2234_v53 = vld [vmem:[%s2950_s1 + $0x1e8] sm:$0xff]   ;;  %v2241_v58 = vld [vmem:[%s2951_s0 + $0xd8] ss:$36 sps:$4 sm:$0xff]  }
  0x13   :  { %v2225_v46 = vld [vmem:[%s2950_s1 + $0x130] sm:$0xff]   ;;  %v2235_v54 = vld [vmem:[%s2950_s1 + $0x128] sm:$0xff]   ;;  %v2242_v59 = vld [vmem:[%s2951_s0 + $0xe0] ss:$36 sps:$4 sm:$0xff]  }
  0x14   :  { %1864 = vmatpush3.bf16.msra.mxu0 %v2193_v18  ;;  %v2226_v47 = vld [vmem:[%s2950_s1 + $0x1b0] sm:$0xff]   ;;  %v2236_v55 = vld [vmem:[%s2950_s1 + $0x1a8] sm:$0xff]   ;;  %v2243_v60 = vld [vmem:[%s2950_s1 + $0x160] sm:$0xff]  }
  0x15   :  { %1928 = vmatpush3.bf16.msra.mxu1 %v2194_v19  ;;  %1865 = vmatprep.subr.bf16.mxu0 %v2195_v20  ;;  %v2231_v50 = vld [vmem:[%s2951_s0 + $0x90] ss:$36 sps:$4 sm:$0xff]   ;;  %v2244_v61 = vld [vmem:[%s2950_s1 + $0x1e0] sm:$0xff]   ;;  %v2253_v3 = vld [vmem:[%s2950_s1 + $0x158] sm:$0xff]  }
  0x16   :  { %1929 = vmatprep.subr.bf16.mxu1 %v2196_v21  ;;  %v2245_v62 = vld [vmem:[%s2950_s1 + $0x120] sm:$0xff]   ;;  %v2249_v1 = vld [vmem:[%s2951_s0 + $0x12c] ss:$36 sps:$4 sm:$0xff]   ;;  %v2254_v5 = vld [vmem:[%s2950_s1 + $0x1d8] sm:$0xff]  }
  0x17   :  { %v2246_v63 = vld [vmem:[%s2950_s1 + $0x1a0] sm:$0xff]   ;;  %v2252_v4 = vld [vmem:[%s2951_s0 + $0x128] ss:$36 sps:$4 sm:$0xff]   ;;  %v2255_v6 = vld [vmem:[%s2950_s1 + $0x118] sm:$0xff]  }
  0x18   :  { %1866 = vmatpush3.bf16.msra.mxu0 %v2197_v22  ;;  %v2247_v0 = vld [vmem:[%s2951_s0 + $0x124] ss:$36 sps:$4 sm:$0xff]   ;;  %v2256_v7 = vld [vmem:[%s2950_s1 + $0x198] sm:$0xff]   ;;  %v2257_v8 = vld [vmem:[%s2951_s0 + $0x16c] ss:$36 sps:$4 sm:$0xff]  }
  0x19   :  { %1930 = vmatpush3.bf16.msra.mxu1 %v2198_v23  ;;  %1867 = vmatprep.subr.bf16.mxu0 %v2199_v24  ;;  %v2251_v2 = vld [vmem:[%s2951_s0 + $0x120] ss:$36 sps:$4 sm:$0xff]   ;;  %v2259_v9 = vld [vmem:[%s2951_s0 + $0x174] ss:$36 sps:$4 sm:$0xff]   ;;  %v2261_v12 = vld [vmem:[%s2951_s0 + $0x168] ss:$36 sps:$4 sm:$0xff]  }
  0x1a   :  { %1931 = vmatprep.subr.bf16.mxu1 %v2200_v25  ;;  %v2263_v10 = vld [vmem:[%s2950_s1 + $0x150] sm:$0xff]   ;;  %v2269_v17 = vld [vmem:[%s2951_s0 + $0x1bc] ss:$36 sps:$4 sm:$0xff]   ;;  %v2273_v18 = vld [vmem:[%s2950_s1 + $0x148] sm:$0xff]  }
  0x1b   :  { %v2264_v11 = vld [vmem:[%s2950_s1 + $0x1d0] sm:$0xff]   ;;  %v2274_v19 = vld [vmem:[%s2950_s1 + $0x1c8] sm:$0xff]   ;;  %v2272_v23 = vld [vmem:[%s2951_s0 + $0x1b8] ss:$36 sps:$4 sm:$0xff]  }
  0x1c   :  { %1868 = vmatpush3.bf16.msra.mxu0 %v2201_v26  ;;  %v2265_v13 = vld [vmem:[%s2950_s1 + $0x110] sm:$0xff]   ;;  %v2275_v20 = vld [vmem:[%s2950_s1 + $0x108] sm:$0xff]   ;;  %v2277_v24 = vld [vmem:[%s2951_s0 + $0x1fc] ss:$36 sps:$4 sm:$0xff]  }
  0x1d   :  { %1932 = vmatpush3.bf16.msra.mxu1 %v2202_v27  ;;  %1869 = vmatprep.subr.bf16.mxu0 %v2203_v28  ;;  %v2266_v14 = vld [vmem:[%s2950_s1 + $0x190] sm:$0xff]   ;;  %v2276_v21 = vld [vmem:[%s2950_s1 + $0x188] sm:$0xff]   ;;  %v2283_v26 = vld [vmem:[%s2950_s1 + $0x140] sm:$0xff]  }
  0x1e   :  { %1933 = vmatprep.subr.bf16.mxu1 %v2204_v29  ;;  %v2262_v15 = vld [vmem:[%s2951_s0 + $0x170] ss:$36 sps:$4 sm:$0xff]   ;;  %v2279_v25 = vld [vmem:[%s2951_s0 + $0x204] ss:$36 sps:$4 sm:$0xff]  }
  0x1f   :  { %v2267_v16 = vld [vmem:[%s2951_s0 + $0x1b4] ss:$36 sps:$4 sm:$0xff]   ;;  %v2284_v27 = vld [vmem:[%s2950_s1 + $0x1c0] sm:$0xff]  }
  0x20   :  { %1870 = vmatpush3.bf16.msra.mxu0 %v2205_v30  ;;  %v2271_v22 = vld [vmem:[%s2951_s0 + $0x1b0] ss:$36 sps:$4 sm:$0xff]   ;;  %v2285_v28 = vld [vmem:[%s2950_s1 + $0x100] sm:$0xff]   ;;  %v2281_v30 = vld [vmem:[%s2951_s0 + $0x1f8] ss:$36 sps:$4 sm:$0xff]  }
  0x21   :  { %1934 = vmatpush3.bf16.msra.mxu1 %v2206_v31  ;;  %1983 = vmatprep.subr.bf16.mxu0 %v2213_v36  ;;  %v2286_v29 = vld [vmem:[%s2950_s1 + $0x180] sm:$0xff]   ;;  %v2289_v33 = vld [vmem:[%s2951_s0 + $0x14] ss:$36 sps:$4 sm:$0xff]  }
  0x22   :  { %2047 = vmatprep.subr.bf16.mxu1 %v2214_v37  ;;  %v2282_v31 = vld [vmem:[%s2951_s0 + $0x200] ss:$36 sps:$4 sm:$0xff]   ;;  %v2287_v35 = vld [vmem:[%s2951_s0 + $0x10] ss:$36 sps:$4 sm:$0xff]   ;;  %v2290_v36 = vld [vmem:[%s2951_s0 + $0x18] ss:$36 sps:$4 sm:$0xff]  }
  0x23   :  { %1079 = vmatmul.mubr.bf16.vlgmr.msra.gmra.mxu0 %v2207_v32  ;;  %v2293_v32 = vld [vmem:[%s2950_s1 + $0x238] sm:$0xff]  }
  0x24   :  { %1176 = vmatmul.mubr.bf16.vlgmr.msra.gmra.mxu1 %v2210_v34  ;;  %1984 = vmatpush3.bf16.msra.mxu0 %v2215_v38  ;;  %v2292_v34 = vld [vmem:[%s2951_s0 + $0x1c] ss:$36 sps:$4 sm:$0xff]   ;;  %v2296_v38 = vld [vmem:[%s2951_s0 + $0x64] ss:$36 sps:$4 sm:$0xff]  }
  0x25   :  { %2048 = vmatpush3.bf16.msra.mxu1 %v2216_v39  ;;  %1086 = vmatprep.mubr.bf16.mxu0 %v2217_v40  ;;  %v2294_v37 = vld [vmem:[%s2951_s0 + $0x5c] ss:$36 sps:$4 sm:$0xff]   ;;  %v2300_v39 = vld [vmem:[%s2950_s1 + $0x230] sm:$0xff]   ;;  %v2307_v40 = vld [vmem:[%s2950_s1 + $0x228] sm:$0xff]  }
  0x26   :  { %1183 = vmatprep.mubr.bf16.mxu1 %v2219_v41  ;;  %1985 = vmatprep.subr.bf16.mxu0 %v2223_v44  ;;  %v2298_v41 = vld [vmem:[%s2951_s0 + $0x58] ss:$36 sps:$4 sm:$0xff]   ;;  %v2303_v44 = vld [vmem:[%s2951_s0 + $0xac] ss:$36 sps:$4 sm:$0xff]  }
  0x27   :  { %2049 = vmatprep.subr.bf16.mxu1 %v2224_v45  ;;  %v2314_v45 = vld [vmem:[%s2950_s1 + $0x220] sm:$0xff]  }
  0x28   :  { %1986 = vmatpush3.bf16.msra.mxu0 %v2225_v46  ;;  %v2321_v46 = vld [vmem:[%s2950_s1 + $0x218] sm:$0xff]  }
  0x29   :  { %2050 = vmatpush3.bf16.msra.mxu1 %v2226_v47  ;;  %1987 = vmatprep.subr.bf16.mxu0 %v2233_v52  ;;  %v2305_v47 = vld [vmem:[%s2951_s0 + $0xa0] ss:$36 sps:$4 sm:$0xff]   ;;  %v2312_v52 = vld [vmem:[%s2951_s0 + $0xe8] ss:$36 sps:$4 sm:$0xff]  }
  0x2a   :  { %2051 = vmatprep.subr.bf16.mxu1 %v2234_v53  ;;  %v2335_v53 = vld [vmem:[%s2950_s1 + $0x208] sm:$0xff]  }
  0x2b   :  { %1087 = vmatmul.mubr.bf16.gmra.mxu0 %v2221_v42  ;;  %v2299_v42 = vld [vmem:[%s2951_s0 + $0x60] ss:$36 sps:$4 sm:$0xff]  }
  0x2c   :  { %1184 = vmatmul.mubr.bf16.gmra.mxu1 %v2222_v43  ;;  %1094 = vmatprep.mubr.bf16.mxu0 %v2227_v48  ;;  %v2301_v43 = vld [vmem:[%s2951_s0 + $0xa4] ss:$36 sps:$4 sm:$0xff]  }
  0x2d   :  { %1191 = vmatprep.mubr.bf16.mxu1 %v2229_v49  ;;  %1988 = vmatpush3.bf16.msra.mxu0 %v2235_v54  ;;  %v2306_v48 = vld [vmem:[%s2951_s0 + $0xa8] ss:$36 sps:$4 sm:$0xff]   ;;  %v2313_v54 = vld [vmem:[%s2951_s0 + $0xf0] ss:$36 sps:$4 sm:$0xff]  }
  0x2e   :  { %2052 = vmatpush3.bf16.msra.mxu1 %v2236_v55  ;;  %1989 = vmatprep.subr.bf16.mxu0 %v2243_v60  ;;  %v2308_v49 = vld [vmem:[%s2951_s0 + $0xec] ss:$36 sps:$4 sm:$0xff]   ;;  %v2315_v55 = vld [vmem:[%s2951_s0 + $0x134] ss:$36 sps:$4 sm:$0xff]   ;;  %v2322_v60 = vld [vmem:[%s2951_s0 + $0x17c] ss:$36 sps:$4 sm:$0xff]  }
  0x2f   :  { %2053 = vmatprep.subr.bf16.mxu1 %v2244_v61  ;;  %v2324_v61 = vld [vmem:[%s2951_s0 + $0x184] ss:$36 sps:$4 sm:$0xff]  }
  0x31   :  { %1990 = vmatpush3.bf16.msra.mxu0 %v2245_v62  ;;  %v2326_v62 = vld [vmem:[%s2951_s0 + $0x178] ss:$36 sps:$4 sm:$0xff]  }
  0x32   :  { %2054 = vmatpush3.bf16.msra.mxu1 %v2246_v63  ;;  %1991 = vmatprep.subr.bf16.mxu0 %v2253_v3  ;;  %v2327_v63 = vld [vmem:[%s2951_s0 + $0x180] ss:$36 sps:$4 sm:$0xff]   ;;  %v2334_v3 = vld [vmem:[%s2951_s0 + $0x1c8] ss:$36 sps:$4 sm:$0xff]  }
  0x33   :  { %1095 = vmatmul.mubr.bf16.gmra.mxu0 %v2231_v50  ;;  %2055 = vmatprep.subr.bf16.mxu1 %v2254_v5  ;;  %v2310_v50 = vld [vmem:[%s2951_s0 + $0xf4] ss:$36 sps:$4 sm:$0xff]  }
  0x34   :  { %1192 = vmatmul.mubr.bf16.gmra.mxu1 %v2232_v51  ;;  %1102 = vmatprep.mubr.bf16.mxu0 %v2237_v56  ;;  %v2328_v51 = vld [vmem:[%s2950_s1 + $0x210] sm:$0xff]   ;;  %v2317_v56 = vld [vmem:[%s2951_s0 + $0x13c] ss:$36 sps:$4 sm:$0xff]  }
  0x35   :  { %1199 = vmatprep.mubr.bf16.mxu1 %v2239_v57  ;;  %1992 = vmatpush3.bf16.msra.mxu0 %v2255_v6  ;;  %v2342_v57 = vld [vmem:[%s2950_s1 + $0x200] sm:$0xff]   ;;  %v2338_v5 = vld [vmem:[%s2951_s0 + $0x214] ss:$36 sps:$4 sm:$0xff]   ;;  %v2340_v6 = vld [vmem:[%s2951_s0 + $0x208] ss:$36 sps:$4 sm:$0xff]  }
  0x36   :  { %2056 = vmatpush3.bf16.msra.mxu1 %v2256_v7  ;;  %1993 = vmatprep.subr.bf16.mxu0 %v2263_v10  ;;  %v2341_v7 = vld [vmem:[%s2951_s0 + $0x210] ss:$36 sps:$4 sm:$0xff]   ;;  %v2345_v10 = vld [vmem:[%s2951_s0 + $0x68] ss:$36 sps:$4 sm:$0xff]  }
  0x37   :  { %2057 = vmatprep.subr.bf16.mxu1 %v2264_v11  ;;  %v2346_v11 = vld [vmem:[%s2951_s0 + $0x188] ss:$36 sps:$4 sm:$0xff]  }
  0x39   :  { %1994 = vmatpush3.bf16.msra.mxu0 %v2265_v13  ;;  %v2348_v13 = vld [vmem:[%s2951_s0 + $0x1d0] ss:$36 sps:$4 sm:$0xff]  }
  0x3a   :  { %2058 = vmatpush3.bf16.msra.mxu1 %v2266_v14  ;;  %1995 = vmatprep.subr.bf16.mxu0 %v2273_v18  ;;  %v2349_v14 = vld [vmem:[%s2951_s0 + $0xf8] ss:$36 sps:$4 sm:$0xff]   ;;  %v2806_v18 = vld [vmem:[%s2952_s2] ss:$0 sm:$0xff] }
  0x3b   :  { %1103 = vmatmul.mubr.bf16.gmra.mxu0 %v2241_v58  ;;  %2059 = vmatprep.subr.bf16.mxu1 %v2274_v19  ;;  %v2319_v58 = vld [vmem:[%s2951_s0 + $0x130] ss:$36 sps:$4 sm:$0xff]  }
  0x3c   :  { %1200 = vmatmul.mubr.bf16.gmra.mxu1 %v2242_v59  ;;  %1110 = vmatprep.mubr.bf16.mxu0 %v2247_v0  ;;  %v2320_v59 = vld [vmem:[%s2951_s0 + $0x138] ss:$36 sps:$4 sm:$0xff]   ;;  %v2329_v0 = vld [vmem:[%s2951_s0 + $0x1c4] ss:$36 sps:$4 sm:$0xff]  }
  0x3d   :  { %1207 = vmatprep.mubr.bf16.mxu1 %v2249_v1  ;;  %1996 = vmatpush3.bf16.msra.mxu0 %v2275_v20  ;;  %v2331_v1 = vld [vmem:[%s2951_s0 + $0x1cc] ss:$36 sps:$4 sm:$0xff]  }
  0x3e   :  { %2060 = vmatpush3.bf16.msra.mxu1 %v2276_v21  ;;  %1997 = vmatprep.subr.bf16.mxu0 %v2283_v26 }
  0x3f   :  { %2061 = vmatprep.subr.bf16.mxu1 %v2284_v27 }
  0x41   :  { %1998 = vmatpush3.bf16.msra.mxu0 %v2285_v28 }
  0x42   :  { %2062 = vmatpush3.bf16.msra.mxu1 %v2286_v29  ;;  %2127 = vmatprep.subr.bf16.mxu0 %v2293_v32 }
  0x43   :  { %1111 = vmatmul.mubr.bf16.gmra.mxu0 %v2251_v2  ;;  %2159 = vmatprep.subr.bf16.mxu1 %v2293_v32  ;;  %v2333_v2 = vld [vmem:[%s2951_s0 + $0x1c0] ss:$36 sps:$4 sm:$0xff]  }
  0x44   :  { %1208 = vmatmul.mubr.bf16.gmra.mxu1 %v2252_v4  ;;  %1118 = vmatprep.mubr.bf16.mxu0 %v2257_v8  ;;  %v2336_v4 = vld [vmem:[%s2951_s0 + $0x20c] ss:$36 sps:$4 sm:$0xff]   ;;  %v2343_v8 = vld [vmem:[%s2951_s0 + $0x20] ss:$36 sps:$4 sm:$0xff]  }
  0x45   :  { %1215 = vmatprep.mubr.bf16.mxu1 %v2259_v9  ;;  %v2344_v9 = vld [vmem:[%s2951_s0 + $0x140] ss:$36 sps:$4 sm:$0xff]  }
  0x4b   :  { %1119 = vmatmul.mubr.bf16.gmra.mxu0 %v2261_v12  ;;  %v2347_v12 = vld [vmem:[%s2951_s0 + $0xb0] ss:$36 sps:$4 sm:$0xff]  }
  0x4c   :  { %1216 = vmatmul.mubr.bf16.gmra.mxu1 %v2262_v15  ;;  %1126 = vmatprep.mubr.bf16.mxu0 %v2267_v16  ;;  %v2350_v15 = vld [vmem:[%s2951_s0 + $0x218] ss:$36 sps:$4 sm:$0xff]  }
  0x4d   :  { %1223 = vmatprep.mubr.bf16.mxu1 %v2269_v17 }
  0x53   :  { %1127 = vmatmul.mubr.bf16.gmra.mxu0 %v2271_v22 }
  0x54   :  { %1224 = vmatmul.mubr.bf16.gmra.mxu1 %v2272_v23  ;;  %1134 = vmatprep.mubr.bf16.mxu0 %v2277_v24 }
  0x55   :  { %1231 = vmatprep.mubr.bf16.mxu1 %v2279_v25 }
  0x5b   :  { %1135 = vmatmul.mubr.bf16.gmra.mxu0 %v2281_v30 }
  0x5c   :  { %1232 = vmatmul.mubr.bf16.gmra.mxu1 %v2282_v31  ;;  %1272 = vmatprep.mubr.bf16.mxu0 %v2289_v33 }
  0x5d   :  { %1369 = vmatprep.mubr.bf16.mxu1 %v2292_v34 }
  0x63   :  { %1273 = vmatmul.mubr.bf16.vlgmr.msra.gmra.mxu0 %v2287_v35 }
  0x64   :  { %1370 = vmatmul.mubr.bf16.vlgmr.msra.gmra.mxu1 %v2290_v36  ;;  %2128 = vmatpush3.bf16.msra.mxu0 %v2293_v32 }
  0x65   :  { %2167 = vmatpush3.bf16.msra.mxu1 %v2293_v32  ;;  %1280 = vmatprep.mubr.bf16.mxu0 %v2294_v37 }
  0x66   :  { %1377 = vmatprep.mubr.bf16.mxu1 %v2296_v38  ;;  %2129 = vmatprep.subr.bf16.mxu0 %v2300_v39 }
  0x67   :  { %2160 = vmatprep.subr.bf16.mxu1 %v2300_v39 }
  0x68   :  { %2130 = vmatpush3.bf16.msra.mxu0 %v2300_v39 }
  0x69   :  { %2168 = vmatpush3.bf16.msra.mxu1 %v2300_v39  ;;  %2131 = vmatprep.subr.bf16.mxu0 %v2307_v40 }
  0x6a   :  { %2161 = vmatprep.subr.bf16.mxu1 %v2307_v40 }
  0x6b   :  { %1281 = vmatmul.mubr.bf16.gmra.mxu0 %v2298_v41 }
  0x6c   :  { %1378 = vmatmul.mubr.bf16.gmra.mxu1 %v2299_v42  ;;  %1288 = vmatprep.mubr.bf16.mxu0 %v2301_v43 }
  0x6d   :  { %1385 = vmatprep.mubr.bf16.mxu1 %v2303_v44  ;;  %2132 = vmatpush3.bf16.msra.mxu0 %v2307_v40 }
  0x6e   :  { %2169 = vmatpush3.bf16.msra.mxu1 %v2307_v40  ;;  %2133 = vmatprep.subr.bf16.mxu0 %v2314_v45 }
  0x6f   :  { %2162 = vmatprep.subr.bf16.mxu1 %v2314_v45 }
  0x71   :  { %2134 = vmatpush3.bf16.msra.mxu0 %v2314_v45 }
  0x72   :  { %2170 = vmatpush3.bf16.msra.mxu1 %v2314_v45  ;;  %2135 = vmatprep.subr.bf16.mxu0 %v2321_v46 }
  0x73   :  { %1289 = vmatmul.mubr.bf16.gmra.mxu0 %v2305_v47  ;;  %2163 = vmatprep.subr.bf16.mxu1 %v2321_v46 }
  0x74   :  { %1386 = vmatmul.mubr.bf16.gmra.mxu1 %v2306_v48  ;;  %1296 = vmatprep.mubr.bf16.mxu0 %v2308_v49 }
  0x75   :  { %1393 = vmatprep.mubr.bf16.mxu1 %v2310_v50  ;;  %2136 = vmatpush3.bf16.msra.mxu0 %v2321_v46 }
  0x76   :  { %2171 = vmatpush3.bf16.msra.mxu1 %v2321_v46  ;;  %2137 = vmatprep.subr.bf16.mxu0 %v2328_v51 }
  0x77   :  { %2164 = vmatprep.subr.bf16.mxu1 %v2328_v51 }
  0x79   :  { %2138 = vmatpush3.bf16.msra.mxu0 %v2328_v51 }
  0x7a   :  { %2172 = vmatpush3.bf16.msra.mxu1 %v2328_v51  ;;  %2139 = vmatprep.subr.bf16.mxu0 %v2335_v53 }
  0x7b   :  { %1297 = vmatmul.mubr.bf16.gmra.mxu0 %v2312_v52  ;;  %2165 = vmatprep.subr.bf16.mxu1 %v2335_v53 }
  0x7c   :  { %1394 = vmatmul.mubr.bf16.gmra.mxu1 %v2313_v54  ;;  %1304 = vmatprep.mubr.bf16.mxu0 %v2315_v55 }
  0x7d   :  { %1401 = vmatprep.mubr.bf16.mxu1 %v2317_v56  ;;  %2140 = vmatpush3.bf16.msra.mxu0 %v2335_v53 }
  0x7e   :  { %2173 = vmatpush3.bf16.msra.mxu1 %v2335_v53  ;;  %2141 = vmatprep.subr.bf16.mxu0 %v2342_v57 }
  0x7f   :  { %2166 = vmatprep.subr.bf16.mxu1 %v2342_v57 }
  0x81   :  { %2142 = vmatpush3.bf16.msra.mxu0 %v2342_v57 }
  0x82   :  { %2174 = vmatpush3.bf16.msra.mxu1 %v2342_v57 }
  0x83   :  { %1305 = vmatmul.mubr.bf16.gmra.mxu0 %v2319_v58 }
  0x84   :  { %1402 = vmatmul.mubr.bf16.gmra.mxu1 %v2320_v59  ;;  %1312 = vmatprep.mubr.bf16.mxu0 %v2322_v60 }
  0x85   :  { %1409 = vmatprep.mubr.bf16.mxu1 %v2324_v61 }
  0x8b   :  { %1313 = vmatmul.mubr.bf16.gmra.mxu0 %v2326_v62 }
  0x8c   :  { %1410 = vmatmul.mubr.bf16.gmra.mxu1 %v2327_v63  ;;  %1320 = vmatprep.mubr.bf16.mxu0 %v2329_v0 }
  0x8d   :  { %1417 = vmatprep.mubr.bf16.mxu1 %v2331_v1 }
  0x93   :  { %1321 = vmatmul.mubr.bf16.gmra.mxu0 %v2333_v2 }
  0x94   :  { %1418 = vmatmul.mubr.bf16.gmra.mxu1 %v2334_v3  ;;  %1328 = vmatprep.mubr.bf16.mxu0 %v2336_v4 }
  0x95   :  { %1425 = vmatprep.mubr.bf16.mxu1 %v2338_v5 }
  0x9b   :  { %1329 = vmatmul.mubr.bf16.gmra.mxu0 %v2340_v6 }
  0x9c   :  { %1426 = vmatmul.mubr.bf16.gmra.mxu1 %v2341_v7  ;;  %2143 = vmatprep.mubr.bf16.mxu0 %v2343_v8 }
  0x9d   :  { %2151 = vmatprep.mubr.bf16.mxu1 %v2344_v9 }
  0xa3   :  { %2144 = vmatmul.mubr.bf16.vlgmr.msra.gmra.mxu0 %v2345_v10 }
  0xa4   :  { %2152 = vmatmul.mubr.bf16.vlgmr.msra.gmra.mxu1 %v2346_v11  ;;  %2147 = vmatprep.mubr.bf16.mxu0 %v2347_v12 }
  0xa5   :  { %2155 = vmatprep.mubr.bf16.mxu1 %v2348_v13 }
  0xab   :  { %2148 = vmatmul.mubr.bf16.gmra.mxu0 %v2349_v14 }
  0xac   :  { %2156 = vmatmul.mubr.bf16.gmra.mxu1 %v2350_v15 }
  0xe3   :  { %v1871_v16 = vpop.f32.mrf.mxu0 }
  0xe4   :  { %v1935_v17 = vpop.f32.mrf.mxu1 }
  0xe5   :  { %v1872_v19 = vpop.f32.mrf.mxu0 }
  0xe6   :  { %v1873_v20 = vadd.f32 %v1872_v19, %v1871_v16  ;;  %v1936_v21 = vpop.f32.mrf.mxu1 }
  0xe7   :  { %v1937_v22 = vadd.f32 %v1936_v21, %v1935_v17  ;;  %v1874_v23 = vpop.f32.mrf.mxu0 }
  0xe8   :  { %v1081_v24 = vadd.f32 %v1873_v20, %v2806_v18  ;;  %v1938_v25 = vpop.f32.mrf.mxu1 }
  0xe9   :  { %v1875_v26 = vpop.f32.mrf.mxu0 }
  0xea   :  { %v2809_v27 = vadd.f32 %v1937_v22, %v1081_v24  ;;  %v1876_v28 = vadd.f32 %v1875_v26, %v1874_v23  ;;  %v1939_v29 = vpop.f32.mrf.mxu1 }
  0xeb   :  { %v1940_v30 = vadd.f32 %v1939_v29, %v1938_v25  ;;  %v1877_v31 = vpop.f32.mrf.mxu0 }
  0xec   :  { %v1084_v32 = vadd.f32 %v1876_v28, %v2806_v18  ;;  %v1941_v33 = vpop.f32.mrf.mxu1 }
  0xed   :  { %v1878_v34 = vpop.f32.mrf.mxu0 }
  0xee   :  { %v2812_v35 = vadd.f32 %v1940_v30, %v1084_v32  ;;  %v1879_v36 = vadd.f32 %v1878_v34, %v1877_v31  ;;  %v1942_v37 = vpop.f32.mrf.mxu1 }
  0xef   :  { %v1943_v38 = vadd.f32 %v1942_v37, %v1941_v33  ;;  %v1880_v39 = vpop.f32.mrf.mxu0 }
  0xf0   :  { %v1089_v40 = vadd.f32 %v1879_v36, %v2806_v18  ;;  %v1944_v41 = vpop.f32.mrf.mxu1 }
  0xf1   :  { %v1881_v42 = vpop.f32.mrf.mxu0 }
  0xf2   :  { %v2815_v43 = vadd.f32 %v1943_v38, %v1089_v40  ;;  %v1882_v44 = vadd.f32 %v1881_v42, %v1880_v39  ;;  %v1945_v45 = vpop.f32.mrf.mxu1 }
  0xf3   :  { %v1946_v46 = vadd.f32 %v1945_v45, %v1944_v41  ;;  %v1883_v47 = vpop.f32.mrf.mxu0 }
  0xf4   :  { %v1092_v48 = vadd.f32 %v1882_v44, %v2806_v18  ;;  %v1947_v49 = vpop.f32.mrf.mxu1 }
  0xf5   :  { %v1884_v50 = vpop.f32.mrf.mxu0 }
  0xf6   :  { %v2818_v51 = vadd.f32 %v1946_v46, %v1092_v48  ;;  %v1885_v52 = vadd.f32 %v1884_v50, %v1883_v47  ;;  %v1948_v53 = vpop.f32.mrf.mxu1 }
  0xf7   :  { %v1949_v54 = vadd.f32 %v1948_v53, %v1947_v49  ;;  %v1886_v55 = vpop.f32.mrf.mxu0 }
  0xf8   :  { %v1097_v56 = vadd.f32 %v1885_v52, %v2806_v18  ;;  %v1950_v57 = vpop.f32.mrf.mxu1 }
  0xf9   :  { %v1887_v58 = vpop.f32.mrf.mxu0 }
  0xfa   :  { %v2821_v59 = vadd.f32 %v1949_v54, %v1097_v56  ;;  %v1888_v60 = vadd.f32 %v1887_v58, %v1886_v55  ;;  %v1951_v61 = vpop.f32.mrf.mxu1 }
  0xfb   :  { %v1952_v62 = vadd.f32 %v1951_v61, %v1950_v57  ;;  %v1889_v63 = vpop.f32.mrf.mxu0 }
  0xfc   :  { %v1100_v0 = vadd.f32 %v1888_v60, %v2806_v18  ;;  %v1953_v1 = vpop.f32.mrf.mxu1 }
  0xfd   :  { %v1890_v2 = vpop.f32.mrf.mxu0 }
  0xfe   :  { %v2824_v3 = vadd.f32 %v1952_v62, %v1100_v0  ;;  %v1891_v4 = vadd.f32 %v1890_v2, %v1889_v63  ;;  %v1954_v5 = vpop.f32.mrf.mxu1 }
  0xff   :  { %v1955_v6 = vadd.f32 %v1954_v5, %v1953_v1  ;;  %v1892_v7 = vpop.f32.mrf.mxu0 }
 0x100   :  { %2954 = vst [vmem:[#allocation2_spill] sm:$0xff] %v2824_v3  ;;  %v1105_v8 = vadd.f32 %v1891_v4, %v2806_v18  ;;  %v1956_v9 = vpop.f32.mrf.mxu1 }
 0x101   :  { %v1893_v10 = vpop.f32.mrf.mxu0 }
 0x102   :  { %v2827_v11 = vadd.f32 %v1955_v6, %v1105_v8  ;;  %v1894_v12 = vadd.f32 %v1893_v10, %v1892_v7  ;;  %v1957_v13 = vpop.f32.mrf.mxu1 }
 0x103   :  { %v1958_v14 = vadd.f32 %v1957_v13, %v1956_v9  ;;  %v1895_v15 = vpop.f32.mrf.mxu0 }
 0x104   :  { %v1108_v16 = vadd.f32 %v1894_v12, %v2806_v18  ;;  %v1959_v17 = vpop.f32.mrf.mxu1 }
 0x105   :  { %v1896_v19 = vpop.f32.mrf.mxu0 }
 0x106   :  { %v2830_v20 = vadd.f32 %v1958_v14, %v1108_v16  ;;  %v1897_v21 = vadd.f32 %v1896_v19, %v1895_v15  ;;  %v1960_v22 = vpop.f32.mrf.mxu1 }
 0x107   :  { %v1961_v23 = vadd.f32 %v1960_v22, %v1959_v17  ;;  %v1898_v24 = vpop.f32.mrf.mxu0 }
 0x108   :  { %2955 = vst [vmem:[#allocation3_spill] sm:$0xff] %v2830_v20  ;;  %v1113_v25 = vadd.f32 %v1897_v21, %v2806_v18  ;;  %v1962_v26 = vpop.f32.mrf.mxu1 }
 0x109   :  { %v1899_v28 = vpop.f32.mrf.mxu0 }
 0x10a   :  { %v2833_v29 = vadd.f32 %v1961_v23, %v1113_v25  ;;  %v1900_v30 = vadd.f32 %v1899_v28, %v1898_v24  ;;  %v1963_v31 = vpop.f32.mrf.mxu1 }
 0x10b   :  { %v1964_v32 = vadd.f32 %v1963_v31, %v1962_v26  ;;  %v1901_v33 = vpop.f32.mrf.mxu0 }
 0x10c   :  { %v1116_v34 = vadd.f32 %v1900_v30, %v2806_v18  ;;  %v1965_v36 = vpop.f32.mrf.mxu1 }
 0x10d   :  { %v1902_v37 = vpop.f32.mrf.mxu0 }
 0x10e   :  { %v2836_v38 = vadd.f32 %v1964_v32, %v1116_v34  ;;  %v1903_v39 = vadd.f32 %v1902_v37, %v1901_v33  ;;  %v1966_v40 = vpop.f32.mrf.mxu1 }
 0x10f   :  { %v1967_v41 = vadd.f32 %v1966_v40, %v1965_v36  ;;  %v1904_v42 = vpop.f32.mrf.mxu0 }
 0x110   :  { %2956 = vst [vmem:[#allocation4_spill] sm:$0xff] %v2836_v38  ;;  %v1121_v44 = vadd.f32 %v1903_v39, %v2806_v18  ;;  %v1968_v45 = vpop.f32.mrf.mxu1 }
 0x111   :  { %v1905_v46 = vpop.f32.mrf.mxu0 }
 0x112   :  { %v2839_v47 = vadd.f32 %v1967_v41, %v1121_v44  ;;  %v1906_v48 = vadd.f32 %v1905_v46, %v1904_v42  ;;  %v1969_v49 = vpop.f32.mrf.mxu1 }
 0x113   :  { %v1970_v50 = vadd.f32 %v1969_v49, %v1968_v45  ;;  %v1907_v52 = vpop.f32.mrf.mxu0 }
 0x114   :  { %v1124_v53 = vadd.f32 %v1906_v48, %v2806_v18  ;;  %v1971_v54 = vpop.f32.mrf.mxu1 }
 0x115   :  { %v1908_v55 = vpop.f32.mrf.mxu0 }
 0x116   :  { %v2842_v56 = vadd.f32 %v1970_v50, %v1124_v53  ;;  %v1909_v57 = vadd.f32 %v1908_v55, %v1907_v52  ;;  %v1972_v58 = vpop.f32.mrf.mxu1 }
 0x117   :  { %v1973_v60 = vadd.f32 %v1972_v58, %v1971_v54  ;;  %v1910_v61 = vpop.f32.mrf.mxu0 }
 0x118   :  { %2957 = vst [vmem:[#allocation5_spill] sm:$0xff] %v2842_v56  ;;  %v1129_v62 = vadd.f32 %v1909_v57, %v2806_v18  ;;  %v1974_v63 = vpop.f32.mrf.mxu1 }
 0x119   :  { %v1911_v0 = vpop.f32.mrf.mxu0 }
 0x11a   :  { %v2845_v1 = vadd.f32 %v1973_v60, %v1129_v62  ;;  %v1912_v2 = vadd.f32 %v1911_v0, %v1910_v61  ;;  %v1975_v4 = vpop.f32.mrf.mxu1 }
 0x11b   :  { %v1976_v5 = vadd.f32 %v1975_v4, %v1974_v63  ;;  %v1913_v6 = vpop.f32.mrf.mxu0 }
 0x11c   :  { %2958 = vst [vmem:[#allocation6_spill] sm:$0xff] %v2845_v1  ;;  %v1132_v7 = vadd.f32 %v1912_v2, %v2806_v18  ;;  %v1977_v8 = vpop.f32.mrf.mxu1 }
 0x11d   :  { %v1914_v9 = vpop.f32.mrf.mxu0 }
 0x11e   :  { %v2848_v10 = vadd.f32 %v1976_v5, %v1132_v7  ;;  %v1915_v12 = vadd.f32 %v1914_v9, %v1913_v6  ;;  %v1978_v13 = vpop.f32.mrf.mxu1 }
 0x11f   :  { %v1979_v14 = vadd.f32 %v1978_v13, %v1977_v8  ;;  %v1916_v15 = vpop.f32.mrf.mxu0 }
 0x120   :  { %2959 = vst [vmem:[#allocation7_spill] sm:$0xff] %v2848_v10  ;;  %v1137_v16 = vadd.f32 %v1915_v12, %v2806_v18  ;;  %v1980_v17 = vpop.f32.mrf.mxu1 }
 0x121   :  { %v1917_v19 = vpop.f32.mrf.mxu0 }
 0x122   :  { %v2851_v21 = vadd.f32 %v1979_v14, %v1137_v16  ;;  %v1918_v22 = vadd.f32 %v1917_v19, %v1916_v15  ;;  %v1981_v23 = vpop.f32.mrf.mxu1 }
 0x123   :  { %v1982_v24 = vadd.f32 %v1981_v23, %v1980_v17  ;;  %v1999_v25 = vpop.f32.mrf.mxu0 }
 0x124   :  { %2960 = vst [vmem:[#allocation8_spill] sm:$0xff] %v2851_v21  ;;  %v1140_v26 = vadd.f32 %v1918_v22, %v2806_v18  ;;  %v2063_v28 = vpop.f32.mrf.mxu1 }
 0x125   :  { %v2000_v30 = vpop.f32.mrf.mxu0 }
 0x126   :  { %v2854_v31 = vadd.f32 %v1982_v24, %v1140_v26  ;;  %v2001_v32 = vadd.f32 %v2000_v30, %v1999_v25  ;;  %v2064_v33 = vpop.f32.mrf.mxu1 }
 0x127   :  { %v2002_v34 = vpop.f32.mrf.mxu0  ;;  %v2065_v37 = vadd.f32 %v2064_v33, %v2063_v28 }
 0x128   :  { %2961 = vst [vmem:[#allocation9_spill] sm:$0xff] %v2854_v31  ;;  %v1275_v36 = vadd.f32 %v2001_v32, %v2809_v27  ;;  %v2857_v39 = vpop.f32.mrf.mxu1 }
 0x129   :  { %v2003_v40 = vpop.f32.mrf.mxu0 }
 0x12a   :  { %v2859_v41 = vpop.f32.mrf.mxu1  ;;  %v2861_v42 = vadd.f32 %v2065_v37, %v1275_v36  ;;  %v2004_v10 = vadd.f32 %v2003_v40, %v2002_v34 }
 0x12b   :  { %v2005_v44 = vpop.f32.mrf.mxu0 }
 0x12c   :  { %2962 = vst [vmem:[#allocation10_spill] sm:$0xff] %v2861_v42  ;;  %v2069_v45 = vpop.f32.mrf.mxu1  ;;  %v1278_v56 = vadd.f32 %v2004_v10, %v2812_v35 }
 0x12d   :  { %v2006_v18 = vpop.f32.mrf.mxu0 }
 0x12e   :  { %v2070_v46 = vpop.f32.mrf.mxu1  ;;  %v2007_v42 = vadd.f32 %v2006_v18, %v2005_v44  ;;  %v2068_v44 = vadd.f32 %v2859_v41, %v2857_v39 }
 0x12f   :  { %v2008_v48 = vpop.f32.mrf.mxu0  ;;  %v2071_v18 = vadd.f32 %v2070_v46, %v2069_v45 }
 0x130   :  { %v2072_v49 = vpop.f32.mrf.mxu1 }
 0x131   :  { %v2009_v50 = vpop.f32.mrf.mxu0 }
 0x132   :  { %v2073_v52 = vpop.f32.mrf.mxu1  ;;  %v2010_v21 = vadd.f32 %v2009_v50, %v2008_v48 }
 0x133   :  { %v2011_v53 = vpop.f32.mrf.mxu0  ;;  %v2074_v48 = vadd.f32 %v2073_v52, %v2072_v49 }
 0x134   :  { %v2075_v54 = vpop.f32.mrf.mxu1 }
 0x135   :  { %v2012_v55 = vpop.f32.mrf.mxu0 }
 0x136   :  { %v2076_v27 = vpop.f32.mrf.mxu1 }
 0x137   :  { %v2014_v57 = vpop.f32.mrf.mxu0 }
 0x138   :  { %v2863_v58 = vpop.f32.mrf.mxu1 }
 0x139   :  { %v2015_v60 = vpop.f32.mrf.mxu0 }
 0x13a   :  { %v2865_v61 = vpop.f32.mrf.mxu1  ;;  %v2016_v35 = vadd.f32 %v2015_v60, %v2014_v57 }
 0x13b   :  { %v2017_v62 = vpop.f32.mrf.mxu0  ;;  %v2899_v41 = vadd.f32 %v2865_v61, %v2863_v58 }
 0x13c   :  { %v2867_v63 = vpop.f32.mrf.mxu1 }
 0x13d   :  { %v2018_v0 = vpop.f32.mrf.mxu0 }
 0x13e   :  { %v2082_v2 = vpop.f32.mrf.mxu1  ;;  %v2019_v38 = vadd.f32 %v2018_v0, %v2017_v62 }
 0x13f   :  { %v2020_v4 = vpop.f32.mrf.mxu0  ;;  %v2083_v45 = vadd.f32 %v2082_v2, %v2867_v63 }
 0x140   :  { %v2869_v5 = vpop.f32.mrf.mxu1 }
 0x141   :  { %2963 = vst [vmem:[#allocation11_spill] sm:$0xff] %v2869_v5  ;;  %v2021_v6 = vpop.f32.mrf.mxu0 }
 0x142   :  { %v2871_v7 = vpop.f32.mrf.mxu1  ;;  %v2022_v46 = vadd.f32 %v2021_v6, %v2020_v4 }
 0x143   :  { %2964 = vst [vmem:[#allocation12_spill] sm:$0xff] %v2871_v7  ;;  %v2023_v8 = vpop.f32.mrf.mxu0  ;;  %v2013_v7 = vadd.f32 %v2012_v55, %v2011_v53  ;;  %v2077_v55 = vadd.f32 %v2076_v27, %v2075_v54  ;;  %v2971_v27 = vld [vmem:[#allocation5_spill] sm:$0xff] }
 0x144   :  { %v2873_v9 = vpop.f32.mrf.mxu1 }
 0x145   :  { %2965 = vst [vmem:[#allocation13_spill] sm:$0xff] %v2873_v9  ;;  %v2024_v12 = vpop.f32.mrf.mxu0  ;;  %v1291_v34 = vadd.f32 %v2013_v7, %v2821_v59 }
 0x146   :  { %v2088_v13 = vpop.f32.mrf.mxu1  ;;  %v2025_v50 = vadd.f32 %v2024_v12, %v2023_v8 }
 0x147   :  { %v2026_v14 = vpop.f32.mrf.mxu0  ;;  %v2895_v39 = vadd.f32 %v2077_v55, %v1291_v34  ;;  %v2981_v55 = vld [vmem:[#allocation7_spill] sm:$0xff] }
 0x148   :  { %v2090_v15 = vpop.f32.mrf.mxu1  ;;  %v1307_v49 = vadd.f32 %v2025_v50, %v2833_v29 }
 0x149   :  { %v2027_v16 = vpop.f32.mrf.mxu0 }
 0x14a   :  { %v2091_v17 = vpop.f32.mrf.mxu1  ;;  %v2028_v10 = vadd.f32 %v2027_v16, %v2026_v14 }
 0x14b   :  { %v2029_v19 = vpop.f32.mrf.mxu0  ;;  %v2092_v14 = vadd.f32 %v2091_v17, %v2090_v15 }
 0x14c   :  { %v2093_v22 = vpop.f32.mrf.mxu1  ;;  %v2972_v8 = vld [vmem:[#allocation13_spill] sm:$0xff] }
 0x14d   :  { %v2030_v23 = vpop.f32.mrf.mxu0  ;;  %v2089_v12 = vadd.f32 %v2088_v13, %v2972_v8 }
 0x14e   :  { %v2094_v24 = vpop.f32.mrf.mxu1  ;;  %v2031_v40 = vadd.f32 %v2030_v23, %v2029_v19  ;;  %v2973_v23 = vld [vmem:[#allocation3_spill] sm:$0xff] }
 0x14f   :  { %v2032_v25 = vpop.f32.mrf.mxu0  ;;  %v2095_v54 = vadd.f32 %v2094_v24, %v2093_v22  ;;  %v1404_v24 = vadd.f32 %v2089_v12, %v1307_v49 }
 0x150   :  { %v2096_v26 = vpop.f32.mrf.mxu1  ;;  %v1315_v59 = vadd.f32 %v2031_v40, %v2839_v47 }
 0x151   :  { %v2033_v28 = vpop.f32.mrf.mxu0 }
 0x152   :  { %v2097_v30 = vpop.f32.mrf.mxu1  ;;  %v2034_v62 = vadd.f32 %v2033_v28, %v2032_v25  ;;  %v1412_v29 = vadd.f32 %v2095_v54, %v1315_v59  ;;  %v1302_v25 = vadd.f32 %v2022_v46, %v2973_v23  ;;  %v2974_v28 = vld [vmem:[#allocation11_spill] sm:$0xff]  ;;  %v2982_v46 = vld [vmem:[#allocation9_spill] sm:$0xff] }
 0x153   :  { %v2035_v32 = vpop.f32.mrf.mxu0  ;;  %v2098_v63 = vadd.f32 %v2097_v30, %v2096_v26  ;;  %v2978_v30 = vld [vmem:[#allocation8_spill] sm:$0xff] }
 0x154   :  { %v2875_v33 = vpop.f32.mrf.mxu1  ;;  %v1318_v57 = vadd.f32 %v2034_v62, %v2971_v27 }
 0x155   :  { %2966 = vst [vmem:[#allocation14_spill] sm:$0xff] %v2875_v33  ;;  %v2036_v36 = vpop.f32.mrf.mxu0  ;;  %v1283_v33 = vadd.f32 %v2007_v42, %v2815_v43  ;;  %v1299_v43 = vadd.f32 %v2019_v38, %v2827_v11  ;;  %v2969_v38 = vld [vmem:[#allocation2_spill] sm:$0xff] }
 0x156   :  { %v2877_v37 = vpop.f32.mrf.mxu1  ;;  %v2904_v52 = vadd.f32 %v2016_v35, %v2969_v38  ;;  %v2037_v2 = vadd.f32 %v2036_v36, %v2035_v32  ;;  %v1415_v15 = vadd.f32 %v2098_v63, %v1318_v57 }
 0x157   :  { %2967 = vst [vmem:[#allocation15_spill] sm:$0xff] %v2877_v37  ;;  %v2038_v31 = vpop.f32.mrf.mxu0  ;;  %v1286_v37 = vadd.f32 %v2010_v21, %v2818_v51  ;;  %v1375_v51 = vadd.f32 %v2068_v44, %v1278_v56  ;;  %v1380_v7 = vadd.f32 %v2071_v18, %v1283_v33  ;;  %v2970_v56 = vld [vmem:[#allocation4_spill] sm:$0xff]  ;;  %v1396_v16 = vadd.f32 %v2083_v45, %v1299_v43 }
 0x158   :  { %v2879_v1 = vpop.f32.mrf.mxu1  ;;  %v1310_v47 = vadd.f32 %v2028_v10, %v2970_v56  ;;  %v2975_v33 = vld [vmem:[#allocation12_spill] sm:$0xff] }
 0x159   :  { %2968 = vst [vmem:[#allocation16_spill] sm:$0xff] %v2879_v1  ;;  %v2039_v5 = vpop.f32.mrf.mxu0  ;;  %v1383_v19 = vadd.f32 %v2074_v48, %v1286_v37  ;;  %v2086_v37 = vadd.f32 %v2975_v33, %v2974_v28  ;;  %v2980_v48 = vld [vmem:[#allocation6_spill] sm:$0xff] }
 0x15a   :  { %v2881_v20 = vpop.f32.mrf.mxu1  ;;  %v2040_v4 = vadd.f32 %v2039_v5, %v2038_v31  ;;  %v2979_v5 = vld [vmem:[#allocation10_spill] sm:$0xff]  ;;  %v1323_v50 = vadd.f32 %v2037_v2, %v2980_v48 }
 0x15b   :  { %v2041_v9 = vpop.f32.mrf.mxu0 }
 0x15c   :  { %v2884_v3 = vpop.f32.mrf.mxu1  ;;  %v1326_v35 = vadd.f32 %v2040_v4, %v2981_v55  ;;  %v1399_v4 = vadd.f32 %v2086_v37, %v1302_v25  ;;  %v1391_v25 = vadd.f32 %v2899_v41, %v2904_v52 }
 0x15d   :  { %v2042_v1 = vpop.f32.mrf.mxu0 }
 0x15e   :  { %v2106_v53 = vpop.f32.mrf.mxu1  ;;  %v2043_v58 = vadd.f32 %v2042_v1, %v2041_v9  ;;  %v1407_v1 = vadd.f32 %v2092_v14, %v1310_v47  ;;  %v2976_v9 = vld [vmem:[#allocation14_spill] sm:$0xff]  ;;  %v2977_v17 = vld [vmem:[#allocation15_spill] sm:$0xff] }
 0x15f   :  { %v2044_v0 = vpop.f32.mrf.mxu0  ;;  %v2101_v26 = vadd.f32 %v2977_v17, %v2976_v9  ;;  %v2107_v43 = vadd.f32 %v2106_v53, %v2884_v3 }
 0x160   :  { %v2892_v42 = vpop.f32.mrf.mxu1  ;;  %v1331_v31 = vadd.f32 %v2043_v58, %v2978_v30 }
 0x161   :  { %v2045_v21 = vpop.f32.mrf.mxu0  ;;  %v1420_v63 = vadd.f32 %v2101_v26, %v1323_v50 }
 0x162   :  { %v2109_v11 = vpop.f32.mrf.mxu1  ;;  %v2046_v40 = vadd.f32 %v2045_v21, %v2044_v0 }
 0x163   :  { %v2145_v60 = vpop.f32.mrf.mxu0  ;;  %v2110_v12 = vadd.f32 %v2109_v11, %v2892_v42 }
 0x164   :  { %v2153_v61 = vpop.f32.mrf.mxu1  ;;  %v1477_v22 = vadd.f32 %v2145_v60, %v1380_v7  ;;  %v1334_v49 = vadd.f32 %v2046_v40, %v2982_v46  ;;  %v1428_v60 = vadd.f32 %v2107_v43, %v1331_v31 }
 0x165   :  { %v1468_v6 = vpop.f32.mrf.mxu0  ;;  %v1509_v44 = vadd.f32 %v2153_v61, %v1412_v29  ;;  %v2983_v29 = vld [vmem:[#allocation16_spill] sm:$0xff] }
 0x166   :  { %v1500_v34 = vpop.f32.mrf.mxu1  ;;  %v1469_v32 = vadd.f32 %v1468_v6, %v2979_v5  ;;  %v1533_v59 = vmax.f32 %v1477_v22, 0.0  ;;  %v2104_v6 = vadd.f32 %v2881_v20, %v2983_v29  ;;  %v1431_v28 = vadd.f32 %v2110_v12, %v1334_v49 }
 0x167   :  { %v2146_v13 = vpop.f32.mrf.mxu0  ;;  %v1501_v10 = vadd.f32 %v1500_v34, %v1404_v24  ;;  %v1541_v38 = vmax.f32 %v1509_v44, 0.0 }
 0x168   :  { %v1480_v36 = vadd.f32 %v2146_v13, %v1383_v19  ;;  %v2154_v18 = vpop.f32.mrf.mxu1  ;;  %v1531_v54 = vmax.f32 %v1469_v32, 0.0  ;;  %v1423_v34 = vadd.f32 %v2104_v6, %v1326_v35 }
 0x169   :  { %v1512_v62 = vadd.f32 %v2154_v18, %v1415_v15  ;;  %v1471_v0 = vpop.f32.mrf.mxu0  ;;  %v1539_v14 = vmax.f32 %v1501_v10, 0.0 }
 0x16a   :  { %v1534_v21 = vmax.f32 %v1480_v36, 0.0  ;;  %v1472_v7 = vadd.f32 %v1471_v0, %v1375_v51  ;;  %v1503_v45 = vpop.f32.mrf.mxu1 }
 0x16b   :  { %v1542_v56 = vmax.f32 %v1512_v62, 0.0  ;;  %v1504_v47 = vadd.f32 %v1503_v45, %v1407_v1  ;;  %v2149_v19 = vpop.f32.mrf.mxu0 }
 0x16c   :  { %v1816_v27 = vpack.c.bf16 %v1534_v21, %v1533_v59  ;;  %v1532_v57 = vmax.f32 %v1472_v7, 0.0  ;;  %v2157_v8 = vpop.f32.mrf.mxu1  ;;  %v1493_v61 = vadd.f32 %v2149_v19, %v1396_v16 }
 0x16d   :  { %v1836_v58 = vpack.c.bf16 %v1542_v56, %v1541_v38  ;;  %v1540_v3 = vmax.f32 %v1504_v47, 0.0  ;;  %v1484_v53 = vpop.f32.mrf.mxu0  ;;  %v1525_v11 = vadd.f32 %v2157_v8, %v1428_v60 }
 0x16e   :  { %1848 = vst [vmem:[%s2953_s3 + $0x8] sm:$0xff] %v1816_v27   ;;  %v1811_v51 = vpack.c.bf16 %v1532_v57, %v1531_v54  ;;  %v1516_v2 = vpop.f32.mrf.mxu1  ;;  %v1485_v16 = vadd.f32 %v1484_v53, %v2895_v39  ;;  %v1537_v40 = vmax.f32 %v1493_v61, 0.0 }
 0x16f   :  { %1852 = vst [vmem:[%s2953_s3 + $0x28] sm:$0xff] %v1836_v58   ;;  %v1831_v42 = vpack.c.bf16 %v1540_v3, %v1539_v14  ;;  %v2150_v23 = vpop.f32.mrf.mxu0  ;;  %v1517_v20 = vadd.f32 %v1516_v2, %v1420_v63  ;;  %v1545_v1 = vmax.f32 %v1525_v11, 0.0 }
 0x170   :  { %1812 = vst [vmem:[%s2953_s3] sm:$0xff] %v1811_v51   ;;  %v1496_v33 = vadd.f32 %v2150_v23, %v1399_v4  ;;  %v2158_v22 = vpop.f32.mrf.mxu1  ;;  %v1535_v17 = vmax.f32 %v1485_v16, 0.0 }
 0x171   :  { %1851 = vst [vmem:[%s2953_s3 + $0x20] sm:$0xff] %v1831_v42   ;;  %v1528_v37 = vadd.f32 %v2158_v22, %v1431_v28  ;;  %v1487_v24 = vpop.f32.mrf.mxu0  ;;  %v1543_v31 = vmax.f32 %v1517_v20, 0.0 }
 0x172   :  { %v1538_v44 = vmax.f32 %v1496_v33, 0.0  ;;  %v1488_v13 = vadd.f32 %v1487_v24, %v1391_v25  ;;  %v1519_v15 = vpop.f32.mrf.mxu1 }
 0x173   :  { %v1546_v9 = vmax.f32 %v1528_v37, 0.0  ;;  %v1520_v39 = vadd.f32 %v1519_v15, %v1423_v34 }
 0x174   :  { %v1826_v26 = vpack.c.bf16 %v1538_v44, %v1537_v40  ;;  %v1536_v30 = vmax.f32 %v1488_v13, 0.0 }
 0x175   :  { %v1846_v41 = vpack.c.bf16 %v1546_v9, %v1545_v1  ;;  %v1544_v52 = vmax.f32 %v1520_v39, 0.0 }
 0x176   :  { %1850 = vst [vmem:[%s2953_s3 + $0x18] sm:$0xff] %v1826_v26   ;;  %v1821_v5 = vpack.c.bf16 %v1536_v30, %v1535_v17 }
 0x177   :  { %1854 = vst [vmem:[%s2953_s3 + $0x38] sm:$0xff] %v1846_v41   ;;  %v1841_v32 = vpack.c.bf16 %v1544_v52, %v1543_v31 }
 0x178   :  { %1849 = vst [vmem:[%s2953_s3 + $0x10] sm:$0xff] %v1821_v5  }
 0x179   :  { %1853 = vst [vmem:[%s2953_s3 + $0x30] sm:$0xff] %v1841_v32  }

// kernel: candidate_detector_forward.9
= control target key start
LH: loop header
LB: loop body
LE: loop exit
PB: predicated region body
PF: predicated region fallthrough
CT: control target
= control target key end

     0   :  { %s12400_s1 = inlined_call_operand.vmem [shape: bf16[3200,384], index: 1, kind: input, shape index: {}]   ;;  %s12401_s0 = inlined_call_operand.vmem [shape: bf16[32,3200], index: 0, kind: input, shape index: {}]   ;;  %s12402_s2 = inlined_call_operand.vmem [shape: f32[1,384], index: 2, kind: input, shape index: {}]   ;;  %s12403_s3 = inlined_call_operand.vmem [shape: bf16[384,384], index: 3, kind: input, shape index: {}]   ;;  %s12404_s5 = inlined_call_operand.vmem [shape: bf16[384,256], index: 5, kind: input, shape index: {}]   ;;  %s12405_s4 = inlined_call_operand.vmem [shape: f32[1,384], index: 4, kind: input, shape index: {}]   ;;  %s12406_s7 = inlined_call_operand.vmem [shape: bf16[256,128], index: 7, kind: input, shape index: {}]   ;;  %s12407_s6 = inlined_call_operand.vmem [shape: f32[1,256], index: 6, kind: input, shape index: {}]   ;;  %s12408_s8 = inlined_call_operand.vmem [shape: f32[1,128], index: 8, kind: input, shape index: {}]   ;;  %s12409_s9 = inlined_call_operand.vmem [shape: f32[32,128], index: 9, kind: output, shape index: {}]  }
   0x1   :  { %v8283_v0 = vld [vmem:[%s12400_s1 + $0xac] ss:$12 sps:$4 sm:$0xff]   ;;  %v8287_v2 = vld [vmem:[%s12400_s1 + $0xa8] ss:$12 sps:$4 sm:$0xff]   ;;  %v8293_v6 = vld [vmem:[%s12400_s1 + $0x90] ss:$12 sps:$4 sm:$0xff]  }
   0x2   :  { %v8285_v1 = vld [vmem:[%s12400_s1 + $0x22c] ss:$12 sps:$4 sm:$0xff]   ;;  %4354 = vmatprep.subr.bf16.mxu0 %v8283_v0  ;;  %v8288_v3 = vld [vmem:[%s12400_s1 + $0x228] ss:$12 sps:$4 sm:$0xff]   ;;  %v8294_v7 = vld [vmem:[%s12400_s1 + $0x210] ss:$12 sps:$4 sm:$0xff]  }
   0x3   :  { %4407 = vmatprep.subr.bf16.mxu1 %v8285_v1  ;;  %v8289_v4 = vld [vmem:[%s12400_s1 + $0x94] ss:$12 sps:$4 sm:$0xff]   ;;  %4355 = vmatpush1.bf16.msra.mxu0 %v8287_v2  ;;  %v8295_v8 = vld [vmem:[%s12400_s1 + $0x7c] ss:$12 sps:$4 sm:$0xff]   ;;  %v8299_v10 = vld [vmem:[%s12400_s1 + $0x78] ss:$12 sps:$4 sm:$0xff]  }
   0x4   :  { %4408 = vmatpush1.bf16.msra.mxu1 %v8288_v3  ;;  %v8291_v5 = vld [vmem:[%s12400_s1 + $0x214] ss:$12 sps:$4 sm:$0xff]   ;;  %4356 = vmatprep.subr.bf16.mxu0 %v8289_v4  ;;  %v8297_v9 = vld [vmem:[%s12400_s1 + $0x1fc] ss:$12 sps:$4 sm:$0xff]   ;;  %v8300_v11 = vld [vmem:[%s12400_s1 + $0x1f8] ss:$12 sps:$4 sm:$0xff]  }
   0x5   :  { %4409 = vmatprep.subr.bf16.mxu1 %v8291_v5  ;;  %v8301_v12 = vld [vmem:[%s12400_s1 + $0x64] ss:$12 sps:$4 sm:$0xff]   ;;  %v8305_v14 = vld [vmem:[%s12400_s1 + $0x60] ss:$12 sps:$4 sm:$0xff]   ;;  %v8311_v18 = vld [vmem:[%s12400_s1 + $0x48] ss:$12 sps:$4 sm:$0xff]  }
   0x6   :  { %v8303_v13 = vld [vmem:[%s12400_s1 + $0x1e4] ss:$12 sps:$4 sm:$0xff]   ;;  %v8306_v15 = vld [vmem:[%s12400_s1 + $0x1e0] ss:$12 sps:$4 sm:$0xff]   ;;  %v8312_v19 = vld [vmem:[%s12400_s1 + $0x1c8] ss:$12 sps:$4 sm:$0xff]  }
   0x7   :  { %4357 = vmatpush1.bf16.msra.mxu0 %v8293_v6  ;;  %v8307_v16 = vld [vmem:[%s12400_s1 + $0x4c] ss:$12 sps:$4 sm:$0xff]   ;;  %v8313_v20 = vld [vmem:[%s12400_s1 + $0x34] ss:$12 sps:$4 sm:$0xff]   ;;  %v8317_v22 = vld [vmem:[%s12400_s1 + $0x30] ss:$12 sps:$4 sm:$0xff]  }
   0x8   :  { %4410 = vmatpush1.bf16.msra.mxu1 %v8294_v7  ;;  %4358 = vmatprep.subr.bf16.mxu0 %v8295_v8  ;;  %v8309_v17 = vld [vmem:[%s12400_s1 + $0x1cc] ss:$12 sps:$4 sm:$0xff]   ;;  %v8315_v21 = vld [vmem:[%s12400_s1 + $0x1b4] ss:$12 sps:$4 sm:$0xff]   ;;  %v8318_v23 = vld [vmem:[%s12400_s1 + $0x1b0] ss:$12 sps:$4 sm:$0xff]  }
   0x9   :  { %4411 = vmatprep.subr.bf16.mxu1 %v8297_v9  ;;  %v8319_v24 = vld [vmem:[%s12400_s1 + $0x1c] ss:$12 sps:$4 sm:$0xff]   ;;  %v8323_v26 = vld [vmem:[%s12400_s1 + $0x18] ss:$12 sps:$4 sm:$0xff]   ;;  %v8329_v30 = vld [vmem:[%s12400_s1] ss:$12 sps:$4 sm:$0xff]  }
   0xa   :  { %v8321_v25 = vld [vmem:[%s12400_s1 + $0x19c] ss:$12 sps:$4 sm:$0xff]   ;;  %v8324_v27 = vld [vmem:[%s12400_s1 + $0x198] ss:$12 sps:$4 sm:$0xff]   ;;  %v8330_v31 = vld [vmem:[%s12400_s1 + $0x180] ss:$12 sps:$4 sm:$0xff]  }
   0xb   :  { %4359 = vmatpush1.bf16.msra.mxu0 %v8299_v10  ;;  %v8325_v28 = vld [vmem:[%s12400_s1 + $0x4] ss:$12 sps:$4 sm:$0xff]   ;;  %v8331_v32 = vld [vmem:[%s12400_s1 + $0x16c] ss:$12 sps:$4 sm:$0xff]   ;;  %v8335_v34 = vld [vmem:[%s12400_s1 + $0x168] ss:$12 sps:$4 sm:$0xff]  }
   0xc   :  { %4412 = vmatpush1.bf16.msra.mxu1 %v8300_v11  ;;  %4360 = vmatprep.subr.bf16.mxu0 %v8301_v12  ;;  %v8327_v29 = vld [vmem:[%s12400_s1 + $0x184] ss:$12 sps:$4 sm:$0xff]   ;;  %v8333_v33 = vld [vmem:[%s12400_s1 + $0x2ec] ss:$12 sps:$4 sm:$0xff]   ;;  %v8336_v35 = vld [vmem:[%s12400_s1 + $0x2e8] ss:$12 sps:$4 sm:$0xff]  }
   0xd   :  { %4413 = vmatprep.subr.bf16.mxu1 %v8303_v13  ;;  %v8337_v36 = vld [vmem:[%s12400_s1 + $0x154] ss:$12 sps:$4 sm:$0xff]   ;;  %v8341_v38 = vld [vmem:[%s12400_s1 + $0x150] ss:$12 sps:$4 sm:$0xff]   ;;  %v8347_v42 = vld [vmem:[%s12400_s1 + $0x138] ss:$12 sps:$4 sm:$0xff]  }
   0xe   :  { %v8339_v37 = vld [vmem:[%s12400_s1 + $0x2d4] ss:$12 sps:$4 sm:$0xff]   ;;  %v8342_v39 = vld [vmem:[%s12400_s1 + $0x2d0] ss:$12 sps:$4 sm:$0xff]   ;;  %v8348_v43 = vld [vmem:[%s12400_s1 + $0x2b8] ss:$12 sps:$4 sm:$0xff]  }
   0xf   :  { %4361 = vmatpush1.bf16.msra.mxu0 %v8305_v14  ;;  %v8343_v40 = vld [vmem:[%s12400_s1 + $0x13c] ss:$12 sps:$4 sm:$0xff]   ;;  %v8349_v44 = vld [vmem:[%s12400_s1 + $0x124] ss:$12 sps:$4 sm:$0xff]   ;;  %v8353_v46 = vld [vmem:[%s12400_s1 + $0x120] ss:$12 sps:$4 sm:$0xff]  }
  0x10   :  { %4414 = vmatpush1.bf16.msra.mxu1 %v8306_v15  ;;  %4362 = vmatprep.subr.bf16.mxu0 %v8307_v16  ;;  %v8345_v41 = vld [vmem:[%s12400_s1 + $0x2bc] ss:$12 sps:$4 sm:$0xff]   ;;  %v8351_v45 = vld [vmem:[%s12400_s1 + $0x2a4] ss:$12 sps:$4 sm:$0xff]   ;;  %v8354_v47 = vld [vmem:[%s12400_s1 + $0x2a0] ss:$12 sps:$4 sm:$0xff]  }
  0x11   :  { %4415 = vmatprep.subr.bf16.mxu1 %v8309_v17  ;;  %v8355_v48 = vld [vmem:[%s12400_s1 + $0x10c] ss:$12 sps:$4 sm:$0xff]   ;;  %v8381_v49 = vld [vmem:[%s12401_s0 + $0x4] ss:$100 sps:$4 sm:$0xff]   ;;  %v8361_v54 = vld [vmem:[%s12400_s1 + $0xf4] ss:$12 sps:$4 sm:$0xff]  }
  0x12   :  { %v8357_v50 = vld [vmem:[%s12400_s1 + $0x28c] ss:$12 sps:$4 sm:$0xff]   ;;  %4386 = vmatprep.mubr.bf16.mxu0 %v8381_v49  ;;  %v8359_v52 = vld [vmem:[%s12400_s1 + $0x108] ss:$12 sps:$4 sm:$0xff]   ;;  %v8365_v56 = vld [vmem:[%s12400_s1 + $0xf0] ss:$12 sps:$4 sm:$0xff]  }
  0x13   :  { %4363 = vmatpush1.bf16.msra.mxu0 %v8311_v18  ;;  %v8384_v51 = vld [vmem:[%s12401_s0 + $0xc] ss:$100 sps:$4 sm:$0xff]   ;;  %v8360_v53 = vld [vmem:[%s12400_s1 + $0x288] ss:$12 sps:$4 sm:$0xff]   ;;  %v8371_v60 = vld [vmem:[%s12400_s1 + $0xd8] ss:$12 sps:$4 sm:$0xff]  }
  0x14   :  { %4416 = vmatpush1.bf16.msra.mxu1 %v8312_v19  ;;  %4364 = vmatprep.subr.bf16.mxu0 %v8313_v20  ;;  %v8363_v55 = vld [vmem:[%s12400_s1 + $0x274] ss:$12 sps:$4 sm:$0xff]   ;;  %v8366_v57 = vld [vmem:[%s12400_s1 + $0x270] ss:$12 sps:$4 sm:$0xff]   ;;  %v8372_v61 = vld [vmem:[%s12400_s1 + $0x258] ss:$12 sps:$4 sm:$0xff]  }
  0x15   :  { %4417 = vmatprep.subr.bf16.mxu1 %v8315_v21  ;;  %4439 = vmatprep.mubr.bf16.mxu1 %v8384_v51  ;;  %v8367_v58 = vld [vmem:[%s12400_s1 + $0xdc] ss:$12 sps:$4 sm:$0xff]   ;;  %v8373_v62 = vld [vmem:[%s12400_s1 + $0xc4] ss:$12 sps:$4 sm:$0xff]   ;;  %v8377_v0 = vld [vmem:[%s12400_s1 + $0xc0] ss:$12 sps:$4 sm:$0xff]  }
  0x16   :  { %v8369_v59 = vld [vmem:[%s12400_s1 + $0x25c] ss:$12 sps:$4 sm:$0xff]   ;;  %v8375_v63 = vld [vmem:[%s12400_s1 + $0x244] ss:$12 sps:$4 sm:$0xff]   ;;  %v8378_v1 = vld [vmem:[%s12400_s1 + $0x240] ss:$12 sps:$4 sm:$0xff]  }
  0x17   :  { %4365 = vmatpush1.bf16.msra.mxu0 %v8317_v22  ;;  %v8387_v2 = vld [vmem:[%s12400_s1 + $0x3ac] ss:$12 sps:$4 sm:$0xff]   ;;  %v8379_v4 = vld [vmem:[%s12401_s0] ss:$100 sps:$4 sm:$0xff]   ;;  %v8385_v6 = vld [vmem:[%s12400_s1 + $0x3a8] ss:$12 sps:$4 sm:$0xff]  }
  0x18   :  { %4418 = vmatpush1.bf16.msra.mxu1 %v8318_v23  ;;  %4366 = vmatprep.subr.bf16.mxu0 %v8319_v24  ;;  %v8390_v3 = vld [vmem:[%s12400_s1 + $0x52c] ss:$12 sps:$4 sm:$0xff]   ;;  %v8388_v7 = vld [vmem:[%s12400_s1 + $0x528] ss:$12 sps:$4 sm:$0xff]   ;;  %v8391_v10 = vld [vmem:[%s12400_s1 + $0x390] ss:$12 sps:$4 sm:$0xff]  }
  0x19   :  { %4419 = vmatprep.subr.bf16.mxu1 %v8321_v25  ;;  %v8382_v5 = vld [vmem:[%s12401_s0 + $0x8] ss:$100 sps:$4 sm:$0xff]   ;;  %v8393_v8 = vld [vmem:[%s12400_s1 + $0x394] ss:$12 sps:$4 sm:$0xff]   ;;  %v8394_v11 = vld [vmem:[%s12400_s1 + $0x510] ss:$12 sps:$4 sm:$0xff]  }
  0x1a   :  { %v8396_v9 = vld [vmem:[%s12400_s1 + $0x514] ss:$12 sps:$4 sm:$0xff]   ;;  %v8399_v12 = vld [vmem:[%s12400_s1 + $0x37c] ss:$12 sps:$4 sm:$0xff]   ;;  %v8397_v14 = vld [vmem:[%s12400_s1 + $0x378] ss:$12 sps:$4 sm:$0xff]  }
  0x1b   :  { %4367 = vmatpush1.bf16.msra.mxu0 %v8323_v26  ;;  %v8402_v13 = vld [vmem:[%s12400_s1 + $0x4fc] ss:$12 sps:$4 sm:$0xff]   ;;  %v8400_v15 = vld [vmem:[%s12400_s1 + $0x4f8] ss:$12 sps:$4 sm:$0xff]   ;;  %v8403_v18 = vld [vmem:[%s12400_s1 + $0x360] ss:$12 sps:$4 sm:$0xff]  }
  0x1c   :  { %4420 = vmatpush1.bf16.msra.mxu1 %v8324_v27  ;;  %4368 = vmatprep.subr.bf16.mxu0 %v8325_v28  ;;  %v8405_v16 = vld [vmem:[%s12400_s1 + $0x364] ss:$12 sps:$4 sm:$0xff]   ;;  %v8406_v19 = vld [vmem:[%s12400_s1 + $0x4e0] ss:$12 sps:$4 sm:$0xff]   ;;  %v8409_v22 = vld [vmem:[%s12400_s1 + $0x348] ss:$12 sps:$4 sm:$0xff]  }
  0x1d   :  { %4421 = vmatprep.subr.bf16.mxu1 %v8327_v29  ;;  %v8408_v17 = vld [vmem:[%s12400_s1 + $0x4e4] ss:$12 sps:$4 sm:$0xff]   ;;  %v8411_v20 = vld [vmem:[%s12400_s1 + $0x34c] ss:$12 sps:$4 sm:$0xff]   ;;  %v8412_v23 = vld [vmem:[%s12400_s1 + $0x4c8] ss:$12 sps:$4 sm:$0xff]  }
  0x1e   :  { %v8414_v21 = vld [vmem:[%s12400_s1 + $0x4cc] ss:$12 sps:$4 sm:$0xff]   ;;  %v8417_v24 = vld [vmem:[%s12400_s1 + $0x334] ss:$12 sps:$4 sm:$0xff]   ;;  %v8415_v29 = vld [vmem:[%s12400_s1 + $0x330] ss:$12 sps:$4 sm:$0xff]  }
  0x1f   :  { %4369 = vmatpush1.bf16.msra.mxu0 %v8329_v30  ;;  %v8420_v25 = vld [vmem:[%s12400_s1 + $0x4b4] ss:$12 sps:$4 sm:$0xff]   ;;  %v8463_v26 = vld [vmem:[%s12401_s0 + $0xcc] ss:$100 sps:$4 sm:$0xff]   ;;  %v8450_v51 = vld [vmem:[%s12400_s1 + $0x5bc] ss:$12 sps:$4 sm:$0xff]  }
  0x20   :  { %4422 = vmatpush1.bf16.msra.mxu1 %v8330_v31  ;;  %4370 = vmatprep.subr.bf16.mxu0 %v8331_v32  ;;  %v8465_v27 = vld [vmem:[%s12401_s0 + $0xc8] ss:$100 sps:$4 sm:$0xff]   ;;  %v8466_v28 = vld [vmem:[%s12401_s0 + $0xd4] ss:$100 sps:$4 sm:$0xff]   ;;  %v8418_v30 = vld [vmem:[%s12400_s1 + $0x4b0] ss:$12 sps:$4 sm:$0xff]  }
  0x21   :  { %4423 = vmatprep.subr.bf16.mxu1 %v8333_v33  ;;  %v8423_v31 = vld [vmem:[%s12400_s1 + $0x31c] ss:$12 sps:$4 sm:$0xff]   ;;  %v8474_v33 = vld [vmem:[%s12401_s0 + $0xd0] ss:$100 sps:$4 sm:$0xff]  }
  0x22   :  { %v8426_v32 = vld [vmem:[%s12400_s1 + $0x49c] ss:$12 sps:$4 sm:$0xff]  }
  0x23   :  { %4371 = vmatpush2.bf16.msra.mxu0 %v8335_v34  ;;  %v8421_v34 = vld [vmem:[%s12400_s1 + $0x318] ss:$12 sps:$4 sm:$0xff]   ;;  %v8442_v49 = vld [vmem:[%s12400_s1 + $0x5d0] ss:$12 sps:$4 sm:$0xff]  }
  0x24   :  { %4424 = vmatpush2.bf16.msra.mxu1 %v8336_v35  ;;  %4372 = vmatprep.subr.bf16.mxu0 %v8337_v36  ;;  %v8424_v35 = vld [vmem:[%s12400_s1 + $0x498] ss:$12 sps:$4 sm:$0xff]  }
  0x25   :  { %4425 = vmatprep.subr.bf16.mxu1 %v8339_v37  ;;  %v8429_v36 = vld [vmem:[%s12400_s1 + $0x304] ss:$12 sps:$4 sm:$0xff]  }
  0x26   :  { %v8432_v37 = vld [vmem:[%s12400_s1 + $0x484] ss:$12 sps:$4 sm:$0xff]  }
  0x27   :  { %4373 = vmatpush2.bf16.msra.mxu0 %v8341_v38  ;;  %v8427_v38 = vld [vmem:[%s12400_s1 + $0x300] ss:$12 sps:$4 sm:$0xff]  }
  0x28   :  { %4426 = vmatpush2.bf16.msra.mxu1 %v8342_v39  ;;  %4374 = vmatprep.subr.bf16.mxu0 %v8343_v40  ;;  %v8430_v39 = vld [vmem:[%s12400_s1 + $0x480] ss:$12 sps:$4 sm:$0xff]  }
  0x29   :  { %4427 = vmatprep.subr.bf16.mxu1 %v8345_v41  ;;  %v8435_v40 = vld [vmem:[%s12400_s1 + $0x46c] ss:$12 sps:$4 sm:$0xff]  }
  0x2a   :  { %v8489_v41 = vld [vmem:[%s12401_s0 + $0x14] ss:$100 sps:$4 sm:$0xff]  }
  0x2b   :  { %4375 = vmatpush2.bf16.msra.mxu0 %v8347_v42  ;;  %v8438_v42 = vld [vmem:[%s12400_s1 + $0x5ec] ss:$12 sps:$4 sm:$0xff]  }
  0x2c   :  { %4428 = vmatpush2.bf16.msra.mxu1 %v8348_v43  ;;  %4376 = vmatprep.subr.bf16.mxu0 %v8349_v44  ;;  %v8492_v43 = vld [vmem:[%s12401_s0 + $0x1c] ss:$100 sps:$4 sm:$0xff]   ;;  %v8433_v44 = vld [vmem:[%s12400_s1 + $0x468] ss:$12 sps:$4 sm:$0xff]  }
  0x2d   :  { %4429 = vmatprep.subr.bf16.mxu1 %v8351_v45  ;;  %v8436_v45 = vld [vmem:[%s12400_s1 + $0x5e8] ss:$12 sps:$4 sm:$0xff]  }
  0x2f   :  { %4377 = vmatpush2.bf16.msra.mxu0 %v8353_v46  ;;  %v8441_v46 = vld [vmem:[%s12400_s1 + $0x454] ss:$12 sps:$4 sm:$0xff]  }
  0x30   :  { %4430 = vmatpush2.bf16.msra.mxu1 %v8354_v47  ;;  %4378 = vmatprep.subr.bf16.mxu0 %v8355_v48  ;;  %v8444_v47 = vld [vmem:[%s12400_s1 + $0x5d4] ss:$12 sps:$4 sm:$0xff]   ;;  %v8439_v48 = vld [vmem:[%s12400_s1 + $0x450] ss:$12 sps:$4 sm:$0xff]  }
  0x31   :  { %4431 = vmatprep.subr.bf16.mxu1 %v8357_v50  ;;  %v8447_v50 = vld [vmem:[%s12400_s1 + $0x43c] ss:$12 sps:$4 sm:$0xff]  }
  0x33   :  { %4379 = vmatpush2.bf16.msra.mxu0 %v8359_v52  ;;  %v8445_v52 = vld [vmem:[%s12400_s1 + $0x438] ss:$12 sps:$4 sm:$0xff]  }
  0x34   :  { %4432 = vmatpush2.bf16.msra.mxu1 %v8360_v53  ;;  %4380 = vmatprep.subr.bf16.mxu0 %v8361_v54  ;;  %v8448_v53 = vld [vmem:[%s12400_s1 + $0x5b8] ss:$12 sps:$4 sm:$0xff]  }
  0x35   :  { %4433 = vmatprep.subr.bf16.mxu1 %v8363_v55  ;;  %v8453_v54 = vld [vmem:[%s12400_s1 + $0x424] ss:$12 sps:$4 sm:$0xff]  }
  0x36   :  { %v8456_v55 = vld [vmem:[%s12400_s1 + $0x5a4] ss:$12 sps:$4 sm:$0xff]  }
  0x37   :  { %4381 = vmatpush2.bf16.msra.mxu0 %v8365_v56  ;;  %v8451_v56 = vld [vmem:[%s12400_s1 + $0x420] ss:$12 sps:$4 sm:$0xff]  }
  0x38   :  { %4434 = vmatpush2.bf16.msra.mxu1 %v8366_v57  ;;  %4382 = vmatprep.subr.bf16.mxu0 %v8367_v58  ;;  %v8454_v57 = vld [vmem:[%s12400_s1 + $0x5a0] ss:$12 sps:$4 sm:$0xff]  }
  0x39   :  { %4435 = vmatprep.subr.bf16.mxu1 %v8369_v59  ;;  %v8459_v58 = vld [vmem:[%s12400_s1 + $0x40c] ss:$12 sps:$4 sm:$0xff]  }
  0x3a   :  { %v8462_v59 = vld [vmem:[%s12400_s1 + $0x58c] ss:$12 sps:$4 sm:$0xff]  }
  0x3b   :  { %4383 = vmatpush2.bf16.msra.mxu0 %v8371_v60  ;;  %v8457_v60 = vld [vmem:[%s12400_s1 + $0x408] ss:$12 sps:$4 sm:$0xff]  }
  0x3c   :  { %4436 = vmatpush2.bf16.msra.mxu1 %v8372_v61  ;;  %4384 = vmatprep.subr.bf16.mxu0 %v8373_v62  ;;  %v8460_v61 = vld [vmem:[%s12400_s1 + $0x588] ss:$12 sps:$4 sm:$0xff]  }
  0x3d   :  { %4437 = vmatprep.subr.bf16.mxu1 %v8375_v63  ;;  %v8470_v62 = vld [vmem:[%s12400_s1 + $0x3f4] ss:$12 sps:$4 sm:$0xff]  }
  0x3e   :  { %v8473_v63 = vld [vmem:[%s12400_s1 + $0x574] ss:$12 sps:$4 sm:$0xff]  }
  0x3f   :  { %4385 = vmatpush2.bf16.msra.mxu0 %v8377_v0  ;;  %v8468_v0 = vld [vmem:[%s12400_s1 + $0x3f0] ss:$12 sps:$4 sm:$0xff]  }
  0x40   :  { %4438 = vmatpush2.bf16.msra.mxu1 %v8378_v1  ;;  %4460 = vmatprep.subr.bf16.mxu0 %v8387_v2  ;;  %v8471_v1 = vld [vmem:[%s12400_s1 + $0x570] ss:$12 sps:$4 sm:$0xff]  }
  0x41   :  { %4513 = vmatprep.subr.bf16.mxu1 %v8390_v3  ;;  %v8477_v2 = vld [vmem:[%s12400_s1 + $0x3dc] ss:$12 sps:$4 sm:$0xff]  }
  0x42   :  { %4387 = vmatmul.mubr.bf16.vlgmr.msra.gmra.mxu0 %v8379_v4  ;;  %v8480_v3 = vld [vmem:[%s12400_s1 + $0x55c] ss:$12 sps:$4 sm:$0xff]   ;;  %v8475_v4 = vld [vmem:[%s12400_s1 + $0x3d8] ss:$12 sps:$4 sm:$0xff]  }
  0x43   :  { %4440 = vmatmul.mubr.bf16.vlgmr.msra.gmra.mxu1 %v8382_v5  ;;  %4461 = vmatpush1.bf16.msra.mxu0 %v8385_v6  ;;  %v8478_v5 = vld [vmem:[%s12400_s1 + $0x558] ss:$12 sps:$4 sm:$0xff]  }
  0x44   :  { %4514 = vmatpush1.bf16.msra.mxu1 %v8388_v7  ;;  %4462 = vmatprep.subr.bf16.mxu0 %v8393_v8  ;;  %v8483_v6 = vld [vmem:[%s12400_s1 + $0x3c4] ss:$12 sps:$4 sm:$0xff]   ;;  %v8481_v8 = vld [vmem:[%s12400_s1 + $0x3c0] ss:$12 sps:$4 sm:$0xff]  }
  0x45   :  { %4515 = vmatprep.subr.bf16.mxu1 %v8396_v9  ;;  %4396 = vmatprep.mubr.bf16.mxu0 %v8463_v26  ;;  %v8486_v7 = vld [vmem:[%s12400_s1 + $0x544] ss:$12 sps:$4 sm:$0xff]   ;;  %v8484_v9 = vld [vmem:[%s12400_s1 + $0x540] ss:$12 sps:$4 sm:$0xff]  }
  0x46   :  { %4449 = vmatprep.mubr.bf16.mxu1 %v8466_v28  ;;  %v8511_v26 = vld [vmem:[%s12400_s1 + $0x7f8] ss:$12 sps:$4 sm:$0xff]  }
  0x47   :  { %4463 = vmatpush1.bf16.msra.mxu0 %v8391_v10  ;;  %v8495_v10 = vld [vmem:[%s12400_s1 + $0x6ac] ss:$12 sps:$4 sm:$0xff]   ;;  %v8519_v28 = vld [vmem:[%s12400_s1 + $0x664] ss:$12 sps:$4 sm:$0xff]  }
  0x48   :  { %4516 = vmatpush1.bf16.msra.mxu1 %v8394_v11  ;;  %4464 = vmatprep.subr.bf16.mxu0 %v8399_v12  ;;  %v8498_v11 = vld [vmem:[%s12400_s1 + $0x82c] ss:$12 sps:$4 sm:$0xff]   ;;  %v8487_v12 = vld [vmem:[%s12401_s0 + $0x10] ss:$100 sps:$4 sm:$0xff]  }
  0x49   :  { %4517 = vmatprep.subr.bf16.mxu1 %v8402_v13  ;;  %v8490_v13 = vld [vmem:[%s12401_s0 + $0x18] ss:$100 sps:$4 sm:$0xff]  }
  0x4a   :  { %4397 = vmatmul.mubr.bf16.gmra.mxu0 %v8465_v27  ;;  %v8516_v27 = vld [vmem:[%s12401_s0 + $0xe0] ss:$100 sps:$4 sm:$0xff]  }
  0x4b   :  { %4465 = vmatpush1.bf16.msra.mxu0 %v8397_v14  ;;  %4450 = vmatmul.mubr.bf16.gmra.mxu1 %v8474_v33  ;;  %v8493_v14 = vld [vmem:[%s12400_s1 + $0x6a8] ss:$12 sps:$4 sm:$0xff]  }
  0x4c   :  { %4518 = vmatpush1.bf16.msra.mxu1 %v8400_v15  ;;  %4466 = vmatprep.subr.bf16.mxu0 %v8405_v16  ;;  %v8496_v15 = vld [vmem:[%s12400_s1 + $0x828] ss:$12 sps:$4 sm:$0xff]  }
  0x4d   :  { %4519 = vmatprep.subr.bf16.mxu1 %v8408_v17  ;;  %4492 = vmatprep.mubr.bf16.mxu0 %v8489_v41  ;;  %v8501_v16 = vld [vmem:[%s12400_s1 + $0x694] ss:$12 sps:$4 sm:$0xff]   ;;  %v8597_v33 = vld [vmem:[%s12401_s0 + $0x24] ss:$100 sps:$4 sm:$0xff]   ;;  %v8532_v41 = vld [vmem:[%s12400_s1 + $0x7b0] ss:$12 sps:$4 sm:$0xff]  }
  0x4e   :  { %4545 = vmatprep.mubr.bf16.mxu1 %v8492_v43  ;;  %v8504_v17 = vld [vmem:[%s12400_s1 + $0x814] ss:$12 sps:$4 sm:$0xff]   ;;  %v8540_v43 = vld [vmem:[%s12400_s1 + $0x79c] ss:$12 sps:$4 sm:$0xff]  }
  0x4f   :  { %4467 = vmatpush1.bf16.msra.mxu0 %v8403_v18  ;;  %v8505_v18 = vld [vmem:[%s12401_s0 + $0xdc] ss:$100 sps:$4 sm:$0xff]  }
  0x50   :  { %4520 = vmatpush1.bf16.msra.mxu1 %v8406_v19  ;;  %4468 = vmatprep.subr.bf16.mxu0 %v8411_v20  ;;  %v8514_v19 = vld [vmem:[%s12401_s0 + $0xe4] ss:$100 sps:$4 sm:$0xff]   ;;  %v8499_v20 = vld [vmem:[%s12400_s1 + $0x690] ss:$12 sps:$4 sm:$0xff]  }
  0x51   :  { %4521 = vmatprep.subr.bf16.mxu1 %v8414_v21  ;;  %v8502_v21 = vld [vmem:[%s12400_s1 + $0x810] ss:$12 sps:$4 sm:$0xff]  }
  0x53   :  { %4469 = vmatpush1.bf16.msra.mxu0 %v8409_v22  ;;  %v8510_v22 = vld [vmem:[%s12400_s1 + $0x67c] ss:$12 sps:$4 sm:$0xff]  }
  0x54   :  { %4522 = vmatpush1.bf16.msra.mxu1 %v8412_v23  ;;  %4470 = vmatprep.subr.bf16.mxu0 %v8417_v24  ;;  %v8513_v23 = vld [vmem:[%s12400_s1 + $0x7fc] ss:$12 sps:$4 sm:$0xff]  }
  0x55   :  { %4523 = vmatprep.subr.bf16.mxu1 %v8420_v25  ;;  %v8507_v24 = vld [vmem:[%s12401_s0 + $0xd8] ss:$100 sps:$4 sm:$0xff]  }
  0x56   :  { %v8508_v25 = vld [vmem:[%s12400_s1 + $0x678] ss:$12 sps:$4 sm:$0xff]  }
  0x57   :  { %4471 = vmatpush1.bf16.msra.mxu0 %v8415_v29  ;;  %v8522_v29 = vld [vmem:[%s12400_s1 + $0x7e4] ss:$12 sps:$4 sm:$0xff]  }
  0x58   :  { %4524 = vmatpush1.bf16.msra.mxu1 %v8418_v30  ;;  %4472 = vmatprep.subr.bf16.mxu0 %v8423_v31  ;;  %v8517_v30 = vld [vmem:[%s12400_s1 + $0x660] ss:$12 sps:$4 sm:$0xff]  }
  0x59   :  { %4525 = vmatprep.subr.bf16.mxu1 %v8426_v32  ;;  %v8520_v31 = vld [vmem:[%s12400_s1 + $0x7e0] ss:$12 sps:$4 sm:$0xff]  }
  0x5a   :  { %v8525_v32 = vld [vmem:[%s12400_s1 + $0x64c] ss:$12 sps:$4 sm:$0xff]  }
  0x5b   :  { %4473 = vmatpush1.bf16.msra.mxu0 %v8421_v34  ;;  %v8528_v34 = vld [vmem:[%s12400_s1 + $0x7cc] ss:$12 sps:$4 sm:$0xff]  }
  0x5c   :  { %4526 = vmatpush1.bf16.msra.mxu1 %v8424_v35  ;;  %4474 = vmatprep.subr.bf16.mxu0 %v8429_v36  ;;  %v8600_v35 = vld [vmem:[%s12401_s0 + $0x2c] ss:$100 sps:$4 sm:$0xff]   ;;  %v8523_v36 = vld [vmem:[%s12400_s1 + $0x648] ss:$12 sps:$4 sm:$0xff]  }
  0x5d   :  { %4527 = vmatprep.subr.bf16.mxu1 %v8432_v37  ;;  %v8526_v37 = vld [vmem:[%s12400_s1 + $0x7c8] ss:$12 sps:$4 sm:$0xff]  }
  0x5f   :  { %4475 = vmatpush1.bf16.msra.mxu0 %v8427_v38  ;;  %v8531_v38 = vld [vmem:[%s12400_s1 + $0x634] ss:$12 sps:$4 sm:$0xff]  }
  0x60   :  { %4528 = vmatpush1.bf16.msra.mxu1 %v8430_v39  ;;  %4476 = vmatprep.subr.bf16.mxu0 %v8435_v40  ;;  %v8534_v39 = vld [vmem:[%s12400_s1 + $0x7b4] ss:$12 sps:$4 sm:$0xff]   ;;  %v8529_v40 = vld [vmem:[%s12400_s1 + $0x630] ss:$12 sps:$4 sm:$0xff]  }
  0x61   :  { %4529 = vmatprep.subr.bf16.mxu1 %v8438_v42  ;;  %v8537_v42 = vld [vmem:[%s12400_s1 + $0x61c] ss:$12 sps:$4 sm:$0xff]  }
  0x63   :  { %4477 = vmatpush2.bf16.msra.mxu0 %v8433_v44  ;;  %v8535_v44 = vld [vmem:[%s12400_s1 + $0x618] ss:$12 sps:$4 sm:$0xff]  }
  0x64   :  { %4530 = vmatpush2.bf16.msra.mxu1 %v8436_v45  ;;  %4478 = vmatprep.subr.bf16.mxu0 %v8441_v46  ;;  %v8538_v45 = vld [vmem:[%s12400_s1 + $0x798] ss:$12 sps:$4 sm:$0xff]  }
  0x65   :  { %4531 = vmatprep.subr.bf16.mxu1 %v8444_v47  ;;  %v8543_v46 = vld [vmem:[%s12400_s1 + $0x604] ss:$12 sps:$4 sm:$0xff]  }
  0x66   :  { %v8546_v47 = vld [vmem:[%s12400_s1 + $0x784] ss:$12 sps:$4 sm:$0xff]  }
  0x67   :  { %4479 = vmatpush2.bf16.msra.mxu0 %v8439_v48  ;;  %v8541_v48 = vld [vmem:[%s12400_s1 + $0x600] ss:$12 sps:$4 sm:$0xff]  }
  0x68   :  { %4532 = vmatpush2.bf16.msra.mxu1 %v8442_v49  ;;  %4480 = vmatprep.subr.bf16.mxu0 %v8447_v50  ;;  %v8544_v49 = vld [vmem:[%s12400_s1 + $0x780] ss:$12 sps:$4 sm:$0xff]  }
  0x69   :  { %4533 = vmatprep.subr.bf16.mxu1 %v8450_v51  ;;  %v8549_v50 = vld [vmem:[%s12400_s1 + $0x76c] ss:$12 sps:$4 sm:$0xff]  }
  0x6a   :  { %v8552_v51 = vld [vmem:[%s12400_s1 + $0x8ec] ss:$12 sps:$4 sm:$0xff]  }
  0x6b   :  { %4481 = vmatpush2.bf16.msra.mxu0 %v8445_v52  ;;  %v8547_v52 = vld [vmem:[%s12400_s1 + $0x768] ss:$12 sps:$4 sm:$0xff]  }
  0x6c   :  { %4534 = vmatpush2.bf16.msra.mxu1 %v8448_v53  ;;  %4482 = vmatprep.subr.bf16.mxu0 %v8453_v54  ;;  %v8550_v53 = vld [vmem:[%s12400_s1 + $0x8e8] ss:$12 sps:$4 sm:$0xff]  }
  0x6d   :  { %4535 = vmatprep.subr.bf16.mxu1 %v8456_v55  ;;  %v8555_v54 = vld [vmem:[%s12400_s1 + $0x754] ss:$12 sps:$4 sm:$0xff]  }
  0x6e   :  { %v8558_v55 = vld [vmem:[%s12400_s1 + $0x8d4] ss:$12 sps:$4 sm:$0xff]  }
  0x6f   :  { %4483 = vmatpush2.bf16.msra.mxu0 %v8451_v56  ;;  %v8553_v56 = vld [vmem:[%s12400_s1 + $0x750] ss:$12 sps:$4 sm:$0xff]  }
  0x70   :  { %4536 = vmatpush2.bf16.msra.mxu1 %v8454_v57  ;;  %4484 = vmatprep.subr.bf16.mxu0 %v8459_v58  ;;  %v8556_v57 = vld [vmem:[%s12400_s1 + $0x8d0] ss:$12 sps:$4 sm:$0xff]  }
  0x71   :  { %4537 = vmatprep.subr.bf16.mxu1 %v8462_v59  ;;  %v8561_v58 = vld [vmem:[%s12400_s1 + $0x73c] ss:$12 sps:$4 sm:$0xff]  }
  0x72   :  { %v8564_v59 = vld [vmem:[%s12400_s1 + $0x8bc] ss:$12 sps:$4 sm:$0xff]  }
  0x73   :  { %4485 = vmatpush2.bf16.msra.mxu0 %v8457_v60  ;;  %v8559_v60 = vld [vmem:[%s12400_s1 + $0x738] ss:$12 sps:$4 sm:$0xff]  }
  0x74   :  { %4538 = vmatpush2.bf16.msra.mxu1 %v8460_v61  ;;  %4486 = vmatprep.subr.bf16.mxu0 %v8470_v62  ;;  %v8562_v61 = vld [vmem:[%s12400_s1 + $0x8b8] ss:$12 sps:$4 sm:$0xff]  }
  0x75   :  { %4539 = vmatprep.subr.bf16.mxu1 %v8473_v63  ;;  %v8567_v62 = vld [vmem:[%s12400_s1 + $0x724] ss:$12 sps:$4 sm:$0xff]  }
  0x76   :  { %v8570_v63 = vld [vmem:[%s12400_s1 + $0x8a4] ss:$12 sps:$4 sm:$0xff]  }
  0x77   :  { %4487 = vmatpush2.bf16.msra.mxu0 %v8468_v0  ;;  %v8565_v0 = vld [vmem:[%s12400_s1 + $0x720] ss:$12 sps:$4 sm:$0xff]  }
  0x78   :  { %4540 = vmatpush2.bf16.msra.mxu1 %v8471_v1  ;;  %4488 = vmatprep.subr.bf16.mxu0 %v8477_v2  ;;  %v8568_v1 = vld [vmem:[%s12400_s1 + $0x8a0] ss:$12 sps:$4 sm:$0xff]  }
  0x79   :  { %4541 = vmatprep.subr.bf16.mxu1 %v8480_v3  ;;  %v8573_v2 = vld [vmem:[%s12400_s1 + $0x70c] ss:$12 sps:$4 sm:$0xff]  }
  0x7a   :  { %v8576_v3 = vld [vmem:[%s12400_s1 + $0x88c] ss:$12 sps:$4 sm:$0xff]  }
  0x7b   :  { %4489 = vmatpush2.bf16.msra.mxu0 %v8475_v4  ;;  %v8571_v4 = vld [vmem:[%s12400_s1 + $0x708] ss:$12 sps:$4 sm:$0xff]  }
  0x7c   :  { %4542 = vmatpush2.bf16.msra.mxu1 %v8478_v5  ;;  %4490 = vmatprep.subr.bf16.mxu0 %v8483_v6  ;;  %v8574_v5 = vld [vmem:[%s12400_s1 + $0x888] ss:$12 sps:$4 sm:$0xff]  }
  0x7d   :  { %4543 = vmatprep.subr.bf16.mxu1 %v8486_v7  ;;  %v8579_v6 = vld [vmem:[%s12400_s1 + $0x6f4] ss:$12 sps:$4 sm:$0xff]  }
  0x7e   :  { %v8582_v7 = vld [vmem:[%s12400_s1 + $0x874] ss:$12 sps:$4 sm:$0xff]  }
  0x7f   :  { %4491 = vmatpush2.bf16.msra.mxu0 %v8481_v8  ;;  %v8577_v8 = vld [vmem:[%s12400_s1 + $0x6f0] ss:$12 sps:$4 sm:$0xff]  }
  0x80   :  { %4544 = vmatpush2.bf16.msra.mxu1 %v8484_v9  ;;  %4566 = vmatprep.subr.bf16.mxu0 %v8495_v10  ;;  %v8580_v9 = vld [vmem:[%s12400_s1 + $0x870] ss:$12 sps:$4 sm:$0xff]  }
  0x81   :  { %4619 = vmatprep.subr.bf16.mxu1 %v8498_v11  ;;  %v8585_v10 = vld [vmem:[%s12400_s1 + $0x6dc] ss:$12 sps:$4 sm:$0xff]  }
  0x82   :  { %4493 = vmatmul.mubr.bf16.vlgmr.msra.gmra.mxu0 %v8487_v12  ;;  %v8588_v11 = vld [vmem:[%s12400_s1 + $0x85c] ss:$12 sps:$4 sm:$0xff]   ;;  %v8583_v12 = vld [vmem:[%s12400_s1 + $0x6d8] ss:$12 sps:$4 sm:$0xff]  }
  0x83   :  { %4546 = vmatmul.mubr.bf16.vlgmr.msra.gmra.mxu1 %v8490_v13  ;;  %4567 = vmatpush1.bf16.msra.mxu0 %v8493_v14  ;;  %v8586_v13 = vld [vmem:[%s12400_s1 + $0x858] ss:$12 sps:$4 sm:$0xff]  }
  0x84   :  { %4620 = vmatpush1.bf16.msra.mxu1 %v8496_v15  ;;  %4568 = vmatprep.subr.bf16.mxu0 %v8501_v16  ;;  %v8591_v14 = vld [vmem:[%s12400_s1 + $0x6c4] ss:$12 sps:$4 sm:$0xff]   ;;  %v8589_v16 = vld [vmem:[%s12400_s1 + $0x6c0] ss:$12 sps:$4 sm:$0xff]  }
  0x85   :  { %4621 = vmatprep.subr.bf16.mxu1 %v8504_v17  ;;  %4502 = vmatprep.mubr.bf16.mxu0 %v8505_v18  ;;  %v8594_v15 = vld [vmem:[%s12400_s1 + $0x844] ss:$12 sps:$4 sm:$0xff]   ;;  %v8592_v17 = vld [vmem:[%s12400_s1 + $0x840] ss:$12 sps:$4 sm:$0xff]  }
  0x86   :  { %4555 = vmatprep.mubr.bf16.mxu1 %v8514_v19  ;;  %v8603_v18 = vld [vmem:[%s12400_s1 + $0x9ac] ss:$12 sps:$4 sm:$0xff]  }
  0x87   :  { %4569 = vmatpush1.bf16.msra.mxu0 %v8499_v20  ;;  %v8606_v19 = vld [vmem:[%s12400_s1 + $0xb2c] ss:$12 sps:$4 sm:$0xff]   ;;  %v8595_v20 = vld [vmem:[%s12401_s0 + $0x20] ss:$100 sps:$4 sm:$0xff]  }
  0x88   :  { %4622 = vmatpush1.bf16.msra.mxu1 %v8502_v21  ;;  %4570 = vmatprep.subr.bf16.mxu0 %v8510_v22  ;;  %v8598_v21 = vld [vmem:[%s12401_s0 + $0x28] ss:$100 sps:$4 sm:$0xff]  }
  0x89   :  { %4623 = vmatprep.subr.bf16.mxu1 %v8513_v23  ;;  %v8601_v22 = vld [vmem:[%s12400_s1 + $0x9a8] ss:$12 sps:$4 sm:$0xff]  }
  0x8a   :  { %4503 = vmatmul.mubr.bf16.gmra.mxu0 %v8507_v24  ;;  %v8604_v23 = vld [vmem:[%s12400_s1 + $0xb28] ss:$12 sps:$4 sm:$0xff]  }
  0x8b   :  { %4556 = vmatmul.mubr.bf16.gmra.mxu1 %v8516_v27  ;;  %4571 = vmatpush1.bf16.msra.mxu0 %v8508_v25  ;;  %v8609_v24 = vld [vmem:[%s12400_s1 + $0x994] ss:$12 sps:$4 sm:$0xff]  }
  0x8c   :  { %4624 = vmatpush1.bf16.msra.mxu1 %v8511_v26  ;;  %4572 = vmatprep.subr.bf16.mxu0 %v8519_v28  ;;  %v8612_v25 = vld [vmem:[%s12400_s1 + $0xb14] ss:$12 sps:$4 sm:$0xff]   ;;  %v8613_v26 = vld [vmem:[%s12401_s0 + $0xec] ss:$100 sps:$4 sm:$0xff]  }
  0x8d   :  { %4625 = vmatprep.subr.bf16.mxu1 %v8522_v29  ;;  %4598 = vmatprep.mubr.bf16.mxu0 %v8597_v33  ;;  %v8622_v27 = vld [vmem:[%s12401_s0 + $0xf4] ss:$100 sps:$4 sm:$0xff]   ;;  %v8607_v28 = vld [vmem:[%s12400_s1 + $0x990] ss:$12 sps:$4 sm:$0xff]  }
  0x8e   :  { %4651 = vmatprep.mubr.bf16.mxu1 %v8600_v35  ;;  %v8610_v29 = vld [vmem:[%s12400_s1 + $0xb10] ss:$12 sps:$4 sm:$0xff]   ;;  %v8616_v33 = vld [vmem:[%s12400_s1 + $0x978] ss:$12 sps:$4 sm:$0xff]  }
  0x8f   :  { %4573 = vmatpush1.bf16.msra.mxu0 %v8517_v30  ;;  %v8618_v30 = vld [vmem:[%s12400_s1 + $0x97c] ss:$12 sps:$4 sm:$0xff]   ;;  %v8619_v35 = vld [vmem:[%s12400_s1 + $0xaf8] ss:$12 sps:$4 sm:$0xff]  }
  0x90   :  { %4626 = vmatpush1.bf16.msra.mxu1 %v8520_v31  ;;  %4574 = vmatprep.subr.bf16.mxu0 %v8525_v32  ;;  %v8621_v31 = vld [vmem:[%s12400_s1 + $0xafc] ss:$12 sps:$4 sm:$0xff]  }
  0x91   :  { %4627 = vmatprep.subr.bf16.mxu1 %v8528_v34  ;;  %v8615_v32 = vld [vmem:[%s12401_s0 + $0xe8] ss:$100 sps:$4 sm:$0xff]   ;;  %v8624_v34 = vld [vmem:[%s12401_s0 + $0xf0] ss:$100 sps:$4 sm:$0xff]  }
  0x93   :  { %4575 = vmatpush1.bf16.msra.mxu0 %v8523_v36  ;;  %v8627_v36 = vld [vmem:[%s12400_s1 + $0x964] ss:$12 sps:$4 sm:$0xff]  }
  0x94   :  { %4628 = vmatpush1.bf16.msra.mxu1 %v8526_v37  ;;  %4576 = vmatprep.subr.bf16.mxu0 %v8531_v38  ;;  %v8630_v37 = vld [vmem:[%s12400_s1 + $0xae4] ss:$12 sps:$4 sm:$0xff]   ;;  %v8705_v38 = vld [vmem:[%s12401_s0 + $0x34] ss:$100 sps:$4 sm:$0xff]  }
  0x95   :  { %4629 = vmatprep.subr.bf16.mxu1 %v8534_v39  ;;  %v8708_v39 = vld [vmem:[%s12401_s0 + $0x3c] ss:$100 sps:$4 sm:$0xff]  }
  0x97   :  { %4577 = vmatpush1.bf16.msra.mxu0 %v8529_v40  ;;  %v8625_v40 = vld [vmem:[%s12400_s1 + $0x960] ss:$12 sps:$4 sm:$0xff]  }
  0x98   :  { %4630 = vmatpush1.bf16.msra.mxu1 %v8532_v41  ;;  %4578 = vmatprep.subr.bf16.mxu0 %v8537_v42  ;;  %v8628_v41 = vld [vmem:[%s12400_s1 + $0xae0] ss:$12 sps:$4 sm:$0xff]  }
  0x99   :  { %4631 = vmatprep.subr.bf16.mxu1 %v8540_v43  ;;  %v8633_v42 = vld [vmem:[%s12400_s1 + $0x94c] ss:$12 sps:$4 sm:$0xff]  }
  0x9a   :  { %v8636_v43 = vld [vmem:[%s12400_s1 + $0xacc] ss:$12 sps:$4 sm:$0xff]  }
  0x9b   :  { %4579 = vmatpush1.bf16.msra.mxu0 %v8535_v44  ;;  %v8631_v44 = vld [vmem:[%s12400_s1 + $0x948] ss:$12 sps:$4 sm:$0xff]  }
  0x9c   :  { %4632 = vmatpush1.bf16.msra.mxu1 %v8538_v45  ;;  %4580 = vmatprep.subr.bf16.mxu0 %v8543_v46  ;;  %v8634_v45 = vld [vmem:[%s12400_s1 + $0xac8] ss:$12 sps:$4 sm:$0xff]  }
  0x9d   :  { %4633 = vmatprep.subr.bf16.mxu1 %v8546_v47  ;;  %v8639_v46 = vld [vmem:[%s12400_s1 + $0x934] ss:$12 sps:$4 sm:$0xff]  }
  0x9e   :  { %v8642_v47 = vld [vmem:[%s12400_s1 + $0xab4] ss:$12 sps:$4 sm:$0xff]  }
  0x9f   :  { %4581 = vmatpush1.bf16.msra.mxu0 %v8541_v48  ;;  %v8637_v48 = vld [vmem:[%s12400_s1 + $0x930] ss:$12 sps:$4 sm:$0xff]  }
  0xa0   :  { %4634 = vmatpush1.bf16.msra.mxu1 %v8544_v49  ;;  %4582 = vmatprep.subr.bf16.mxu0 %v8549_v50  ;;  %v8640_v49 = vld [vmem:[%s12400_s1 + $0xab0] ss:$12 sps:$4 sm:$0xff]  }
  0xa1   :  { %4635 = vmatprep.subr.bf16.mxu1 %v8552_v51  ;;  %v8645_v50 = vld [vmem:[%s12400_s1 + $0x91c] ss:$12 sps:$4 sm:$0xff]  }
  0xa2   :  { %v8648_v51 = vld [vmem:[%s12400_s1 + $0xa9c] ss:$12 sps:$4 sm:$0xff]  }
  0xa3   :  { %4583 = vmatpush2.bf16.msra.mxu0 %v8547_v52  ;;  %v8643_v52 = vld [vmem:[%s12400_s1 + $0x918] ss:$12 sps:$4 sm:$0xff]  }
  0xa4   :  { %4636 = vmatpush2.bf16.msra.mxu1 %v8550_v53  ;;  %4584 = vmatprep.subr.bf16.mxu0 %v8555_v54  ;;  %v8646_v53 = vld [vmem:[%s12400_s1 + $0xa98] ss:$12 sps:$4 sm:$0xff]  }
  0xa5   :  { %4637 = vmatprep.subr.bf16.mxu1 %v8558_v55  ;;  %v8651_v54 = vld [vmem:[%s12400_s1 + $0x904] ss:$12 sps:$4 sm:$0xff]  }
  0xa6   :  { %v8654_v55 = vld [vmem:[%s12400_s1 + $0xa84] ss:$12 sps:$4 sm:$0xff]  }
  0xa7   :  { %4585 = vmatpush2.bf16.msra.mxu0 %v8553_v56  ;;  %v8649_v56 = vld [vmem:[%s12400_s1 + $0x900] ss:$12 sps:$4 sm:$0xff]  }
  0xa8   :  { %4638 = vmatpush2.bf16.msra.mxu1 %v8556_v57  ;;  %4586 = vmatprep.subr.bf16.mxu0 %v8561_v58  ;;  %v8652_v57 = vld [vmem:[%s12400_s1 + $0xa80] ss:$12 sps:$4 sm:$0xff]  }
  0xa9   :  { %4639 = vmatprep.subr.bf16.mxu1 %v8564_v59  ;;  %v8657_v58 = vld [vmem:[%s12400_s1 + $0xa6c] ss:$12 sps:$4 sm:$0xff]  }
  0xaa   :  { %v8660_v59 = vld [vmem:[%s12400_s1 + $0xbec] ss:$12 sps:$4 sm:$0xff]  }
  0xab   :  { %4587 = vmatpush2.bf16.msra.mxu0 %v8559_v60  ;;  %v8655_v60 = vld [vmem:[%s12400_s1 + $0xa68] ss:$12 sps:$4 sm:$0xff]  }
  0xac   :  { %4640 = vmatpush2.bf16.msra.mxu1 %v8562_v61  ;;  %4588 = vmatprep.subr.bf16.mxu0 %v8567_v62  ;;  %v8658_v61 = vld [vmem:[%s12400_s1 + $0xbe8] ss:$12 sps:$4 sm:$0xff]  }
  0xad   :  { %4641 = vmatprep.subr.bf16.mxu1 %v8570_v63  ;;  %v8663_v62 = vld [vmem:[%s12400_s1 + $0xa54] ss:$12 sps:$4 sm:$0xff]  }
  0xae   :  { %v8666_v63 = vld [vmem:[%s12400_s1 + $0xbd4] ss:$12 sps:$4 sm:$0xff]  }
  0xaf   :  { %4589 = vmatpush2.bf16.msra.mxu0 %v8565_v0  ;;  %v8661_v0 = vld [vmem:[%s12400_s1 + $0xa50] ss:$12 sps:$4 sm:$0xff]  }
  0xb0   :  { %4642 = vmatpush2.bf16.msra.mxu1 %v8568_v1  ;;  %4590 = vmatprep.subr.bf16.mxu0 %v8573_v2  ;;  %v8664_v1 = vld [vmem:[%s12400_s1 + $0xbd0] ss:$12 sps:$4 sm:$0xff]  }
  0xb1   :  { %4643 = vmatprep.subr.bf16.mxu1 %v8576_v3  ;;  %v8669_v2 = vld [vmem:[%s12400_s1 + $0xa3c] ss:$12 sps:$4 sm:$0xff]  }
  0xb2   :  { %v8672_v3 = vld [vmem:[%s12400_s1 + $0xbbc] ss:$12 sps:$4 sm:$0xff]  }
  0xb3   :  { %4591 = vmatpush2.bf16.msra.mxu0 %v8571_v4  ;;  %v8667_v4 = vld [vmem:[%s12400_s1 + $0xa38] ss:$12 sps:$4 sm:$0xff]  }
  0xb4   :  { %4644 = vmatpush2.bf16.msra.mxu1 %v8574_v5  ;;  %4592 = vmatprep.subr.bf16.mxu0 %v8579_v6  ;;  %v8670_v5 = vld [vmem:[%s12400_s1 + $0xbb8] ss:$12 sps:$4 sm:$0xff]  }
  0xb5   :  { %4645 = vmatprep.subr.bf16.mxu1 %v8582_v7  ;;  %v8675_v6 = vld [vmem:[%s12400_s1 + $0xa24] ss:$12 sps:$4 sm:$0xff]  }
  0xb6   :  { %v8678_v7 = vld [vmem:[%s12400_s1 + $0xba4] ss:$12 sps:$4 sm:$0xff]  }
  0xb7   :  { %4593 = vmatpush2.bf16.msra.mxu0 %v8577_v8  ;;  %v8673_v8 = vld [vmem:[%s12400_s1 + $0xa20] ss:$12 sps:$4 sm:$0xff]  }
  0xb8   :  { %4646 = vmatpush2.bf16.msra.mxu1 %v8580_v9  ;;  %4594 = vmatprep.subr.bf16.mxu0 %v8585_v10  ;;  %v8676_v9 = vld [vmem:[%s12400_s1 + $0xba0] ss:$12 sps:$4 sm:$0xff]  }
  0xb9   :  { %4647 = vmatprep.subr.bf16.mxu1 %v8588_v11  ;;  %v8681_v10 = vld [vmem:[%s12400_s1 + $0xa0c] ss:$12 sps:$4 sm:$0xff]  }
  0xba   :  { %v8684_v11 = vld [vmem:[%s12400_s1 + $0xb8c] ss:$12 sps:$4 sm:$0xff]  }
  0xbb   :  { %4595 = vmatpush2.bf16.msra.mxu0 %v8583_v12  ;;  %v8679_v12 = vld [vmem:[%s12400_s1 + $0xa08] ss:$12 sps:$4 sm:$0xff]  }
  0xbc   :  { %4648 = vmatpush2.bf16.msra.mxu1 %v8586_v13  ;;  %4596 = vmatprep.subr.bf16.mxu0 %v8591_v14  ;;  %v8682_v13 = vld [vmem:[%s12400_s1 + $0xb88] ss:$12 sps:$4 sm:$0xff]  }
  0xbd   :  { %4649 = vmatprep.subr.bf16.mxu1 %v8594_v15  ;;  %v8687_v14 = vld [vmem:[%s12400_s1 + $0x9f4] ss:$12 sps:$4 sm:$0xff]  }
  0xbe   :  { %v8690_v15 = vld [vmem:[%s12400_s1 + $0xb74] ss:$12 sps:$4 sm:$0xff]  }
  0xbf   :  { %4597 = vmatpush2.bf16.msra.mxu0 %v8589_v16  ;;  %v8685_v16 = vld [vmem:[%s12400_s1 + $0x9f0] ss:$12 sps:$4 sm:$0xff]  }
  0xc0   :  { %4650 = vmatpush2.bf16.msra.mxu1 %v8592_v17  ;;  %4672 = vmatprep.subr.bf16.mxu0 %v8603_v18  ;;  %v8688_v17 = vld [vmem:[%s12400_s1 + $0xb70] ss:$12 sps:$4 sm:$0xff]   ;;  %v887_v18 = vlaneseq }
  0xc1   :  { %4725 = vmatprep.subr.bf16.mxu1 %v8606_v19  ;;  %v8693_v19 = vld [vmem:[%s12400_s1 + $0x9dc] ss:$12 sps:$4 sm:$0xff]  }
  0xc2   :  { %4599 = vmatmul.mubr.bf16.vlgmr.msra.gmra.mxu0 %v8595_v20  ;;  %v8696_v20 = vld [vmem:[%s12400_s1 + $0xb5c] ss:$12 sps:$4 sm:$0xff]  }
  0xc3   :  { %4652 = vmatmul.mubr.bf16.vlgmr.msra.gmra.mxu1 %v8598_v21  ;;  %4673 = vmatpush1.bf16.msra.mxu0 %v8601_v22  ;;  %v8691_v21 = vld [vmem:[%s12400_s1 + $0x9d8] ss:$12 sps:$4 sm:$0xff]  }
  0xc4   :  { %4726 = vmatpush1.bf16.msra.mxu1 %v8604_v23  ;;  %4674 = vmatprep.subr.bf16.mxu0 %v8609_v24  ;;  %v8694_v22 = vld [vmem:[%s12400_s1 + $0xb58] ss:$12 sps:$4 sm:$0xff]   ;;  %v10277_v23 = vshrl.u32 %v887_v18, 7  ;;  %v8756_v18 = vld [vmem:[%s12400_s1 + $0xd9c] ss:$12 sps:$4 sm:$0xff]  }
  0xc5   :  { %4727 = vmatprep.subr.bf16.mxu1 %v8612_v25  ;;  %4608 = vmatprep.mubr.bf16.mxu0 %v8613_v26  ;;  %v8699_v24 = vld [vmem:[%s12400_s1 + $0x9c4] ss:$12 sps:$4 sm:$0xff]   ;;  %v8697_v26 = vld [vmem:[%s12400_s1 + $0x9c0] ss:$12 sps:$4 sm:$0xff]  }
  0xc6   :  { %4661 = vmatprep.mubr.bf16.mxu1 %v8622_v27  ;;  %12422 = vst [vmem:[#allocation2_spill] sm:$0xff] %v10277_v23  ;;  %v8702_v25 = vld [vmem:[%s12400_s1 + $0xb44] ss:$12 sps:$4 sm:$0xff]   ;;  %v8700_v27 = vld [vmem:[%s12400_s1 + $0xb40] ss:$12 sps:$4 sm:$0xff]  }
  0xc7   :  { %4675 = vmatpush1.bf16.msra.mxu0 %v8607_v28  ;;  %v885_v28 = vld [vmem:[%s12402_s2] sm:$0x7] }
  0xc8   :  { %4728 = vmatpush1.bf16.msra.mxu1 %v8610_v29  ;;  %4676 = vmatprep.subr.bf16.mxu0 %v8618_v30  ;;  %v10295_v29 = vsub.s32 0, %v10277_v23  ;;  %v8711_v30 = vld [vmem:[%s12400_s1 + $0xcac] ss:$12 sps:$4 sm:$0xff]  }
  0xc9   :  { %4729 = vmatprep.subr.bf16.mxu1 %v8621_v31  ;;  %v8714_v31 = vld [vmem:[%s12400_s1 + $0xe2c] ss:$12 sps:$4 sm:$0xff]  }
  0xca   :  { %4609 = vmatmul.mubr.bf16.gmra.mxu0 %v8615_v32  ;;  %12423 = vst [vmem:[#allocation3_spill] sm:$0xff] %v10295_v29  ;;  %v8703_v32 = vld [vmem:[%s12401_s0 + $0x30] ss:$100 sps:$4 sm:$0xff]  }
  0xcb   :  { %4662 = vmatmul.mubr.bf16.gmra.mxu1 %v8624_v34  ;;  %4677 = vmatpush1.bf16.msra.mxu0 %v8616_v33  ;;  %v8706_v33 = vld [vmem:[%s12401_s0 + $0x38] ss:$100 sps:$4 sm:$0xff]   ;;  %v10310_v34 = vsub.s32 1, %v10277_v23 }
  0xcc   :  { %4730 = vmatpush1.bf16.msra.mxu1 %v8619_v35  ;;  %4678 = vmatprep.subr.bf16.mxu0 %v8627_v36  ;;  %v8709_v35 = vld [vmem:[%s12400_s1 + $0xca8] ss:$12 sps:$4 sm:$0xff]   ;;  %v10316_v36 = vrot.slane %v885_v28, %v10295_v29 }
  0xcd   :  { %4731 = vmatprep.subr.bf16.mxu1 %v8630_v37  ;;  %4704 = vmatprep.mubr.bf16.mxu0 %v8705_v38  ;;  %12424 = vst [vmem:[#allocation4_spill] sm:$0xff] %v10310_v34  ;;  %v8712_v37 = vld [vmem:[%s12400_s1 + $0xe28] ss:$12 sps:$4 sm:$0xff]  }
  0xce   :  { %4757 = vmatprep.mubr.bf16.mxu1 %v8708_v39  ;;  %v8717_v38 = vld [vmem:[%s12400_s1 + $0xc94] ss:$12 sps:$4 sm:$0xff]  }
  0xcf   :  { %4679 = vmatpush1.bf16.msra.mxu0 %v8625_v40  ;;  %v8720_v39 = vld [vmem:[%s12400_s1 + $0xe14] ss:$12 sps:$4 sm:$0xff]   ;;  %v10328_v40 = vrot.slane %v885_v28, %v10310_v34  ;;  %v8759_v28 = vld [vmem:[%s12400_s1 + $0xc04] ss:$12 sps:$4 sm:$0xff]  }
  0xd0   :  { %4732 = vmatpush1.bf16.msra.mxu1 %v8628_v41  ;;  %4680 = vmatprep.subr.bf16.mxu0 %v8633_v42  ;;  %v8721_v41 = vld [vmem:[%s12401_s0 + $0xfc] ss:$100 sps:$4 sm:$0xff]   ;;  %v8730_v42 = vld [vmem:[%s12401_s0 + $0x104] ss:$100 sps:$4 sm:$0xff]  }
  0xd1   :  { %4733 = vmatprep.subr.bf16.mxu1 %v8636_v43 }
  0xd3   :  { %4681 = vmatpush1.bf16.msra.mxu0 %v8631_v44 }
  0xd4   :  { %4734 = vmatpush1.bf16.msra.mxu1 %v8634_v45  ;;  %4682 = vmatprep.subr.bf16.mxu0 %v8639_v46  ;;  %v8715_v45 = vld [vmem:[%s12400_s1 + $0xc90] ss:$12 sps:$4 sm:$0xff]  }
  0xd5   :  { %4735 = vmatprep.subr.bf16.mxu1 %v8642_v47  ;;  %v8718_v47 = vld [vmem:[%s12400_s1 + $0xe10] ss:$12 sps:$4 sm:$0xff]  }
  0xd7   :  { %4683 = vmatpush1.bf16.msra.mxu0 %v8637_v48 }
  0xd8   :  { %4736 = vmatpush1.bf16.msra.mxu1 %v8640_v49  ;;  %4684 = vmatprep.subr.bf16.mxu0 %v8645_v50  ;;  %v8726_v50 = vld [vmem:[%s12400_s1 + $0xc7c] ss:$12 sps:$4 sm:$0xff]  }
  0xd9   :  { %4737 = vmatprep.subr.bf16.mxu1 %v8648_v51  ;;  %v8729_v51 = vld [vmem:[%s12400_s1 + $0xdfc] ss:$12 sps:$4 sm:$0xff]  }
  0xdb   :  { %4685 = vmatpush1.bf16.msra.mxu0 %v8643_v52 }
  0xdc   :  { %4738 = vmatpush1.bf16.msra.mxu1 %v8646_v53  ;;  %4686 = vmatprep.subr.bf16.mxu0 %v8651_v54  ;;  %v8723_v54 = vld [vmem:[%s12401_s0 + $0xf8] ss:$100 sps:$4 sm:$0xff]  }
  0xdd   :  { %4739 = vmatprep.subr.bf16.mxu1 %v8654_v55  ;;  %v8724_v55 = vld [vmem:[%s12400_s1 + $0xc78] ss:$12 sps:$4 sm:$0xff]  }
  0xdf   :  { %4687 = vmatpush1.bf16.msra.mxu0 %v8649_v56 }
  0xe0   :  { %4740 = vmatpush1.bf16.msra.mxu1 %v8652_v57  ;;  %4688 = vmatprep.subr.bf16.mxu0 %v8657_v58  ;;  %v8732_v57 = vld [vmem:[%s12401_s0 + $0x100] ss:$100 sps:$4 sm:$0xff]  }
  0xe1   :  { %4741 = vmatprep.subr.bf16.mxu1 %v8660_v59 }
  0xe3   :  { %4689 = vmatpush2.bf16.msra.mxu0 %v8655_v60  ;;  %v8727_v60 = vld [vmem:[%s12400_s1 + $0xdf8] ss:$12 sps:$4 sm:$0xff]  }
  0xe4   :  { %4742 = vmatpush2.bf16.msra.mxu1 %v8658_v61  ;;  %4690 = vmatprep.subr.bf16.mxu0 %v8663_v62  ;;  %v8735_v62 = vld [vmem:[%s12400_s1 + $0xc64] ss:$12 sps:$4 sm:$0xff]  }
  0xe5   :  { %4743 = vmatprep.subr.bf16.mxu1 %v8666_v63  ;;  %v8738_v63 = vld [vmem:[%s12400_s1 + $0xde4] ss:$12 sps:$4 sm:$0xff]  }
  0xe7   :  { %4691 = vmatpush2.bf16.msra.mxu0 %v8661_v0 }
  0xe8   :  { %4744 = vmatpush2.bf16.msra.mxu1 %v8664_v1  ;;  %4692 = vmatprep.subr.bf16.mxu0 %v8669_v2  ;;  %v8813_v1 = vld [vmem:[%s12401_s0 + $0x44] ss:$100 sps:$4 sm:$0xff]   ;;  %v8816_v2 = vld [vmem:[%s12401_s0 + $0x4c] ss:$100 sps:$4 sm:$0xff]  }
  0xe9   :  { %4745 = vmatprep.subr.bf16.mxu1 %v8672_v3  ;;  %v8733_v3 = vld [vmem:[%s12400_s1 + $0xc60] ss:$12 sps:$4 sm:$0xff]  }
  0xeb   :  { %4693 = vmatpush2.bf16.msra.mxu0 %v8667_v4  ;;  %v8736_v4 = vld [vmem:[%s12400_s1 + $0xde0] ss:$12 sps:$4 sm:$0xff]  }
  0xec   :  { %4746 = vmatpush2.bf16.msra.mxu1 %v8670_v5  ;;  %4694 = vmatprep.subr.bf16.mxu0 %v8675_v6  ;;  %v8741_v5 = vld [vmem:[%s12400_s1 + $0xc4c] ss:$12 sps:$4 sm:$0xff]  }
  0xed   :  { %4747 = vmatprep.subr.bf16.mxu1 %v8678_v7  ;;  %v8744_v6 = vld [vmem:[%s12400_s1 + $0xdcc] ss:$12 sps:$4 sm:$0xff]   ;;  %v8739_v7 = vld [vmem:[%s12400_s1 + $0xc48] ss:$12 sps:$4 sm:$0xff]  }
  0xef   :  { %4695 = vmatpush2.bf16.msra.mxu0 %v8673_v8  ;;  %v8742_v8 = vld [vmem:[%s12400_s1 + $0xdc8] ss:$12 sps:$4 sm:$0xff]  }
  0xf0   :  { %4748 = vmatpush2.bf16.msra.mxu1 %v8676_v9  ;;  %4696 = vmatprep.subr.bf16.mxu0 %v8681_v10  ;;  %v8747_v10 = vld [vmem:[%s12400_s1 + $0xc34] ss:$12 sps:$4 sm:$0xff]  }
  0xf1   :  { %4749 = vmatprep.subr.bf16.mxu1 %v8684_v11  ;;  %v8750_v11 = vld [vmem:[%s12400_s1 + $0xdb4] ss:$12 sps:$4 sm:$0xff]  }
  0xf3   :  { %4697 = vmatpush2.bf16.msra.mxu0 %v8679_v12  ;;  %v8745_v12 = vld [vmem:[%s12400_s1 + $0xc30] ss:$12 sps:$4 sm:$0xff]  }
  0xf4   :  { %4750 = vmatpush2.bf16.msra.mxu1 %v8682_v13  ;;  %4698 = vmatprep.subr.bf16.mxu0 %v8687_v14  ;;  %v8748_v14 = vld [vmem:[%s12400_s1 + $0xdb0] ss:$12 sps:$4 sm:$0xff]  }
  0xf5   :  { %4751 = vmatprep.subr.bf16.mxu1 %v8690_v15 }
  0xf7   :  { %4699 = vmatpush2.bf16.msra.mxu0 %v8685_v16 }
  0xf8   :  { %4752 = vmatpush2.bf16.msra.mxu1 %v8688_v17  ;;  %4700 = vmatprep.subr.bf16.mxu0 %v8693_v19  ;;  %v8753_v17 = vld [vmem:[%s12400_s1 + $0xc1c] ss:$12 sps:$4 sm:$0xff]  }
  0xf9   :  { %4753 = vmatprep.subr.bf16.mxu1 %v8696_v20 }
  0xfb   :  { %4701 = vmatpush2.bf16.msra.mxu0 %v8691_v21  ;;  %v8751_v21 = vld [vmem:[%s12400_s1 + $0xc18] ss:$12 sps:$4 sm:$0xff]  }
  0xfc   :  { %4754 = vmatpush2.bf16.msra.mxu1 %v8694_v22  ;;  %4702 = vmatprep.subr.bf16.mxu0 %v8699_v24 }
  0xfd   :  { %4755 = vmatprep.subr.bf16.mxu1 %v8702_v25  ;;  %v8754_v25 = vld [vmem:[%s12400_s1 + $0xd98] ss:$12 sps:$4 sm:$0xff]  }
  0xff   :  { %4703 = vmatpush2.bf16.msra.mxu0 %v8697_v26 }
 0x100   :  { %4756 = vmatpush2.bf16.msra.mxu1 %v8700_v27  ;;  %4778 = vmatprep.subr.bf16.mxu0 %v8711_v30  ;;  %v8762_v30 = vld [vmem:[%s12400_s1 + $0xd84] ss:$12 sps:$4 sm:$0xff]  }
 0x101   :  { %4831 = vmatprep.subr.bf16.mxu1 %v8714_v31 }
 0x102   :  { %v4388_v43 = vpop.f32.mrf.mxu0  ;;  %4705 = vmatmul.mubr.bf16.vlgmr.msra.gmra.mxu0 %v8703_v32 }
 0x103   :  { %v4441_v44 = vpop.f32.mrf.mxu1  ;;  %4758 = vmatmul.mubr.bf16.vlgmr.msra.gmra.mxu1 %v8706_v33  ;;  %v4389_v46 = vadd.f32 %v4388_v43, %v10316_v36  ;;  %4779 = vmatpush1.bf16.msra.mxu0 %v8709_v35  ;;  %v8757_v33 = vld [vmem:[%s12400_s1 + $0xc00] ss:$12 sps:$4 sm:$0xff]  }
 0x104   :  { %4832 = vmatpush1.bf16.msra.mxu1 %v8712_v37  ;;  %v4390_v48 = vpop.f32.mrf.mxu0  ;;  %4780 = vmatprep.subr.bf16.mxu0 %v8717_v38  ;;  %v8765_v38 = vld [vmem:[%s12400_s1 + $0xd6c] ss:$12 sps:$4 sm:$0xff]   ;;  %v8771_v43 = vld [vmem:[%s12400_s1 + $0xd54] ss:$12 sps:$4 sm:$0xff]  }
 0x105   :  { %v4443_v49 = vpop.f32.mrf.mxu1  ;;  %4833 = vmatprep.subr.bf16.mxu1 %v8720_v39  ;;  %v10349_v52 = vadd.f32 %v4441_v44, %v4389_v46  ;;  %v4391_v53 = vadd.f32 %v4390_v48, %v10328_v40  ;;  %4714 = vmatprep.mubr.bf16.mxu0 %v8721_v41  ;;  %v8768_v39 = vld [vmem:[%s12400_s1 + $0xeec] ss:$12 sps:$4 sm:$0xff]   ;;  %v8763_v41 = vld [vmem:[%s12400_s1 + $0xd68] ss:$12 sps:$4 sm:$0xff]   ;;  %v8772_v46 = vld [vmem:[%s12400_s1 + $0xed0] ss:$12 sps:$4 sm:$0xff]  }
 0x106   :  { %4767 = vmatprep.mubr.bf16.mxu1 %v8730_v42  ;;  %v4392_v56 = vpop.f32.mrf.mxu0  ;;  %v8766_v42 = vld [vmem:[%s12400_s1 + $0xee8] ss:$12 sps:$4 sm:$0xff]  }
 0x107   :  { %v10361_v58 = vadd.f32 %v4443_v49, %v4391_v53  ;;  %v4393_v59 = vadd.f32 %v4392_v56, %v10316_v36  ;;  %4781 = vmatpush1.bf16.msra.mxu0 %v8715_v45  ;;  %v4445_v61 = vpop.f32.mrf.mxu1  ;;  %v8774_v44 = vld [vmem:[%s12400_s1 + $0xed4] ss:$12 sps:$4 sm:$0xff]   ;;  %v8769_v45 = vld [vmem:[%s12400_s1 + $0xd50] ss:$12 sps:$4 sm:$0xff]   ;;  %v8775_v49 = vld [vmem:[%s12400_s1 + $0xd38] ss:$12 sps:$4 sm:$0xff]  }
 0x108   :  { %4834 = vmatpush1.bf16.msra.mxu1 %v8718_v47  ;;  %4782 = vmatprep.subr.bf16.mxu0 %v8726_v50  ;;  %v10399_v9 = vpop.f32.mrf.mxu0  ;;  %v8777_v47 = vld [vmem:[%s12400_s1 + $0xd3c] ss:$12 sps:$4 sm:$0xff]   ;;  %v8778_v50 = vld [vmem:[%s12400_s1 + $0xeb8] ss:$12 sps:$4 sm:$0xff]  }
 0x109   :  { %4835 = vmatprep.subr.bf16.mxu1 %v8729_v51  ;;  %v10373_v0 = vadd.f32 %v4445_v61, %v4393_v59  ;;  %v10414_v16 = vpop.f32.mrf.mxu1  ;;  %v8780_v48 = vld [vmem:[%s12400_s1 + $0xebc] ss:$12 sps:$4 sm:$0xff]   ;;  %v8783_v51 = vld [vmem:[%s12400_s1 + $0xd24] ss:$12 sps:$4 sm:$0xff]   ;;  %v8789_v56 = vld [vmem:[%s12400_s1 + $0xd0c] ss:$12 sps:$4 sm:$0xff]  }
 0x10a   :  { %4715 = vmatmul.mubr.bf16.gmra.mxu0 %v8723_v54  ;;  %v4398_v13 = vpop.f32.mrf.mxu0  ;;  %v8786_v53 = vld [vmem:[%s12400_s1 + $0xea4] ss:$12 sps:$4 sm:$0xff]   ;;  %v8781_v54 = vld [vmem:[%s12400_s1 + $0xd20] ss:$12 sps:$4 sm:$0xff]   ;;  %v8787_v59 = vld [vmem:[%s12400_s1 + $0xd08] ss:$12 sps:$4 sm:$0xff]  }
 0x10b   :  { %4768 = vmatmul.mubr.bf16.gmra.mxu1 %v8732_v57  ;;  %4783 = vmatpush1.bf16.msra.mxu0 %v8724_v55  ;;  %v4399_v15 = vadd.f32 %v4398_v13, %v10316_v36  ;;  %v4451_v22 = vpop.f32.mrf.mxu1  ;;  %v8784_v55 = vld [vmem:[%s12400_s1 + $0xea0] ss:$12 sps:$4 sm:$0xff]  }
 0x10c   :  { %4836 = vmatpush1.bf16.msra.mxu1 %v8727_v60  ;;  %4784 = vmatprep.subr.bf16.mxu0 %v8735_v62  ;;  %v4400_v19 = vpop.f32.mrf.mxu0  ;;  %v8792_v57 = vld [vmem:[%s12400_s1 + $0xe8c] ss:$12 sps:$4 sm:$0xff]   ;;  %v8790_v60 = vld [vmem:[%s12400_s1 + $0xe88] ss:$12 sps:$4 sm:$0xff]  }
 0x10d   :  { %4837 = vmatprep.subr.bf16.mxu1 %v8738_v63  ;;  %4810 = vmatprep.mubr.bf16.mxu0 %v8813_v1  ;;  %v4401_v20 = vadd.f32 %v4400_v19, %v10328_v40  ;;  %v10429_v26 = vadd.f32 %v4451_v22, %v4399_v15  ;;  %v4453_v31 = vpop.f32.mrf.mxu1  ;;  %v8795_v61 = vld [vmem:[%s12400_s1 + $0xcf4] ss:$12 sps:$4 sm:$0xff]   ;;  %v8793_v63 = vld [vmem:[%s12400_s1 + $0xcf0] ss:$12 sps:$4 sm:$0xff]   ;;  %v8814_v13 = vld [vmem:[%s12401_s0 + $0x48] ss:$100 sps:$4 sm:$0xff]  }
 0x10e   :  { %4863 = vmatprep.mubr.bf16.mxu1 %v8816_v2  ;;  %v4402_v24 = vpop.f32.mrf.mxu0  ;;  %v8798_v62 = vld [vmem:[%s12400_s1 + $0xe74] ss:$12 sps:$4 sm:$0xff]   ;;  %v8796_v1 = vld [vmem:[%s12400_s1 + $0xe70] ss:$12 sps:$4 sm:$0xff]  }
 0x10f   :  { %4785 = vmatpush1.bf16.msra.mxu0 %v8733_v3  ;;  %v4403_v27 = vadd.f32 %v4402_v24, %v10316_v36  ;;  %v10438_v32 = vadd.f32 %v4453_v31, %v4401_v20  ;;  %v4455_v35 = vpop.f32.mrf.mxu1  ;;  %v8760_v36 = vld [vmem:[%s12400_s1 + $0xd80] ss:$12 sps:$4 sm:$0xff]   ;;  %v8801_v2 = vld [vmem:[%s12400_s1 + $0xcdc] ss:$12 sps:$4 sm:$0xff]  }
 0x110   :  { %4838 = vmatpush1.bf16.msra.mxu1 %v8736_v4  ;;  %4786 = vmatprep.subr.bf16.mxu0 %v8741_v5  ;;  %v8804_v3 = vld [vmem:[%s12400_s1 + $0xe5c] ss:$12 sps:$4 sm:$0xff]   ;;  %v8799_v4 = vld [vmem:[%s12400_s1 + $0xcd8] ss:$12 sps:$4 sm:$0xff]   ;;  %v8828_v19 = vld [vmem:[%s12400_s1 + $0x1114] ss:$12 sps:$4 sm:$0xff]   ;;  %v10568_v20 = vpop.f32.mrf.mxu0 }
 0x111   :  { %4839 = vmatprep.subr.bf16.mxu1 %v8744_v6  ;;  %v10446_v37 = vadd.f32 %v4455_v35, %v4403_v27  ;;  %v8802_v5 = vld [vmem:[%s12400_s1 + $0xe58] ss:$12 sps:$4 sm:$0xff]   ;;  %v8817_v15 = vld [vmem:[%s12400_s1 + $0xfa8] ss:$12 sps:$4 sm:$0xff]   ;;  %v8829_v22 = vld [vmem:[%s12401_s0 + $0x10c] ss:$100 sps:$4 sm:$0xff]  }
 0x112   :  { %v8807_v6 = vld [vmem:[%s12400_s1 + $0xcc4] ss:$12 sps:$4 sm:$0xff]  }
 0x113   :  { %4787 = vmatpush1.bf16.msra.mxu0 %v8739_v7  ;;  %v8810_v7 = vld [vmem:[%s12400_s1 + $0xe44] ss:$12 sps:$4 sm:$0xff]  }
 0x114   :  { %4840 = vmatpush1.bf16.msra.mxu1 %v8742_v8  ;;  %4788 = vmatprep.subr.bf16.mxu0 %v8747_v10  ;;  %v8805_v8 = vld [vmem:[%s12400_s1 + $0xcc0] ss:$12 sps:$4 sm:$0xff]   ;;  %v8823_v24 = vld [vmem:[%s12400_s1 + $0xf90] ss:$12 sps:$4 sm:$0xff]  }
 0x115   :  { %4841 = vmatprep.subr.bf16.mxu1 %v8750_v11  ;;  %v8808_v10 = vld [vmem:[%s12400_s1 + $0xe40] ss:$12 sps:$4 sm:$0xff]  }
 0x116   :  { %v8819_v11 = vld [vmem:[%s12400_s1 + $0xfac] ss:$12 sps:$4 sm:$0xff]  }
 0x117   :  { %4789 = vmatpush1.bf16.msra.mxu0 %v8745_v12  ;;  %v8811_v12 = vld [vmem:[%s12401_s0 + $0x40] ss:$100 sps:$4 sm:$0xff]  }
 0x118   :  { %4842 = vmatpush1.bf16.msra.mxu1 %v8748_v14  ;;  %4790 = vmatprep.subr.bf16.mxu0 %v8753_v17  ;;  %v8822_v14 = vld [vmem:[%s12400_s1 + $0x112c] ss:$12 sps:$4 sm:$0xff]   ;;  %v8820_v17 = vld [vmem:[%s12400_s1 + $0x1128] ss:$12 sps:$4 sm:$0xff]  }
 0x119   :  { %4843 = vmatprep.subr.bf16.mxu1 %v8756_v18  ;;  %v8825_v18 = vld [vmem:[%s12400_s1 + $0xf94] ss:$12 sps:$4 sm:$0xff]  }
 0x11b   :  { %4791 = vmatpush1.bf16.msra.mxu0 %v8751_v21  ;;  %v10570_v21 = vpop.f32.mrf.mxu1 }
 0x11c   :  { %4844 = vmatpush1.bf16.msra.mxu1 %v8754_v25  ;;  %4792 = vmatprep.subr.bf16.mxu0 %v8759_v28  ;;  %v8838_v25 = vld [vmem:[%s12401_s0 + $0x114] ss:$100 sps:$4 sm:$0xff]  }
 0x11d   :  { %4845 = vmatprep.subr.bf16.mxu1 %v8762_v30  ;;  %v8826_v30 = vld [vmem:[%s12400_s1 + $0x1110] ss:$12 sps:$4 sm:$0xff]  }
 0x11f   :  { %4793 = vmatpush1.bf16.msra.mxu0 %v8757_v33  ;;  %v8834_v33 = vld [vmem:[%s12400_s1 + $0xf7c] ss:$12 sps:$4 sm:$0xff]  }
 0x120   :  { %4846 = vmatpush1.bf16.msra.mxu1 %v8760_v36  ;;  %4794 = vmatprep.subr.bf16.mxu0 %v8765_v38  ;;  %v8831_v38 = vld [vmem:[%s12401_s0 + $0x108] ss:$100 sps:$4 sm:$0xff]  }
 0x121   :  { %4847 = vmatprep.subr.bf16.mxu1 %v8768_v39  ;;  %v8837_v39 = vld [vmem:[%s12400_s1 + $0x10fc] ss:$12 sps:$4 sm:$0xff]  }
 0x123   :  { %4795 = vmatpush2.bf16.msra.mxu0 %v8763_v41 }
 0x124   :  { %4848 = vmatpush2.bf16.msra.mxu1 %v8766_v42  ;;  %4796 = vmatprep.subr.bf16.mxu0 %v8771_v43  ;;  %v8832_v42 = vld [vmem:[%s12400_s1 + $0xf78] ss:$12 sps:$4 sm:$0xff]  }
 0x125   :  { %4849 = vmatprep.subr.bf16.mxu1 %v8774_v44  ;;  %v8835_v43 = vld [vmem:[%s12400_s1 + $0x10f8] ss:$12 sps:$4 sm:$0xff]   ;;  %v8840_v44 = vld [vmem:[%s12401_s0 + $0x110] ss:$100 sps:$4 sm:$0xff]  }
 0x127   :  { %4797 = vmatpush2.bf16.msra.mxu0 %v8769_v45 }
 0x128   :  { %4850 = vmatpush2.bf16.msra.mxu1 %v8772_v46  ;;  %4798 = vmatprep.subr.bf16.mxu0 %v8777_v47 }
 0x129   :  { %4851 = vmatprep.subr.bf16.mxu1 %v8780_v48  ;;  %v8846_v48 = vld [vmem:[%s12400_s1 + $0x10e4] ss:$12 sps:$4 sm:$0xff]  }
 0x12b   :  { %4799 = vmatpush2.bf16.msra.mxu0 %v8775_v49 }
 0x12c   :  { %4852 = vmatpush2.bf16.msra.mxu1 %v8778_v50  ;;  %4800 = vmatprep.subr.bf16.mxu0 %v8783_v51  ;;  %v8921_v51 = vld [vmem:[%s12401_s0 + $0x54] ss:$100 sps:$4 sm:$0xff]  }
 0x12d   :  { %4853 = vmatprep.subr.bf16.mxu1 %v8786_v53 }
 0x12f   :  { %4801 = vmatpush2.bf16.msra.mxu0 %v8781_v54  ;;  %v8924_v54 = vld [vmem:[%s12401_s0 + $0x5c] ss:$100 sps:$4 sm:$0xff]  }
 0x130   :  { %4854 = vmatpush2.bf16.msra.mxu1 %v8784_v55  ;;  %4802 = vmatprep.subr.bf16.mxu0 %v8789_v56 }
 0x131   :  { %4855 = vmatprep.subr.bf16.mxu1 %v8792_v57  ;;  %v8844_v57 = vld [vmem:[%s12400_s1 + $0x10e0] ss:$12 sps:$4 sm:$0xff]  }
 0x133   :  { %4803 = vmatpush2.bf16.msra.mxu0 %v8787_v59 }
 0x134   :  { %4856 = vmatpush2.bf16.msra.mxu1 %v8790_v60  ;;  %4804 = vmatprep.subr.bf16.mxu0 %v8795_v61  ;;  %v8849_v60 = vld [vmem:[%s12400_s1 + $0xf4c] ss:$12 sps:$4 sm:$0xff]  }
 0x135   :  { %4857 = vmatprep.subr.bf16.mxu1 %v8798_v62 }
 0x137   :  { %4805 = vmatpush2.bf16.msra.mxu0 %v8793_v63  ;;  %v8852_v63 = vld [vmem:[%s12400_s1 + $0x10cc] ss:$12 sps:$4 sm:$0xff]  }
 0x138   :  { %4858 = vmatpush2.bf16.msra.mxu1 %v8796_v1  ;;  %4806 = vmatprep.subr.bf16.mxu0 %v8801_v2 }
 0x139   :  { %4859 = vmatprep.subr.bf16.mxu1 %v8804_v3 }
 0x13b   :  { %4807 = vmatpush2.bf16.msra.mxu0 %v8799_v4 }
 0x13c   :  { %4860 = vmatpush2.bf16.msra.mxu1 %v8802_v5  ;;  %4808 = vmatprep.subr.bf16.mxu0 %v8807_v6  ;;  %v8850_v5 = vld [vmem:[%s12400_s1 + $0x10c8] ss:$12 sps:$4 sm:$0xff]  }
 0x13d   :  { %4861 = vmatprep.subr.bf16.mxu1 %v8810_v7 }
 0x13f   :  { %4809 = vmatpush2.bf16.msra.mxu0 %v8805_v8  ;;  %v8858_v8 = vld [vmem:[%s12400_s1 + $0x10b4] ss:$12 sps:$4 sm:$0xff]  }
 0x140   :  { %4862 = vmatpush2.bf16.msra.mxu1 %v8808_v10  ;;  %4884 = vmatprep.subr.bf16.mxu0 %v8819_v11  ;;  %v8856_v11 = vld [vmem:[%s12400_s1 + $0x10b0] ss:$12 sps:$4 sm:$0xff]  }
 0x141   :  { %4937 = vmatprep.subr.bf16.mxu1 %v8822_v14  ;;  %v8859_v14 = vld [vmem:[%s12400_s1 + $0xf18] ss:$12 sps:$4 sm:$0xff]  }
 0x142   :  { %v4494_v27 = vpop.f32.mrf.mxu0  ;;  %4811 = vmatmul.mubr.bf16.vlgmr.msra.gmra.mxu0 %v8811_v12  ;;  %v8861_v12 = vld [vmem:[%s12400_s1 + $0xf1c] ss:$12 sps:$4 sm:$0xff]  }
 0x143   :  { %v4547_v28 = vpop.f32.mrf.mxu1  ;;  %4864 = vmatmul.mubr.bf16.vlgmr.msra.gmra.mxu1 %v8814_v13  ;;  %v4495_v31 = vadd.f32 %v4494_v27, %v10349_v52  ;;  %4885 = vmatpush1.bf16.msra.mxu0 %v8817_v15  ;;  %v8864_v13 = vld [vmem:[%s12400_s1 + $0x109c] ss:$12 sps:$4 sm:$0xff]   ;;  %v8862_v15 = vld [vmem:[%s12400_s1 + $0x1098] ss:$12 sps:$4 sm:$0xff]  }
 0x144   :  { %4938 = vmatpush1.bf16.msra.mxu1 %v8820_v17  ;;  %v4496_v35 = vpop.f32.mrf.mxu0  ;;  %4886 = vmatprep.subr.bf16.mxu0 %v8825_v18  ;;  %v8867_v17 = vld [vmem:[%s12400_s1 + $0xf04] ss:$12 sps:$4 sm:$0xff]   ;;  %v8871_v27 = vld [vmem:[%s12400_s1 + $0x1068] ss:$12 sps:$4 sm:$0xff]  }
 0x145   :  { %v10588_v36 = vpop.f32.mrf.mxu1  ;;  %4939 = vmatprep.subr.bf16.mxu1 %v8828_v19  ;;  %v10596_v52 = vadd.f32 %v4547_v28, %v4495_v31  ;;  %v10599_v41 = vadd.f32 %v4496_v35, %v10361_v58  ;;  %4820 = vmatprep.mubr.bf16.mxu0 %v8829_v22  ;;  %v8843_v58 = vld [vmem:[%s12400_s1 + $0xf64] ss:$12 sps:$4 sm:$0xff]   ;;  %v8865_v19 = vld [vmem:[%s12400_s1 + $0xf00] ss:$12 sps:$4 sm:$0xff]   ;;  %v8874_v28 = vld [vmem:[%s12400_s1 + $0x11e8] ss:$12 sps:$4 sm:$0xff]  }
 0x146   :  { %4873 = vmatprep.mubr.bf16.mxu1 %v8838_v25  ;;  %v4498_v45 = vpop.f32.mrf.mxu0  ;;  %v8870_v18 = vld [vmem:[%s12400_s1 + $0x1084] ss:$12 sps:$4 sm:$0xff]   ;;  %v8868_v22 = vld [vmem:[%s12400_s1 + $0x1080] ss:$12 sps:$4 sm:$0xff]  }
 0x147   :  { %v4551_v46 = vpop.f32.mrf.mxu1  ;;  %v4499_v47 = vadd.f32 %v4498_v45, %v10373_v0  ;;  %4887 = vmatpush1.bf16.msra.mxu0 %v8823_v24  ;;  %v8841_v0 = vld [vmem:[%s12400_s1 + $0xf60] ss:$12 sps:$4 sm:$0xff]   ;;  %v8880_v35 = vld [vmem:[%s12400_s1 + $0x11d0] ss:$12 sps:$4 sm:$0xff]  }
 0x148   :  { %4940 = vmatpush1.bf16.msra.mxu1 %v8826_v30  ;;  %v10617_v49 = vpop.f32.mrf.mxu0  ;;  %4888 = vmatprep.subr.bf16.mxu0 %v8834_v33  ;;  %v8873_v24 = vld [vmem:[%s12400_s1 + $0x106c] ss:$12 sps:$4 sm:$0xff]   ;;  %v8879_v30 = vld [vmem:[%s12400_s1 + $0x1054] ss:$12 sps:$4 sm:$0xff]   ;;  %v8877_v33 = vld [vmem:[%s12400_s1 + $0x1050] ss:$12 sps:$4 sm:$0xff]  }
 0x149   :  { %v10619_v50 = vpop.f32.mrf.mxu1  ;;  %4941 = vmatprep.subr.bf16.mxu1 %v8837_v39  ;;  %v10624_v53 = vadd.f32 %v4551_v46, %v4499_v47  ;;  %v8876_v25 = vld [vmem:[%s12400_s1 + $0x11ec] ss:$12 sps:$4 sm:$0xff]   ;;  %v8882_v31 = vld [vmem:[%s12400_s1 + $0x11d4] ss:$12 sps:$4 sm:$0xff]   ;;  %v8888_v39 = vld [vmem:[%s12400_s1 + $0x11bc] ss:$12 sps:$4 sm:$0xff]  }
 0x14a   :  { %v4504_v55 = vpop.f32.mrf.mxu0  ;;  %4821 = vmatmul.mubr.bf16.gmra.mxu0 %v8831_v38  ;;  %v8885_v38 = vld [vmem:[%s12400_s1 + $0x103c] ss:$12 sps:$4 sm:$0xff]   ;;  %v8894_v45 = vld [vmem:[%s12400_s1 + $0x11a4] ss:$12 sps:$4 sm:$0xff]   ;;  %v8889_v46 = vld [vmem:[%s12400_s1 + $0x1020] ss:$12 sps:$4 sm:$0xff]  }
 0x14b   :  { %v4557_v56 = vpop.f32.mrf.mxu1  ;;  %4874 = vmatmul.mubr.bf16.gmra.mxu1 %v8840_v44  ;;  %v4505_v59 = vadd.f32 %v4504_v55, %v10429_v26  ;;  %4889 = vmatpush1.bf16.msra.mxu0 %v8832_v42  ;;  %v8847_v26 = vld [vmem:[%s12400_s1 + $0xf48] ss:$12 sps:$4 sm:$0xff]   ;;  %v8883_v42 = vld [vmem:[%s12400_s1 + $0x1038] ss:$12 sps:$4 sm:$0xff]  }
 0x14c   :  { %4942 = vmatpush1.bf16.msra.mxu1 %v8835_v43  ;;  %v4506_v61 = vpop.f32.mrf.mxu0  ;;  %4890 = vmatprep.subr.bf16.mxu0 %v8843_v58  ;;  %v8886_v43 = vld [vmem:[%s12400_s1 + $0x11b8] ss:$12 sps:$4 sm:$0xff]   ;;  %v8892_v58 = vld [vmem:[%s12400_s1 + $0x11a0] ss:$12 sps:$4 sm:$0xff]  }
 0x14d   :  { %v4559_v62 = vpop.f32.mrf.mxu1  ;;  %4943 = vmatprep.subr.bf16.mxu1 %v8846_v48  ;;  %v4507_v1 = vadd.f32 %v4506_v61, %v10438_v32  ;;  %v10643_v2 = vadd.f32 %v4557_v56, %v4505_v59  ;;  %4916 = vmatprep.mubr.bf16.mxu0 %v8921_v51  ;;  %v8855_v32 = vld [vmem:[%s12400_s1 + $0xf34] ss:$12 sps:$4 sm:$0xff]   ;;  %v8891_v44 = vld [vmem:[%s12400_s1 + $0x1024] ss:$12 sps:$4 sm:$0xff]   ;;  %v8897_v47 = vld [vmem:[%s12400_s1 + $0x100c] ss:$12 sps:$4 sm:$0xff]  }
 0x14e   :  { %4969 = vmatprep.mubr.bf16.mxu1 %v8924_v54  ;;  %v4508_v3 = vpop.f32.mrf.mxu0  ;;  %v8900_v48 = vld [vmem:[%s12400_s1 + $0x118c] ss:$12 sps:$4 sm:$0xff]   ;;  %v8895_v51 = vld [vmem:[%s12400_s1 + $0x1008] ss:$12 sps:$4 sm:$0xff]   ;;  %v8901_v56 = vld [vmem:[%s12400_s1 + $0xff0] ss:$12 sps:$4 sm:$0xff]  }
 0x14f   :  { %v4561_v4 = vpop.f32.mrf.mxu1  ;;  %v4509_v6 = vadd.f32 %v4508_v3, %v10446_v37  ;;  %v10652_v7 = vadd.f32 %v4559_v62, %v4507_v1  ;;  %4891 = vmatpush1.bf16.msra.mxu0 %v8841_v0  ;;  %v8853_v37 = vld [vmem:[%s12400_s1 + $0xf30] ss:$12 sps:$4 sm:$0xff]   ;;  %v8898_v0 = vld [vmem:[%s12400_s1 + $0x1188] ss:$12 sps:$4 sm:$0xff]   ;;  %v8907_v61 = vld [vmem:[%s12400_s1 + $0xfd8] ss:$12 sps:$4 sm:$0xff]  }
 0x150   :  { %4944 = vmatpush1.bf16.msra.mxu1 %v8844_v57  ;;  %4892 = vmatprep.subr.bf16.mxu0 %v8849_v60  ;;  %v8903_v54 = vld [vmem:[%s12400_s1 + $0xff4] ss:$12 sps:$4 sm:$0xff]   ;;  %v8904_v57 = vld [vmem:[%s12400_s1 + $0x1170] ss:$12 sps:$4 sm:$0xff]   ;;  %v8910_v62 = vld [vmem:[%s12400_s1 + $0x1158] ss:$12 sps:$4 sm:$0xff]  }
 0x151   :  { %4945 = vmatprep.subr.bf16.mxu1 %v8852_v63  ;;  %v10660_v10 = vadd.f32 %v4561_v4, %v4509_v6  ;;  %v8906_v55 = vld [vmem:[%s12400_s1 + $0x1174] ss:$12 sps:$4 sm:$0xff]   ;;  %v8909_v59 = vld [vmem:[%s12400_s1 + $0xfdc] ss:$12 sps:$4 sm:$0xff]   ;;  %v8915_v63 = vld [vmem:[%s12400_s1 + $0xfc4] ss:$12 sps:$4 sm:$0xff]  }
 0x152   :  { %v8912_v60 = vld [vmem:[%s12400_s1 + $0x115c] ss:$12 sps:$4 sm:$0xff]   ;;  %v8918_v1 = vld [vmem:[%s12400_s1 + $0x1144] ss:$12 sps:$4 sm:$0xff]   ;;  %v8916_v3 = vld [vmem:[%s12400_s1 + $0x1140] ss:$12 sps:$4 sm:$0xff]  }
 0x153   :  { %4893 = vmatpush1.bf16.msra.mxu0 %v8847_v26  ;;  %v8913_v26 = vld [vmem:[%s12400_s1 + $0xfc0] ss:$12 sps:$4 sm:$0xff]   ;;  %v8922_v6 = vld [vmem:[%s12401_s0 + $0x58] ss:$100 sps:$4 sm:$0xff]  }
 0x154   :  { %4946 = vmatpush1.bf16.msra.mxu1 %v8850_v5  ;;  %4894 = vmatprep.subr.bf16.mxu0 %v8855_v32  ;;  %v8927_v4 = vld [vmem:[%s12400_s1 + $0x12ac] ss:$12 sps:$4 sm:$0xff]   ;;  %v8919_v5 = vld [vmem:[%s12401_s0 + $0x50] ss:$100 sps:$4 sm:$0xff]  }
 0x155   :  { %4947 = vmatprep.subr.bf16.mxu1 %v8858_v8  ;;  %v8928_v32 = vld [vmem:[%s12400_s1 + $0x170] ss:$12 sps:$4 sm:$0xff]   ;;  %v8925_v8 = vld [vmem:[%s12400_s1 + $0x12a8] ss:$12 sps:$4 sm:$0xff]  }
 0x157   :  { %4895 = vmatpush1.bf16.msra.mxu0 %v8853_v37  ;;  %v8929_v37 = vld [vmem:[%s12400_s1 + $0xb0] ss:$12 sps:$4 sm:$0xff]  }
 0x158   :  { %4948 = vmatpush1.bf16.msra.mxu1 %v8856_v11  ;;  %4896 = vmatprep.subr.bf16.mxu0 %v8861_v12  ;;  %v8932_v11 = vld [vmem:[%s12400_s1 + $0x1294] ss:$12 sps:$4 sm:$0xff]   ;;  %v8933_v12 = vld [vmem:[%s12400_s1 + $0x158] ss:$12 sps:$4 sm:$0xff]  }
 0x159   :  { %4949 = vmatprep.subr.bf16.mxu1 %v8864_v13  ;;  %v4510_v13 = vpop.f32.mrf.mxu0 }
 0x15b   :  { %4897 = vmatpush1.bf16.msra.mxu0 %v8859_v14  ;;  %v10812_v14 = vpop.f32.mrf.mxu1 }
 0x15c   :  { %4950 = vmatpush1.bf16.msra.mxu1 %v8862_v15  ;;  %4898 = vmatprep.subr.bf16.mxu0 %v8867_v17  ;;  %v8935_v15 = vld [vmem:[%s12401_s0 + $0x11c] ss:$100 sps:$4 sm:$0xff]  }
 0x15d   :  { %4951 = vmatprep.subr.bf16.mxu1 %v8870_v18  ;;  %v8930_v17 = vld [vmem:[%s12400_s1 + $0x1290] ss:$12 sps:$4 sm:$0xff]   ;;  %v8942_v18 = vld [vmem:[%s12401_s0 + $0x124] ss:$100 sps:$4 sm:$0xff]  }
 0x15f   :  { %4899 = vmatpush1.bf16.msra.mxu0 %v8865_v19 }
 0x160   :  { %4952 = vmatpush1.bf16.msra.mxu1 %v8868_v22  ;;  %4900 = vmatprep.subr.bf16.mxu0 %v8873_v24  ;;  %v8934_v24 = vld [vmem:[%s12400_s1 + $0x98] ss:$12 sps:$4 sm:$0xff]  }
 0x161   :  { %4953 = vmatprep.subr.bf16.mxu1 %v8876_v25 }
 0x163   :  { %4901 = vmatpush2.bf16.msra.mxu0 %v8871_v27  ;;  %v8940_v27 = vld [vmem:[%s12400_s1 + $0x127c] ss:$12 sps:$4 sm:$0xff]  }
 0x164   :  { %4954 = vmatpush2.bf16.msra.mxu1 %v8874_v28  ;;  %4902 = vmatprep.subr.bf16.mxu0 %v8879_v30 }
 0x165   :  { %4955 = vmatprep.subr.bf16.mxu1 %v8882_v31  ;;  %v8937_v31 = vld [vmem:[%s12401_s0 + $0x118] ss:$100 sps:$4 sm:$0xff]  }
 0x167   :  { %4903 = vmatpush2.bf16.msra.mxu0 %v8877_v33  ;;  %v4405_v33 = vadd.f32 %v10568_v20, %v10328_v40 }
 0x168   :  { %4956 = vmatpush2.bf16.msra.mxu1 %v8880_v35  ;;  %4904 = vmatprep.subr.bf16.mxu0 %v8885_v38  ;;  %v8938_v38 = vld [vmem:[%s12400_s1 + $0x1278] ss:$12 sps:$4 sm:$0xff]  }
 0x169   :  { %4957 = vmatprep.subr.bf16.mxu1 %v8888_v39  ;;  %v8944_v39 = vld [vmem:[%s12400_s1 + $0x80] ss:$12 sps:$4 sm:$0xff]  }
 0x16b   :  { %4905 = vmatpush2.bf16.msra.mxu0 %v8883_v42 }
 0x16c   :  { %4958 = vmatpush2.bf16.msra.mxu1 %v8886_v43  ;;  %4906 = vmatprep.subr.bf16.mxu0 %v8891_v44  ;;  %v8945_v44 = vld [vmem:[%s12401_s0 + $0x120] ss:$100 sps:$4 sm:$0xff]  }
 0x16d   :  { %4959 = vmatprep.subr.bf16.mxu1 %v8894_v45  ;;  %v8948_v45 = vld [vmem:[%s12400_s1 + $0x1264] ss:$12 sps:$4 sm:$0xff]  }
 0x16f   :  { %4907 = vmatpush2.bf16.msra.mxu0 %v8889_v46 }
 0x170   :  { %4960 = vmatpush2.bf16.msra.mxu1 %v8892_v58  ;;  %4908 = vmatprep.subr.bf16.mxu0 %v8897_v47  ;;  %v8949_v47 = vld [vmem:[%s12400_s1 + $0x128] ss:$12 sps:$4 sm:$0xff]  }
 0x171   :  { %4961 = vmatprep.subr.bf16.mxu1 %v8900_v48  ;;  %v4458_v48 = vadd.f32 %v10570_v21, %v4405_v33  ;;  %v8953_v21 = vld [vmem:[%s12400_s1 + $0x124c] ss:$12 sps:$4 sm:$0xff]   ;;  %v8972_v33 = vld [vmem:[%s12400_s1 + $0x2f0] ss:$12 sps:$4 sm:$0xff]  }
 0x173   :  { %4909 = vmatpush2.bf16.msra.mxu0 %v8895_v51 }
 0x174   :  { %4962 = vmatpush2.bf16.msra.mxu1 %v8898_v0  ;;  %4910 = vmatprep.subr.bf16.mxu0 %v8903_v54 }
 0x175   :  { %4963 = vmatprep.subr.bf16.mxu1 %v8906_v55  ;;  %v8950_v55 = vld [vmem:[%s12400_s1 + $0x68] ss:$12 sps:$4 sm:$0xff]  }
 0x177   :  { %4911 = vmatpush2.bf16.msra.mxu0 %v8901_v56  ;;  %v4511_v56 = vadd.f32 %v4510_v13, %v4458_v48  ;;  %v8979_v48 = vld [vmem:[%s12400_s1 + $0x398] ss:$12 sps:$4 sm:$0xff]  }
 0x178   :  { %4964 = vmatpush2.bf16.msra.mxu1 %v8904_v57  ;;  %4912 = vmatprep.subr.bf16.mxu0 %v8909_v59 }
 0x179   :  { %4965 = vmatprep.subr.bf16.mxu1 %v8912_v60 }
 0x17b   :  { %4913 = vmatpush2.bf16.msra.mxu0 %v8907_v61  ;;  %v8954_v61 = vld [vmem:[%s12400_s1 + $0x110] ss:$12 sps:$4 sm:$0xff]  }
 0x17c   :  { %4966 = vmatpush2.bf16.msra.mxu1 %v8910_v62  ;;  %4914 = vmatprep.subr.bf16.mxu0 %v8915_v63 }
 0x17d   :  { %4967 = vmatprep.subr.bf16.mxu1 %v8918_v1  ;;  %v12411_v1 = vmov 0  }
 0x17f   :  { %4915 = vmatpush2.bf16.msra.mxu0 %v8913_v26  ;;  %v9341_v26 = vld [vmem:[%s12401_s0 + $0x4] ss:$100 sps:$4 sm:$0xff]  }
 0x180   :  { %4968 = vmatpush2.bf16.msra.mxu1 %v8916_v3  ;;  %4990 = vmatprep.subr.bf16.mxu0 %v8927_v4 }
 0x181   :  { %7814 = vmatprep.subr.bf16.mxu1 %v8928_v32 }
 0x182   :  { %v4600_v19 = vpop.f32.mrf.mxu0  ;;  %4917 = vmatmul.mubr.bf16.vlgmr.msra.gmra.mxu0 %v8919_v5  ;;  %v4564_v5 = vadd.f32 %v10812_v14, %v4511_v56  ;;  %v9343_v56 = vld [vmem:[%s12401_s0 + $0xcc] ss:$100 sps:$4 sm:$0xff]  }
 0x183   :  { %v4653_v22 = vpop.f32.mrf.mxu1  ;;  %4970 = vmatmul.mubr.bf16.vlgmr.msra.gmra.mxu1 %v8922_v6  ;;  %v4601_v25 = vadd.f32 %v4600_v19, %v10596_v52  ;;  %4991 = vmatpush1.bf16.msra.mxu0 %v8925_v8  ;;  %v8941_v52 = vld [vmem:[%s12400_s1 + $0x140] ss:$12 sps:$4 sm:$0xff]  }
 0x184   :  { %7815 = vmatpush3.bf16.msra.mxu1 %v8929_v37  ;;  %v10830_v28 = vpop.f32.mrf.mxu0  ;;  %4992 = vmatprep.subr.bf16.mxu0 %v8932_v11  ;;  %v8958_v8 = vld [vmem:[%s12400_s1 + $0x1234] ss:$12 sps:$4 sm:$0xff]  }
 0x185   :  { %v10832_v30 = vpop.f32.mrf.mxu1  ;;  %7816 = vmatprep.subr.bf16.mxu1 %v8933_v12  ;;  %v10842_v35 = vadd.f32 %v4653_v22, %v4601_v25  ;;  %4926 = vmatprep.mubr.bf16.mxu0 %v8935_v15  ;;  %v8959_v12 = vld [vmem:[%s12400_s1 + $0xf8] ss:$12 sps:$4 sm:$0xff]   ;;  %v8964_v19 = vld [vmem:[%s12400_s1 + $0xe0] ss:$12 sps:$4 sm:$0xff]  }
 0x186   :  { %4979 = vmatprep.mubr.bf16.mxu1 %v8942_v18  ;;  %v4604_v42 = vpop.f32.mrf.mxu0  ;;  %v8960_v15 = vld [vmem:[%s12400_s1 + $0x38] ss:$12 sps:$4 sm:$0xff]   ;;  %v8963_v18 = vld [vmem:[%s12400_s1 + $0x121c] ss:$12 sps:$4 sm:$0xff]  }
 0x187   :  { %v4657_v43 = vpop.f32.mrf.mxu1  ;;  %v4605_v20 = vadd.f32 %v4604_v42, %v10624_v53  ;;  %4993 = vmatpush1.bf16.msra.mxu0 %v8930_v17  ;;  %v8946_v53 = vld [vmem:[%s12400_s1 + $0x1260] ss:$12 sps:$4 sm:$0xff]   ;;  %v8961_v22 = vld [vmem:[%s12400_s1 + $0x1218] ss:$12 sps:$4 sm:$0xff]   ;;  %v8974_v42 = vld [vmem:[%s12400_s1 + $0x230] ss:$12 sps:$4 sm:$0xff]  }
 0x188   :  { %7817 = vmatpush3.bf16.msra.mxu1 %v8934_v24  ;;  %v10857_v46 = vpop.f32.mrf.mxu0  ;;  %4994 = vmatprep.subr.bf16.mxu0 %v8940_v27  ;;  %v8965_v24 = vld [vmem:[%s12400_s1 + $0x20] ss:$12 sps:$4 sm:$0xff]   ;;  %v8968_v25 = vld [vmem:[%s12400_s1 + $0x1204] ss:$12 sps:$4 sm:$0xff]   ;;  %v8969_v27 = vld [vmem:[%s12400_s1 + $0xc8] ss:$12 sps:$4 sm:$0xff]  }
 0x189   :  { %v10859_v58 = vpop.f32.mrf.mxu1  ;;  %7818 = vmatprep.subr.bf16.mxu1 %v8941_v52  ;;  %v10865_v51 = vadd.f32 %v4657_v43, %v4605_v20  ;;  %v8970_v52 = vld [vmem:[%s12400_s1 + $0x8] ss:$12 sps:$4 sm:$0xff]   ;;  %v8975_v43 = vld [vmem:[%s12400_s1 + $0x3b0] ss:$12 sps:$4 sm:$0xff]   ;;  %v8977_v20 = vld [vmem:[%s12400_s1 + $0x458] ss:$12 sps:$4 sm:$0xff]  }
 0x18a   :  { %v4610_v0 = vpop.f32.mrf.mxu0  ;;  %4927 = vmatmul.mubr.bf16.gmra.mxu0 %v8937_v31  ;;  %v8966_v31 = vld [vmem:[%s12400_s1 + $0x1200] ss:$12 sps:$4 sm:$0xff]  }
 0x18b   :  { %v4663_v54 = vpop.f32.mrf.mxu1  ;;  %4980 = vmatmul.mubr.bf16.gmra.mxu1 %v8945_v44  ;;  %v4611_v57 = vadd.f32 %v4610_v0, %v10643_v2  ;;  %4995 = vmatpush1.bf16.msra.mxu0 %v8938_v38  ;;  %v8951_v2 = vld [vmem:[%s12400_s1 + $0x1248] ss:$12 sps:$4 sm:$0xff]   ;;  %v8971_v38 = vld [vmem:[%s12401_s0 + $0x60] ss:$100 sps:$4 sm:$0xff]  }
 0x18c   :  { %7819 = vmatpush3.bf16.msra.mxu1 %v8944_v39  ;;  %v4612_v59 = vpop.f32.mrf.mxu0  ;;  %4996 = vmatprep.subr.bf16.mxu0 %v8948_v45  ;;  %v8973_v39 = vld [vmem:[%s12400_s1 + $0x470] ss:$12 sps:$4 sm:$0xff]   ;;  %v8976_v44 = vld [vmem:[%s12400_s1 + $0x2d8] ss:$12 sps:$4 sm:$0xff]   ;;  %v8980_v0 = vld [vmem:[%s12401_s0 + $0x128] ss:$100 sps:$4 sm:$0xff]  }
 0x18d   :  { %v4665_v60 = vpop.f32.mrf.mxu1  ;;  %7820 = vmatprep.subr.bf16.mxu1 %v8949_v47  ;;  %v4613_v62 = vadd.f32 %v4612_v59, %v10652_v7  ;;  %v10881_v63 = vadd.f32 %v4663_v54, %v4611_v57  ;;  %5022 = vmatprep.mubr.bf16.mxu0 %v12411_v1  ;;  %v8955_v7 = vld [vmem:[%s12400_s1 + $0x50] ss:$12 sps:$4 sm:$0xff]   ;;  %v8978_v45 = vld [vmem:[%s12400_s1 + $0x218] ss:$12 sps:$4 sm:$0xff]   ;;  %v8982_v54 = vld [vmem:[%s12400_s1 + $0x440] ss:$12 sps:$4 sm:$0xff]  }
 0x18e   :  { %5075 = vmatprep.mubr.bf16.mxu1 %v9341_v26  ;;  %v4614_v3 = vpop.f32.mrf.mxu0  ;;  %v9342_v47 = vld [vmem:[%s12401_s0] ss:$100 sps:$4 sm:$0xff]   ;;  %v8986_v59 = vld [vmem:[%s12400_s1 + $0x428] ss:$12 sps:$4 sm:$0xff]   ;;  %v8990_v26 = vld [vmem:[%s12400_s1 + $0x410] ss:$12 sps:$4 sm:$0xff]  }
 0x18f   :  { %v4667_v4 = vpop.f32.mrf.mxu1  ;;  %v4615_v6 = vadd.f32 %v4614_v3, %v10660_v10  ;;  %v10895_v32 = vadd.f32 %v4665_v60, %v4613_v62  ;;  %4997 = vmatpush1.bf16.msra.mxu0 %v8946_v53  ;;  %v8956_v10 = vld [vmem:[%s12400_s1 + $0x1230] ss:$12 sps:$4 sm:$0xff]   ;;  %v8981_v53 = vld [vmem:[%s12400_s1 + $0x2c0] ss:$12 sps:$4 sm:$0xff]   ;;  %v8987_v60 = vld [vmem:[%s12400_s1 + $0x1e8] ss:$12 sps:$4 sm:$0xff]  }
 0x190   :  { %7821 = vmatpush3.bf16.msra.mxu1 %v8950_v55  ;;  %v4616_v37 = vpop.f32.mrf.mxu0  ;;  %4998 = vmatprep.subr.bf16.mxu0 %v8953_v21  ;;  %v8983_v55 = vld [vmem:[%s12400_s1 + $0x200] ss:$12 sps:$4 sm:$0xff]   ;;  %v8985_v21 = vld [vmem:[%s12400_s1 + $0x2a8] ss:$12 sps:$4 sm:$0xff]   ;;  %v8991_v3 = vld [vmem:[%s12400_s1 + $0x1d0] ss:$12 sps:$4 sm:$0xff]  }
 0x191   :  { %v4669_v11 = vpop.f32.mrf.mxu1  ;;  %7822 = vmatprep.subr.bf16.mxu1 %v8954_v61  ;;  %v4617_v13 = vadd.f32 %v4616_v37, %v4564_v5  ;;  %v10903_v14 = vadd.f32 %v4667_v4, %v4615_v6  ;;  %v8984_v57 = vld [vmem:[%s12400_s1 + $0x380] ss:$12 sps:$4 sm:$0xff]   ;;  %v8988_v61 = vld [vmem:[%s12400_s1 + $0x368] ss:$12 sps:$4 sm:$0xff]   ;;  %v8992_v5 = vld [vmem:[%s12400_s1 + $0x350] ss:$12 sps:$4 sm:$0xff]  }
 0x192   :  { %v9344_v62 = vld [vmem:[%s12401_s0 + $0xc8] ss:$100 sps:$4 sm:$0xff]   ;;  %v8993_v6 = vld [vmem:[%s12400_s1 + $0x278] ss:$12 sps:$4 sm:$0xff]  }
 0x193   :  { %v10911_v17 = vadd.f32 %v4669_v11, %v4617_v13  ;;  %4999 = vmatpush1.bf16.msra.mxu0 %v8951_v2  ;;  %v8989_v2 = vld [vmem:[%s12400_s1 + $0x290] ss:$12 sps:$4 sm:$0xff]   ;;  %v8995_v37 = vld [vmem:[%s12400_s1 + $0x1b8] ss:$12 sps:$4 sm:$0xff]   ;;  %v8998_v13 = vld [vmem:[%s12400_s1 + $0x3e0] ss:$12 sps:$4 sm:$0xff]  }
 0x194   :  { %7823 = vmatpush3.bf16.msra.mxu1 %v8955_v7  ;;  %5000 = vmatprep.subr.bf16.mxu0 %v8958_v8  ;;  %v9345_v4 = vld [vmem:[%s12401_s0 + $0xc] ss:$100 sps:$4 sm:$0xff]   ;;  %v9346_v7 = vld [vmem:[%s12401_s0 + $0x14] ss:$100 sps:$4 sm:$0xff]  }
 0x195   :  { %7824 = vmatprep.subr.bf16.mxu1 %v8959_v12  ;;  %v8994_v8 = vld [vmem:[%s12400_s1 + $0x3f8] ss:$12 sps:$4 sm:$0xff]   ;;  %v8997_v12 = vld [vmem:[%s12400_s1 + $0x260] ss:$12 sps:$4 sm:$0xff]  }
 0x196   :  { %v8996_v11 = vld [vmem:[%s12400_s1 + $0x338] ss:$12 sps:$4 sm:$0xff]  }
 0x197   :  { %5001 = vmatpush1.bf16.msra.mxu0 %v8956_v10  ;;  %v8999_v10 = vld [vmem:[%s12400_s1 + $0x1a0] ss:$12 sps:$4 sm:$0xff]  }
 0x198   :  { %7825 = vmatpush3.bf16.msra.mxu1 %v8960_v15  ;;  %5002 = vmatprep.subr.bf16.mxu0 %v8963_v18  ;;  %v9000_v15 = vld [vmem:[%s12400_s1 + $0x320] ss:$12 sps:$4 sm:$0xff]   ;;  %v9001_v18 = vld [vmem:[%s12400_s1 + $0x248] ss:$12 sps:$4 sm:$0xff]  }
 0x199   :  { %7826 = vmatprep.subr.bf16.mxu1 %v8964_v19  ;;  %v9002_v19 = vld [vmem:[%s12400_s1 + $0x3c8] ss:$12 sps:$4 sm:$0xff]  }
 0x19b   :  { %5003 = vmatpush1.bf16.msra.mxu0 %v8961_v22  ;;  %v9003_v22 = vld [vmem:[%s12400_s1 + $0x188] ss:$12 sps:$4 sm:$0xff]  }
 0x19c   :  { %7827 = vmatpush3.bf16.msra.mxu1 %v8965_v24  ;;  %5004 = vmatprep.subr.bf16.mxu0 %v8968_v25  ;;  %v9004_v24 = vld [vmem:[%s12400_s1 + $0x308] ss:$12 sps:$4 sm:$0xff]   ;;  %v9005_v25 = vld [vmem:[%s12400_s1 + $0x5f0] ss:$12 sps:$4 sm:$0xff]  }
 0x19d   :  { %7828 = vmatprep.subr.bf16.mxu1 %v8969_v27  ;;  %v9006_v27 = vld [vmem:[%s12400_s1 + $0x770] ss:$12 sps:$4 sm:$0xff]  }
 0x19f   :  { %5005 = vmatpush1.bf16.msra.mxu0 %v8966_v31  ;;  %v9007_v31 = vld [vmem:[%s12400_s1 + $0x530] ss:$12 sps:$4 sm:$0xff]  }
 0x1a0   :  { %7829 = vmatpush3.bf16.msra.mxu1 %v8970_v52  ;;  %7842 = vmatprep.subr.bf16.mxu0 %v8972_v33  ;;  %v9008_v52 = vld [vmem:[%s12400_s1 + $0x6b0] ss:$12 sps:$4 sm:$0xff]   ;;  %v9009_v33 = vld [vmem:[%s12400_s1 + $0x5d8] ss:$12 sps:$4 sm:$0xff]  }
 0x1a1   :  { %7870 = vmatprep.subr.bf16.mxu1 %v8973_v39  ;;  %v9011_v39 = vld [vmem:[%s12400_s1 + $0x518] ss:$12 sps:$4 sm:$0xff]  }
 0x1a2   :  { %5023 = vmatmul.mubr.bf16.vlgmr.msra.gmra.mxu0 %v8971_v38  ;;  %v9010_v38 = vld [vmem:[%s12400_s1 + $0x758] ss:$12 sps:$4 sm:$0xff]  }
 0x1a3   :  { %5076 = vmatmul.mubr.bf16.vlgmr.msra.gmra.mxu1 %v9342_v47  ;;  %7843 = vmatpush3.bf16.msra.mxu0 %v8974_v42 }
 0x1a4   :  { %7871 = vmatpush3.bf16.msra.mxu1 %v8975_v43  ;;  %7844 = vmatprep.subr.bf16.mxu0 %v8976_v44  ;;  %v9347_v44 = vld [vmem:[%s12401_s0 + $0x8] ss:$100 sps:$4 sm:$0xff]  }
 0x1a5   :  { %7872 = vmatprep.subr.bf16.mxu1 %v8977_v20  ;;  %5032 = vmatprep.mubr.bf16.mxu0 %v12411_v1  ;;  %v9348_v20 = vld [vmem:[%s12401_s0 + $0x10] ss:$100 sps:$4 sm:$0xff]  }
 0x1a6   :  { %5083 = vmatprep.mubr.bf16.mxu1 %v9343_v56  ;;  %v9350_v56 = vld [vmem:[%s12401_s0 + $0xdc] ss:$100 sps:$4 sm:$0xff]  }
 0x1a7   :  { %7845 = vmatpush3.bf16.msra.mxu0 %v8978_v45  ;;  %v9012_v45 = vld [vmem:[%s12400_s1 + $0x698] ss:$12 sps:$4 sm:$0xff]  }
 0x1a8   :  { %7873 = vmatpush3.bf16.msra.mxu1 %v8979_v48  ;;  %7846 = vmatprep.subr.bf16.mxu0 %v8981_v53  ;;  %v9013_v48 = vld [vmem:[%s12400_s1 + $0x5c0] ss:$12 sps:$4 sm:$0xff]  }
 0x1a9   :  { %7874 = vmatprep.subr.bf16.mxu1 %v8982_v54  ;;  %v9014_v54 = vld [vmem:[%s12400_s1 + $0x740] ss:$12 sps:$4 sm:$0xff]  }
 0x1aa   :  { %5033 = vmatmul.mubr.bf16.gmra.mxu0 %v8980_v0 }
 0x1ab   :  { %5084 = vmatmul.mubr.bf16.gmra.mxu1 %v9344_v62  ;;  %7847 = vmatpush3.bf16.msra.mxu0 %v8983_v55  ;;  %v9017_v62 = vld [vmem:[%s12400_s1 + $0x5a8] ss:$12 sps:$4 sm:$0xff]  }
 0x1ac   :  { %7875 = vmatpush3.bf16.msra.mxu1 %v8984_v57  ;;  %7848 = vmatprep.subr.bf16.mxu0 %v8985_v21  ;;  %v9015_v57 = vld [vmem:[%s12400_s1 + $0x500] ss:$12 sps:$4 sm:$0xff]  }
 0x1ad   :  { %7876 = vmatprep.subr.bf16.mxu1 %v8986_v59  ;;  %5124 = vmatprep.mubr.bf16.mxu0 %v9345_v4 }
 0x1ae   :  { %5173 = vmatprep.mubr.bf16.mxu1 %v9346_v7 }
 0x1af   :  { %7849 = vmatpush3.bf16.msra.mxu0 %v8987_v60  ;;  %v9016_v60 = vld [vmem:[%s12400_s1 + $0x680] ss:$12 sps:$4 sm:$0xff]  }
 0x1b0   :  { %7877 = vmatpush3.bf16.msra.mxu1 %v8988_v61  ;;  %7850 = vmatprep.subr.bf16.mxu0 %v8989_v2 }
 0x1b1   :  { %7878 = vmatprep.subr.bf16.mxu1 %v8990_v26 }
 0x1b3   :  { %7851 = vmatpush3.bf16.msra.mxu0 %v8991_v3  ;;  %v9018_v3 = vld [vmem:[%s12400_s1 + $0x728] ss:$12 sps:$4 sm:$0xff]  }
 0x1b4   :  { %7879 = vmatpush3.bf16.msra.mxu1 %v8992_v5  ;;  %7852 = vmatprep.subr.bf16.mxu0 %v8993_v6  ;;  %v9351_v5 = vld [vmem:[%s12401_s0 + $0xd0] ss:$100 sps:$4 sm:$0xff]  }
 0x1b5   :  { %7880 = vmatprep.subr.bf16.mxu1 %v8994_v8  ;;  %v9352_v8 = vld [vmem:[%s12401_s0 + $0xd8] ss:$100 sps:$4 sm:$0xff]  }
 0x1b7   :  { %7853 = vmatpush3.bf16.msra.mxu0 %v8995_v37  ;;  %v9020_v37 = vld [vmem:[%s12400_s1 + $0x668] ss:$12 sps:$4 sm:$0xff]  }
 0x1b8   :  { %7881 = vmatpush3.bf16.msra.mxu1 %v8996_v11  ;;  %7854 = vmatprep.subr.bf16.mxu0 %v8997_v12  ;;  %v9021_v12 = vld [vmem:[%s12400_s1 + $0x590] ss:$12 sps:$4 sm:$0xff]  }
 0x1b9   :  { %7882 = vmatprep.subr.bf16.mxu1 %v8998_v13 }
 0x1bb   :  { %7855 = vmatpush3.bf16.msra.mxu0 %v8999_v10 }
 0x1bc   :  { %7883 = vmatpush3.bf16.msra.mxu1 %v9000_v15  ;;  %7856 = vmatprep.subr.bf16.mxu0 %v9001_v18  ;;  %v9022_v15 = vld [vmem:[%s12400_s1 + $0x710] ss:$12 sps:$4 sm:$0xff]  }
 0x1bd   :  { %7884 = vmatprep.subr.bf16.mxu1 %v9002_v19 }
 0x1bf   :  { %7857 = vmatpush3.bf16.msra.mxu0 %v9003_v22  ;;  %v9353_v22 = vld [vmem:[%s12401_s0 + $0x1c] ss:$100 sps:$4 sm:$0xff]  }
 0x1c0   :  { %7885 = vmatpush3.bf16.msra.mxu1 %v9004_v24  ;;  %7898 = vmatprep.subr.bf16.mxu0 %v9005_v25  ;;  %v9354_v24 = vld [vmem:[%s12401_s0 + $0x24] ss:$100 sps:$4 sm:$0xff]  }
 0x1c1   :  { %7926 = vmatprep.subr.bf16.mxu1 %v9006_v27 }
 0x1c2   :  { %v4706_v42 = vpop.f32.mrf.mxu0  ;;  %5125 = vmatmul.mubr.bf16.vlgmr.msra.gmra.mxu0 %v9347_v44 }
 0x1c3   :  { %v4759_v43 = vpop.f32.mrf.mxu1  ;;  %5174 = vmatmul.mubr.bf16.vlgmr.msra.gmra.mxu1 %v9348_v20  ;;  %v4707_v47 = vadd.f32 %v4706_v42, %v10842_v35  ;;  %7899 = vmatpush3.bf16.msra.mxu0 %v9007_v31  ;;  %v9349_v35 = vld [vmem:[%s12401_s0 + $0xd4] ss:$100 sps:$4 sm:$0xff]  }
 0x1c4   :  { %7927 = vmatpush3.bf16.msra.mxu1 %v9008_v52  ;;  %v11089_v53 = vpop.f32.mrf.mxu0  ;;  %7900 = vmatprep.subr.bf16.mxu0 %v9009_v33  ;;  %v9025_v33 = vld [vmem:[%s12400_s1 + $0x578] ss:$12 sps:$4 sm:$0xff]  }
 0x1c5   :  { %v11091_v0 = vpop.f32.mrf.mxu1  ;;  %7928 = vmatprep.subr.bf16.mxu1 %v9010_v38  ;;  %v11096_v55 = vadd.f32 %v4759_v43, %v4707_v47  ;;  %5132 = vmatprep.mubr.bf16.mxu0 %v9349_v35  ;;  %v9026_v42 = vld [vmem:[%s12400_s1 + $0x6f8] ss:$12 sps:$4 sm:$0xff]   ;;  %v9029_v47 = vld [vmem:[%s12400_s1 + $0x560] ss:$12 sps:$4 sm:$0xff]   ;;  %v9033_v35 = vld [vmem:[%s12400_s1 + $0x548] ss:$12 sps:$4 sm:$0xff]  }
 0x1c6   :  { %5181 = vmatprep.mubr.bf16.mxu1 %v9350_v56  ;;  %v4710_v21 = vpop.f32.mrf.mxu0  ;;  %v9028_v20 = vld [vmem:[%s12400_s1 + $0x638] ss:$12 sps:$4 sm:$0xff]   ;;  %v9034_v56 = vld [vmem:[%s12400_s1 + $0x6c8] ss:$12 sps:$4 sm:$0xff]  }
 0x1c7   :  { %v4763_v59 = vpop.f32.mrf.mxu1  ;;  %v4711_v61 = vadd.f32 %v4710_v21, %v10865_v51  ;;  %7901 = vmatpush3.bf16.msra.mxu0 %v9011_v39  ;;  %v9019_v51 = vld [vmem:[%s12400_s1 + $0x4e8] ss:$12 sps:$4 sm:$0xff]  }
 0x1c8   :  { %7929 = vmatpush3.bf16.msra.mxu1 %v9012_v45  ;;  %v11114_v2 = vpop.f32.mrf.mxu0  ;;  %7902 = vmatprep.subr.bf16.mxu0 %v9013_v48  ;;  %v9031_v48 = vld [vmem:[%s12400_s1 + $0x4a0] ss:$12 sps:$4 sm:$0xff]   ;;  %v9036_v21 = vld [vmem:[%s12400_s1 + $0x608] ss:$12 sps:$4 sm:$0xff]  }
 0x1c9   :  { %v11116_v26 = vpop.f32.mrf.mxu1  ;;  %7930 = vmatprep.subr.bf16.mxu1 %v9014_v54  ;;  %v11121_v4 = vadd.f32 %v4763_v59, %v4711_v61  ;;  %v9032_v54 = vld [vmem:[%s12400_s1 + $0x620] ss:$12 sps:$4 sm:$0xff]   ;;  %v9037_v59 = vld [vmem:[%s12400_s1 + $0x8f0] ss:$12 sps:$4 sm:$0xff]  }
 0x1ca   :  { %v4716_v7 = vpop.f32.mrf.mxu0  ;;  %5133 = vmatmul.mubr.bf16.gmra.mxu0 %v9351_v5  ;;  %v9039_v61 = vld [vmem:[%s12400_s1 + $0x830] ss:$12 sps:$4 sm:$0xff]  }
 0x1cb   :  { %v4769_v6 = vpop.f32.mrf.mxu1  ;;  %5182 = vmatmul.mubr.bf16.gmra.mxu1 %v9352_v8  ;;  %v4717_v11 = vadd.f32 %v4716_v7, %v10881_v63  ;;  %7903 = vmatpush3.bf16.msra.mxu0 %v9015_v57  ;;  %v9023_v63 = vld [vmem:[%s12400_s1 + $0x4d0] ss:$12 sps:$4 sm:$0xff]   ;;  %v9035_v57 = vld [vmem:[%s12400_s1 + $0x488] ss:$12 sps:$4 sm:$0xff]   ;;  %v9043_v7 = vld [vmem:[%s12400_s1 + $0x818] ss:$12 sps:$4 sm:$0xff]  }
 0x1cc   :  { %7931 = vmatpush3.bf16.msra.mxu1 %v9016_v60  ;;  %v4718_v13 = vpop.f32.mrf.mxu0  ;;  %7904 = vmatprep.subr.bf16.mxu0 %v9017_v62  ;;  %v9038_v60 = vld [vmem:[%s12400_s1 + $0xa70] ss:$12 sps:$4 sm:$0xff]   ;;  %v9044_v8 = vld [vmem:[%s12400_s1 + $0x998] ss:$12 sps:$4 sm:$0xff]  }
 0x1cd   :  { %v4771_v10 = vpop.f32.mrf.mxu1  ;;  %7932 = vmatprep.subr.bf16.mxu1 %v9018_v3  ;;  %v4719_v18 = vadd.f32 %v4718_v13, %v10895_v32  ;;  %v11143_v19 = vadd.f32 %v4769_v6, %v4717_v11  ;;  %5222 = vmatprep.mubr.bf16.mxu0 %v9353_v22  ;;  %v9024_v32 = vld [vmem:[%s12400_s1 + $0x650] ss:$12 sps:$4 sm:$0xff]   ;;  %v9041_v3 = vld [vmem:[%s12400_s1 + $0x8d8] ss:$12 sps:$4 sm:$0xff]   ;;  %v9046_v11 = vld [vmem:[%s12400_s1 + $0xa40] ss:$12 sps:$4 sm:$0xff]  }
 0x1ce   :  { %5271 = vmatprep.mubr.bf16.mxu1 %v9354_v24  ;;  %v4720_v25 = vpop.f32.mrf.mxu0  ;;  %v9040_v62 = vld [vmem:[%s12400_s1 + $0x9b0] ss:$12 sps:$4 sm:$0xff]   ;;  %v9356_v6 = vld [vmem:[%s12401_s0 + $0x20] ss:$100 sps:$4 sm:$0xff]   ;;  %v9051_v22 = vld [vmem:[%s12400_s1 + $0x7e8] ss:$12 sps:$4 sm:$0xff]  }
 0x1cf   :  { %v4773_v27 = vpop.f32.mrf.mxu1  ;;  %v4721_v31 = vadd.f32 %v4720_v25, %v10903_v14  ;;  %v11158_v52 = vadd.f32 %v4771_v10, %v4719_v18  ;;  %7905 = vmatpush3.bf16.msra.mxu0 %v9019_v51  ;;  %v9027_v14 = vld [vmem:[%s12400_s1 + $0x4b8] ss:$12 sps:$4 sm:$0xff]   ;;  %v9358_v13 = vld [vmem:[%s12401_s0 + $0xec] ss:$100 sps:$4 sm:$0xff]   ;;  %v9049_v18 = vld [vmem:[%s12400_s1 + $0x8a8] ss:$12 sps:$4 sm:$0xff]  }
 0x1d0   :  { %7933 = vmatpush3.bf16.msra.mxu1 %v9020_v37  ;;  %v4722_v38 = vpop.f32.mrf.mxu0  ;;  %7906 = vmatprep.subr.bf16.mxu0 %v9021_v12  ;;  %v9042_v51 = vld [vmem:[%s12400_s1 + $0xa58] ss:$12 sps:$4 sm:$0xff]   ;;  %v9045_v37 = vld [vmem:[%s12400_s1 + $0x8c0] ss:$12 sps:$4 sm:$0xff]  }
 0x1d1   :  { %v4775_v39 = vpop.f32.mrf.mxu1  ;;  %7934 = vmatprep.subr.bf16.mxu1 %v9022_v15  ;;  %v4723_v43 = vadd.f32 %v4722_v38, %v10911_v17  ;;  %v11167_v44 = vadd.f32 %v4773_v27, %v4721_v31  ;;  %v9030_v17 = vld [vmem:[%s12400_s1 + $0x6e0] ss:$12 sps:$4 sm:$0xff]   ;;  %v9355_v5 = vld [vmem:[%s12401_s0 + $0x18] ss:$100 sps:$4 sm:$0xff]   ;;  %v9357_v12 = vld [vmem:[%s12401_s0 + $0xe4] ss:$100 sps:$4 sm:$0xff]  }
 0x1d2   :  { %v9047_v10 = vld [vmem:[%s12400_s1 + $0x800] ss:$12 sps:$4 sm:$0xff]   ;;  %v9052_v27 = vld [vmem:[%s12400_s1 + $0x968] ss:$12 sps:$4 sm:$0xff]   ;;  %v9054_v31 = vld [vmem:[%s12400_s1 + $0xa10] ss:$12 sps:$4 sm:$0xff]  }
 0x1d3   :  { %v11175_v45 = vadd.f32 %v4775_v39, %v4723_v43  ;;  %7907 = vmatpush3.bf16.msra.mxu0 %v9023_v63  ;;  %v9048_v15 = vld [vmem:[%s12400_s1 + $0x980] ss:$12 sps:$4 sm:$0xff]   ;;  %v9050_v63 = vld [vmem:[%s12400_s1 + $0xa28] ss:$12 sps:$4 sm:$0xff]   ;;  %v9057_v43 = vld [vmem:[%s12400_s1 + $0x878] ss:$12 sps:$4 sm:$0xff]  }
 0x1d4   :  { %7935 = vmatpush3.bf16.msra.mxu1 %v9024_v32  ;;  %7908 = vmatprep.subr.bf16.mxu0 %v9025_v33  ;;  %v9359_v24 = vld [vmem:[%s12401_s0 + $0xe0] ss:$100 sps:$4 sm:$0xff]   ;;  %v9360_v25 = vld [vmem:[%s12401_s0 + $0xe8] ss:$100 sps:$4 sm:$0xff]   ;;  %v9053_v32 = vld [vmem:[%s12400_s1 + $0x890] ss:$12 sps:$4 sm:$0xff]  }
 0x1d5   :  { %7936 = vmatprep.subr.bf16.mxu1 %v9026_v42  ;;  %v9055_v33 = vld [vmem:[%s12400_s1 + $0x7d0] ss:$12 sps:$4 sm:$0xff]   ;;  %v9362_v39 = vld [vmem:[%s12401_s0 + $0x34] ss:$100 sps:$4 sm:$0xff]  }
 0x1d6   :  { %v9361_v38 = vld [vmem:[%s12401_s0 + $0x2c] ss:$100 sps:$4 sm:$0xff]  }
 0x1d7   :  { %7909 = vmatpush3.bf16.msra.mxu0 %v9027_v14  ;;  %v9056_v42 = vld [vmem:[%s12400_s1 + $0x950] ss:$12 sps:$4 sm:$0xff]   ;;  %v9058_v14 = vld [vmem:[%s12400_s1 + $0x9f8] ss:$12 sps:$4 sm:$0xff]  }
 0x1d8   :  { %7937 = vmatpush3.bf16.msra.mxu1 %v9028_v20  ;;  %7910 = vmatprep.subr.bf16.mxu0 %v9029_v47  ;;  %v9059_v20 = vld [vmem:[%s12400_s1 + $0x7b8] ss:$12 sps:$4 sm:$0xff]  }
 0x1d9   :  { %7938 = vmatprep.subr.bf16.mxu1 %v9030_v17  ;;  %v9060_v47 = vld [vmem:[%s12400_s1 + $0x938] ss:$12 sps:$4 sm:$0xff]   ;;  %v9061_v17 = vld [vmem:[%s12400_s1 + $0x860] ss:$12 sps:$4 sm:$0xff]  }
 0x1db   :  { %7911 = vmatpush3.bf16.msra.mxu0 %v9031_v48  ;;  %v9062_v48 = vld [vmem:[%s12400_s1 + $0x9e0] ss:$12 sps:$4 sm:$0xff]  }
 0x1dc   :  { %7939 = vmatpush3.bf16.msra.mxu1 %v9032_v54  ;;  %7912 = vmatprep.subr.bf16.mxu0 %v9033_v35  ;;  %v9063_v54 = vld [vmem:[%s12400_s1 + $0x7a0] ss:$12 sps:$4 sm:$0xff]  }
 0x1dd   :  { %7940 = vmatprep.subr.bf16.mxu1 %v9034_v56  ;;  %v9064_v35 = vld [vmem:[%s12400_s1 + $0x920] ss:$12 sps:$4 sm:$0xff]   ;;  %v9065_v56 = vld [vmem:[%s12400_s1 + $0x848] ss:$12 sps:$4 sm:$0xff]  }
 0x1df   :  { %7913 = vmatpush3.bf16.msra.mxu0 %v9035_v57  ;;  %v9066_v57 = vld [vmem:[%s12400_s1 + $0x9c8] ss:$12 sps:$4 sm:$0xff]  }
 0x1e0   :  { %7941 = vmatpush3.bf16.msra.mxu1 %v9036_v21  ;;  %7954 = vmatprep.subr.bf16.mxu0 %v9037_v59  ;;  %v9067_v21 = vld [vmem:[%s12400_s1 + $0x788] ss:$12 sps:$4 sm:$0xff]  }
 0x1e1   :  { %7982 = vmatprep.subr.bf16.mxu1 %v9038_v60  ;;  %v9068_v59 = vld [vmem:[%s12400_s1 + $0x908] ss:$12 sps:$4 sm:$0xff]   ;;  %v9069_v60 = vld [vmem:[%s12400_s1 + $0xbf0] ss:$12 sps:$4 sm:$0xff]  }
 0x1e2   :  { %5223 = vmatmul.mubr.bf16.vlgmr.msra.gmra.mxu0 %v9355_v5  ;;  %v9075_v5 = vld [vmem:[%s12400_s1 + $0xb18] ss:$12 sps:$4 sm:$0xff]  }
 0x1e3   :  { %5272 = vmatmul.mubr.bf16.vlgmr.msra.gmra.mxu1 %v9356_v6  ;;  %7955 = vmatpush3.bf16.msra.mxu0 %v9039_v61  ;;  %v9070_v61 = vld [vmem:[%s12400_s1 + $0xd70] ss:$12 sps:$4 sm:$0xff]   ;;  %v9076_v6 = vld [vmem:[%s12400_s1 + $0xc98] ss:$12 sps:$4 sm:$0xff]  }
 0x1e4   :  { %7983 = vmatpush3.bf16.msra.mxu1 %v9040_v62  ;;  %7956 = vmatprep.subr.bf16.mxu0 %v9041_v3  ;;  %v9071_v62 = vld [vmem:[%s12400_s1 + $0xb30] ss:$12 sps:$4 sm:$0xff]  }
 0x1e5   :  { %7984 = vmatprep.subr.bf16.mxu1 %v9042_v51  ;;  %5230 = vmatprep.mubr.bf16.mxu0 %v9357_v12  ;;  %v9072_v3 = vld [vmem:[%s12400_s1 + $0xcb0] ss:$12 sps:$4 sm:$0xff]   ;;  %v9073_v51 = vld [vmem:[%s12400_s1 + $0xbd8] ss:$12 sps:$4 sm:$0xff]  }
 0x1e6   :  { %5279 = vmatprep.mubr.bf16.mxu1 %v9358_v13  ;;  %v9364_v12 = vld [vmem:[%s12401_s0 + $0x30] ss:$100 sps:$4 sm:$0xff]   ;;  %v9077_v13 = vld [vmem:[%s12400_s1 + $0xbc0] ss:$12 sps:$4 sm:$0xff]  }
 0x1e7   :  { %7957 = vmatpush3.bf16.msra.mxu0 %v9043_v7  ;;  %v9074_v7 = vld [vmem:[%s12400_s1 + $0xd58] ss:$12 sps:$4 sm:$0xff]  }
 0x1e8   :  { %7985 = vmatpush3.bf16.msra.mxu1 %v9044_v8  ;;  %7958 = vmatprep.subr.bf16.mxu0 %v9045_v37 }
 0x1e9   :  { %7986 = vmatprep.subr.bf16.mxu1 %v9046_v11  ;;  %v9363_v11 = vld [vmem:[%s12401_s0 + $0x28] ss:$100 sps:$4 sm:$0xff]  }
 0x1ea   :  { %5231 = vmatmul.mubr.bf16.gmra.mxu0 %v9359_v24  ;;  %v9365_v24 = vld [vmem:[%s12401_s0 + $0xf4] ss:$100 sps:$4 sm:$0xff]  }
 0x1eb   :  { %5280 = vmatmul.mubr.bf16.gmra.mxu1 %v9360_v25  ;;  %7959 = vmatpush3.bf16.msra.mxu0 %v9047_v10  ;;  %v9079_v25 = vld [vmem:[%s12400_s1 + $0xb00] ss:$12 sps:$4 sm:$0xff]  }
 0x1ec   :  { %7987 = vmatpush3.bf16.msra.mxu1 %v9048_v15  ;;  %7960 = vmatprep.subr.bf16.mxu0 %v9049_v18 }
 0x1ed   :  { %7988 = vmatprep.subr.bf16.mxu1 %v9050_v63  ;;  %5320 = vmatprep.mubr.bf16.mxu0 %v9361_v38  ;;  %v9078_v63 = vld [vmem:[%s12400_s1 + $0xd40] ss:$12 sps:$4 sm:$0xff]  }
 0x1ee   :  { %5369 = vmatprep.mubr.bf16.mxu1 %v9362_v39 }
 0x1ef   :  { %7961 = vmatpush3.bf16.msra.mxu0 %v9051_v22 }
 0x1f0   :  { %7989 = vmatpush3.bf16.msra.mxu1 %v9052_v27  ;;  %7962 = vmatprep.subr.bf16.mxu0 %v9053_v32  ;;  %v9080_v27 = vld [vmem:[%s12400_s1 + $0xc80] ss:$12 sps:$4 sm:$0xff]  }
 0x1f1   :  { %7990 = vmatprep.subr.bf16.mxu1 %v9054_v31 }
 0x1f3   :  { %7963 = vmatpush3.bf16.msra.mxu0 %v9055_v33  ;;  %v9081_v33 = vld [vmem:[%s12400_s1 + $0xba8] ss:$12 sps:$4 sm:$0xff]  }
 0x1f4   :  { %7991 = vmatpush3.bf16.msra.mxu1 %v9056_v42  ;;  %7964 = vmatprep.subr.bf16.mxu0 %v9057_v43  ;;  %v9082_v43 = vld [vmem:[%s12400_s1 + $0xd28] ss:$12 sps:$4 sm:$0xff]  }
 0x1f5   :  { %7992 = vmatprep.subr.bf16.mxu1 %v9058_v14 }
 0x1f7   :  { %7965 = vmatpush3.bf16.msra.mxu0 %v9059_v20  ;;  %v9083_v20 = vld [vmem:[%s12400_s1 + $0xae8] ss:$12 sps:$4 sm:$0xff]  }
 0x1f8   :  { %7993 = vmatpush3.bf16.msra.mxu1 %v9060_v47  ;;  %7966 = vmatprep.subr.bf16.mxu0 %v9061_v17  ;;  %v9367_v17 = vld [vmem:[%s12401_s0 + $0xf0] ss:$100 sps:$4 sm:$0xff]  }
 0x1f9   :  { %7994 = vmatprep.subr.bf16.mxu1 %v9062_v48 }
 0x1fb   :  { %7967 = vmatpush3.bf16.msra.mxu0 %v9063_v54  ;;  %v9368_v54 = vld [vmem:[%s12401_s0 + $0xf8] ss:$100 sps:$4 sm:$0xff]  }
 0x1fc   :  { %7995 = vmatpush3.bf16.msra.mxu1 %v9064_v35  ;;  %7968 = vmatprep.subr.bf16.mxu0 %v9065_v56  ;;  %v9085_v35 = vld [vmem:[%s12400_s1 + $0xb90] ss:$12 sps:$4 sm:$0xff]  }
 0x1fd   :  { %7996 = vmatprep.subr.bf16.mxu1 %v9066_v57 }
 0x1ff   :  { %7969 = vmatpush3.bf16.msra.mxu0 %v9067_v21 }
 0x200   :  { %7997 = vmatpush3.bf16.msra.mxu1 %v9068_v59  ;;  %8010 = vmatprep.subr.bf16.mxu0 %v9069_v60  ;;  %v9086_v59 = vld [vmem:[%s12400_s1 + $0xd10] ss:$12 sps:$4 sm:$0xff]  }
 0x201   :  { %8038 = vmatprep.subr.bf16.mxu1 %v9070_v61 }
 0x202   :  { %v4812_v8 = vpop.f32.mrf.mxu0  ;;  %5321 = vmatmul.mubr.bf16.vlgmr.msra.gmra.mxu0 %v9363_v11 }
 0x203   :  { %v4865_v37 = vpop.f32.mrf.mxu1  ;;  %5370 = vmatmul.mubr.bf16.vlgmr.msra.gmra.mxu1 %v9364_v12  ;;  %v4813_v10 = vadd.f32 %v4812_v8, %v11096_v55  ;;  %8011 = vmatpush3.bf16.msra.mxu0 %v9071_v62  ;;  %v9366_v55 = vld [vmem:[%s12401_s0 + $0xfc] ss:$100 sps:$4 sm:$0xff]  }
 0x204   :  { %8039 = vmatpush3.bf16.msra.mxu1 %v9072_v3  ;;  %v11355_v15 = vpop.f32.mrf.mxu0  ;;  %8012 = vmatprep.subr.bf16.mxu0 %v9073_v51  ;;  %v9088_v62 = vld [vmem:[%s12400_s1 + $0xc50] ss:$12 sps:$4 sm:$0xff]  }
 0x205   :  { %v11357_v18 = vpop.f32.mrf.mxu1  ;;  %8040 = vmatprep.subr.bf16.mxu1 %v9074_v7  ;;  %v11362_v22 = vadd.f32 %v4865_v37, %v4813_v10  ;;  %5328 = vmatprep.mubr.bf16.mxu0 %v9365_v24  ;;  %v9369_v3 = vld [vmem:[%s12401_s0 + $0x3c] ss:$100 sps:$4 sm:$0xff]   ;;  %v9090_v37 = vld [vmem:[%s12400_s1 + $0xcf8] ss:$12 sps:$4 sm:$0xff]  }
 0x206   :  { %5377 = vmatprep.mubr.bf16.mxu1 %v9366_v55  ;;  %v4816_v32 = vpop.f32.mrf.mxu0  ;;  %v9093_v10 = vld [vmem:[%s12400_s1 + $0xb60] ss:$12 sps:$4 sm:$0xff]   ;;  %v9097_v55 = vld [vmem:[%s12400_s1 + $0xb48] ss:$12 sps:$4 sm:$0xff]  }
 0x207   :  { %v4869_v31 = vpop.f32.mrf.mxu1  ;;  %v4817_v38 = vadd.f32 %v4816_v32, %v11121_v4  ;;  %8013 = vmatpush3.bf16.msra.mxu0 %v9075_v5  ;;  %v9084_v4 = vld [vmem:[%s12400_s1 + $0xc68] ss:$12 sps:$4 sm:$0xff]   ;;  %v9089_v5 = vld [vmem:[%s12400_s1 + $0xb78] ss:$12 sps:$4 sm:$0xff]   ;;  %v9096_v24 = vld [vmem:[%s12400_s1 + $0xc20] ss:$12 sps:$4 sm:$0xff]  }
 0x208   :  { %8041 = vmatpush3.bf16.msra.mxu1 %v9076_v6  ;;  %v11380_v39 = vpop.f32.mrf.mxu0  ;;  %8014 = vmatprep.subr.bf16.mxu0 %v9077_v13  ;;  %v9091_v13 = vld [vmem:[%s12400_s1 + $0xab8] ss:$12 sps:$4 sm:$0xff]   ;;  %v9100_v32 = vld [vmem:[%s12400_s1 + $0xc08] ss:$12 sps:$4 sm:$0xff]  }
 0x209   :  { %v11382_v42 = vpop.f32.mrf.mxu1  ;;  %8042 = vmatprep.subr.bf16.mxu1 %v9078_v63  ;;  %v11387_v14 = vadd.f32 %v4869_v31, %v4817_v38  ;;  %v9095_v63 = vld [vmem:[%s12400_s1 + $0xaa0] ss:$12 sps:$4 sm:$0xff]   ;;  %v9101_v31 = vld [vmem:[%s12400_s1 + $0xef0] ss:$12 sps:$4 sm:$0xff]  }
 0x20a   :  { %v4822_v47 = vpop.f32.mrf.mxu0  ;;  %5329 = vmatmul.mubr.bf16.gmra.mxu0 %v9367_v17  ;;  %v9103_v38 = vld [vmem:[%s12400_s1 + $0xe30] ss:$12 sps:$4 sm:$0xff]   ;;  %v9372_v17 = vld [vmem:[%s12401_s0 + $0x40] ss:$100 sps:$4 sm:$0xff]  }
 0x20b   :  { %v4875_v48 = vpop.f32.mrf.mxu1  ;;  %5378 = vmatmul.mubr.bf16.gmra.mxu1 %v9368_v54  ;;  %v4823_v56 = vadd.f32 %v4822_v47, %v11143_v19  ;;  %8015 = vmatpush3.bf16.msra.mxu0 %v9079_v25  ;;  %v9087_v19 = vld [vmem:[%s12400_s1 + $0xad0] ss:$12 sps:$4 sm:$0xff]   ;;  %v9098_v25 = vld [vmem:[%s12400_s1 + $0xcc8] ss:$12 sps:$4 sm:$0xff]   ;;  %v9108_v54 = vld [vmem:[%s12400_s1 + $0xf98] ss:$12 sps:$4 sm:$0xff]  }
 0x20c   :  { %8043 = vmatpush3.bf16.msra.mxu1 %v9080_v27  ;;  %v4824_v57 = vpop.f32.mrf.mxu0  ;;  %8016 = vmatprep.subr.bf16.mxu0 %v9081_v33  ;;  %v9099_v27 = vld [vmem:[%s12400_s1 + $0xa88] ss:$12 sps:$4 sm:$0xff]   ;;  %v9102_v33 = vld [vmem:[%s12400_s1 + $0x1070] ss:$12 sps:$4 sm:$0xff]  }
 0x20d   :  { %v11405_v21 = vpop.f32.mrf.mxu1  ;;  %8044 = vmatprep.subr.bf16.mxu1 %v9082_v43  ;;  %v11411_v60 = vadd.f32 %v4824_v57, %v11158_v52  ;;  %v11413_v61 = vadd.f32 %v4875_v48, %v4823_v56  ;;  %5418 = vmatprep.mubr.bf16.mxu0 %v9369_v3  ;;  %v9370_v52 = vld [vmem:[%s12401_s0 + $0x44] ss:$100 sps:$4 sm:$0xff]   ;;  %v9104_v43 = vld [vmem:[%s12400_s1 + $0xfb0] ss:$12 sps:$4 sm:$0xff]   ;;  %v9110_v56 = vld [vmem:[%s12400_s1 + $0x1040] ss:$12 sps:$4 sm:$0xff]  }
 0x20e   :  { %5467 = vmatprep.mubr.bf16.mxu1 %v9370_v52  ;;  %v4826_v51 = vpop.f32.mrf.mxu0  ;;  %v9371_v47 = vld [vmem:[%s12401_s0 + $0x38] ss:$100 sps:$4 sm:$0xff]   ;;  %v9373_v57 = vld [vmem:[%s12401_s0 + $0x104] ss:$100 sps:$4 sm:$0xff]  }
 0x20f   :  { %v4879_v7 = vpop.f32.mrf.mxu1  ;;  %v4827_v6 = vadd.f32 %v4826_v51, %v11167_v44  ;;  %8017 = vmatpush3.bf16.msra.mxu0 %v9083_v20  ;;  %v9092_v44 = vld [vmem:[%s12400_s1 + $0xc38] ss:$12 sps:$4 sm:$0xff]   ;;  %v9113_v3 = vld [vmem:[%s12400_s1 + $0xea8] ss:$12 sps:$4 sm:$0xff]  }
 0x210   :  { %8045 = vmatpush3.bf16.msra.mxu1 %v9084_v4  ;;  %v4828_v8 = vpop.f32.mrf.mxu0  ;;  %8018 = vmatprep.subr.bf16.mxu0 %v9085_v35  ;;  %v9105_v20 = vld [vmem:[%s12400_s1 + $0xed8] ss:$12 sps:$4 sm:$0xff]   ;;  %v9109_v35 = vld [vmem:[%s12400_s1 + $0xec0] ss:$12 sps:$4 sm:$0xff]   ;;  %v9114_v52 = vld [vmem:[%s12400_s1 + $0x1028] ss:$12 sps:$4 sm:$0xff]  }
 0x211   :  { %8046 = vmatprep.subr.bf16.mxu1 %v9086_v59  ;;  %v11435_v11 = vadd.f32 %v4828_v8, %v11175_v45  ;;  %v11437_v12 = vadd.f32 %v4879_v7, %v4827_v6  ;;  %v9094_v45 = vld [vmem:[%s12400_s1 + $0xce0] ss:$12 sps:$4 sm:$0xff]   ;;  %v9106_v4 = vld [vmem:[%s12400_s1 + $0x1058] ss:$12 sps:$4 sm:$0xff]   ;;  %v9116_v6 = vld [vmem:[%s12400_s1 + $0xf68] ss:$12 sps:$4 sm:$0xff]  }
 0x212   :  { %v9107_v48 = vld [vmem:[%s12400_s1 + $0xe18] ss:$12 sps:$4 sm:$0xff]   ;;  %v9374_v59 = vld [vmem:[%s12401_s0 + $0x10c] ss:$100 sps:$4 sm:$0xff]  }
 0x213   :  { %8019 = vmatpush3.bf16.msra.mxu0 %v9087_v19  ;;  %v9111_v19 = vld [vmem:[%s12400_s1 + $0xe00] ss:$12 sps:$4 sm:$0xff]   ;;  %v9117_v8 = vld [vmem:[%s12400_s1 + $0xe90] ss:$12 sps:$4 sm:$0xff]  }
 0x214   :  { %8047 = vmatpush3.bf16.msra.mxu1 %v9088_v62  ;;  %8020 = vmatprep.subr.bf16.mxu0 %v9089_v5  ;;  %v9112_v62 = vld [vmem:[%s12400_s1 + $0xf80] ss:$12 sps:$4 sm:$0xff]   ;;  %v9115_v5 = vld [vmem:[%s12400_s1 + $0xde8] ss:$12 sps:$4 sm:$0xff]  }
 0x215   :  { %8048 = vmatprep.subr.bf16.mxu1 %v9090_v37  ;;  %v9375_v51 = vld [vmem:[%s12401_s0 + $0x100] ss:$100 sps:$4 sm:$0xff]   ;;  %v9376_v7 = vld [vmem:[%s12401_s0 + $0x108] ss:$100 sps:$4 sm:$0xff]   ;;  %v9118_v37 = vld [vmem:[%s12400_s1 + $0x1010] ss:$12 sps:$4 sm:$0xff]  }
 0x217   :  { %8021 = vmatpush3.bf16.msra.mxu0 %v9091_v13  ;;  %v9377_v13 = vld [vmem:[%s12401_s0 + $0x4c] ss:$100 sps:$4 sm:$0xff]  }
 0x218   :  { %8049 = vmatpush3.bf16.msra.mxu1 %v9092_v44  ;;  %8022 = vmatprep.subr.bf16.mxu0 %v9093_v10  ;;  %v9378_v44 = vld [vmem:[%s12401_s0 + $0x54] ss:$100 sps:$4 sm:$0xff]   ;;  %v9119_v10 = vld [vmem:[%s12400_s1 + $0xdd0] ss:$12 sps:$4 sm:$0xff]  }
 0x219   :  { %8050 = vmatprep.subr.bf16.mxu1 %v9094_v45  ;;  %v9120_v45 = vld [vmem:[%s12400_s1 + $0xf50] ss:$12 sps:$4 sm:$0xff]  }
 0x21b   :  { %8023 = vmatpush3.bf16.msra.mxu0 %v9095_v63  ;;  %v9121_v63 = vld [vmem:[%s12400_s1 + $0xe78] ss:$12 sps:$4 sm:$0xff]  }
 0x21c   :  { %8051 = vmatpush3.bf16.msra.mxu1 %v9096_v24  ;;  %8024 = vmatprep.subr.bf16.mxu0 %v9097_v55  ;;  %v9122_v24 = vld [vmem:[%s12400_s1 + $0xff8] ss:$12 sps:$4 sm:$0xff]  }
 0x21d   :  { %8052 = vmatprep.subr.bf16.mxu1 %v9098_v25  ;;  %v9123_v55 = vld [vmem:[%s12400_s1 + $0xdb8] ss:$12 sps:$4 sm:$0xff]  }
 0x21e   :  { %v9124_v25 = vld [vmem:[%s12400_s1 + $0xf38] ss:$12 sps:$4 sm:$0xff]  }
 0x21f   :  { %8025 = vmatpush3.bf16.msra.mxu0 %v9099_v27  ;;  %v9125_v27 = vld [vmem:[%s12400_s1 + $0xe60] ss:$12 sps:$4 sm:$0xff]  }
 0x220   :  { %8053 = vmatpush3.bf16.msra.mxu1 %v9100_v32  ;;  %8066 = vmatprep.subr.bf16.mxu0 %v9101_v31  ;;  %v9126_v32 = vld [vmem:[%s12400_s1 + $0xfe0] ss:$12 sps:$4 sm:$0xff]  }
 0x221   :  { %8094 = vmatprep.subr.bf16.mxu1 %v9102_v33  ;;  %v9127_v31 = vld [vmem:[%s12400_s1 + $0xda0] ss:$12 sps:$4 sm:$0xff]  }
 0x222   :  { %5419 = vmatmul.mubr.bf16.vlgmr.msra.gmra.mxu0 %v9371_v47  ;;  %v9128_v33 = vld [vmem:[%s12400_s1 + $0xf20] ss:$12 sps:$4 sm:$0xff]   ;;  %v9133_v47 = vld [vmem:[%s12400_s1 + $0x11f0] ss:$12 sps:$4 sm:$0xff]  }
 0x223   :  { %5468 = vmatmul.mubr.bf16.vlgmr.msra.gmra.mxu1 %v9372_v17  ;;  %8067 = vmatpush3.bf16.msra.mxu0 %v9103_v38  ;;  %v9129_v38 = vld [vmem:[%s12400_s1 + $0xe48] ss:$12 sps:$4 sm:$0xff]   ;;  %v9134_v17 = vld [vmem:[%s12400_s1 + $0x12b0] ss:$12 sps:$4 sm:$0xff]  }
 0x224   :  { %8095 = vmatpush3.bf16.msra.mxu1 %v9104_v43  ;;  %8068 = vmatprep.subr.bf16.mxu0 %v9105_v20  ;;  %v9130_v43 = vld [vmem:[%s12400_s1 + $0xfc8] ss:$12 sps:$4 sm:$0xff]  }
 0x225   :  { %8096 = vmatprep.subr.bf16.mxu1 %v9106_v4  ;;  %5426 = vmatprep.mubr.bf16.mxu0 %v9373_v57  ;;  %v9131_v20 = vld [vmem:[%s12400_s1 + $0xd88] ss:$12 sps:$4 sm:$0xff]  }
 0x226   :  { %5475 = vmatprep.mubr.bf16.mxu1 %v9374_v59  ;;  %v9132_v4 = vld [vmem:[%s12400_s1 + $0xf08] ss:$12 sps:$4 sm:$0xff]  }
 0x227   :  { %8069 = vmatpush3.bf16.msra.mxu0 %v9107_v48  ;;  %v9135_v48 = vld [vmem:[%s12400_s1 + $0x1130] ss:$12 sps:$4 sm:$0xff]   ;;  %v9379_v57 = vld [vmem:[%s12401_s0 + $0x48] ss:$100 sps:$4 sm:$0xff]  }
 0x228   :  { %8097 = vmatpush3.bf16.msra.mxu1 %v9108_v54  ;;  %8070 = vmatprep.subr.bf16.mxu0 %v9109_v35  ;;  %v9136_v54 = vld [vmem:[%s12400_s1 + $0x11d8] ss:$12 sps:$4 sm:$0xff]   ;;  %v9380_v59 = vld [vmem:[%s12401_s0 + $0x50] ss:$100 sps:$4 sm:$0xff]  }
 0x229   :  { %8098 = vmatprep.subr.bf16.mxu1 %v9110_v56  ;;  %v9137_v35 = vld [vmem:[%s12400_s1 + $0x1298] ss:$12 sps:$4 sm:$0xff]  }
 0x22a   :  { %5427 = vmatmul.mubr.bf16.gmra.mxu0 %v9375_v51  ;;  %v9139_v51 = vld [vmem:[%s12400_s1 + $0x11c0] ss:$12 sps:$4 sm:$0xff]  }
 0x22b   :  { %5476 = vmatmul.mubr.bf16.gmra.mxu1 %v9376_v7  ;;  %8071 = vmatpush3.bf16.msra.mxu0 %v9111_v19  ;;  %v4395_v7 = vadd.f32 %v10399_v9, %v10328_v40  ;;  %v9141_v40 = vld [vmem:[%s12400_s1 + $0x1100] ss:$12 sps:$4 sm:$0xff]  }
 0x22c   :  { %8099 = vmatpush3.bf16.msra.mxu1 %v9112_v62  ;;  %8072 = vmatprep.subr.bf16.mxu0 %v9113_v3  ;;  %v9138_v62 = vld [vmem:[%s12400_s1 + $0x1118] ss:$12 sps:$4 sm:$0xff]   ;;  %v11616_v3 = vpop.f32.mrf.mxu1 }
 0x22d   :  { %8100 = vmatprep.subr.bf16.mxu1 %v9114_v52  ;;  %5516 = vmatprep.mubr.bf16.mxu0 %v9377_v13 }
 0x22e   :  { %5565 = vmatprep.mubr.bf16.mxu1 %v9378_v44  ;;  %v9142_v44 = vld [vmem:[%s12400_s1 + $0x11a8] ss:$12 sps:$4 sm:$0xff]  }
 0x22f   :  { %8073 = vmatpush3.bf16.msra.mxu0 %v9115_v5  ;;  %v9381_v5 = vld [vmem:[%s12401_s0 + $0x114] ss:$100 sps:$4 sm:$0xff]  }
 0x230   :  { %8101 = vmatpush3.bf16.msra.mxu1 %v9116_v6  ;;  %8074 = vmatprep.subr.bf16.mxu0 %v9117_v8  ;;  %v9382_v6 = vld [vmem:[%s12401_s0 + $0x11c] ss:$100 sps:$4 sm:$0xff]  }
 0x231   :  { %8102 = vmatprep.subr.bf16.mxu1 %v9118_v37 }
 0x233   :  { %8075 = vmatpush3.bf16.msra.mxu0 %v9119_v10  ;;  %v9143_v10 = vld [vmem:[%s12400_s1 + $0x1268] ss:$12 sps:$4 sm:$0xff]  }
 0x234   :  { %8103 = vmatpush3.bf16.msra.mxu1 %v9120_v45  ;;  %8076 = vmatprep.subr.bf16.mxu0 %v9121_v63 }
 0x235   :  { %8104 = vmatprep.subr.bf16.mxu1 %v9122_v24  ;;  %v9383_v24 = vld [vmem:[%s12401_s0 + $0x110] ss:$100 sps:$4 sm:$0xff]  }
 0x237   :  { %8077 = vmatpush3.bf16.msra.mxu0 %v9123_v55  ;;  %v9384_v55 = vld [vmem:[%s12401_s0 + $0x118] ss:$100 sps:$4 sm:$0xff]  }
 0x238   :  { %8105 = vmatpush3.bf16.msra.mxu1 %v9124_v25  ;;  %8078 = vmatprep.subr.bf16.mxu0 %v9125_v27 }
 0x239   :  { %8106 = vmatprep.subr.bf16.mxu1 %v9126_v32 }
 0x23b   :  { %8079 = vmatpush3.bf16.msra.mxu0 %v9127_v31  ;;  %v9145_v31 = vld [vmem:[%s12400_s1 + $0x1190] ss:$12 sps:$4 sm:$0xff]  }
 0x23c   :  { %8107 = vmatpush3.bf16.msra.mxu1 %v9128_v33  ;;  %8080 = vmatprep.subr.bf16.mxu0 %v9129_v38  ;;  %v9385_v33 = vld [vmem:[%s12401_s0 + $0x5c] ss:$100 sps:$4 sm:$0xff]  }
 0x23d   :  { %8108 = vmatprep.subr.bf16.mxu1 %v9130_v43  ;;  %v9386_v38 = vld [vmem:[%s12401_s0 + $0x60] ss:$100 sps:$4 sm:$0xff]  }
 0x23f   :  { %8081 = vmatpush3.bf16.msra.mxu0 %v9131_v20 }
 0x240   :  { %8109 = vmatpush3.bf16.msra.mxu1 %v9132_v4  ;;  %8122 = vmatprep.subr.bf16.mxu0 %v9133_v47 }
 0x241   :  { %8226 = vmatprep.subr.bf16.mxu1 %v9134_v17 }
 0x242   :  { %v4918_v56 = vpop.f32.mrf.mxu0  ;;  %5517 = vmatmul.mubr.bf16.vlgmr.msra.gmra.mxu0 %v9379_v57 }
 0x243   :  { %5566 = vmatmul.mubr.bf16.vlgmr.msra.gmra.mxu1 %v9380_v59  ;;  %v11611_v19 = vadd.f32 %v4918_v56, %v11362_v22  ;;  %8123 = vmatpush3.bf16.msra.mxu0 %v9135_v48  ;;  %v9140_v22 = vld [vmem:[%s12400_s1 + $0x1280] ss:$12 sps:$4 sm:$0xff]   ;;  %v11634_v8 = vpop.f32.mrf.mxu1 }
 0x244   :  { %8227 = vmatpush3.bf16.msra.mxu1 %v9134_v17  ;;  %v11618_v52 = vpop.f32.mrf.mxu0  ;;  %8124 = vmatprep.subr.bf16.mxu0 %v9136_v54  ;;  %v9150_v54 = vld [vmem:[%s12400_s1 + $0x10b8] ss:$12 sps:$4 sm:$0xff]   ;;  %v9151_v56 = vld [vmem:[%s12400_s1 + $0x1160] ss:$12 sps:$4 sm:$0xff]  }
 0x245   :  { %8228 = vmatprep.subr.bf16.mxu1 %v9137_v35  ;;  %5524 = vmatprep.mubr.bf16.mxu0 %v9381_v5  ;;  %v11651_v45 = vpop.f32.mrf.mxu1  ;;  %v9156_v5 = vld [vmem:[%s12400_s1 + $0x1088] ss:$12 sps:$4 sm:$0xff]  }
 0x246   :  { %5573 = vmatprep.mubr.bf16.mxu1 %v9382_v6  ;;  %v4922_v37 = vpop.f32.mrf.mxu0 }
 0x247   :  { %v11637_v13 = vadd.f32 %v4922_v37, %v11387_v14  ;;  %8125 = vmatpush3.bf16.msra.mxu0 %v9138_v62  ;;  %v4448_v14 = vadd.f32 %v10414_v16, %v4395_v7  ;;  %v9144_v16 = vld [vmem:[%s12400_s1 + $0x10e8] ss:$12 sps:$4 sm:$0xff]   ;;  %v11682_v43 = vpop.f32.mrf.mxu1  ;;  %v9153_v62 = vld [vmem:[%s12400_s1 + $0x10a0] ss:$12 sps:$4 sm:$0xff]  }
 0x248   :  { %8229 = vmatpush3.bf16.msra.mxu1 %v9137_v35  ;;  %v11642_v9 = vpop.f32.mrf.mxu0  ;;  %8126 = vmatprep.subr.bf16.mxu0 %v9139_v51  ;;  %v9159_v37 = vld [vmem:[%s12403_s3 + $0xac] ss:$12 sps:$4 sm:$0xff]  }
 0x249   :  { %8230 = vmatprep.subr.bf16.mxu1 %v9140_v22  ;;  %v4501_v25 = vadd.f32 %v10617_v49, %v4448_v14  ;;  %v9146_v49 = vld [vmem:[%s12400_s1 + $0x1250] ss:$12 sps:$4 sm:$0xff]  }
 0x24a   :  { %v4928_v63 = vpop.f32.mrf.mxu0  ;;  %5525 = vmatmul.mubr.bf16.gmra.mxu0 %v9383_v24  ;;  %v9387_v24 = vld [vmem:[%s12401_s0 + $0x58] ss:$100 sps:$4 sm:$0xff]  }
 0x24b   :  { %5574 = vmatmul.mubr.bf16.gmra.mxu1 %v9384_v55  ;;  %v11661_v27 = vadd.f32 %v4928_v63, %v11413_v61  ;;  %8127 = vmatpush3.bf16.msra.mxu0 %v9141_v40  ;;  %v4550_v61 = vadd.f32 %v10588_v36, %v10599_v41  ;;  %v4554_v4 = vadd.f32 %v10619_v50, %v4501_v25  ;;  %v9147_v36 = vld [vmem:[%s12400_s1 + $0x10d0] ss:$12 sps:$4 sm:$0xff]   ;;  %v9148_v41 = vld [vmem:[%s12400_s1 + $0x1178] ss:$12 sps:$4 sm:$0xff]   ;;  %v9388_v55 = vld [vmem:[%s12401_s0 + $0x128] ss:$100 sps:$4 sm:$0xff]  }
 0x24c   :  { %8231 = vmatpush3.bf16.msra.mxu1 %v9140_v22  ;;  %v11666_v32 = vpop.f32.mrf.mxu0  ;;  %8128 = vmatprep.subr.bf16.mxu0 %v9142_v44  ;;  %v9149_v50 = vld [vmem:[%s12400_s1 + $0x1238] ss:$12 sps:$4 sm:$0xff]   ;;  %v9154_v22 = vld [vmem:[%s12400_s1 + $0x1148] ss:$12 sps:$4 sm:$0xff]   ;;  %v4972_v25 = vadd.f32 %v11634_v8, %v11611_v19  ;;  %v4976_v8 = vadd.f32 %v11682_v43, %v11637_v13  ;;  %v4882_v13 = vadd.f32 %v11616_v3, %v11435_v11 }
 0x24d   :  { %8232 = vmatprep.subr.bf16.mxu1 %v9143_v10  ;;  %5614 = vmatprep.mubr.bf16.mxu0 %v9385_v33  ;;  %v4603_v47 = vadd.f32 %v10830_v28, %v4550_v61  ;;  %v4607_v28 = vadd.f32 %v10857_v46, %v4554_v4  ;;  %v9152_v46 = vld [vmem:[%s12400_s1 + $0x1220] ss:$12 sps:$4 sm:$0xff]   ;;  %v9165_v61 = vld [vmem:[%s12403_s3 + $0x7c] ss:$12 sps:$4 sm:$0xff]  }
 0x24e   :  { %8242 = vmatprep.mubr.bf16.mxu1 %v9386_v38  ;;  %v4932_v20 = vpop.f32.mrf.mxu0  ;;  %v4878_v38 = vadd.f32 %v11405_v21, %v11411_v60  ;;  %v9168_v21 = vld [vmem:[%s12403_s3 + $0x64] ss:$12 sps:$4 sm:$0xff]  }
 0x24f   :  { %v11687_v17 = vadd.f32 %v4932_v20, %v11437_v12  ;;  %8129 = vmatpush3.bf16.msra.mxu0 %v9144_v16  ;;  %v11699_v12 = vpop.f32.mrf.mxu1  ;;  %v4656_v48 = vadd.f32 %v10832_v30, %v4603_v47  ;;  %v4660_v30 = vadd.f32 %v10859_v58, %v4607_v28  ;;  %v9155_v58 = vld [vmem:[%s12400_s1 + $0x1208] ss:$12 sps:$4 sm:$0xff]   ;;  %v9390_v11 = vld [vmem:[%s12401_s0 + $0x120] ss:$100 sps:$4 sm:$0xff]  }
 0x250   :  { %8233 = vmatpush3.bf16.msra.mxu1 %v9143_v10  ;;  %8130 = vmatprep.subr.bf16.mxu0 %v9145_v31  ;;  %v4934_v40 = vpop.f32.mrf.mxu0  ;;  %v9162_v10 = vld [vmem:[%s12403_s3 + $0x94] ss:$12 sps:$4 sm:$0xff]   ;;  %v4931_v43 = vadd.f32 %v11666_v32, %v4878_v38 }
 0x251   :  { %8234 = vmatprep.subr.bf16.mxu1 %v9146_v49  ;;  %v11705_v35 = vpop.f32.mrf.mxu1  ;;  %v4709_v57 = vadd.f32 %v11089_v53, %v4656_v48  ;;  %v4713_v59 = vadd.f32 %v11114_v2, %v4660_v30  ;;  %v4935_v32 = vadd.f32 %v4934_v40, %v4882_v13  ;;  %v9169_v40 = vld [vmem:[%s12403_s3 + $0x48] ss:$12 sps:$4 sm:$0xff]   ;;  %v9391_v38 = vld [vmem:[%s12402_s2] sm:$0x7] }
 0x252   :  { %v9189_v13 = vld [vmem:[%s12403_s3 + $0x13c] ss:$12 sps:$4 sm:$0xff]  }
 0x253   :  { %8131 = vmatpush3.bf16.msra.mxu0 %v9147_v36  ;;  %v11719_v51 = vpop.f32.mrf.mxu1  ;;  %v4762_v53 = vadd.f32 %v11091_v0, %v4709_v57  ;;  %v4766_v2 = vadd.f32 %v11116_v26, %v4713_v59 }
 0x254   :  { %8235 = vmatpush3.bf16.msra.mxu1 %v9146_v49  ;;  %8132 = vmatprep.subr.bf16.mxu0 %v9148_v41 }
 0x255   :  { %8236 = vmatprep.subr.bf16.mxu1 %v9149_v50  ;;  %v4815_v7 = vadd.f32 %v11355_v15, %v4762_v53  ;;  %v11733_v6 = vpop.f32.mrf.mxu1  ;;  %v4819_v0 = vadd.f32 %v11380_v39, %v4766_v2  ;;  %v9157_v15 = vld [vmem:[%s12403_s3 + $0xa8] ss:$12 sps:$4 sm:$0xff]  }
 0x256   :  { %v4986_v53 = vadd.f32 %v11733_v6, %v11687_v17  ;;  %v9174_v17 = vld [vmem:[%s12403_s3 + $0x34] ss:$12 sps:$4 sm:$0xff]  }
 0x257   :  { %8133 = vmatpush3.bf16.msra.mxu0 %v9150_v54  ;;  %v4868_v26 = vadd.f32 %v11357_v18, %v4815_v7  ;;  %v11743_v44 = vpop.f32.mrf.mxu1  ;;  %v4872_v14 = vadd.f32 %v11382_v42, %v4819_v0  ;;  %v9160_v42 = vld [vmem:[%s12403_s3 + $0x90] ss:$12 sps:$4 sm:$0xff]  }
 0x258   :  { %8237 = vmatpush3.bf16.msra.mxu1 %v9149_v50  ;;  %8134 = vmatprep.subr.bf16.mxu0 %v9151_v56  ;;  %v4982_v56 = vadd.f32 %v11705_v35, %v11661_v27  ;;  %v9171_v35 = vld [vmem:[%s12403_s3 + $0x4c] ss:$12 sps:$4 sm:$0xff]  }
 0x259   :  { %8238 = vmatprep.subr.bf16.mxu1 %v9152_v46  ;;  %v4921_v39 = vadd.f32 %v11618_v52, %v4868_v26  ;;  %v4925_v16 = vadd.f32 %v11642_v9, %v4872_v14  ;;  %v9389_v52 = vld [vmem:[%s12401_s0 + $0x124] ss:$100 sps:$4 sm:$0xff]   ;;  %v4988_v26 = vadd.f32 %v11743_v44, %v4935_v32 }
 0x25b   :  { %8135 = vmatpush3.bf16.msra.mxu0 %v9153_v62  ;;  %v4974_v19 = vadd.f32 %v11651_v45, %v4921_v39  ;;  %v4978_v47 = vadd.f32 %v11699_v12, %v4925_v16  ;;  %v9163_v45 = vld [vmem:[%s12403_s3 + $0x78] ss:$12 sps:$4 sm:$0xff]   ;;  %v9166_v62 = vld [vmem:[%s12403_s3 + $0x60] ss:$12 sps:$4 sm:$0xff]   ;;  %v9177_v16 = vld [vmem:[%s12403_s3 + $0x1c] ss:$12 sps:$4 sm:$0xff]  }
 0x25c   :  { %8239 = vmatpush3.bf16.msra.mxu1 %v9152_v46  ;;  %8136 = vmatprep.subr.bf16.mxu0 %v9154_v22  ;;  %v4984_v22 = vadd.f32 %v11719_v51, %v4931_v43 }
 0x25d   :  { %8240 = vmatprep.subr.bf16.mxu1 %v9155_v58 }
 0x25f   :  { %8137 = vmatpush3.bf16.msra.mxu0 %v9156_v5 }
 0x260   :  { %8241 = vmatpush3.bf16.msra.mxu1 %v9155_v58  ;;  %6195 = vmatprep.subr.bf16.mxu0 %v9159_v37 }
 0x262   :  { %v5024_v63 = vpop.f32.mrf.mxu0  ;;  %5615 = vmatmul.mubr.bf16.vlgmr.msra.gmra.mxu0 %v9387_v24 }
 0x263   :  { %v7830_v18 = vpop.f32.mrf.mxu1  ;;  %8243 = vmatmul.mubr.bf16.vlgmr.msra.gmra.mxu1 %v9388_v55  ;;  %6196 = vmatpush1.bf16.msra.mxu0 %v9157_v15  ;;  %v5025_v9 = vadd.f32 %v5024_v63, %v4972_v25  ;;  %v9172_v25 = vld [vmem:[%s12403_s3 + $0x30] ss:$12 sps:$4 sm:$0xff]  }
 0x264   :  { %5622 = vmatprep.mubr.bf16.mxu0 %v9389_v52  ;;  %v5026_v31 = vpop.f32.mrf.mxu0  ;;  %6197 = vmatprep.subr.bf16.mxu0 %v9162_v10  ;;  %v9175_v52 = vld [vmem:[%s12403_s3 + $0x18] ss:$12 sps:$4 sm:$0xff]  }
 0x265   :  { %v7831_v49 = vpop.f32.mrf.mxu1  ;;  %6280 = vmatprep.mubr.bf16.mxu1 %v12411_v1  ;;  %v5027_v36 = vadd.f32 %v5026_v31, %v4974_v19  ;;  %v5680_v60 = vmax.f32 %v5025_v9, 0.0  ;;  %v9180_v31 = vld [vmem:[%s12403_s3 + $0x4] ss:$12 sps:$4 sm:$0xff]   ;;  %v12410_v19 = vsub.s32 2, %v10277_v23  ;;  %v9186_v9 = vld [vmem:[%s12403_s3 + $0x154] ss:$12 sps:$4 sm:$0xff]  }
 0x266   :  { %v11772_v33 = vadd.f32 %v7831_v49, %v7830_v18  ;;  %v5028_v20 = vpop.f32.mrf.mxu0  ;;  %v9178_v49 = vld [vmem:[%s12403_s3] ss:$12 sps:$4 sm:$0xff]  }
 0x267   :  { %v7833_v4 = vpop.f32.mrf.mxu1  ;;  %v5029_v41 = vadd.f32 %v5028_v20, %v4976_v8  ;;  %6198 = vmatpush1.bf16.msra.mxu0 %v9160_v42  ;;  %v5681_v30 = vmax.f32 %v5027_v36, 0.0  ;;  %v9181_v8 = vld [vmem:[%s12403_s3 + $0x168] ss:$12 sps:$4 sm:$0xff]   ;;  %v11852_v20 = vrot.slane %v9391_v38, %v12410_v19  ;;  %v9184_v36 = vld [vmem:[%s12403_s3 + $0x150] ss:$12 sps:$4 sm:$0xff]  }
 0x268   :  { %v5030_v50 = vpop.f32.mrf.mxu0  ;;  %6199 = vmatprep.subr.bf16.mxu0 %v9165_v61  ;;  %v9183_v61 = vld [vmem:[%s12403_s3 + $0x16c] ss:$12 sps:$4 sm:$0xff]  }
 0x269   :  { %v7834_v28 = vpop.f32.mrf.mxu1  ;;  %v5683_v12 = vmax.f32 %v5029_v41, 0.0  ;;  %v5031_v48 = vadd.f32 %v5030_v50, %v4978_v47  ;;  %v5078_v43 = vadd.f32 %v11772_v33, %v11852_v20  ;;  %v9192_v33 = vld [vmem:[%s12403_s3 + $0x124] ss:$12 sps:$4 sm:$0xff]  }
 0x26a   :  { %v11786_v54 = vadd.f32 %v7834_v28, %v7833_v4  ;;  %v5034_v46 = vpop.f32.mrf.mxu0  ;;  %5623 = vmatmul.mubr.bf16.gmra.mxu0 %v9390_v11 }
 0x26b   :  { %v7836_v3 = vpop.f32.mrf.mxu1  ;;  %v11793_v57 = vpack.c.bf16 %v5683_v12, %v5680_v60  ;;  %v5684_v59 = vmax.f32 %v5031_v48, 0.0  ;;  %6200 = vmatpush1.bf16.msra.mxu0 %v9163_v45  ;;  %v5035_v7 = vadd.f32 %v5034_v46, %v4982_v56  ;;  %v9187_v48 = vld [vmem:[%s12403_s3 + $0x138] ss:$12 sps:$4 sm:$0xff]  }
 0x26c   :  { %v5036_v27 = vpop.f32.mrf.mxu0  ;;  %6201 = vmatprep.subr.bf16.mxu0 %v9168_v21 }
 0x26d   :  { %12425 = vst [vmem:[#allocation5_spill] sm:$0xff] %v11793_v57  ;;  %v7837_v58 = vpop.f32.mrf.mxu1  ;;  %v11804_v2 = vpack.c.bf16 %v5684_v59, %v5681_v30  ;;  %v5037_v51 = vadd.f32 %v5036_v27, %v4984_v22  ;;  %v5686_v14 = vmax.f32 %v5035_v7, 0.0  ;;  %v9190_v30 = vld [vmem:[%s12403_s3 + $0x120] ss:$12 sps:$4 sm:$0xff]   ;;  %v9193_v7 = vld [vmem:[%s12403_s3 + $0x108] ss:$12 sps:$4 sm:$0xff]  }
 0x26e   :  { %v11806_v5 = vadd.f32 %v7837_v58, %v7836_v3  ;;  %v5038_v37 = vpop.f32.mrf.mxu0  ;;  %v9195_v22 = vld [vmem:[%s12403_s3 + $0x10c] ss:$12 sps:$4 sm:$0xff]  }
 0x26f   :  { %12426 = vst [vmem:[#allocation6_spill] sm:$0xff] %v11804_v2  ;;  %v7839_v0 = vpop.f32.mrf.mxu1  ;;  %v5039_v15 = vadd.f32 %v5038_v37, %v4986_v53  ;;  %6202 = vmatpush1.bf16.msra.mxu0 %v9166_v62  ;;  %6227 = vmatprep.mubr.bf16.mxu0 %v11804_v2  ;;  %v5687_v18 = vmax.f32 %v5037_v51, 0.0  ;;  %v9198_v37 = vld [vmem:[%s12403_s3 + $0xf4] ss:$12 sps:$4 sm:$0xff]   ;;  %v9196_v51 = vld [vmem:[%s12403_s3 + $0xf0] ss:$12 sps:$4 sm:$0xff]  }
 0x270   :  { %v5040_v10 = vpop.f32.mrf.mxu0  ;;  %6203 = vmatprep.subr.bf16.mxu0 %v9171_v35  ;;  %v5086_v27 = vadd.f32 %v11806_v5, %v11852_v20  ;;  %v9205_v5 = vld [vmem:[%s12403_s3 + $0x228] ss:$12 sps:$4 sm:$0xff]  }
 0x271   :  { %v7840_v6 = vpop.f32.mrf.mxu1  ;;  %v5689_v39 = vmax.f32 %v5039_v15, 0.0  ;;  %v5041_v63 = vadd.f32 %v5040_v10, %v4988_v26  ;;  %v9201_v15 = vld [vmem:[%s12403_s3 + $0xdc] ss:$12 sps:$4 sm:$0xff]  }
 0x272   :  { %v11816_v44 = vadd.f32 %v7840_v6, %v7839_v0  ;;  %v9207_v0 = vld [vmem:[%s12403_s3 + $0x22c] ss:$12 sps:$4 sm:$0xff]   ;;  %v9208_v10 = vld [vmem:[%s12403_s3 + $0x210] ss:$12 sps:$4 sm:$0xff]  }
 0x273   :  { %v11818_v24 = vpack.c.bf16 %v5689_v39, %v5686_v14  ;;  %v5690_v55 = vmax.f32 %v5041_v63, 0.0  ;;  %6204 = vmatpush1.bf16.msra.mxu0 %v9169_v40  ;;  %6248 = vmatprep.subr.bf16.mxu1 %v9207_v0  ;;  %v9210_v40 = vld [vmem:[%s12403_s3 + $0x214] ss:$12 sps:$4 sm:$0xff]   ;;  %v9199_v6 = vld [vmem:[%s12403_s3 + $0xd8] ss:$12 sps:$4 sm:$0xff]  }
 0x274   :  { %6205 = vmatprep.subr.bf16.mxu0 %v9174_v17  ;;  %6249 = vmatpush1.bf16.msra.mxu1 %v9205_v5  ;;  %v9213_v17 = vld [vmem:[%s12403_s3 + $0x1fc] ss:$12 sps:$4 sm:$0xff]   ;;  %v9211_v14 = vld [vmem:[%s12403_s3 + $0x1f8] ss:$12 sps:$4 sm:$0xff]  }
 0x275   :  { %12427 = vst [vmem:[#allocation7_spill] sm:$0xff] %v11818_v24  ;;  %v11826_v42 = vpack.c.bf16 %v5690_v55, %v5687_v18  ;;  %6250 = vmatprep.subr.bf16.mxu1 %v9210_v40  ;;  %v9204_v39 = vld [vmem:[%s12403_s3 + $0xc4] ss:$12 sps:$4 sm:$0xff]   ;;  %v9202_v18 = vld [vmem:[%s12403_s3 + $0xc0] ss:$12 sps:$4 sm:$0xff]  }
 0x276   :  { %v9217_v63 = vld [vmem:[%s12403_s3 + $0x1e4] ss:$12 sps:$4 sm:$0xff]   ;;  %v9215_v55 = vld [vmem:[%s12403_s3 + $0x1e0] ss:$12 sps:$4 sm:$0xff]  }
 0x277   :  { %12428 = vst [vmem:[#allocation8_spill] sm:$0xff] %v11826_v42  ;;  %6206 = vmatpush1.bf16.msra.mxu0 %v9172_v25  ;;  %v9214_v25 = vld [vmem:[%s12403_s3 + $0x230] ss:$12 sps:$4 sm:$0xff]  }
 0x278   :  { %6207 = vmatprep.subr.bf16.mxu0 %v9177_v16  ;;  %6251 = vmatpush1.bf16.msra.mxu1 %v9208_v10  ;;  %v9218_v16 = vld [vmem:[%s12403_s3 + $0x218] ss:$12 sps:$4 sm:$0xff]  }
 0x279   :  { %6252 = vmatprep.subr.bf16.mxu1 %v9213_v17 }
 0x27b   :  { %6208 = vmatpush1.bf16.msra.mxu0 %v9175_v52  ;;  %v9221_v52 = vld [vmem:[%s12403_s3 + $0x1cc] ss:$12 sps:$4 sm:$0xff]  }
 0x27c   :  { %6209 = vmatprep.subr.bf16.mxu0 %v9180_v31  ;;  %6253 = vmatpush1.bf16.msra.mxu1 %v9211_v14  ;;  %v9219_v31 = vld [vmem:[%s12403_s3 + $0x1c8] ss:$12 sps:$4 sm:$0xff]  }
 0x27d   :  { %6254 = vmatprep.subr.bf16.mxu1 %v9217_v63 }
 0x27f   :  { %6210 = vmatpush1.bf16.msra.mxu0 %v9178_v49 }
 0x280   :  { %6211 = vmatprep.subr.bf16.mxu0 %v9183_v61  ;;  %6255 = vmatpush1.bf16.msra.mxu1 %v9215_v55  ;;  %v9222_v61 = vld [vmem:[%s12403_s3 + $0x200] ss:$12 sps:$4 sm:$0xff]  }
 0x281   :  { %6256 = vmatprep.subr.bf16.mxu1 %v9221_v52 }
 0x282   :  { %v7858_v4 = vpop.f32.mrf.mxu0 }
 0x283   :  { %v7886_v47 = vpop.f32.mrf.mxu1  ;;  %6212 = vmatpush2.bf16.msra.mxu0 %v9181_v8  ;;  %v9225_v8 = vld [vmem:[%s12403_s3 + $0x1b4] ss:$12 sps:$4 sm:$0xff]  }
 0x284   :  { %v7859_v41 = vpop.f32.mrf.mxu0  ;;  %6213 = vmatprep.subr.bf16.mxu0 %v9186_v9  ;;  %6257 = vmatpush1.bf16.msra.mxu1 %v9219_v31  ;;  %v9223_v9 = vld [vmem:[%s12403_s3 + $0x1b0] ss:$12 sps:$4 sm:$0xff]  }
 0x285   :  { %v7887_v45 = vpop.f32.mrf.mxu1  ;;  %v7860_v50 = vadd.f32 %v7859_v41, %v7858_v4  ;;  %6258 = vmatprep.subr.bf16.mxu1 %v9225_v8  ;;  %v9226_v4 = vld [vmem:[%s12403_s3 + $0x1e8] ss:$12 sps:$4 sm:$0xff]  }
 0x286   :  { %v7888_v28 = vadd.f32 %v7887_v45, %v7886_v47  ;;  %v11862_v21 = vpop.f32.mrf.mxu0  ;;  %v9229_v47 = vld [vmem:[%s12403_s3 + $0x19c] ss:$12 sps:$4 sm:$0xff]  }
 0x287   :  { %v11864_v60 = vpop.f32.mrf.mxu1  ;;  %v5127_v12 = vadd.f32 %v7860_v50, %v5078_v43  ;;  %6214 = vmatpush2.bf16.msra.mxu0 %v9184_v36  ;;  %v9227_v36 = vld [vmem:[%s12403_s3 + $0x198] ss:$12 sps:$4 sm:$0xff]   ;;  %v9231_v50 = vld [vmem:[%s12403_s3 + $0x180] ss:$12 sps:$4 sm:$0xff]  }
 0x288   :  { %v11869_v56 = vpop.f32.mrf.mxu0  ;;  %6215 = vmatprep.subr.bf16.mxu0 %v9189_v13  ;;  %6259 = vmatpush1.bf16.msra.mxu1 %v9223_v9  ;;  %v9230_v13 = vld [vmem:[%s12403_s3 + $0x1d0] ss:$12 sps:$4 sm:$0xff]  }
 0x289   :  { %v11871_v46 = vpop.f32.mrf.mxu1  ;;  %v11876_v11 = vadd.f32 %v7888_v28, %v5127_v12  ;;  %6260 = vmatprep.subr.bf16.mxu1 %v9229_v47  ;;  %v9233_v43 = vld [vmem:[%s12403_s3 + $0x184] ss:$12 sps:$4 sm:$0xff]  }
 0x28a   :  { %v7864_v3 = vpop.f32.mrf.mxu0 }
 0x28b   :  { %v7892_v32 = vpop.f32.mrf.mxu1  ;;  %6216 = vmatpush2.bf16.msra.mxu0 %v9187_v48  ;;  %v9234_v48 = vld [vmem:[%s12403_s3 + $0x1b8] ss:$12 sps:$4 sm:$0xff]  }
 0x28c   :  { %v7865_v59 = vpop.f32.mrf.mxu0  ;;  %6217 = vmatprep.subr.bf16.mxu0 %v9192_v33  ;;  %6261 = vmatpush1.bf16.msra.mxu1 %v9227_v36  ;;  %v9235_v33 = vld [vmem:[%s12403_s3 + $0x170] ss:$12 sps:$4 sm:$0xff]  }
 0x28d   :  { %v7893_v62 = vpop.f32.mrf.mxu1  ;;  %v7866_v35 = vadd.f32 %v7865_v59, %v7864_v3  ;;  %6262 = vmatprep.subr.bf16.mxu1 %v9233_v43 }
 0x28e   :  { %v7894_v58 = vadd.f32 %v7893_v62, %v7892_v32  ;;  %v11947_v49 = vpop.f32.mrf.mxu0 }
 0x28f   :  { %v5135_v53 = vadd.f32 %v7866_v35, %v5086_v27  ;;  %6218 = vmatpush2.bf16.msra.mxu0 %v9190_v30  ;;  %v11972_v45 = vpop.f32.mrf.mxu1  ;;  %v9237_v30 = vld [vmem:[%s12403_s3 + $0x1a0] ss:$12 sps:$4 sm:$0xff]  }
 0x290   :  { %6219 = vmatprep.subr.bf16.mxu0 %v9195_v22  ;;  %v11958_v38 = vpop.f32.mrf.mxu0  ;;  %6263 = vmatpush1.bf16.msra.mxu1 %v9231_v50  ;;  %v9240_v22 = vld [vmem:[%s12403_s3 + $0x188] ss:$12 sps:$4 sm:$0xff]  }
 0x291   :  { %v11895_v26 = vadd.f32 %v7894_v58, %v5135_v53  ;;  %v11985_v12 = vpop.f32.mrf.mxu1  ;;  %8160 = vmatprep.subr.bf16.mxu1 %v9235_v33 }
 0x293   :  { %6220 = vmatpush2.bf16.msra.mxu0 %v9193_v7 }
 0x294   :  { %6221 = vmatprep.subr.bf16.mxu0 %v9198_v37 }
 0x297   :  { %6222 = vmatpush2.bf16.msra.mxu0 %v9196_v51 }
 0x298   :  { %6223 = vmatprep.subr.bf16.mxu0 %v9201_v15 }
 0x29b   :  { %6224 = vmatpush2.bf16.msra.mxu0 %v9199_v6 }
 0x29c   :  { %6225 = vmatprep.subr.bf16.mxu0 %v9204_v39 }
 0x29f   :  { %6226 = vmatpush2.bf16.msra.mxu0 %v9202_v18 }
 0x2a0   :  { %8246 = vmatprep.subr.bf16.mxu0 %v9214_v25 }
 0x2a2   :  { %6228 = vmatmul.mubr.bf16.vlgmr.msra.gmra.mxu0 %v11793_v57  ;;  %v11969_v41 = vpop.f32.mrf.mxu0 }
 0x2a3   :  { %6237 = vmatprep.mubr.bf16.mxu0 %v11826_v42  ;;  %8247 = vmatpush3.bf16.msra.mxu0 %v9214_v25  ;;  %v11993_v3 = vpop.f32.mrf.mxu1 }
 0x2a4   :  { %8248 = vmatprep.subr.bf16.mxu0 %v9218_v16  ;;  %v11983_v28 = vpop.f32.mrf.mxu0 }
 0x2a5   :  { %v12000_v59 = vpop.f32.mrf.mxu1 }
 0x2a6   :  { %v11995_v32 = vpop.f32.mrf.mxu0 }
 0x2a7   :  { %8249 = vmatpush3.bf16.msra.mxu0 %v9218_v16  ;;  %v12007_v27 = vpop.f32.mrf.mxu1 }
 0x2a8   :  { %8250 = vmatprep.subr.bf16.mxu0 %v9222_v61  ;;  %v12002_v62 = vpop.f32.mrf.mxu0 }
 0x2a9   :  { %v12011_v58 = vpop.f32.mrf.mxu1 }
 0x2aa   :  { %6238 = vmatmul.mubr.bf16.gmra.mxu0 %v11818_v24  ;;  %v12009_v35 = vpop.f32.mrf.mxu0 }
 0x2ab   :  { %8251 = vmatpush3.bf16.msra.mxu0 %v9222_v61  ;;  %v12013_v7 = vpop.f32.mrf.mxu1 }
 0x2ac   :  { %8252 = vmatprep.subr.bf16.mxu0 %v9226_v4  ;;  %v7921_v53 = vpop.f32.mrf.mxu0 }
 0x2ad   :  { %v12017_v0 = vpop.f32.mrf.mxu1 }
 0x2ae   :  { %v12015_v37 = vpop.f32.mrf.mxu0 }
 0x2af   :  { %8253 = vmatpush3.bf16.msra.mxu0 %v9226_v4  ;;  %v12021_v51 = vpop.f32.mrf.mxu1 }
 0x2b0   :  { %8254 = vmatprep.subr.bf16.mxu0 %v9230_v13  ;;  %v12019_v5 = vpop.f32.mrf.mxu0 }
 0x2b1   :  { %v12023_v40 = vpop.f32.mrf.mxu1 }
 0x2b3   :  { %8255 = vmatpush3.bf16.msra.mxu0 %v9230_v13 }
 0x2b4   :  { %8256 = vmatprep.subr.bf16.mxu0 %v9234_v48 }
 0x2b7   :  { %8257 = vmatpush3.bf16.msra.mxu0 %v9234_v48 }
 0x2b8   :  { %8258 = vmatprep.subr.bf16.mxu0 %v9237_v30 }
 0x2bb   :  { %8259 = vmatpush3.bf16.msra.mxu0 %v9237_v30 }
 0x2bc   :  { %8260 = vmatprep.subr.bf16.mxu0 %v9240_v22 }
 0x2bf   :  { %8261 = vmatpush3.bf16.msra.mxu0 %v9240_v22 }
 0x2c2   :  { %v7970_v15 = vpop.f32.mrf.mxu0 }
 0x2c3   :  { %v7998_v17 = vpop.f32.mrf.mxu1 }
 0x2c4   :  { %v7971_v10 = vpop.f32.mrf.mxu0 }
 0x2c5   :  { %v7999_v14 = vpop.f32.mrf.mxu1 }
 0x2c6   :  { %v7973_v6 = vpop.f32.mrf.mxu0 }
 0x2c7   :  { %v12025_v63 = vpop.f32.mrf.mxu1 }
 0x2c8   :  { %v7974_v39 = vpop.f32.mrf.mxu0 }
 0x2c9   :  { %v12029_v55 = vpop.f32.mrf.mxu1 }
 0x2ca   :  { %v12027_v18 = vpop.f32.mrf.mxu0 }
 0x2cb   :  { %v12031_v16 = vpop.f32.mrf.mxu1 }
 0x2cc   :  { %v7977_v25 = vpop.f32.mrf.mxu0 }
 0x2cd   :  { %v12035_v31 = vpop.f32.mrf.mxu1 }
 0x2ce   :  { %v12033_v52 = vpop.f32.mrf.mxu0 }
 0x2cf   :  { %v12039_v8 = vpop.f32.mrf.mxu1 }
 0x2d0   :  { %v12037_v61 = vpop.f32.mrf.mxu0 }
 0x2d1   :  { %v12041_v4 = vpop.f32.mrf.mxu1 }
 0x2e2   :  { %v8026_v9 = vpop.f32.mrf.mxu0 }
 0x2e3   :  { %v12043_v47 = vpop.f32.mrf.mxu1 }
 0x2e4   :  { %v8027_v36 = vpop.f32.mrf.mxu0 }
 0x2e5   :  { %v8055_v13 = vpop.f32.mrf.mxu1 }
 0x2e6   :  { %v8029_v43 = vpop.f32.mrf.mxu0 }
 0x2e7   :  { %v12045_v50 = vpop.f32.mrf.mxu1 }
 0x2e8   :  { %12429 = vst [vmem:[#allocation9_spill] sm:$0xff] %v12045_v50  ;;  %v8030_v48 = vpop.f32.mrf.mxu0 }
 0x2e9   :  { %v12047_v33 = vpop.f32.mrf.mxu1 }
 0x2ea   :  { %12430 = vst [vmem:[#allocation10_spill] sm:$0xff] %v12047_v33  ;;  %v12049_v30 = vpop.f32.mrf.mxu0  ;;  %v7863_v33 = vadd.f32 %v11869_v56, %v11862_v21  ;;  %v7944_v21 = vadd.f32 %v12000_v59, %v11993_v3  ;;  %v7919_v56 = vadd.f32 %v12002_v62, %v11995_v32  ;;  %v7897_v3 = vadd.f32 %v11985_v12, %v11972_v45 }
 0x2eb   :  { %v12051_v22 = vpop.f32.mrf.mxu1  ;;  %v7975_v62 = vadd.f32 %v7974_v39, %v7973_v6  ;;  %v7978_v12 = vadd.f32 %v7977_v25, %v12027_v18  ;;  %v7981_v39 = vadd.f32 %v12037_v61, %v12033_v52 }
 0x2ec   :  { %12431 = vst [vmem:[#allocation11_spill] sm:$0xff] %v12051_v22  ;;  %v12053_v19 = vpop.f32.mrf.mxu0 }
 0x2ed   :  { %v12055_v1 = vpop.f32.mrf.mxu1 }
 0x2ee   :  { %12432 = vst [vmem:[#allocation12_spill] sm:$0xff] %v12055_v1  ;;  %v12057_v23 = vpop.f32.mrf.mxu0  ;;  %v5081_v1 = vadd.f32 %v11786_v54, %v11852_v20  ;;  %v7869_v54 = vadd.f32 %v11958_v38, %v11947_v49  ;;  %v8000_v38 = vadd.f32 %v7999_v14, %v7998_v17  ;;  %v8006_v14 = vadd.f32 %v12035_v31, %v12031_v16 }
 0x2ef   :  { %12433 = vst [vmem:[#allocation13_spill] sm:$0xff] %v12057_v23  ;;  %v12059_v29 = vpop.f32.mrf.mxu1  ;;  %v7916_v23 = vadd.f32 %v11983_v28, %v11969_v41  ;;  %v7972_v28 = vadd.f32 %v7971_v10, %v7970_v15  ;;  %v12439_v31 = vld [vmem:[#allocation9_spill] sm:$0xff] }
 0x2f0   :  { %12434 = vst [vmem:[#allocation14_spill] sm:$0xff] %v12059_v29  ;;  %v12061_v34 = vpop.f32.mrf.mxu0  ;;  %v5130_v50 = vadd.f32 %v7863_v33, %v5081_v1  ;;  %v5089_v1 = vadd.f32 %v11816_v44, %v11852_v20  ;;  %v7922_v33 = vadd.f32 %v7921_v53, %v12009_v35  ;;  %v7950_v20 = vadd.f32 %v12017_v0, %v12013_v7 }
 0x2f1   :  { %12435 = vst [vmem:[#allocation15_spill] sm:$0xff] %v12061_v34  ;;  %v12063_v24 = vpop.f32.mrf.mxu1  ;;  %v8028_v53 = vadd.f32 %v8027_v36, %v8026_v9  ;;  %v8003_v7 = vadd.f32 %v12029_v55, %v12025_v63 }
 0x2f2   :  { %12436 = vst [vmem:[#allocation16_spill] sm:$0xff] %v12063_v24  ;;  %v7891_v24 = vadd.f32 %v11871_v46, %v11864_v60  ;;  %v5233_v44 = vadd.f32 %v7922_v33, %v11895_v26  ;;  %v7953_v26 = vadd.f32 %v12023_v40, %v12021_v51  ;;  %v8034_v51 = vadd.f32 %v12053_v19, %v12049_v30 }
 0x2f4   :  { %v5179_v41 = vadd.f32 %v7891_v24, %v5130_v50  ;;  %v7947_v24 = vadd.f32 %v12011_v58, %v12007_v27  ;;  %v5282_v58 = vadd.f32 %v7950_v20, %v5233_v44 }
 0x2f5   :  { %v12444_v19 = vld [vmem:[#allocation12_spill] sm:$0xff] }
 0x2f6   :  { %v5228_v46 = vadd.f32 %v7919_v56, %v5179_v41  ;;  %v5331_v6 = vadd.f32 %v7978_v12, %v5282_v58 }
 0x2f8   :  { %v5277_v35 = vadd.f32 %v7947_v24, %v5228_v46  ;;  %v5380_v55 = vadd.f32 %v8006_v14, %v5331_v6  ;;  %v12445_v46 = vld [vmem:[#allocation13_spill] sm:$0xff] }
 0x2fa   :  { %v5326_v27 = vadd.f32 %v7975_v62, %v5277_v35  ;;  %v5429_v41 = vadd.f32 %v8034_v51, %v5380_v55  ;;  %v12448_v35 = vld [vmem:[#allocation16_spill] sm:$0xff] }
 0x2fc   :  { %v5375_v9 = vadd.f32 %v8003_v7, %v5326_v27 }
 0x302   :  { %v8082_v42 = vpop.f32.mrf.mxu0 }
 0x303   :  { %v12065_v57 = vpop.f32.mrf.mxu1 }
 0x304   :  { %12437 = vst [vmem:[#allocation17_spill] sm:$0xff] %v12065_v57  ;;  %v8083_v2 = vpop.f32.mrf.mxu0  ;;  %v5225_v57 = vadd.f32 %v7916_v23, %v11876_v11  ;;  %v5138_v11 = vadd.f32 %v7869_v54, %v5089_v1 }
 0x305   :  { %v12069_v22 = vpop.f32.mrf.mxu1  ;;  %v8084_v36 = vadd.f32 %v8083_v2, %v8082_v42 }
 0x306   :  { %12438 = vst [vmem:[#allocation18_spill] sm:$0xff] %v12069_v22  ;;  %v8085_v29 = vpop.f32.mrf.mxu0  ;;  %v5274_v23 = vadd.f32 %v7944_v21, %v5225_v57  ;;  %v7925_v57 = vadd.f32 %v12019_v5, %v12015_v37  ;;  %v5187_v45 = vadd.f32 %v7897_v3, %v5138_v11  ;;  %v8056_v37 = vadd.f32 %v8055_v13, %v12043_v47  ;;  %v12446_v11 = vld [vmem:[#allocation15_spill] sm:$0xff] }
 0x307   :  { %v12075_v34 = vpop.f32.mrf.mxu1  ;;  %v8031_v5 = vadd.f32 %v8030_v48, %v8029_v43  ;;  %v8009_v13 = vadd.f32 %v12041_v4, %v12039_v8  ;;  %v12440_v48 = vld [vmem:[#allocation10_spill] sm:$0xff]  ;;  %v8037_v8 = vadd.f32 %v12446_v11, %v12445_v46  ;;  %v9251_v11 = vld [vmem:[%s12403_s3 + $0xc8] ss:$12 sps:$4 sm:$0xff]  }
 0x308   :  { %v8086_v22 = vpop.f32.mrf.mxu0  ;;  %v5323_v49 = vadd.f32 %v7972_v28, %v5274_v23  ;;  %v5236_v17 = vadd.f32 %v7925_v57, %v5187_v45  ;;  %v8059_v52 = vadd.f32 %v12440_v48, %v12439_v31  ;;  %v12443_v28 = vld [vmem:[#allocation11_spill] sm:$0xff]  ;;  %v12449_v31 = vmov 0  }
 0x309   :  { %v12089_v60 = vpop.f32.mrf.mxu1  ;;  %v5424_v63 = vadd.f32 %v8031_v5, %v5375_v9  ;;  %v8087_v42 = vadd.f32 %v8086_v22, %v8085_v29  ;;  %v8062_v30 = vadd.f32 %v12444_v19, %v12443_v28  ;;  %v12447_v22 = vld [vmem:[#allocation14_spill] sm:$0xff]  ;;  %v9244_v28 = vld [vmem:[%s12403_s3 + $0x68] ss:$12 sps:$4 sm:$0xff]   ;;  %v9245_v19 = vld [vmem:[%s12403_s3 + $0x110] ss:$12 sps:$4 sm:$0xff]  }
 0x30a   :  { %v8088_v32 = vpop.f32.mrf.mxu0  ;;  %v5372_v50 = vadd.f32 %v8000_v38, %v5323_v49  ;;  %v5285_v21 = vadd.f32 %v7953_v26, %v5236_v17  ;;  %v8115_v45 = vadd.f32 %v12089_v60, %v12075_v34  ;;  %v9250_v46 = vld [vmem:[%s12403_s3 + $0x20] ss:$12 sps:$4 sm:$0xff]  }
 0x30b   :  { %v12093_v59 = vpop.f32.mrf.mxu1  ;;  %v12441_v56 = vld [vmem:[#allocation17_spill] sm:$0xff]  ;;  %v5473_v23 = vadd.f32 %v8059_v52, %v5424_v63  ;;  %v5478_v20 = vadd.f32 %v8062_v30, %v5429_v41  ;;  %v9241_v52 = vld [vmem:[%s12403_s3 + $0x140] ss:$12 sps:$4 sm:$0xff]  }
 0x30c   :  { %v8089_v15 = vpop.f32.mrf.mxu0  ;;  %v5421_v0 = vadd.f32 %v8028_v53, %v5372_v50  ;;  %v5334_v47 = vadd.f32 %v7981_v39, %v5285_v21  ;;  %v8065_v53 = vadd.f32 %v12448_v35, %v12447_v22  ;;  %v12450_v41 = vld [vmem:[#allocation6_spill] sm:$0xff]  ;;  %v9246_v30 = vld [vmem:[%s12403_s3 + $0x50] ss:$12 sps:$4 sm:$0xff]  }
 0x30d   :  { %v8117_v10 = vpop.f32.mrf.mxu1  ;;  %v12442_v54 = vld [vmem:[#allocation18_spill] sm:$0xff]  ;;  %v8090_v4 = vadd.f32 %v8089_v15, %v8088_v32  ;;  %v5522_v62 = vadd.f32 %v8087_v42, %v5473_v23  ;;  %v9243_v42 = vld [vmem:[%s12403_s3 + $0x128] ss:$12 sps:$4 sm:$0xff]  }
 0x30e   :  { %v8091_v18 = vpop.f32.mrf.mxu0  ;;  %v5470_v40 = vadd.f32 %v8056_v37, %v5421_v0  ;;  %v8112_v2 = vadd.f32 %v12442_v54, %v12441_v56  ;;  %v5383_v49 = vadd.f32 %v8009_v13, %v5334_v47  ;;  %v8118_v27 = vadd.f32 %v8117_v10, %v12093_v59  ;;  %v9238_v13 = vld [vmem:[%s12403_s3 + $0x158] ss:$12 sps:$4 sm:$0xff]   ;;  %v9242_v54 = vld [vmem:[%s12403_s3 + $0x80] ss:$12 sps:$4 sm:$0xff]   ;;  %v9267_v35 = vld [vmem:[%s12404_s5 + $0x34] ss:$8 sps:$4 sm:$0xff]  }
 0x30f   :  { %v8119_v25 = vpop.f32.mrf.mxu1  ;;  %v5527_v50 = vadd.f32 %v8090_v4, %v5478_v20  ;;  %v5571_v58 = vadd.f32 %v8115_v45, %v5522_v62  ;;  %v9249_v23 = vld [vmem:[%s12403_s3 + $0xe0] ss:$12 sps:$4 sm:$0xff]   ;;  %v9255_v4 = vld [vmem:[%s12404_s5 + $0x74] ss:$8 sps:$4 sm:$0xff]   ;;  %v9259_v20 = vld [vmem:[%s12404_s5 + $0x50] ss:$8 sps:$4 sm:$0xff]  }
 0x310   :  { %v8092_v43 = vpop.f32.mrf.mxu0  ;;  %v5519_v61 = vadd.f32 %v8084_v36, %v5470_v40  ;;  %v5432_v29 = vadd.f32 %v8037_v8, %v5383_v49  ;;  %v9252_v8 = vld [vmem:[%s12403_s3 + $0x8] ss:$12 sps:$4 sm:$0xff]   ;;  %v12451_v49 = vld [vmem:[#allocation5_spill] sm:$0xff]  ;;  %v9270_v45 = vld [vmem:[%s12404_s5 + $0x24] ss:$8 sps:$4 sm:$0xff]  }
 0x311   :  { %v8120_v16 = vpop.f32.mrf.mxu1  ;;  %v8093_v17 = vadd.f32 %v8092_v43, %v8091_v18  ;;  %v5576_v6 = vadd.f32 %v8118_v27, %v5527_v50  ;;  %v9236_v18 = vld [vmem:[%s12403_s3 + $0xb0] ss:$12 sps:$4 sm:$0xff]   ;;  %v9256_v62 = vld [vmem:[%s12404_s5 + $0x60] ss:$8 sps:$4 sm:$0xff]  }
 0x312   :  { %v5568_v38 = vadd.f32 %v8112_v2, %v5519_v61  ;;  %v5481_v0 = vadd.f32 %v8065_v53, %v5432_v29  ;;  %v8121_v36 = vadd.f32 %v8120_v16, %v8119_v25  ;;  %v9239_v16 = vld [vmem:[%s12403_s3 + $0x98] ss:$12 sps:$4 sm:$0xff]   ;;  %v12453_v29 = vld [vmem:[#allocation7_spill] sm:$0xff]  ;;  %v9273_v50 = vld [vmem:[%s12404_s5 + $0x14] ss:$8 sps:$4 sm:$0xff]  }
 0x313   :  { %v9262_v22 = vld [vmem:[%s12404_s5 + $0x40] ss:$8 sps:$4 sm:$0xff]   ;;  %v9265_v53 = vld [vmem:[%s12404_s5 + $0x30] ss:$8 sps:$4 sm:$0xff]  }
 0x314   :  { %v5530_v9 = vadd.f32 %v8093_v17, %v5481_v0  ;;  %v9271_v27 = vld [vmem:[%s12404_s5 + $0x10] ss:$8 sps:$4 sm:$0xff]   ;;  %v9285_v0 = vld [vmem:[%s12404_s5 + $0xd4] ss:$8 sps:$4 sm:$0xff]  }
 0x315   :  { %v9277_v17 = vld [vmem:[%s12404_s5 + $0xf0] ss:$8 sps:$4 sm:$0xff]  }
 0x316   :  { %v5579_v63 = vadd.f32 %v8121_v36, %v5530_v9  ;;  %v9294_v9 = vld [vmem:[%s12404_s5 + $0xa4] ss:$8 sps:$4 sm:$0xff]   ;;  %v9303_v36 = vld [vmem:[%s12404_s5 + $0x174] ss:$8 sps:$4 sm:$0xff]  }
 0x317   :  { %6770 = vmatprep.subr.bf16.mxu0 %v9303_v36 }
 0x322   :  { %v8138_v1 = vpop.f32.mrf.mxu0 }
 0x323   :  { %v8244_v33 = vpop.f32.mrf.mxu1 }
 0x324   :  { %v8139_v3 = vpop.f32.mrf.mxu0 }
 0x325   :  { %v5665_v24 = vpop.f32.mrf.mxu1  ;;  %v8140_v44 = vadd.f32 %v8139_v3, %v8138_v1  ;;  %v9247_v1 = vld [vmem:[%s12403_s3 + $0xf8] ss:$12 sps:$4 sm:$0xff]  }
 0x326   :  { %v8141_v57 = vpop.f32.mrf.mxu0  ;;  %v9253_v3 = vld [vmem:[%s12404_s5 + $0x70] ss:$8 sps:$4 sm:$0xff]  }
 0x327   :  { %v5617_v12 = vadd.f32 %v8140_v44, %v5568_v38  ;;  %v8245_v32 = vpop.f32.mrf.mxu1  ;;  %v12452_v38 = vld [vmem:[#allocation8_spill] sm:$0xff] }
 0x328   :  { %v8142_v15 = vpop.f32.mrf.mxu0  ;;  %v9261_v44 = vld [vmem:[%s12404_s5 + $0x54] ss:$8 sps:$4 sm:$0xff]  }
 0x329   :  { %v8143_v26 = vadd.f32 %v8142_v15, %v8141_v57  ;;  %v5666_v37 = vadd.f32 %v5665_v24, %v5617_v12  ;;  %v5668_v14 = vpop.f32.mrf.mxu1  ;;  %v9258_v24 = vld [vmem:[%s12404_s5 + $0x64] ss:$8 sps:$4 sm:$0xff]   ;;  %v9268_v12 = vld [vmem:[%s12404_s5 + $0x20] ss:$8 sps:$4 sm:$0xff]  }
 0x32a   :  { %v8144_v7 = vpop.f32.mrf.mxu0  ;;  %v9264_v57 = vld [vmem:[%s12404_s5 + $0x44] ss:$8 sps:$4 sm:$0xff]   ;;  %v9274_v15 = vld [vmem:[%s12404_s5] ss:$8 sps:$4 sm:$0xff]  }
 0x32b   :  { %v5620_v5 = vadd.f32 %v8143_v26, %v5571_v58  ;;  %v5682_v51 = vmax.f32 %v5666_v37, 0.0  ;;  %v9279_v58 = vld [vmem:[%s12404_s5 + $0xf4] ss:$8 sps:$4 sm:$0xff]   ;;  %v9282_v26 = vld [vmem:[%s12404_s5 + $0xe4] ss:$8 sps:$4 sm:$0xff]  }
 0x32c   :  { %v8145_v39 = vpop.f32.mrf.mxu0  ;;  %v9283_v37 = vld [vmem:[%s12404_s5 + $0xd0] ss:$8 sps:$4 sm:$0xff]  }
 0x32d   :  { %v5669_v21 = vadd.f32 %v5668_v14, %v5620_v5  ;;  %v8146_v34 = vadd.f32 %v8145_v39, %v8144_v7  ;;  %v9280_v7 = vld [vmem:[%s12404_s5 + $0xe0] ss:$8 sps:$4 sm:$0xff]   ;;  %v9288_v5 = vld [vmem:[%s12404_s5 + $0xc4] ss:$8 sps:$4 sm:$0xff]   ;;  %v9291_v14 = vld [vmem:[%s12404_s5 + $0xb4] ss:$8 sps:$4 sm:$0xff]  }
 0x32e   :  { %v8147_v60 = vpop.f32.mrf.mxu0  ;;  %v9289_v39 = vld [vmem:[%s12404_s5 + $0xb0] ss:$8 sps:$4 sm:$0xff]  }
 0x32f   :  { %v5685_v40 = vmax.f32 %v5669_v21, 0.0  ;;  %v5625_v59 = vadd.f32 %v8146_v34, %v5576_v6  ;;  %v9286_v6 = vld [vmem:[%s12404_s5 + $0xc0] ss:$8 sps:$4 sm:$0xff]   ;;  %v9301_v21 = vld [vmem:[%s12404_s5 + $0x170] ss:$8 sps:$4 sm:$0xff]  }
 0x330   :  { %v8148_v10 = vpop.f32.mrf.mxu0  ;;  %v9292_v34 = vld [vmem:[%s12404_s5 + $0xa0] ss:$8 sps:$4 sm:$0xff]  }
 0x331   :  { %v5694_v55 = vpack.c.bf16 %v5685_v40, %v5682_v51  ;;  %v8149_v47 = vadd.f32 %v8148_v10, %v8147_v60  ;;  %v5674_v43 = vadd.f32 %v8244_v33, %v5625_v59  ;;  %v9248_v33 = vld [vmem:[%s12403_s3 + $0x38] ss:$12 sps:$4 sm:$0xff]   ;;  %v9297_v60 = vld [vmem:[%s12404_s5 + $0x94] ss:$8 sps:$4 sm:$0xff]   ;;  %v9304_v51 = vld [vmem:[%s12404_s5 + $0x160] ss:$8 sps:$4 sm:$0xff]  }
 0x332   :  { %v9306_v40 = vld [vmem:[%s12404_s5 + $0x164] ss:$8 sps:$4 sm:$0xff]   ;;  %v9295_v59 = vld [vmem:[%s12404_s5 + $0x90] ss:$8 sps:$4 sm:$0xff]  }
 0x333   :  { %v5628_v25 = vadd.f32 %v8149_v47, %v5579_v63  ;;  %6281 = vmatmul.mubr.bf16.vlgmr.msra.gmra.mxu1 %v5694_v55  ;;  %8262 = vmatprep.mubr.bf16.mxu0 %v5694_v55  ;;  %v5688_v61 = vmax.f32 %v5674_v43, 0.0  ;;  %v9300_v10 = vld [vmem:[%s12404_s5 + $0x84] ss:$8 sps:$4 sm:$0xff]   ;;  %v9309_v63 = vld [vmem:[%s12404_s5 + $0x154] ss:$8 sps:$4 sm:$0xff]  }
 0x334   :  { %8161 = vmatpush3.bf16.msra.mxu1 %v9236_v18  ;;  %6290 = vmatprep.mubr.bf16.mxu1 %v12449_v31  ;;  %v9307_v18 = vld [vmem:[%s12404_s5 + $0x150] ss:$8 sps:$4 sm:$0xff]   ;;  %v9312_v55 = vld [vmem:[%s12404_s5 + $0x144] ss:$8 sps:$4 sm:$0xff]   ;;  %v9298_v47 = vld [vmem:[%s12404_s5 + $0x80] ss:$8 sps:$4 sm:$0xff]  }
 0x335   :  { %v5677_v48 = vadd.f32 %v8245_v32, %v5628_v25  ;;  %8162 = vmatprep.subr.bf16.mxu1 %v9238_v13  ;;  %v9276_v32 = vld [vmem:[%s12404_s5 + $0x4] ss:$8 sps:$4 sm:$0xff]   ;;  %v9310_v13 = vld [vmem:[%s12404_s5 + $0x140] ss:$8 sps:$4 sm:$0xff]   ;;  %v9315_v43 = vld [vmem:[%s12404_s5 + $0x134] ss:$8 sps:$4 sm:$0xff]  }
 0x336   :  { %v9313_v25 = vld [vmem:[%s12404_s5 + $0x130] ss:$8 sps:$4 sm:$0xff]  }
 0x337   :  { %v5691_v56 = vmax.f32 %v5677_v48, 0.0  ;;  %v9316_v48 = vld [vmem:[%s12404_s5 + $0x120] ss:$8 sps:$4 sm:$0xff]  }
 0x338   :  { %8163 = vmatpush3.bf16.msra.mxu1 %v9239_v16  ;;  %v9318_v16 = vld [vmem:[%s12404_s5 + $0x124] ss:$8 sps:$4 sm:$0xff]  }
 0x339   :  { %8164 = vmatprep.subr.bf16.mxu1 %v9241_v52  ;;  %v5697_v2 = vpack.c.bf16 %v5691_v56, %v5688_v61  ;;  %v9321_v52 = vld [vmem:[%s12404_s5 + $0x114] ss:$8 sps:$4 sm:$0xff]   ;;  %v9319_v61 = vld [vmem:[%s12404_s5 + $0x110] ss:$8 sps:$4 sm:$0xff]   ;;  %v9324_v56 = vld [vmem:[%s12404_s5 + $0x104] ss:$8 sps:$4 sm:$0xff]  }
 0x33b   :  { %6291 = vmatmul.mubr.bf16.gmra.mxu1 %v5697_v2  ;;  %8263 = vmatmul.mubr.bf16.vlgmr.msra.gmra.mxu0 %v5697_v2 }
 0x33c   :  { %8165 = vmatpush3.bf16.msra.mxu1 %v9242_v54  ;;  %6333 = vmatprep.mubr.bf16.mxu1 %v12450_v41  ;;  %v9322_v54 = vld [vmem:[%s12404_s5 + $0x100] ss:$8 sps:$4 sm:$0xff]  }
 0x33d   :  { %8166 = vmatprep.subr.bf16.mxu1 %v9243_v42  ;;  %6802 = vmatprep.mubr.bf16.mxu0 %v12449_v31 }
 0x33e   :  { %6771 = vmatpush1.bf16.msra.mxu0 %v9301_v21 }
 0x33f   :  { %6772 = vmatprep.subr.bf16.mxu0 %v9306_v40 }
 0x340   :  { %8167 = vmatpush3.bf16.msra.mxu1 %v9244_v28 }
 0x341   :  { %8168 = vmatprep.subr.bf16.mxu1 %v9245_v19  ;;  %v5794_v19 = vld [vmem:[%s12405_s4] sm:$0x7] }
 0x342   :  { %6773 = vmatpush1.bf16.msra.mxu0 %v9304_v51 }
 0x343   :  { %6774 = vmatprep.subr.bf16.mxu0 %v9309_v63  ;;  %v12456_v63 = vld [vmem:[#allocation2_spill] sm:$0xff] }
 0x344   :  { %8169 = vmatpush3.bf16.msra.mxu1 %v9246_v30 }
 0x345   :  { %8170 = vmatprep.subr.bf16.mxu1 %v9247_v1  ;;  %v12454_v1 = vld [vmem:[#allocation4_spill] sm:$0xff] }
 0x346   :  { %6775 = vmatpush1.bf16.msra.mxu0 %v9307_v18 }
 0x347   :  { %6776 = vmatprep.subr.bf16.mxu0 %v9312_v55  ;;  %v12457_v55 = vsub.s32 2, %v12456_v63 }
 0x348   :  { %8171 = vmatpush3.bf16.msra.mxu1 %v9248_v33  ;;  %v5803_v33 = vrot.slane %v5794_v19, %v12454_v1 }
 0x349   :  { %8172 = vmatprep.subr.bf16.mxu1 %v9249_v23  ;;  %v12455_v23 = vld [vmem:[#allocation3_spill] sm:$0xff] }
 0x34a   :  { %6777 = vmatpush1.bf16.msra.mxu0 %v9310_v13 }
 0x34b   :  { %6778 = vmatprep.subr.bf16.mxu0 %v9315_v43 }
 0x34c   :  { %8173 = vmatpush3.bf16.msra.mxu1 %v9250_v46  ;;  %v5799_v46 = vrot.slane %v5794_v19, %v12455_v23 }
 0x34d   :  { %8174 = vmatprep.subr.bf16.mxu1 %v9251_v11 }
 0x34e   :  { %6779 = vmatpush1.bf16.msra.mxu0 %v9313_v25 }
 0x34f   :  { %6780 = vmatprep.subr.bf16.mxu0 %v9318_v16 }
 0x350   :  { %8175 = vmatpush3.bf16.msra.mxu1 %v9252_v8 }
 0x351   :  { %6717 = vmatprep.subr.bf16.mxu1 %v9255_v4 }
 0x352   :  { %6781 = vmatpush1.bf16.msra.mxu0 %v9316_v48 }
 0x353   :  { %6334 = vmatmul.mubr.bf16.vlgmr.msra.gmra.mxu1 %v12451_v49  ;;  %6782 = vmatprep.subr.bf16.mxu0 %v9321_v52 }
 0x354   :  { %6341 = vmatprep.mubr.bf16.mxu1 %v12452_v38  ;;  %6718 = vmatpush1.bf16.msra.mxu1 %v9253_v3 }
 0x355   :  { %6719 = vmatprep.subr.bf16.mxu1 %v9258_v24 }
 0x356   :  { %6783 = vmatpush1.bf16.msra.mxu0 %v9319_v61 }
 0x357   :  { %6784 = vmatprep.subr.bf16.mxu0 %v9324_v56 }
 0x358   :  { %6720 = vmatpush1.bf16.msra.mxu1 %v9256_v62 }
 0x359   :  { %6721 = vmatprep.subr.bf16.mxu1 %v9261_v44 }
 0x35a   :  { %6785 = vmatpush1.bf16.msra.mxu0 %v9322_v54 }
 0x35b   :  { %6342 = vmatmul.mubr.bf16.gmra.mxu1 %v12453_v29 }
 0x35c   :  { %6722 = vmatpush1.bf16.msra.mxu1 %v9259_v20 }
 0x35d   :  { %6723 = vmatprep.subr.bf16.mxu1 %v9264_v57 }
 0x360   :  { %6724 = vmatpush1.bf16.msra.mxu1 %v9262_v22 }
 0x361   :  { %6725 = vmatprep.subr.bf16.mxu1 %v9267_v35 }
 0x362   :  { %v6229_v2 = vpop.f32.mrf.mxu0 }
 0x363   :  { %v6230_v49 = vadd.f32 %v6229_v2, %v5799_v46 }
 0x364   :  { %6726 = vmatpush1.bf16.msra.mxu1 %v9265_v53  ;;  %v6231_v42 = vpop.f32.mrf.mxu0 }
 0x365   :  { %6727 = vmatprep.subr.bf16.mxu1 %v9270_v45  ;;  %v6232_v3 = vadd.f32 %v6231_v42, %v5803_v33 }
 0x366   :  { %v6233_v41 = vpop.f32.mrf.mxu0 }
 0x367   :  { %v6234_v24 = vadd.f32 %v6233_v41, %v5799_v46 }
 0x368   :  { %6728 = vmatpush1.bf16.msra.mxu1 %v9268_v12  ;;  %v6235_v28 = vpop.f32.mrf.mxu0 }
 0x369   :  { %6729 = vmatprep.subr.bf16.mxu1 %v9273_v50  ;;  %v6236_v62 = vadd.f32 %v6235_v28, %v5803_v33 }
 0x36a   :  { %v6239_v30 = vpop.f32.mrf.mxu0 }
 0x36c   :  { %6730 = vmatpush1.bf16.msra.mxu1 %v9271_v27  ;;  %v6241_v8 = vpop.f32.mrf.mxu0 }
 0x36d   :  { %6731 = vmatprep.subr.bf16.mxu1 %v9276_v32 }
 0x36e   :  { %v6243_v57 = vpop.f32.mrf.mxu0 }
 0x370   :  { %6732 = vmatpush1.bf16.msra.mxu1 %v9274_v15  ;;  %v6245_v27 = vpop.f32.mrf.mxu0 }
 0x371   :  { %6733 = vmatprep.subr.bf16.mxu1 %v9279_v58  ;;  %v6242_v58 = vadd.f32 %v6241_v8, %v5803_v33 }
 0x374   :  { %6734 = vmatpush2.bf16.msra.mxu1 %v9277_v17  ;;  %v6244_v17 = vadd.f32 %v6243_v57, %v5799_v46 }
 0x375   :  { %6735 = vmatprep.subr.bf16.mxu1 %v9282_v26 }
 0x378   :  { %6736 = vmatpush2.bf16.msra.mxu1 %v9280_v7  ;;  %v6240_v7 = vadd.f32 %v6239_v30, %v5799_v46 }
 0x379   :  { %6737 = vmatprep.subr.bf16.mxu1 %v9285_v0 }
 0x37c   :  { %6738 = vmatpush2.bf16.msra.mxu1 %v9283_v37 }
 0x37d   :  { %6739 = vmatprep.subr.bf16.mxu1 %v9288_v5  ;;  %v6246_v5 = vadd.f32 %v6245_v27, %v5803_v33  ;;  %v9333_v27 = vld [vmem:[%s12406_s7 + $0x58] sm:$0xff]  }
 0x380   :  { %6740 = vmatpush2.bf16.msra.mxu1 %v9286_v6 }
 0x381   :  { %6741 = vmatprep.subr.bf16.mxu1 %v9291_v14 }
 0x384   :  { %6742 = vmatpush2.bf16.msra.mxu1 %v9289_v39 }
 0x385   :  { %6743 = vmatprep.subr.bf16.mxu1 %v9294_v9 }
 0x388   :  { %6744 = vmatpush2.bf16.msra.mxu1 %v9292_v34 }
 0x389   :  { %6745 = vmatprep.subr.bf16.mxu1 %v9297_v60 }
 0x38c   :  { %6746 = vmatpush2.bf16.msra.mxu1 %v9295_v59 }
 0x38d   :  { %6747 = vmatprep.subr.bf16.mxu1 %v9300_v10 }
 0x390   :  { %6748 = vmatpush2.bf16.msra.mxu1 %v9298_v47  ;;  %v5807_v47 = vrot.slane %v5794_v19, %v12457_v55 }
 0x3f3   :  { %v6282_v11 = vpop.f32.mrf.mxu1 }
 0x3f4   :  { %v6283_v29 = vadd.f32 %v6282_v11, %v6230_v49 }
 0x3f5   :  { %v6284_v4 = vpop.f32.mrf.mxu1 }
 0x3f6   :  { %v6285_v44 = vadd.f32 %v6284_v4, %v6232_v3  ;;  %v6399_v32 = vmax.f32 %v6283_v29, 0.0  ;;  %v9325_v29 = vld [vmem:[%s12406_s7 + $0x78] sm:$0xff]  }
 0x3f7   :  { %v6286_v38 = vpop.f32.mrf.mxu1  ;;  %8198 = vmatprep.subr.bf16.mxu0 %v9325_v29  ;;  %8266 = vmatprep.subr.bf16.mxu1 %v9325_v29  ;;  %v7797_v29 = vld [vmem:[%s12408_s8] ss:$0 sm:$0xff] }
 0x3f8   :  { %v6287_v20 = vadd.f32 %v6286_v38, %v6234_v24  ;;  %v6400_v12 = vmax.f32 %v6285_v44, 0.0 }
 0x3f9   :  { %v6288_v22 = vpop.f32.mrf.mxu1 }
 0x3fa   :  { %v6289_v35 = vadd.f32 %v6288_v22, %v6236_v62  ;;  %v6402_v53 = vmax.f32 %v6287_v20, 0.0  ;;  %v9326_v22 = vld [vmem:[%s12406_s7 + $0x38] sm:$0xff]  }
 0x3fb   :  { %v6292_v45 = vpop.f32.mrf.mxu1  ;;  %v8264_v10 = vpop.f32.mrf.mxu0 }
 0x3fc   :  { %v6403_v50 = vmax.f32 %v6289_v35, 0.0  ;;  %v6411_v0 = vpack.c.bf16 %v6402_v53, %v6399_v32  ;;  %v6293_v39 = vadd.f32 %v6292_v45, %v6240_v7  ;;  %v9327_v35 = vld [vmem:[%s12406_s7 + $0x70] sm:$0xff]   ;;  %v9329_v53 = vld [vmem:[%s12406_s7 + $0x68] sm:$0xff]   ;;  %v9334_v32 = vld [vmem:[%s12406_s7 + $0x18] sm:$0xff]  }
 0x3fd   :  { %v6294_v15 = vpop.f32.mrf.mxu1  ;;  %v6384_v13 = vpop.f32.mrf.mxu0  ;;  %v9330_v45 = vld [vmem:[%s12406_s7 + $0x28] sm:$0xff]   ;;  %v9339_v7 = vld [vmem:[%s12406_s7 + $0x40] sm:$0xff]  }
 0x3fe   :  { %v6412_v26 = vpack.c.bf16 %v6403_v50, %v6400_v12  ;;  %v6295_v6 = vadd.f32 %v6294_v15, %v6242_v58  ;;  %v6405_v51 = vmax.f32 %v6293_v39, 0.0  ;;  %v9331_v12 = vld [vmem:[%s12406_s7 + $0x60] sm:$0xff]   ;;  %v9335_v15 = vld [vmem:[%s12406_s7 + $0x50] sm:$0xff]  }
 0x3ff   :  { %v6296_v37 = vpop.f32.mrf.mxu1  ;;  %v8265_v52 = vpop.f32.mrf.mxu0  ;;  %v9332_v50 = vld [vmem:[%s12406_s7 + $0x20] sm:$0xff]   ;;  %v9336_v58 = vld [vmem:[%s12406_s7 + $0x10] sm:$0xff]  }
 0x400   :  { %v6297_v14 = vadd.f32 %v6296_v37, %v6244_v17  ;;  %6749 = vmatprep.mubr.bf16.mxu1 %v6412_v26  ;;  %v6406_v34 = vmax.f32 %v6295_v6, 0.0  ;;  %v9337_v17 = vld [vmem:[%s12406_s7 + $0x48] sm:$0xff]   ;;  %v6465_v39 = vld [vmem:[%s12407_s6] sm:$0x3] }
 0x401   :  { %v6298_v9 = vpop.f32.mrf.mxu1  ;;  %6750 = vmatmul.mubr.bf16.vlgmr.msra.gmra.mxu1 %v6411_v0  ;;  %v6387_v41 = vpop.f32.mrf.mxu0  ;;  %v9338_v26 = vld [vmem:[%s12406_s7 + $0x8] sm:$0xff]   ;;  %v9340_v0 = vld [vmem:[%s12406_s7] sm:$0xff]  }
 0x402   :  { %v6299_v36 = vadd.f32 %v6298_v9, %v6246_v5  ;;  %v6408_v21 = vmax.f32 %v6297_v14, 0.0  ;;  %8274 = vmatpush3.bf16.msra.mxu1 %v9326_v22 }
 0x403   :  { %8267 = vmatprep.subr.bf16.mxu1 %v9327_v35 }
 0x404   :  { %v6409_v60 = vmax.f32 %v6299_v36, 0.0  ;;  %v6414_v59 = vpack.c.bf16 %v6408_v21, %v6405_v51  ;;  %v6474_v36 = vrot.slane %v6465_v39, %v12454_v1  ;;  %v6470_v21 = vrot.slane %v6465_v39, %v12455_v23 }
 0x406   :  { %v6415_v40 = vpack.c.bf16 %v6409_v60, %v6406_v34 }
 0x408   :  { %6759 = vmatprep.mubr.bf16.mxu1 %v6415_v40 }
 0x409   :  { %6760 = vmatmul.mubr.bf16.gmra.mxu1 %v6414_v59 }
 0x413   :  { %v8176_v18 = vpop.f32.mrf.mxu1 }
 0x415   :  { %v8177_v43 = vpop.f32.mrf.mxu1 }
 0x416   :  { %v8178_v25 = vadd.f32 %v8177_v43, %v8176_v18 }
 0x417   :  { %v8179_v16 = vpop.f32.mrf.mxu1 }
 0x418   :  { %v6336_v48 = vadd.f32 %v8178_v25, %v5807_v47 }
 0x419   :  { %v8180_v61 = vpop.f32.mrf.mxu1 }
 0x41a   :  { %v8181_v56 = vadd.f32 %v8180_v61, %v8179_v16  ;;  %v6385_v2 = vadd.f32 %v6384_v13, %v6336_v48 }
 0x41b   :  { %v8182_v54 = vpop.f32.mrf.mxu1 }
 0x41c   :  { %v6339_v42 = vadd.f32 %v8181_v56, %v5807_v47  ;;  %v6401_v11 = vmax.f32 %v6385_v2, 0.0 }
 0x41d   :  { %v8183_v28 = vpop.f32.mrf.mxu1 }
 0x41e   :  { %v6388_v30 = vadd.f32 %v6387_v41, %v6339_v42  ;;  %v8184_v33 = vadd.f32 %v8183_v28, %v8182_v54 }
 0x41f   :  { %v8185_v46 = vpop.f32.mrf.mxu1 }
 0x420   :  { %v6404_v8 = vmax.f32 %v6388_v30, 0.0  ;;  %v6344_v4 = vadd.f32 %v8184_v33, %v5807_v47 }
 0x421   :  { %v8186_v19 = vpop.f32.mrf.mxu1 }
 0x422   :  { %v6413_v3 = vpack.c.bf16 %v6404_v8, %v6401_v11  ;;  %v8187_v24 = vadd.f32 %v8186_v19, %v8185_v46  ;;  %v6393_v49 = vadd.f32 %v8264_v10, %v6344_v4 }
 0x424   :  { %v6347_v38 = vadd.f32 %v8187_v24, %v5807_v47  ;;  %6803 = vmatmul.mubr.bf16.vlgmr.msra.gmra.mxu0 %v6413_v3  ;;  %v6407_v44 = vmax.f32 %v6393_v49, 0.0 }
 0x425   :  { %6812 = vmatprep.mubr.bf16.mxu0 %v12449_v31  ;;  %8199 = vmatpush3.bf16.msra.mxu0 %v9326_v22  ;;  %v9328_v31 = vld [vmem:[%s12406_s7 + $0x30] sm:$0xff]  }
 0x426   :  { %v6396_v62 = vadd.f32 %v8265_v52, %v6347_v38  ;;  %8200 = vmatprep.subr.bf16.mxu0 %v9327_v35  ;;  %8275 = vmatpush3.bf16.msra.mxu1 %v9328_v31 }
 0x427   :  { %8268 = vmatprep.subr.bf16.mxu1 %v9329_v53 }
 0x428   :  { %v6410_v20 = vmax.f32 %v6396_v62, 0.0 }
 0x429   :  { %8201 = vmatpush3.bf16.msra.mxu0 %v9328_v31 }
 0x42a   :  { %v6416_v57 = vpack.c.bf16 %v6410_v20, %v6407_v44  ;;  %8202 = vmatprep.subr.bf16.mxu0 %v9329_v53  ;;  %8276 = vmatpush3.bf16.msra.mxu1 %v9330_v45 }
 0x42b   :  { %8269 = vmatprep.subr.bf16.mxu1 %v9331_v12 }
 0x42c   :  { %6813 = vmatmul.mubr.bf16.gmra.mxu0 %v6416_v57 }
 0x42d   :  { %8203 = vmatpush3.bf16.msra.mxu0 %v9330_v45 }
 0x42e   :  { %8204 = vmatprep.subr.bf16.mxu0 %v9331_v12  ;;  %8277 = vmatpush3.bf16.msra.mxu1 %v9332_v50 }
 0x42f   :  { %8270 = vmatprep.subr.bf16.mxu1 %v9333_v27 }
 0x431   :  { %8205 = vmatpush3.bf16.msra.mxu0 %v9332_v50 }
 0x432   :  { %8206 = vmatprep.subr.bf16.mxu0 %v9333_v27  ;;  %8278 = vmatpush3.bf16.msra.mxu1 %v9334_v32 }
 0x433   :  { %8271 = vmatprep.subr.bf16.mxu1 %v9335_v15 }
 0x435   :  { %8207 = vmatpush3.bf16.msra.mxu0 %v9334_v32 }
 0x436   :  { %8208 = vmatprep.subr.bf16.mxu0 %v9335_v15  ;;  %8279 = vmatpush3.bf16.msra.mxu1 %v9336_v58 }
 0x437   :  { %8272 = vmatprep.subr.bf16.mxu1 %v9337_v17 }
 0x439   :  { %8209 = vmatpush3.bf16.msra.mxu0 %v9336_v58 }
 0x43a   :  { %8210 = vmatprep.subr.bf16.mxu0 %v9337_v17  ;;  %8280 = vmatpush3.bf16.msra.mxu1 %v9338_v26 }
 0x43b   :  { %8273 = vmatprep.subr.bf16.mxu1 %v9339_v7 }
 0x43d   :  { %8211 = vmatpush3.bf16.msra.mxu0 %v9338_v26 }
 0x43e   :  { %8212 = vmatprep.subr.bf16.mxu0 %v9339_v7  ;;  %8281 = vmatpush3.bf16.msra.mxu1 %v9340_v0 }
 0x441   :  { %8213 = vmatpush3.bf16.msra.mxu0 %v9340_v0 }
 0x4c1   :  { %v6751_v37 = vpop.f32.mrf.mxu1 }
 0x4c2   :  { %v6752_v10 = vadd.f32 %v6751_v37, %v6470_v21 }
 0x4c3   :  { %v6753_v5 = vpop.f32.mrf.mxu1 }
 0x4c4   :  { %v6754_v40 = vadd.f32 %v6753_v5, %v6474_v36 }
 0x4c5   :  { %v6755_v6 = vpop.f32.mrf.mxu1 }
 0x4c6   :  { %v6756_v59 = vadd.f32 %v6755_v6, %v6470_v21 }
 0x4c7   :  { %v6757_v14 = vpop.f32.mrf.mxu1 }
 0x4c8   :  { %v6758_v63 = vadd.f32 %v6757_v14, %v6474_v36 }
 0x4c9   :  { %v6761_v9 = vpop.f32.mrf.mxu1 }
 0x4ca   :  { %v6762_v28 = vadd.f32 %v6761_v9, %v6470_v21 }
 0x4cb   :  { %v6763_v60 = vpop.f32.mrf.mxu1 }
 0x4cc   :  { %v6764_v2 = vadd.f32 %v6763_v60, %v6474_v36 }
 0x4cd   :  { %v6765_v13 = vpop.f32.mrf.mxu1 }
 0x4ce   :  { %v6766_v42 = vadd.f32 %v6765_v13, %v6470_v21 }
 0x4cf   :  { %v6767_v56 = vpop.f32.mrf.mxu1 }
 0x4d0   :  { %v6768_v46 = vadd.f32 %v6767_v56, %v6474_v36 }
 0x4e4   :  { %v6804_v34 = vpop.f32.mrf.mxu0 }
 0x4e5   :  { %v6805_v43 = vadd.f32 %v6804_v34, %v6752_v10 }
 0x4e6   :  { %v6806_v51 = vpop.f32.mrf.mxu0 }
 0x4e7   :  { %v6807_v55 = vadd.f32 %v6806_v51, %v6754_v40  ;;  %v6823_v23 = vmax.f32 %v6805_v43, 0.0 }
 0x4e8   :  { %v6808_v18 = vpop.f32.mrf.mxu0 }
 0x4e9   :  { %v6809_v47 = vadd.f32 %v6808_v18, %v6756_v59  ;;  %v6824_v61 = vmax.f32 %v6807_v55, 0.0 }
 0x4ea   :  { %v6810_v25 = vpop.f32.mrf.mxu0 }
 0x4eb   :  { %v6811_v16 = vadd.f32 %v6810_v25, %v6758_v63  ;;  %v6825_v48 = vmax.f32 %v6809_v47, 0.0 }
 0x4ec   :  { %v6814_v52 = vpop.f32.mrf.mxu0 }
 0x4ed   :  { %v6826_v1 = vmax.f32 %v6811_v16, 0.0  ;;  %v6831_v30 = vpack.c.bf16 %v6825_v48, %v6823_v23  ;;  %v6815_v4 = vadd.f32 %v6814_v52, %v6762_v28 }
 0x4ee   :  { %v6816_v54 = vpop.f32.mrf.mxu0 }
 0x4ef   :  { %v6832_v41 = vpack.c.bf16 %v6826_v1, %v6824_v61  ;;  %v6817_v11 = vadd.f32 %v6816_v54, %v6764_v2  ;;  %v6827_v62 = vmax.f32 %v6815_v4, 0.0 }
 0x4f0   :  { %v6818_v33 = vpop.f32.mrf.mxu0 }
 0x4f1   :  { %v6819_v8 = vadd.f32 %v6818_v33, %v6766_v42  ;;  %7002 = vmatprep.mubr.bf16.mxu0 %v6832_v41  ;;  %v6828_v49 = vmax.f32 %v6817_v11, 0.0 }
 0x4f2   :  { %v6820_v19 = vpop.f32.mrf.mxu0  ;;  %7003 = vmatmul.mubr.bf16.vlgmr.msra.gmra.mxu0 %v6831_v30 }
 0x4f3   :  { %v6821_v3 = vadd.f32 %v6820_v19, %v6768_v46  ;;  %v6829_v24 = vmax.f32 %v6819_v8, 0.0 }
 0x4f5   :  { %v6830_v38 = vmax.f32 %v6821_v3, 0.0  ;;  %v6833_v20 = vpack.c.bf16 %v6829_v24, %v6827_v62 }
 0x4f7   :  { %v6834_v44 = vpack.c.bf16 %v6830_v38, %v6828_v49 }
 0x4f9   :  { %7010 = vmatprep.mubr.bf16.mxu1 %v6834_v44 }
 0x4fa   :  { %7011 = vmatmul.mubr.bf16.vlgmr.msra.gmra.mxu1 %v6833_v20 }
 0x5b2   :  { %v8214_v57 = vpop.f32.mrf.mxu0 }
 0x5b4   :  { %v8215_v22 = vpop.f32.mrf.mxu0 }
 0x5b5   :  { %v8216_v35 = vadd.f32 %v8215_v22, %v8214_v57 }
 0x5b6   :  { %v8217_v31 = vpop.f32.mrf.mxu0 }
 0x5b7   :  { %v7005_v53 = vadd.f32 %v8216_v35, %v7797_v29 }
 0x5b8   :  { %v8218_v45 = vpop.f32.mrf.mxu0 }
 0x5b9   :  { %7019 = vst [vmem:[%s12409_s9] sm:$0xff] %v7005_v53  ;;  %v8219_v12 = vadd.f32 %v8218_v45, %v8217_v31 }
 0x5ba   :  { %v8220_v50 = vpop.f32.mrf.mxu1 }
 0x5bb   :  { %v7008_v27 = vadd.f32 %v8219_v12, %v7797_v29 }
 0x5bc   :  { %v8221_v32 = vpop.f32.mrf.mxu1 }
 0x5bd   :  { %7020 = vst [vmem:[%s12409_s9 + $0x8] sm:$0xff] %v7008_v27  ;;  %v8222_v15 = vadd.f32 %v8221_v32, %v8220_v50 }
 0x5be   :  { %v8223_v58 = vpop.f32.mrf.mxu1 }
 0x5bf   :  { %v7013_v17 = vadd.f32 %v8222_v15, %v7797_v29 }
 0x5c0   :  { %v8224_v26 = vpop.f32.mrf.mxu1 }
 0x5c1   :  { %7021 = vst [vmem:[%s12409_s9 + $0x10] sm:$0xff] %v7013_v17  ;;  %v8225_v7 = vadd.f32 %v8224_v26, %v8223_v58 }
 0x5c3   :  { %v7016_v0 = vadd.f32 %v8225_v7, %v7797_v29 }
 0x5c5   :  { %7022 = vst [vmem:[%s12409_s9 + $0x18] sm:$0xff] %v7016_v0 }

</bundles_post_ra>
